<compile_context>
chip_gen: v7x
topology: tpu7x:2x2x1
jax: 0.10.0
libtpu: 0.0.40
codegen_flags: <defaults>
</compile_context>

<pallas_src>
import functools

import jax
import jax.numpy as jnp
from jax.experimental import pallas as pl
from jax.experimental.pallas import tpu as pltpu


def _round_up(x, m):
    return (x + m - 1) // m * m


# ----------------------------------------------------------------------------
# Pallas kernels
# ----------------------------------------------------------------------------

def _mm_bias_kernel(a_ref, b_ref, bias_ref, o_ref, acc_ref, *, relu):
    """out = maybe_relu(A @ B + bias); K-reduction over innermost grid axis."""
    k = pl.program_id(2)

    @pl.when(k == 0)
    def _():
        acc_ref[...] = jnp.zeros_like(acc_ref)

    acc_ref[...] += jnp.dot(a_ref[...], b_ref[...],
                            preferred_element_type=jnp.float32)

    @pl.when(k == pl.num_programs(2) - 1)
    def _():
        out = acc_ref[...] + bias_ref[...]
        if relu:
            out = jnp.maximum(out, 0.0)
        o_ref[...] = out.astype(o_ref.dtype)


def _mm_bias_res_kernel(a_ref, b_ref, bias_ref, res_ref, o_ref, acc_ref, *, relu):
    """out = maybe_relu(A @ B + bias + residual); K-reduction over innermost grid axis."""
    k = pl.program_id(2)

    @pl.when(k == 0)
    def _():
        acc_ref[...] = jnp.zeros_like(acc_ref)

    acc_ref[...] += jnp.dot(a_ref[...], b_ref[...],
                            preferred_element_type=jnp.float32)

    @pl.when(k == pl.num_programs(2) - 1)
    def _():
        out = acc_ref[...] + bias_ref[...] + res_ref[...]
        if relu:
            out = jnp.maximum(out, 0.0)
        o_ref[...] = out.astype(o_ref.dtype)


def _pick_mn_tile(d, pref=256):
    """(tile, padded_extent) for an M/N matmul dimension."""
    if d >= pref:
        return pref, _round_up(d, pref)
    return d, d            # full-extent block (allowed: equals the full array dim)


def _pick_k_tile(k):
    """Largest lane-aligned tile that divides K exactly; otherwise use full K."""
    for tk in (512, 384, 256, 128):
        if k % tk == 0:
            return tk
    return k               # single K step, full-extent block


def matmul_bias(a, b, bias, residual=None, relu=False):
    """Pallas tiled matmul: maybe_relu(a @ b + bias (+ residual)).

    a, b are cast to bfloat16 (f32 accumulation on the MXU); bias/residual/output f32.
    """
    M, K = a.shape
    K2, N = b.shape
    assert K == K2
    tm, Mp = _pick_mn_tile(M)
    tn, Np = _pick_mn_tile(N)
    tk = _pick_k_tile(K)

    a = a.astype(jnp.bfloat16)
    b = b.astype(jnp.bfloat16)
    bias = bias.astype(jnp.float32)
    if Mp != M:
        a = jnp.pad(a, ((0, Mp - M), (0, 0)))
    if Np != N:
        b = jnp.pad(b, ((0, 0), (0, Np - N)))
        bias = jnp.pad(bias, (0, Np - N))
    bias2d = bias.reshape(1, Np)

    grid = (Mp // tm, Np // tn, pl.cdiv(K, tk))

    in_specs = [
        pl.BlockSpec((tm, tk), lambda i, j, k: (i, k)),
        pl.BlockSpec((tk, tn), lambda i, j, k: (k, j)),
        pl.BlockSpec((1, tn), lambda i, j, k: (0, j)),
    ]
    operands = [a, b, bias2d]

    if residual is not None:
        res = residual.astype(jnp.float32)
        if Mp != M or Np != N:
            res = jnp.pad(res, ((0, Mp - M), (0, Np - N)))
        in_specs.append(pl.BlockSpec((tm, tn), lambda i, j, k: (i, j)))
        operands.append(res)
        kernel = functools.partial(_mm_bias_res_kernel, relu=relu)
    else:
        kernel = functools.partial(_mm_bias_kernel, relu=relu)

    out = pl.pallas_call(
        kernel,
        out_shape=jax.ShapeDtypeStruct((Mp, Np), jnp.float32),
        grid_spec=pltpu.PrefetchScalarGridSpec(
            num_scalar_prefetch=0,
            grid=grid,
            in_specs=in_specs,
            out_specs=pl.BlockSpec((tm, tn), lambda i, j, k: (i, j)),
            scratch_shapes=[pltpu.VMEM((tm, tn), jnp.float32)],
        ),
        compiler_params=pltpu.CompilerParams(
            dimension_semantics=("parallel", "parallel", "arbitrary"),
            vmem_limit_bytes=32 * 1024 * 1024,
        ),
    )(*operands)

    if Mp != M or Np != N:
        out = out[:M, :N]
    return out


def _global_avgpool_kernel(x_ref, o_ref):
    o_ref[...] = jnp.mean(x_ref[...], axis=1)


def global_avgpool(x):
    """AdaptiveAvgPool2d((1,1)) -> (N, C).  Feature map is tiny here; single block."""
    N, H, W, C = x.shape
    return pl.pallas_call(
        _global_avgpool_kernel,
        out_shape=jax.ShapeDtypeStruct((N, C), jnp.float32),
    )(x.reshape(N, H * W, C))


# ----------------------------------------------------------------------------
# JAX glue: maxpool, im2col, blocks, full forward
# ----------------------------------------------------------------------------

def maxpool_3x3_s2_p1(x):
    """MaxPool2d(kernel_size=3, stride=2, padding=1) on NHWC.

    Implemented as a fused running maximum over the 9 shifted windows (pure JAX,
    per perf review) -- avoids materializing a 9x stacked tensor in HBM.
    """
    N, H, W, C = x.shape
    Ho = (H + 2 - 3) // 2 + 1
    Wo = (W + 2 - 3) // 2 + 1
    xp = jnp.pad(x, ((0, 0), (1, 1), (1, 1), (0, 0)),
                 constant_values=-jnp.inf)
    out = None
    for i in range(3):
        for j in range(3):
            win = xp[:, i:i + 2 * Ho:2, j:j + 2 * Wo:2, :]
            out = win if out is None else jnp.maximum(out, win)
    return out


def _im2col(x, kh, kw, stride, pad):
    """Patch matrix (N*Ho*Wo, kh*kw*C) with K-order = (tap_i, tap_j, Cin)."""
    N, H, W, C = x.shape
    Ho = (H + 2 * pad - kh) // stride + 1
    Wo = (W + 2 * pad - kw) // stride + 1
    if kh == 1 and kw == 1 and pad == 0:
        if stride != 1:
            x = x[:, ::stride, ::stride, :]
        return x.reshape(N * Ho * Wo, C), Ho, Wo
    xp = jnp.pad(x, ((0, 0), (pad, pad), (pad, pad), (0, 0)))
    cols = [xp[:, i:i + stride * Ho:stride, j:j + stride * Wo:stride, :]
            for i in range(kh) for j in range(kw)]
    patches = jnp.concatenate(cols, axis=-1)             # (N, Ho, Wo, kh*kw*C)
    return patches.reshape(N * Ho * Wo, kh * kw * C), Ho, Wo


def conv_bn(x, w, bn, stride, pad, relu, residual=None):
    """conv2d(bias=False) + folded BatchNorm + optional residual + optional ReLU."""
    scale, bias = bn
    N, H, W, C = x.shape
    Co, Ci, kh, kw = w.shape
    patches, Ho, Wo = _im2col(x.astype(jnp.bfloat16), kh, kw, stride, pad)
    # Fold BN scale into the weight matrix (K-order matches im2col: tap_i, tap_j, Cin).
    wmat = jnp.transpose(w, (2, 3, 1, 0)).reshape(kh * kw * Ci, Co)
    wmat = wmat * scale[None, :]
    res2d = None if residual is None else residual.reshape(N * Ho * Wo, Co)
    out = matmul_bias(patches, wmat, bias, res2d, relu)
    return out.reshape(N, Ho, Wo, Co)


def basic_block(x, blk):
    identity = x
    out = conv_bn(x, blk['conv1_w'], blk['bn1'], blk['stride'], 1, relu=True)
    if 'down_w' in blk:
        identity = conv_bn(x, blk['down_w'], blk['down_bn'], blk['stride'], 0,
                           relu=False)
    out = conv_bn(out, blk['conv2_w'], blk['bn2'], 1, 1, relu=True,
                  residual=identity)
    return out


def resnet18_forward(x_nchw, params):
    x = jnp.transpose(x_nchw, (0, 2, 3, 1)).astype(jnp.float32)  # NCHW -> NHWC
    x = conv_bn(x, params['conv1_w'], params['bn1'], 2, 3, relu=True)
    x = maxpool_3x3_s2_p1(x)
    for blocks in params['layers']:
        for blk in blocks:
            x = basic_block(x, blk)
    pooled = global_avgpool(x)                                   # (N, 512)
    fc_w, fc_b = params['fc']
    logits = matmul_bias(pooled, fc_w.T, fc_b, None, relu=False)
    return logits


# ----------------------------------------------------------------------------
# Deterministic parameter initialization (shapes match torchvision resnet18)
# ----------------------------------------------------------------------------

class _ParamGen:
    def __init__(self, seed):
        self._key = jax.random.PRNGKey(seed)

    def _next(self):
        self._key, sub = jax.random.split(self._key)
        return sub

    def conv(self, cout, cin, kh, kw):
        fan_in = cin * kh * kw
        return jax.random.normal(self._next(), (cout, cin, kh, kw),
                                 jnp.float32) / jnp.sqrt(float(fan_in))

    def bn(self, c):
        gamma = jax.random.uniform(self._next(), (c,), jnp.float32, 0.8, 1.2)
        beta = 0.05 * jax.random.normal(self._next(), (c,), jnp.float32)
        mean = 0.05 * jax.random.normal(self._next(), (c,), jnp.float32)
        var = jax.random.uniform(self._next(), (c,), jnp.float32, 0.8, 1.2)
        scale = gamma / jnp.sqrt(var + 1e-5)
        bias = beta - mean * scale
        return scale, bias

    def linear(self, cout, cin):
        bound = 1.0 / float(cin) ** 0.5
        w = jax.random.uniform(self._next(), (cout, cin), jnp.float32,
                               -bound, bound)
        b = jax.random.uniform(self._next(), (cout,), jnp.float32,
                               -bound, bound)
        return w, b


def init_resnet18_params(num_classes, seed=42):
    pg = _ParamGen(seed)
    params = {
        'conv1_w': pg.conv(64, 3, 7, 7),
        'bn1': pg.bn(64),
    }
    stage_cfg = [(64, 64, 1), (64, 128, 2), (128, 256, 2), (256, 512, 2)]
    layers = []
    for cin, cout, stride in stage_cfg:
        blocks = []
        for b in range(2):
            s = stride if b == 0 else 1
            ci = cin if b == 0 else cout
            blk = {
                'conv1_w': pg.conv(cout, ci, 3, 3),
                'bn1': pg.bn(cout),
                'conv2_w': pg.conv(cout, cout, 3, 3),
                'bn2': pg.bn(cout),
                'stride': s,
            }
            if s != 1 or ci != cout:
                blk['down_w'] = pg.conv(cout, ci, 1, 1)
                blk['down_bn'] = pg.bn(cout)
            blocks.append(blk)
        layers.append(blocks)
    params['layers'] = layers
    params['fc'] = pg.linear(num_classes, 512)   # replaced resnet.fc
    return params


# ----------------------------------------------------------------------------

if __name__ == "__main__":
    num_classes = 10
    params = init_resnet18_params(num_classes, seed=42)

    key = jax.random.PRNGKey(0)
    x = jax.random.normal(key, (2, 3, 32, 32), jnp.float32)  # NCHW, like PyTorch

    fwd = jax.jit(lambda inp: resnet18_forward(inp, params))
    logits = fwd(x)
    jax.block_until_ready(logits)

    assert logits.shape == (2, num_classes), logits.shape
    assert bool(jnp.all(jnp.isfinite(logits)))
    print("KERNEL_OK")
</pallas_src>

<mosaic_0001>
module attributes {stable_mosaic.version = 11 : i64} {
  func.func @_mm_bias_kernel(%arg0: i32, %arg1: i32, %arg2: i32, %arg3: memref<256x147xbf16, #tpu.memory_space<vmem>>, %arg4: memref<147x64xbf16, #tpu.memory_space<vmem>>, %arg5: memref<1x64xf32, #tpu.memory_space<vmem>>, %arg6: memref<256x64xf32, #tpu.memory_space<vmem>>, %arg7: memref<256x64xf32, #tpu.memory_space<vmem>>) attributes {dimension_semantics = [#tpu.dimension_semantics<parallel>, #tpu.dimension_semantics<parallel>, #tpu.dimension_semantics<arbitrary>], iteration_bounds = array<i64: 2, 1, 1>, scalar_prefetch = 0 : i64, scratch_operands = 1 : i64, tpu.core_type = #tpu.core_type<tc>, window_params = [{transform_indices = @transform_0, window_bounds = array<i64: 256, 147>}, {transform_indices = @transform_1, window_bounds = array<i64: 147, 64>}, {transform_indices = @transform_2, window_bounds = array<i64: 1, 64>}, {transform_indices = @transform_3, window_bounds = array<i64: 256, 64>}]} {
    %c0_i32 = arith.constant 0 : i32
    %0 = arith.cmpi eq, %arg2, %c0_i32 : i32
    %1 = arith.extui %0 : i1 to i32
    %c0_i32_0 = arith.constant 0 : i32
    %2 = arith.cmpi ne, %1, %c0_i32_0 : i32
    scf.if %2 {
      %cst_10 = arith.constant 0.000000e+00 : f32
      %12 = vector.broadcast %cst_10 : f32 to vector<256x64xf32>
      %c0_11 = arith.constant 0 : index
      %c0_12 = arith.constant 0 : index
      %13 = vector.load %arg7[%c0_11, %c0_12] : memref<256x64xf32, #tpu.memory_space<vmem>>, vector<256x64xf32>
      tpu.vector_store %arg7[%c0_11, %c0_12], %12 {strides = array<i32>} : memref<256x64xf32, #tpu.memory_space<vmem>>, vector<256x64xf32>,
    } else {
    }
    %c0 = arith.constant 0 : index
    %c0_1 = arith.constant 0 : index
    %3 = vector.load %arg7[%c0, %c0_1] : memref<256x64xf32, #tpu.memory_space<vmem>>, vector<256x64xf32>
    %c0_2 = arith.constant 0 : index
    %c0_3 = arith.constant 0 : index
    %4 = vector.load %arg3[%c0_2, %c0_3] : memref<256x147xbf16, #tpu.memory_space<vmem>>, vector<256x147xbf16>
    %c0_4 = arith.constant 0 : index
    %c0_5 = arith.constant 0 : index
    %5 = vector.load %arg4[%c0_4, %c0_5] : memref<147x64xbf16, #tpu.memory_space<vmem>>, vector<147x64xbf16>
    %cst = arith.constant dense<0.000000e+00> : vector<256x64xf32>
    %6 = tpu.matmul %4, %5, %cst {dimension_numbers = #tpu.dot_dimension_numbers<[1], [0], [0], [1], [0, 0, 1, 1], [], []>} : vector<256x147xbf16>, vector<147x64xbf16>, vector<256x64xf32> -> vector<256x64xf32>
    %7 = arith.addf %3, %6 : vector<256x64xf32>
    %c0_6 = arith.constant 0 : index
    %c0_7 = arith.constant 0 : index
    %8 = vector.load %arg7[%c0_6, %c0_7] : memref<256x64xf32, #tpu.memory_space<vmem>>, vector<256x64xf32>
    tpu.vector_store %arg7[%c0_6, %c0_7], %7 {strides = array<i32>} : memref<256x64xf32, #tpu.memory_space<vmem>>, vector<256x64xf32>,
    %c0_i32_8 = arith.constant 0 : i32
    %9 = arith.cmpi eq, %arg2, %c0_i32_8 : i32
    %10 = arith.extui %9 : i1 to i32
    %c0_i32_9 = arith.constant 0 : i32
    %11 = arith.cmpi ne, %10, %c0_i32_9 : i32
    scf.if %11 {
      %c0_10 = arith.constant 0 : index
      %c0_11 = arith.constant 0 : index
      %12 = vector.load %arg7[%c0_10, %c0_11] : memref<256x64xf32, #tpu.memory_space<vmem>>, vector<256x64xf32>
      %c0_12 = arith.constant 0 : index
      %c0_13 = arith.constant 0 : index
      %13 = vector.load %arg5[%c0_12, %c0_13] : memref<1x64xf32, #tpu.memory_space<vmem>>, vector<1x64xf32>
      %14 = vector.broadcast %13 : vector<1x64xf32> to vector<256x64xf32>
      %15 = arith.addf %12, %14 : vector<256x64xf32>
      %cst_14 = arith.constant 0.000000e+00 : f32
      %16 = vector.broadcast %cst_14 : f32 to vector<256x64xf32>
      %17 = arith.maximumf %15, %16 : vector<256x64xf32>
      %c0_15 = arith.constant 0 : index
      %c0_16 = arith.constant 0 : index
      %18 = vector.load %arg6[%c0_15, %c0_16] : memref<256x64xf32, #tpu.memory_space<vmem>>, vector<256x64xf32>
      tpu.vector_store %arg6[%c0_15, %c0_16], %17 {strides = array<i32>} : memref<256x64xf32, #tpu.memory_space<vmem>>, vector<256x64xf32>,
    } else {
    }
    return
  }
  func.func @transform_0(%arg0: i32, %arg1: i32, %arg2: i32) -> (i32, i32) {
    %c0_i32 = arith.constant 0 : i32
    return %arg0, %arg2 : i32, i32
  }
  func.func @transform_1(%arg0: i32, %arg1: i32, %arg2: i32) -> (i32, i32) {
    %c0_i32 = arith.constant 0 : i32
    return %arg2, %arg1 : i32, i32
  }
  func.func @transform_2(%arg0: i32, %arg1: i32, %arg2: i32) -> (i32, i32) {
    %c0_i32 = arith.constant 0 : i32
    %c0_i32_0 = arith.constant 0 : i32
    return %c0_i32, %arg1 : i32, i32
  }
  func.func @transform_3(%arg0: i32, %arg1: i32, %arg2: i32) -> (i32, i32) {
    %c0_i32 = arith.constant 0 : i32
    return %arg0, %arg1 : i32, i32
  }
}

module attributes {stable_mosaic.version = 11 : i64} {
  func.func @_mm_bias_kernel(%arg0: i32, %arg1: i32, %arg2: i32, %arg3: memref<128x576xbf16, #tpu.memory_space<vmem>>, %arg4: memref<576x64xbf16, #tpu.memory_space<vmem>>, %arg5: memref<1x64xf32, #tpu.memory_space<vmem>>, %arg6: memref<128x64xf32, #tpu.memory_space<vmem>>, %arg7: memref<128x64xf32, #tpu.memory_space<vmem>>) attributes {dimension_semantics = [#tpu.dimension_semantics<parallel>, #tpu.dimension_semantics<parallel>, #tpu.dimension_semantics<arbitrary>], iteration_bounds = array<i64: 1, 1, 1>, scalar_prefetch = 0 : i64, scratch_operands = 1 : i64, tpu.core_type = #tpu.core_type<tc>, window_params = [{transform_indices = @transform_0, window_bounds = array<i64: 128, 576>}, {transform_indices = @transform_1, window_bounds = array<i64: 576, 64>}, {transform_indices = @transform_2, window_bounds = array<i64: 1, 64>}, {transform_indices = @transform_3, window_bounds = array<i64: 128, 64>}]} {
    %c0_i32 = arith.constant 0 : i32
    %0 = arith.cmpi eq, %arg2, %c0_i32 : i32
    %1 = arith.extui %0 : i1 to i32
    %c0_i32_0 = arith.constant 0 : i32
    %2 = arith.cmpi ne, %1, %c0_i32_0 : i32
    scf.if %2 {
      %cst_10 = arith.constant 0.000000e+00 : f32
      %12 = vector.broadcast %cst_10 : f32 to vector<128x64xf32>
      %c0_11 = arith.constant 0 : index
      %c0_12 = arith.constant 0 : index
      %13 = vector.load %arg7[%c0_11, %c0_12] : memref<128x64xf32, #tpu.memory_space<vmem>>, vector<128x64xf32>
      tpu.vector_store %arg7[%c0_11, %c0_12], %12 {strides = array<i32>} : memref<128x64xf32, #tpu.memory_space<vmem>>, vector<128x64xf32>,
    } else {
    }
    %c0 = arith.constant 0 : index
    %c0_1 = arith.constant 0 : index
    %3 = vector.load %arg7[%c0, %c0_1] : memref<128x64xf32, #tpu.memory_space<vmem>>, vector<128x64xf32>
    %c0_2 = arith.constant 0 : index
    %c0_3 = arith.constant 0 : index
    %4 = vector.load %arg3[%c0_2, %c0_3] : memref<128x576xbf16, #tpu.memory_space<vmem>>, vector<128x576xbf16>
    %c0_4 = arith.constant 0 : index
    %c0_5 = arith.constant 0 : index
    %5 = vector.load %arg4[%c0_4, %c0_5] : memref<576x64xbf16, #tpu.memory_space<vmem>>, vector<576x64xbf16>
    %cst = arith.constant dense<0.000000e+00> : vector<128x64xf32>
    %6 = tpu.matmul %4, %5, %cst {dimension_numbers = #tpu.dot_dimension_numbers<[1], [0], [0], [1], [0, 0, 1, 1], [], []>} : vector<128x576xbf16>, vector<576x64xbf16>, vector<128x64xf32> -> vector<128x64xf32>
    %7 = arith.addf %3, %6 : vector<128x64xf32>
    %c0_6 = arith.constant 0 : index
    %c0_7 = arith.constant 0 : index
    %8 = vector.load %arg7[%c0_6, %c0_7] : memref<128x64xf32, #tpu.memory_space<vmem>>, vector<128x64xf32>
    tpu.vector_store %arg7[%c0_6, %c0_7], %7 {strides = array<i32>} : memref<128x64xf32, #tpu.memory_space<vmem>>, vector<128x64xf32>,
    %c0_i32_8 = arith.constant 0 : i32
    %9 = arith.cmpi eq, %arg2, %c0_i32_8 : i32
    %10 = arith.extui %9 : i1 to i32
    %c0_i32_9 = arith.constant 0 : i32
    %11 = arith.cmpi ne, %10, %c0_i32_9 : i32
    scf.if %11 {
      %c0_10 = arith.constant 0 : index
      %c0_11 = arith.constant 0 : index
      %12 = vector.load %arg7[%c0_10, %c0_11] : memref<128x64xf32, #tpu.memory_space<vmem>>, vector<128x64xf32>
      %c0_12 = arith.constant 0 : index
      %c0_13 = arith.constant 0 : index
      %13 = vector.load %arg5[%c0_12, %c0_13] : memref<1x64xf32, #tpu.memory_space<vmem>>, vector<1x64xf32>
      %14 = vector.broadcast %13 : vector<1x64xf32> to vector<128x64xf32>
      %15 = arith.addf %12, %14 : vector<128x64xf32>
      %cst_14 = arith.constant 0.000000e+00 : f32
      %16 = vector.broadcast %cst_14 : f32 to vector<128x64xf32>
      %17 = arith.maximumf %15, %16 : vector<128x64xf32>
      %c0_15 = arith.constant 0 : index
      %c0_16 = arith.constant 0 : index
      %18 = vector.load %arg6[%c0_15, %c0_16] : memref<128x64xf32, #tpu.memory_space<vmem>>, vector<128x64xf32>
      tpu.vector_store %arg6[%c0_15, %c0_16], %17 {strides = array<i32>} : memref<128x64xf32, #tpu.memory_space<vmem>>, vector<128x64xf32>,
    } else {
    }
    return
  }
  func.func @transform_0(%arg0: i32, %arg1: i32, %arg2: i32) -> (i32, i32) {
    %c0_i32 = arith.constant 0 : i32
    return %arg0, %arg2 : i32, i32
  }
  func.func @transform_1(%arg0: i32, %arg1: i32, %arg2: i32) -> (i32, i32) {
    %c0_i32 = arith.constant 0 : i32
    return %arg2, %arg1 : i32, i32
  }
  func.func @transform_2(%arg0: i32, %arg1: i32, %arg2: i32) -> (i32, i32) {
    %c0_i32 = arith.constant 0 : i32
    %c0_i32_0 = arith.constant 0 : i32
    return %c0_i32, %arg1 : i32, i32
  }
  func.func @transform_3(%arg0: i32, %arg1: i32, %arg2: i32) -> (i32, i32) {
    %c0_i32 = arith.constant 0 : i32
    return %arg0, %arg1 : i32, i32
  }
}

module attributes {stable_mosaic.version = 11 : i64} {
  func.func @_mm_bias_res_kernel(%arg0: i32, %arg1: i32, %arg2: i32, %arg3: memref<128x576xbf16, #tpu.memory_space<vmem>>, %arg4: memref<576x64xbf16, #tpu.memory_space<vmem>>, %arg5: memref<1x64xf32, #tpu.memory_space<vmem>>, %arg6: memref<128x64xf32, #tpu.memory_space<vmem>>, %arg7: memref<128x64xf32, #tpu.memory_space<vmem>>, %arg8: memref<128x64xf32, #tpu.memory_space<vmem>>) attributes {dimension_semantics = [#tpu.dimension_semantics<parallel>, #tpu.dimension_semantics<parallel>, #tpu.dimension_semantics<arbitrary>], iteration_bounds = array<i64: 1, 1, 1>, scalar_prefetch = 0 : i64, scratch_operands = 1 : i64, tpu.core_type = #tpu.core_type<tc>, window_params = [{transform_indices = @transform_0, window_bounds = array<i64: 128, 576>}, {transform_indices = @transform_1, window_bounds = array<i64: 576, 64>}, {transform_indices = @transform_2, window_bounds = array<i64: 1, 64>}, {transform_indices = @transform_3, window_bounds = array<i64: 128, 64>}, {transform_indices = @transform_4, window_bounds = array<i64: 128, 64>}]} {
    %c0_i32 = arith.constant 0 : i32
    %0 = arith.cmpi eq, %arg2, %c0_i32 : i32
    %1 = arith.extui %0 : i1 to i32
    %c0_i32_0 = arith.constant 0 : i32
    %2 = arith.cmpi ne, %1, %c0_i32_0 : i32
    scf.if %2 {
      %cst_10 = arith.constant 0.000000e+00 : f32
      %12 = vector.broadcast %cst_10 : f32 to vector<128x64xf32>
      %c0_11 = arith.constant 0 : index
      %c0_12 = arith.constant 0 : index
      %13 = vector.load %arg8[%c0_11, %c0_12] : memref<128x64xf32, #tpu.memory_space<vmem>>, vector<128x64xf32>
      tpu.vector_store %arg8[%c0_11, %c0_12], %12 {strides = array<i32>} : memref<128x64xf32, #tpu.memory_space<vmem>>, vector<128x64xf32>,
    } else {
    }
    %c0 = arith.constant 0 : index
    %c0_1 = arith.constant 0 : index
    %3 = vector.load %arg8[%c0, %c0_1] : memref<128x64xf32, #tpu.memory_space<vmem>>, vector<128x64xf32>
    %c0_2 = arith.constant 0 : index
    %c0_3 = arith.constant 0 : index
    %4 = vector.load %arg3[%c0_2, %c0_3] : memref<128x576xbf16, #tpu.memory_space<vmem>>, vector<128x576xbf16>
    %c0_4 = arith.constant 0 : index
    %c0_5 = arith.constant 0 : index
    %5 = vector.load %arg4[%c0_4, %c0_5] : memref<576x64xbf16, #tpu.memory_space<vmem>>, vector<576x64xbf16>
    %cst = arith.constant dense<0.000000e+00> : vector<128x64xf32>
    %6 = tpu.matmul %4, %5, %cst {dimension_numbers = #tpu.dot_dimension_numbers<[1], [0], [0], [1], [0, 0, 1, 1], [], []>} : vector<128x576xbf16>, vector<576x64xbf16>, vector<128x64xf32> -> vector<128x64xf32>
    %7 = arith.addf %3, %6 : vector<128x64xf32>
    %c0_6 = arith.constant 0 : index
    %c0_7 = arith.constant 0 : index
    %8 = vector.load %arg8[%c0_6, %c0_7] : memref<128x64xf32, #tpu.memory_space<vmem>>, vector<128x64xf32>
    tpu.vector_store %arg8[%c0_6, %c0_7], %7 {strides = array<i32>} : memref<128x64xf32, #tpu.memory_space<vmem>>, vector<128x64xf32>,
    %c0_i32_8 = arith.constant 0 : i32
    %9 = arith.cmpi eq, %arg2, %c0_i32_8 : i32
    %10 = arith.extui %9 : i1 to i32
    %c0_i32_9 = arith.constant 0 : i32
    %11 = arith.cmpi ne, %10, %c0_i32_9 : i32
    scf.if %11 {
      %c0_10 = arith.constant 0 : index
      %c0_11 = arith.constant 0 : index
      %12 = vector.load %arg8[%c0_10, %c0_11] : memref<128x64xf32, #tpu.memory_space<vmem>>, vector<128x64xf32>
      %c0_12 = arith.constant 0 : index
      %c0_13 = arith.constant 0 : index
      %13 = vector.load %arg5[%c0_12, %c0_13] : memref<1x64xf32, #tpu.memory_space<vmem>>, vector<1x64xf32>
      %14 = vector.broadcast %13 : vector<1x64xf32> to vector<128x64xf32>
      %15 = arith.addf %12, %14 : vector<128x64xf32>
      %c0_14 = arith.constant 0 : index
      %c0_15 = arith.constant 0 : index
      %16 = vector.load %arg6[%c0_14, %c0_15] : memref<128x64xf32, #tpu.memory_space<vmem>>, vector<128x64xf32>
      %17 = arith.addf %15, %16 : vector<128x64xf32>
      %cst_16 = arith.constant 0.000000e+00 : f32
      %18 = vector.broadcast %cst_16 : f32 to vector<128x64xf32>
      %19 = arith.maximumf %17, %18 : vector<128x64xf32>
      %c0_17 = arith.constant 0 : index
      %c0_18 = arith.constant 0 : index
      %20 = vector.load %arg7[%c0_17, %c0_18] : memref<128x64xf32, #tpu.memory_space<vmem>>, vector<128x64xf32>
      tpu.vector_store %arg7[%c0_17, %c0_18], %19 {strides = array<i32>} : memref<128x64xf32, #tpu.memory_space<vmem>>, vector<128x64xf32>,
    } else {
    }
    return
  }
  func.func @transform_0(%arg0: i32, %arg1: i32, %arg2: i32) -> (i32, i32) {
    %c0_i32 = arith.constant 0 : i32
    return %arg0, %arg2 : i32, i32
  }
  func.func @transform_1(%arg0: i32, %arg1: i32, %arg2: i32) -> (i32, i32) {
    %c0_i32 = arith.constant 0 : i32
    return %arg2, %arg1 : i32, i32
  }
  func.func @transform_2(%arg0: i32, %arg1: i32, %arg2: i32) -> (i32, i32) {
    %c0_i32 = arith.constant 0 : i32
    %c0_i32_0 = arith.constant 0 : i32
    return %c0_i32, %arg1 : i32, i32
  }
  func.func @transform_3(%arg0: i32, %arg1: i32, %arg2: i32) -> (i32, i32) {
    %c0_i32 = arith.constant 0 : i32
    return %arg0, %arg1 : i32, i32
  }
  func.func @transform_4(%arg0: i32, %arg1: i32, %arg2: i32) -> (i32, i32) {
    %c0_i32 = arith.constant 0 : i32
    return %arg0, %arg1 : i32, i32
  }
}

module attributes {stable_mosaic.version = 11 : i64} {
  func.func @_mm_bias_kernel(%arg0: i32, %arg1: i32, %arg2: i32, %arg3: memref<32x576xbf16, #tpu.memory_space<vmem>>, %arg4: memref<576x128xbf16, #tpu.memory_space<vmem>>, %arg5: memref<1x128xf32, #tpu.memory_space<vmem>>, %arg6: memref<32x128xf32, #tpu.memory_space<vmem>>, %arg7: memref<32x128xf32, #tpu.memory_space<vmem>>) attributes {dimension_semantics = [#tpu.dimension_semantics<parallel>, #tpu.dimension_semantics<parallel>, #tpu.dimension_semantics<arbitrary>], iteration_bounds = array<i64: 1, 1, 1>, scalar_prefetch = 0 : i64, scratch_operands = 1 : i64, tpu.core_type = #tpu.core_type<tc>, window_params = [{transform_indices = @transform_0, window_bounds = array<i64: 32, 576>}, {transform_indices = @transform_1, window_bounds = array<i64: 576, 128>}, {transform_indices = @transform_2, window_bounds = array<i64: 1, 128>}, {transform_indices = @transform_3, window_bounds = array<i64: 32, 128>}]} {
    %c0_i32 = arith.constant 0 : i32
    %0 = arith.cmpi eq, %arg2, %c0_i32 : i32
    %1 = arith.extui %0 : i1 to i32
    %c0_i32_0 = arith.constant 0 : i32
    %2 = arith.cmpi ne, %1, %c0_i32_0 : i32
    scf.if %2 {
      %cst_10 = arith.constant 0.000000e+00 : f32
      %12 = vector.broadcast %cst_10 : f32 to vector<32x128xf32>
      %c0_11 = arith.constant 0 : index
      %c0_12 = arith.constant 0 : index
      %13 = vector.load %arg7[%c0_11, %c0_12] : memref<32x128xf32, #tpu.memory_space<vmem>>, vector<32x128xf32>
      tpu.vector_store %arg7[%c0_11, %c0_12], %12 {strides = array<i32>} : memref<32x128xf32, #tpu.memory_space<vmem>>, vector<32x128xf32>,
    } else {
    }
    %c0 = arith.constant 0 : index
    %c0_1 = arith.constant 0 : index
    %3 = vector.load %arg7[%c0, %c0_1] : memref<32x128xf32, #tpu.memory_space<vmem>>, vector<32x128xf32>
    %c0_2 = arith.constant 0 : index
    %c0_3 = arith.constant 0 : index
    %4 = vector.load %arg3[%c0_2, %c0_3] : memref<32x576xbf16, #tpu.memory_space<vmem>>, vector<32x576xbf16>
    %c0_4 = arith.constant 0 : index
    %c0_5 = arith.constant 0 : index
    %5 = vector.load %arg4[%c0_4, %c0_5] : memref<576x128xbf16, #tpu.memory_space<vmem>>, vector<576x128xbf16>
    %cst = arith.constant dense<0.000000e+00> : vector<32x128xf32>
    %6 = tpu.matmul %4, %5, %cst {dimension_numbers = #tpu.dot_dimension_numbers<[1], [0], [0], [1], [0, 0, 1, 1], [], []>} : vector<32x576xbf16>, vector<576x128xbf16>, vector<32x128xf32> -> vector<32x128xf32>
    %7 = arith.addf %3, %6 : vector<32x128xf32>
    %c0_6 = arith.constant 0 : index
    %c0_7 = arith.constant 0 : index
    %8 = vector.load %arg7[%c0_6, %c0_7] : memref<32x128xf32, #tpu.memory_space<vmem>>, vector<32x128xf32>
    tpu.vector_store %arg7[%c0_6, %c0_7], %7 {strides = array<i32>} : memref<32x128xf32, #tpu.memory_space<vmem>>, vector<32x128xf32>,
    %c0_i32_8 = arith.constant 0 : i32
    %9 = arith.cmpi eq, %arg2, %c0_i32_8 : i32
    %10 = arith.extui %9 : i1 to i32
    %c0_i32_9 = arith.constant 0 : i32
    %11 = arith.cmpi ne, %10, %c0_i32_9 : i32
    scf.if %11 {
      %c0_10 = arith.constant 0 : index
      %c0_11 = arith.constant 0 : index
      %12 = vector.load %arg7[%c0_10, %c0_11] : memref<32x128xf32, #tpu.memory_space<vmem>>, vector<32x128xf32>
      %c0_12 = arith.constant 0 : index
      %c0_13 = arith.constant 0 : index
      %13 = vector.load %arg5[%c0_12, %c0_13] : memref<1x128xf32, #tpu.memory_space<vmem>>, vector<1x128xf32>
      %14 = vector.broadcast %13 : vector<1x128xf32> to vector<32x128xf32>
      %15 = arith.addf %12, %14 : vector<32x128xf32>
      %cst_14 = arith.constant 0.000000e+00 : f32
      %16 = vector.broadcast %cst_14 : f32 to vector<32x128xf32>
      %17 = arith.maximumf %15, %16 : vector<32x128xf32>
      %c0_15 = arith.constant 0 : index
      %c0_16 = arith.constant 0 : index
      %18 = vector.load %arg6[%c0_15, %c0_16] : memref<32x128xf32, #tpu.memory_space<vmem>>, vector<32x128xf32>
      tpu.vector_store %arg6[%c0_15, %c0_16], %17 {strides = array<i32>} : memref<32x128xf32, #tpu.memory_space<vmem>>, vector<32x128xf32>,
    } else {
    }
    return
  }
  func.func @transform_0(%arg0: i32, %arg1: i32, %arg2: i32) -> (i32, i32) {
    %c0_i32 = arith.constant 0 : i32
    return %arg0, %arg2 : i32, i32
  }
  func.func @transform_1(%arg0: i32, %arg1: i32, %arg2: i32) -> (i32, i32) {
    %c0_i32 = arith.constant 0 : i32
    return %arg2, %arg1 : i32, i32
  }
  func.func @transform_2(%arg0: i32, %arg1: i32, %arg2: i32) -> (i32, i32) {
    %c0_i32 = arith.constant 0 : i32
    %c0_i32_0 = arith.constant 0 : i32
    return %c0_i32, %arg1 : i32, i32
  }
  func.func @transform_3(%arg0: i32, %arg1: i32, %arg2: i32) -> (i32, i32) {
    %c0_i32 = arith.constant 0 : i32
    return %arg0, %arg1 : i32, i32
  }
}

module attributes {stable_mosaic.version = 11 : i64} {
  func.func @_mm_bias_kernel(%arg0: i32, %arg1: i32, %arg2: i32, %arg3: memref<32x64xbf16, #tpu.memory_space<vmem>>, %arg4: memref<64x128xbf16, #tpu.memory_space<vmem>>, %arg5: memref<1x128xf32, #tpu.memory_space<vmem>>, %arg6: memref<32x128xf32, #tpu.memory_space<vmem>>, %arg7: memref<32x128xf32, #tpu.memory_space<vmem>>) attributes {dimension_semantics = [#tpu.dimension_semantics<parallel>, #tpu.dimension_semantics<parallel>, #tpu.dimension_semantics<arbitrary>], iteration_bounds = array<i64: 1, 1, 1>, scalar_prefetch = 0 : i64, scratch_operands = 1 : i64, tpu.core_type = #tpu.core_type<tc>, window_params = [{transform_indices = @transform_0, window_bounds = array<i64: 32, 64>}, {transform_indices = @transform_1, window_bounds = array<i64: 64, 128>}, {transform_indices = @transform_2, window_bounds = array<i64: 1, 128>}, {transform_indices = @transform_3, window_bounds = array<i64: 32, 128>}]} {
    %c0_i32 = arith.constant 0 : i32
    %0 = arith.cmpi eq, %arg2, %c0_i32 : i32
    %1 = arith.extui %0 : i1 to i32
    %c0_i32_0 = arith.constant 0 : i32
    %2 = arith.cmpi ne, %1, %c0_i32_0 : i32
    scf.if %2 {
      %cst_10 = arith.constant 0.000000e+00 : f32
      %12 = vector.broadcast %cst_10 : f32 to vector<32x128xf32>
      %c0_11 = arith.constant 0 : index
      %c0_12 = arith.constant 0 : index
      %13 = vector.load %arg7[%c0_11, %c0_12] : memref<32x128xf32, #tpu.memory_space<vmem>>, vector<32x128xf32>
      tpu.vector_store %arg7[%c0_11, %c0_12], %12 {strides = array<i32>} : memref<32x128xf32, #tpu.memory_space<vmem>>, vector<32x128xf32>,
    } else {
    }
    %c0 = arith.constant 0 : index
    %c0_1 = arith.constant 0 : index
    %3 = vector.load %arg7[%c0, %c0_1] : memref<32x128xf32, #tpu.memory_space<vmem>>, vector<32x128xf32>
    %c0_2 = arith.constant 0 : index
    %c0_3 = arith.constant 0 : index
    %4 = vector.load %arg3[%c0_2, %c0_3] : memref<32x64xbf16, #tpu.memory_space<vmem>>, vector<32x64xbf16>
    %c0_4 = arith.constant 0 : index
    %c0_5 = arith.constant 0 : index
    %5 = vector.load %arg4[%c0_4, %c0_5] : memref<64x128xbf16, #tpu.memory_space<vmem>>, vector<64x128xbf16>
    %cst = arith.constant dense<0.000000e+00> : vector<32x128xf32>
    %6 = tpu.matmul %4, %5, %cst {dimension_numbers = #tpu.dot_dimension_numbers<[1], [0], [0], [1], [0, 0, 1, 1], [], []>} : vector<32x64xbf16>, vector<64x128xbf16>, vector<32x128xf32> -> vector<32x128xf32>
    %7 = arith.addf %3, %6 : vector<32x128xf32>
    %c0_6 = arith.constant 0 : index
    %c0_7 = arith.constant 0 : index
    %8 = vector.load %arg7[%c0_6, %c0_7] : memref<32x128xf32, #tpu.memory_space<vmem>>, vector<32x128xf32>
    tpu.vector_store %arg7[%c0_6, %c0_7], %7 {strides = array<i32>} : memref<32x128xf32, #tpu.memory_space<vmem>>, vector<32x128xf32>,
    %c0_i32_8 = arith.constant 0 : i32
    %9 = arith.cmpi eq, %arg2, %c0_i32_8 : i32
    %10 = arith.extui %9 : i1 to i32
    %c0_i32_9 = arith.constant 0 : i32
    %11 = arith.cmpi ne, %10, %c0_i32_9 : i32
    scf.if %11 {
      %c0_10 = arith.constant 0 : index
      %c0_11 = arith.constant 0 : index
      %12 = vector.load %arg7[%c0_10, %c0_11] : memref<32x128xf32, #tpu.memory_space<vmem>>, vector<32x128xf32>
      %c0_12 = arith.constant 0 : index
      %c0_13 = arith.constant 0 : index
      %13 = vector.load %arg5[%c0_12, %c0_13] : memref<1x128xf32, #tpu.memory_space<vmem>>, vector<1x128xf32>
      %14 = vector.broadcast %13 : vector<1x128xf32> to vector<32x128xf32>
      %15 = arith.addf %12, %14 : vector<32x128xf32>
      %c0_14 = arith.constant 0 : index
      %c0_15 = arith.constant 0 : index
      %16 = vector.load %arg6[%c0_14, %c0_15] : memref<32x128xf32, #tpu.memory_space<vmem>>, vector<32x128xf32>
      tpu.vector_store %arg6[%c0_14, %c0_15], %15 {strides = array<i32>} : memref<32x128xf32, #tpu.memory_space<vmem>>, vector<32x128xf32>,
    } else {
    }
    return
  }
  func.func @transform_0(%arg0: i32, %arg1: i32, %arg2: i32) -> (i32, i32) {
    %c0_i32 = arith.constant 0 : i32
    return %arg0, %arg2 : i32, i32
  }
  func.func @transform_1(%arg0: i32, %arg1: i32, %arg2: i32) -> (i32, i32) {
    %c0_i32 = arith.constant 0 : i32
    return %arg2, %arg1 : i32, i32
  }
  func.func @transform_2(%arg0: i32, %arg1: i32, %arg2: i32) -> (i32, i32) {
    %c0_i32 = arith.constant 0 : i32
    %c0_i32_0 = arith.constant 0 : i32
    return %c0_i32, %arg1 : i32, i32
  }
  func.func @transform_3(%arg0: i32, %arg1: i32, %arg2: i32) -> (i32, i32) {
    %c0_i32 = arith.constant 0 : i32
    return %arg0, %arg1 : i32, i32
  }
}

module attributes {stable_mosaic.version = 11 : i64} {
  func.func @_mm_bias_kernel(%arg0: i32, %arg1: i32, %arg2: i32, %arg3: memref<32x384xbf16, #tpu.memory_space<vmem>>, %arg4: memref<384x128xbf16, #tpu.memory_space<vmem>>, %arg5: memref<1x128xf32, #tpu.memory_space<vmem>>, %arg6: memref<32x128xf32, #tpu.memory_space<vmem>>, %arg7: memref<32x128xf32, #tpu.memory_space<vmem>>) attributes {dimension_semantics = [#tpu.dimension_semantics<parallel>, #tpu.dimension_semantics<parallel>, #tpu.dimension_semantics<arbitrary>], iteration_bounds = array<i64: 1, 1, 3>, scalar_prefetch = 0 : i64, scratch_operands = 1 : i64, tpu.core_type = #tpu.core_type<tc>, window_params = [{transform_indices = @transform_0, window_bounds = array<i64: 32, 384>}, {transform_indices = @transform_1, window_bounds = array<i64: 384, 128>}, {transform_indices = @transform_2, window_bounds = array<i64: 1, 128>}, {transform_indices = @transform_3, window_bounds = array<i64: 32, 128>}]} {
    %c0_i32 = arith.constant 0 : i32
    %0 = arith.cmpi eq, %arg2, %c0_i32 : i32
    %1 = arith.extui %0 : i1 to i32
    %c0_i32_0 = arith.constant 0 : i32
    %2 = arith.cmpi ne, %1, %c0_i32_0 : i32
    scf.if %2 {
      %cst_9 = arith.constant 0.000000e+00 : f32
      %12 = vector.broadcast %cst_9 : f32 to vector<32x128xf32>
      %c0_10 = arith.constant 0 : index
      %c0_11 = arith.constant 0 : index
      %13 = vector.load %arg7[%c0_10, %c0_11] : memref<32x128xf32, #tpu.memory_space<vmem>>, vector<32x128xf32>
      tpu.vector_store %arg7[%c0_10, %c0_11], %12 {strides = array<i32>} : memref<32x128xf32, #tpu.memory_space<vmem>>, vector<32x128xf32>,
    } else {
    }
    %c0 = arith.constant 0 : index
    %c0_1 = arith.constant 0 : index
    %3 = vector.load %arg7[%c0, %c0_1] : memref<32x128xf32, #tpu.memory_space<vmem>>, vector<32x128xf32>
    %c0_2 = arith.constant 0 : index
    %c0_3 = arith.constant 0 : index
    %4 = vector.load %arg3[%c0_2, %c0_3] : memref<32x384xbf16, #tpu.memory_space<vmem>>, vector<32x384xbf16>
    %c0_4 = arith.constant 0 : index
    %c0_5 = arith.constant 0 : index
    %5 = vector.load %arg4[%c0_4, %c0_5] : memref<384x128xbf16, #tpu.memory_space<vmem>>, vector<384x128xbf16>
    %cst = arith.constant dense<0.000000e+00> : vector<32x128xf32>
    %6 = tpu.matmul %4, %5, %cst {dimension_numbers = #tpu.dot_dimension_numbers<[1], [0], [0], [1], [0, 0, 1, 1], [], []>} : vector<32x384xbf16>, vector<384x128xbf16>, vector<32x128xf32> -> vector<32x128xf32>
    %7 = arith.addf %3, %6 : vector<32x128xf32>
    %c0_6 = arith.constant 0 : index
    %c0_7 = arith.constant 0 : index
    %8 = vector.load %arg7[%c0_6, %c0_7] : memref<32x128xf32, #tpu.memory_space<vmem>>, vector<32x128xf32>
    tpu.vector_store %arg7[%c0_6, %c0_7], %7 {strides = array<i32>} : memref<32x128xf32, #tpu.memory_space<vmem>>, vector<32x128xf32>,
    %c2_i32 = arith.constant 2 : i32
    %9 = arith.cmpi eq, %arg2, %c2_i32 : i32
    %10 = arith.extui %9 : i1 to i32
    %c0_i32_8 = arith.constant 0 : i32
    %11 = arith.cmpi ne, %10, %c0_i32_8 : i32
    scf.if %11 {
      %c0_9 = arith.constant 0 : index
      %c0_10 = arith.constant 0 : index
      %12 = vector.load %arg7[%c0_9, %c0_10] : memref<32x128xf32, #tpu.memory_space<vmem>>, vector<32x128xf32>
      %c0_11 = arith.constant 0 : index
      %c0_12 = arith.constant 0 : index
      %13 = vector.load %arg5[%c0_11, %c0_12] : memref<1x128xf32, #tpu.memory_space<vmem>>, vector<1x128xf32>
      %14 = vector.broadcast %13 : vector<1x128xf32> to vector<32x128xf32>
      %15 = arith.addf %12, %14 : vector<32x128xf32>
      %cst_13 = arith.constant 0.000000e+00 : f32
      %16 = vector.broadcast %cst_13 : f32 to vector<32x128xf32>
      %17 = arith.maximumf %15, %16 : vector<32x128xf32>
      %c0_14 = arith.constant 0 : index
      %c0_15 = arith.constant 0 : index
      %18 = vector.load %arg6[%c0_14, %c0_15] : memref<32x128xf32, #tpu.memory_space<vmem>>, vector<32x128xf32>
      tpu.vector_store %arg6[%c0_14, %c0_15], %17 {strides = array<i32>} : memref<32x128xf32, #tpu.memory_space<vmem>>, vector<32x128xf32>,
    } else {
    }
    return
  }
  func.func @transform_0(%arg0: i32, %arg1: i32, %arg2: i32) -> (i32, i32) {
    %c0_i32 = arith.constant 0 : i32
    return %arg0, %arg2 : i32, i32
  }
  func.func @transform_1(%arg0: i32, %arg1: i32, %arg2: i32) -> (i32, i32) {
    %c0_i32 = arith.constant 0 : i32
    return %arg2, %arg1 : i32, i32
  }
  func.func @transform_2(%arg0: i32, %arg1: i32, %arg2: i32) -> (i32, i32) {
    %c0_i32 = arith.constant 0 : i32
    %c0_i32_0 = arith.constant 0 : i32
    return %c0_i32, %arg1 : i32, i32
  }
  func.func @transform_3(%arg0: i32, %arg1: i32, %arg2: i32) -> (i32, i32) {
    %c0_i32 = arith.constant 0 : i32
    return %arg0, %arg1 : i32, i32
  }
}

module attributes {stable_mosaic.version = 11 : i64} {
  func.func @_mm_bias_res_kernel(%arg0: i32, %arg1: i32, %arg2: i32, %arg3: memref<32x384xbf16, #tpu.memory_space<vmem>>, %arg4: memref<384x128xbf16, #tpu.memory_space<vmem>>, %arg5: memref<1x128xf32, #tpu.memory_space<vmem>>, %arg6: memref<32x128xf32, #tpu.memory_space<vmem>>, %arg7: memref<32x128xf32, #tpu.memory_space<vmem>>, %arg8: memref<32x128xf32, #tpu.memory_space<vmem>>) attributes {dimension_semantics = [#tpu.dimension_semantics<parallel>, #tpu.dimension_semantics<parallel>, #tpu.dimension_semantics<arbitrary>], iteration_bounds = array<i64: 1, 1, 3>, scalar_prefetch = 0 : i64, scratch_operands = 1 : i64, tpu.core_type = #tpu.core_type<tc>, window_params = [{transform_indices = @transform_0, window_bounds = array<i64: 32, 384>}, {transform_indices = @transform_1, window_bounds = array<i64: 384, 128>}, {transform_indices = @transform_2, window_bounds = array<i64: 1, 128>}, {transform_indices = @transform_3, window_bounds = array<i64: 32, 128>}, {transform_indices = @transform_4, window_bounds = array<i64: 32, 128>}]} {
    %c0_i32 = arith.constant 0 : i32
    %0 = arith.cmpi eq, %arg2, %c0_i32 : i32
    %1 = arith.extui %0 : i1 to i32
    %c0_i32_0 = arith.constant 0 : i32
    %2 = arith.cmpi ne, %1, %c0_i32_0 : i32
    scf.if %2 {
      %cst_9 = arith.constant 0.000000e+00 : f32
      %12 = vector.broadcast %cst_9 : f32 to vector<32x128xf32>
      %c0_10 = arith.constant 0 : index
      %c0_11 = arith.constant 0 : index
      %13 = vector.load %arg8[%c0_10, %c0_11] : memref<32x128xf32, #tpu.memory_space<vmem>>, vector<32x128xf32>
      tpu.vector_store %arg8[%c0_10, %c0_11], %12 {strides = array<i32>} : memref<32x128xf32, #tpu.memory_space<vmem>>, vector<32x128xf32>,
    } else {
    }
    %c0 = arith.constant 0 : index
    %c0_1 = arith.constant 0 : index
    %3 = vector.load %arg8[%c0, %c0_1] : memref<32x128xf32, #tpu.memory_space<vmem>>, vector<32x128xf32>
    %c0_2 = arith.constant 0 : index
    %c0_3 = arith.constant 0 : index
    %4 = vector.load %arg3[%c0_2, %c0_3] : memref<32x384xbf16, #tpu.memory_space<vmem>>, vector<32x384xbf16>
    %c0_4 = arith.constant 0 : index
    %c0_5 = arith.constant 0 : index
    %5 = vector.load %arg4[%c0_4, %c0_5] : memref<384x128xbf16, #tpu.memory_space<vmem>>, vector<384x128xbf16>
    %cst = arith.constant dense<0.000000e+00> : vector<32x128xf32>
    %6 = tpu.matmul %4, %5, %cst {dimension_numbers = #tpu.dot_dimension_numbers<[1], [0], [0], [1], [0, 0, 1, 1], [], []>} : vector<32x384xbf16>, vector<384x128xbf16>, vector<32x128xf32> -> vector<32x128xf32>
    %7 = arith.addf %3, %6 : vector<32x128xf32>
    %c0_6 = arith.constant 0 : index
    %c0_7 = arith.constant 0 : index
    %8 = vector.load %arg8[%c0_6, %c0_7] : memref<32x128xf32, #tpu.memory_space<vmem>>, vector<32x128xf32>
    tpu.vector_store %arg8[%c0_6, %c0_7], %7 {strides = array<i32>} : memref<32x128xf32, #tpu.memory_space<vmem>>, vector<32x128xf32>,
    %c2_i32 = arith.constant 2 : i32
    %9 = arith.cmpi eq, %arg2, %c2_i32 : i32
    %10 = arith.extui %9 : i1 to i32
    %c0_i32_8 = arith.constant 0 : i32
    %11 = arith.cmpi ne, %10, %c0_i32_8 : i32
    scf.if %11 {
      %c0_9 = arith.constant 0 : index
      %c0_10 = arith.constant 0 : index
      %12 = vector.load %arg8[%c0_9, %c0_10] : memref<32x128xf32, #tpu.memory_space<vmem>>, vector<32x128xf32>
      %c0_11 = arith.constant 0 : index
      %c0_12 = arith.constant 0 : index
      %13 = vector.load %arg5[%c0_11, %c0_12] : memref<1x128xf32, #tpu.memory_space<vmem>>, vector<1x128xf32>
      %14 = vector.broadcast %13 : vector<1x128xf32> to vector<32x128xf32>
      %15 = arith.addf %12, %14 : vector<32x128xf32>
      %c0_13 = arith.constant 0 : index
      %c0_14 = arith.constant 0 : index
      %16 = vector.load %arg6[%c0_13, %c0_14] : memref<32x128xf32, #tpu.memory_space<vmem>>, vector<32x128xf32>
      %17 = arith.addf %15, %16 : vector<32x128xf32>
      %cst_15 = arith.constant 0.000000e+00 : f32
      %18 = vector.broadcast %cst_15 : f32 to vector<32x128xf32>
      %19 = arith.maximumf %17, %18 : vector<32x128xf32>
      %c0_16 = arith.constant 0 : index
      %c0_17 = arith.constant 0 : index
      %20 = vector.load %arg7[%c0_16, %c0_17] : memref<32x128xf32, #tpu.memory_space<vmem>>, vector<32x128xf32>
      tpu.vector_store %arg7[%c0_16, %c0_17], %19 {strides = array<i32>} : memref<32x128xf32, #tpu.memory_space<vmem>>, vector<32x128xf32>,
    } else {
    }
    return
  }
  func.func @transform_0(%arg0: i32, %arg1: i32, %arg2: i32) -> (i32, i32) {
    %c0_i32 = arith.constant 0 : i32
    return %arg0, %arg2 : i32, i32
  }
  func.func @transform_1(%arg0: i32, %arg1: i32, %arg2: i32) -> (i32, i32) {
    %c0_i32 = arith.constant 0 : i32
    return %arg2, %arg1 : i32, i32
  }
  func.func @transform_2(%arg0: i32, %arg1: i32, %arg2: i32) -> (i32, i32) {
    %c0_i32 = arith.constant 0 : i32
    %c0_i32_0 = arith.constant 0 : i32
    return %c0_i32, %arg1 : i32, i32
  }
  func.func @transform_3(%arg0: i32, %arg1: i32, %arg2: i32) -> (i32, i32) {
    %c0_i32 = arith.constant 0 : i32
    return %arg0, %arg1 : i32, i32
  }
  func.func @transform_4(%arg0: i32, %arg1: i32, %arg2: i32) -> (i32, i32) {
    %c0_i32 = arith.constant 0 : i32
    return %arg0, %arg1 : i32, i32
  }
}

module attributes {stable_mosaic.version = 11 : i64} {
  func.func @_mm_bias_kernel(%arg0: i32, %arg1: i32, %arg2: i32, %arg3: memref<8x384xbf16, #tpu.memory_space<vmem>>, %arg4: memref<384x256xbf16, #tpu.memory_space<vmem>>, %arg5: memref<1x256xf32, #tpu.memory_space<vmem>>, %arg6: memref<8x256xf32, #tpu.memory_space<vmem>>, %arg7: memref<8x256xf32, #tpu.memory_space<vmem>>) attributes {dimension_semantics = [#tpu.dimension_semantics<parallel>, #tpu.dimension_semantics<parallel>, #tpu.dimension_semantics<arbitrary>], iteration_bounds = array<i64: 1, 1, 3>, scalar_prefetch = 0 : i64, scratch_operands = 1 : i64, tpu.core_type = #tpu.core_type<tc>, window_params = [{transform_indices = @transform_0, window_bounds = array<i64: 8, 384>}, {transform_indices = @transform_1, window_bounds = array<i64: 384, 256>}, {transform_indices = @transform_2, window_bounds = array<i64: 1, 256>}, {transform_indices = @transform_3, window_bounds = array<i64: 8, 256>}]} {
    %c0_i32 = arith.constant 0 : i32
    %0 = arith.cmpi eq, %arg2, %c0_i32 : i32
    %1 = arith.extui %0 : i1 to i32
    %c0_i32_0 = arith.constant 0 : i32
    %2 = arith.cmpi ne, %1, %c0_i32_0 : i32
    scf.if %2 {
      %cst_9 = arith.constant 0.000000e+00 : f32
      %12 = vector.broadcast %cst_9 : f32 to vector<8x256xf32>
      %c0_10 = arith.constant 0 : index
      %c0_11 = arith.constant 0 : index
      %13 = vector.load %arg7[%c0_10, %c0_11] : memref<8x256xf32, #tpu.memory_space<vmem>>, vector<8x256xf32>
      tpu.vector_store %arg7[%c0_10, %c0_11], %12 {strides = array<i32>} : memref<8x256xf32, #tpu.memory_space<vmem>>, vector<8x256xf32>,
    } else {
    }
    %c0 = arith.constant 0 : index
    %c0_1 = arith.constant 0 : index
    %3 = vector.load %arg7[%c0, %c0_1] : memref<8x256xf32, #tpu.memory_space<vmem>>, vector<8x256xf32>
    %c0_2 = arith.constant 0 : index
    %c0_3 = arith.constant 0 : index
    %4 = vector.load %arg3[%c0_2, %c0_3] : memref<8x384xbf16, #tpu.memory_space<vmem>>, vector<8x384xbf16>
    %c0_4 = arith.constant 0 : index
    %c0_5 = arith.constant 0 : index
    %5 = vector.load %arg4[%c0_4, %c0_5] : memref<384x256xbf16, #tpu.memory_space<vmem>>, vector<384x256xbf16>
    %cst = arith.constant dense<0.000000e+00> : vector<8x256xf32>
    %6 = tpu.matmul %4, %5, %cst {dimension_numbers = #tpu.dot_dimension_numbers<[1], [0], [0], [1], [0, 0, 1, 1], [], []>} : vector<8x384xbf16>, vector<384x256xbf16>, vector<8x256xf32> -> vector<8x256xf32>
    %7 = arith.addf %3, %6 : vector<8x256xf32>
    %c0_6 = arith.constant 0 : index
    %c0_7 = arith.constant 0 : index
    %8 = vector.load %arg7[%c0_6, %c0_7] : memref<8x256xf32, #tpu.memory_space<vmem>>, vector<8x256xf32>
    tpu.vector_store %arg7[%c0_6, %c0_7], %7 {strides = array<i32>} : memref<8x256xf32, #tpu.memory_space<vmem>>, vector<8x256xf32>,
    %c2_i32 = arith.constant 2 : i32
    %9 = arith.cmpi eq, %arg2, %c2_i32 : i32
    %10 = arith.extui %9 : i1 to i32
    %c0_i32_8 = arith.constant 0 : i32
    %11 = arith.cmpi ne, %10, %c0_i32_8 : i32
    scf.if %11 {
      %c0_9 = arith.constant 0 : index
      %c0_10 = arith.constant 0 : index
      %12 = vector.load %arg7[%c0_9, %c0_10] : memref<8x256xf32, #tpu.memory_space<vmem>>, vector<8x256xf32>
      %c0_11 = arith.constant 0 : index
      %c0_12 = arith.constant 0 : index
      %13 = vector.load %arg5[%c0_11, %c0_12] : memref<1x256xf32, #tpu.memory_space<vmem>>, vector<1x256xf32>
      %14 = vector.broadcast %13 : vector<1x256xf32> to vector<8x256xf32>
      %15 = arith.addf %12, %14 : vector<8x256xf32>
      %cst_13 = arith.constant 0.000000e+00 : f32
      %16 = vector.broadcast %cst_13 : f32 to vector<8x256xf32>
      %17 = arith.maximumf %15, %16 : vector<8x256xf32>
      %c0_14 = arith.constant 0 : index
      %c0_15 = arith.constant 0 : index
      %18 = vector.load %arg6[%c0_14, %c0_15] : memref<8x256xf32, #tpu.memory_space<vmem>>, vector<8x256xf32>
      tpu.vector_store %arg6[%c0_14, %c0_15], %17 {strides = array<i32>} : memref<8x256xf32, #tpu.memory_space<vmem>>, vector<8x256xf32>,
    } else {
    }
    return
  }
  func.func @transform_0(%arg0: i32, %arg1: i32, %arg2: i32) -> (i32, i32) {
    %c0_i32 = arith.constant 0 : i32
    return %arg0, %arg2 : i32, i32
  }
  func.func @transform_1(%arg0: i32, %arg1: i32, %arg2: i32) -> (i32, i32) {
    %c0_i32 = arith.constant 0 : i32
    return %arg2, %arg1 : i32, i32
  }
  func.func @transform_2(%arg0: i32, %arg1: i32, %arg2: i32) -> (i32, i32) {
    %c0_i32 = arith.constant 0 : i32
    %c0_i32_0 = arith.constant 0 : i32
    return %c0_i32, %arg1 : i32, i32
  }
  func.func @transform_3(%arg0: i32, %arg1: i32, %arg2: i32) -> (i32, i32) {
    %c0_i32 = arith.constant 0 : i32
    return %arg0, %arg1 : i32, i32
  }
}

module attributes {stable_mosaic.version = 11 : i64} {
  func.func @_mm_bias_kernel(%arg0: i32, %arg1: i32, %arg2: i32, %arg3: memref<8x128xbf16, #tpu.memory_space<vmem>>, %arg4: memref<128x256xbf16, #tpu.memory_space<vmem>>, %arg5: memref<1x256xf32, #tpu.memory_space<vmem>>, %arg6: memref<8x256xf32, #tpu.memory_space<vmem>>, %arg7: memref<8x256xf32, #tpu.memory_space<vmem>>) attributes {dimension_semantics = [#tpu.dimension_semantics<parallel>, #tpu.dimension_semantics<parallel>, #tpu.dimension_semantics<arbitrary>], iteration_bounds = array<i64: 1, 1, 1>, scalar_prefetch = 0 : i64, scratch_operands = 1 : i64, tpu.core_type = #tpu.core_type<tc>, window_params = [{transform_indices = @transform_0, window_bounds = array<i64: 8, 128>}, {transform_indices = @transform_1, window_bounds = array<i64: 128, 256>}, {transform_indices = @transform_2, window_bounds = array<i64: 1, 256>}, {transform_indices = @transform_3, window_bounds = array<i64: 8, 256>}]} {
    %c0_i32 = arith.constant 0 : i32
    %0 = arith.cmpi eq, %arg2, %c0_i32 : i32
    %1 = arith.extui %0 : i1 to i32
    %c0_i32_0 = arith.constant 0 : i32
    %2 = arith.cmpi ne, %1, %c0_i32_0 : i32
    scf.if %2 {
      %cst_10 = arith.constant 0.000000e+00 : f32
      %12 = vector.broadcast %cst_10 : f32 to vector<8x256xf32>
      %c0_11 = arith.constant 0 : index
      %c0_12 = arith.constant 0 : index
      %13 = vector.load %arg7[%c0_11, %c0_12] : memref<8x256xf32, #tpu.memory_space<vmem>>, vector<8x256xf32>
      tpu.vector_store %arg7[%c0_11, %c0_12], %12 {strides = array<i32>} : memref<8x256xf32, #tpu.memory_space<vmem>>, vector<8x256xf32>,
    } else {
    }
    %c0 = arith.constant 0 : index
    %c0_1 = arith.constant 0 : index
    %3 = vector.load %arg7[%c0, %c0_1] : memref<8x256xf32, #tpu.memory_space<vmem>>, vector<8x256xf32>
    %c0_2 = arith.constant 0 : index
    %c0_3 = arith.constant 0 : index
    %4 = vector.load %arg3[%c0_2, %c0_3] : memref<8x128xbf16, #tpu.memory_space<vmem>>, vector<8x128xbf16>
    %c0_4 = arith.constant 0 : index
    %c0_5 = arith.constant 0 : index
    %5 = vector.load %arg4[%c0_4, %c0_5] : memref<128x256xbf16, #tpu.memory_space<vmem>>, vector<128x256xbf16>
    %cst = arith.constant dense<0.000000e+00> : vector<8x256xf32>
    %6 = tpu.matmul %4, %5, %cst {dimension_numbers = #tpu.dot_dimension_numbers<[1], [0], [0], [1], [0, 0, 1, 1], [], []>} : vector<8x128xbf16>, vector<128x256xbf16>, vector<8x256xf32> -> vector<8x256xf32>
    %7 = arith.addf %3, %6 : vector<8x256xf32>
    %c0_6 = arith.constant 0 : index
    %c0_7 = arith.constant 0 : index
    %8 = vector.load %arg7[%c0_6, %c0_7] : memref<8x256xf32, #tpu.memory_space<vmem>>, vector<8x256xf32>
    tpu.vector_store %arg7[%c0_6, %c0_7], %7 {strides = array<i32>} : memref<8x256xf32, #tpu.memory_space<vmem>>, vector<8x256xf32>,
    %c0_i32_8 = arith.constant 0 : i32
    %9 = arith.cmpi eq, %arg2, %c0_i32_8 : i32
    %10 = arith.extui %9 : i1 to i32
    %c0_i32_9 = arith.constant 0 : i32
    %11 = arith.cmpi ne, %10, %c0_i32_9 : i32
    scf.if %11 {
      %c0_10 = arith.constant 0 : index
      %c0_11 = arith.constant 0 : index
      %12 = vector.load %arg7[%c0_10, %c0_11] : memref<8x256xf32, #tpu.memory_space<vmem>>, vector<8x256xf32>
      %c0_12 = arith.constant 0 : index
      %c0_13 = arith.constant 0 : index
      %13 = vector.load %arg5[%c0_12, %c0_13] : memref<1x256xf32, #tpu.memory_space<vmem>>, vector<1x256xf32>
      %14 = vector.broadcast %13 : vector<1x256xf32> to vector<8x256xf32>
      %15 = arith.addf %12, %14 : vector<8x256xf32>
      %c0_14 = arith.constant 0 : index
      %c0_15 = arith.constant 0 : index
      %16 = vector.load %arg6[%c0_14, %c0_15] : memref<8x256xf32, #tpu.memory_space<vmem>>, vector<8x256xf32>
      tpu.vector_store %arg6[%c0_14, %c0_15], %15 {strides = array<i32>} : memref<8x256xf32, #tpu.memory_space<vmem>>, vector<8x256xf32>,
    } else {
    }
    return
  }
  func.func @transform_0(%arg0: i32, %arg1: i32, %arg2: i32) -> (i32, i32) {
    %c0_i32 = arith.constant 0 : i32
    return %arg0, %arg2 : i32, i32
  }
  func.func @transform_1(%arg0: i32, %arg1: i32, %arg2: i32) -> (i32, i32) {
    %c0_i32 = arith.constant 0 : i32
    return %arg2, %arg1 : i32, i32
  }
  func.func @transform_2(%arg0: i32, %arg1: i32, %arg2: i32) -> (i32, i32) {
    %c0_i32 = arith.constant 0 : i32
    %c0_i32_0 = arith.constant 0 : i32
    return %c0_i32, %arg1 : i32, i32
  }
  func.func @transform_3(%arg0: i32, %arg1: i32, %arg2: i32) -> (i32, i32) {
    %c0_i32 = arith.constant 0 : i32
    return %arg0, %arg1 : i32, i32
  }
}

module attributes {stable_mosaic.version = 11 : i64} {
  func.func @_mm_bias_kernel(%arg0: i32, %arg1: i32, %arg2: i32, %arg3: memref<8x384xbf16, #tpu.memory_space<vmem>>, %arg4: memref<384x256xbf16, #tpu.memory_space<vmem>>, %arg5: memref<1x256xf32, #tpu.memory_space<vmem>>, %arg6: memref<8x256xf32, #tpu.memory_space<vmem>>, %arg7: memref<8x256xf32, #tpu.memory_space<vmem>>) attributes {dimension_semantics = [#tpu.dimension_semantics<parallel>, #tpu.dimension_semantics<parallel>, #tpu.dimension_semantics<arbitrary>], iteration_bounds = array<i64: 1, 1, 6>, scalar_prefetch = 0 : i64, scratch_operands = 1 : i64, tpu.core_type = #tpu.core_type<tc>, window_params = [{transform_indices = @transform_0, window_bounds = array<i64: 8, 384>}, {transform_indices = @transform_1, window_bounds = array<i64: 384, 256>}, {transform_indices = @transform_2, window_bounds = array<i64: 1, 256>}, {transform_indices = @transform_3, window_bounds = array<i64: 8, 256>}]} {
    %c0_i32 = arith.constant 0 : i32
    %0 = arith.cmpi eq, %arg2, %c0_i32 : i32
    %1 = arith.extui %0 : i1 to i32
    %c0_i32_0 = arith.constant 0 : i32
    %2 = arith.cmpi ne, %1, %c0_i32_0 : i32
    scf.if %2 {
      %cst_9 = arith.constant 0.000000e+00 : f32
      %12 = vector.broadcast %cst_9 : f32 to vector<8x256xf32>
      %c0_10 = arith.constant 0 : index
      %c0_11 = arith.constant 0 : index
      %13 = vector.load %arg7[%c0_10, %c0_11] : memref<8x256xf32, #tpu.memory_space<vmem>>, vector<8x256xf32>
      tpu.vector_store %arg7[%c0_10, %c0_11], %12 {strides = array<i32>} : memref<8x256xf32, #tpu.memory_space<vmem>>, vector<8x256xf32>,
    } else {
    }
    %c0 = arith.constant 0 : index
    %c0_1 = arith.constant 0 : index
    %3 = vector.load %arg7[%c0, %c0_1] : memref<8x256xf32, #tpu.memory_space<vmem>>, vector<8x256xf32>
    %c0_2 = arith.constant 0 : index
    %c0_3 = arith.constant 0 : index
    %4 = vector.load %arg3[%c0_2, %c0_3] : memref<8x384xbf16, #tpu.memory_space<vmem>>, vector<8x384xbf16>
    %c0_4 = arith.constant 0 : index
    %c0_5 = arith.constant 0 : index
    %5 = vector.load %arg4[%c0_4, %c0_5] : memref<384x256xbf16, #tpu.memory_space<vmem>>, vector<384x256xbf16>
    %cst = arith.constant dense<0.000000e+00> : vector<8x256xf32>
    %6 = tpu.matmul %4, %5, %cst {dimension_numbers = #tpu.dot_dimension_numbers<[1], [0], [0], [1], [0, 0, 1, 1], [], []>} : vector<8x384xbf16>, vector<384x256xbf16>, vector<8x256xf32> -> vector<8x256xf32>
    %7 = arith.addf %3, %6 : vector<8x256xf32>
    %c0_6 = arith.constant 0 : index
    %c0_7 = arith.constant 0 : index
    %8 = vector.load %arg7[%c0_6, %c0_7] : memref<8x256xf32, #tpu.memory_space<vmem>>, vector<8x256xf32>
    tpu.vector_store %arg7[%c0_6, %c0_7], %7 {strides = array<i32>} : memref<8x256xf32, #tpu.memory_space<vmem>>, vector<8x256xf32>,
    %c5_i32 = arith.constant 5 : i32
    %9 = arith.cmpi eq, %arg2, %c5_i32 : i32
    %10 = arith.extui %9 : i1 to i32
    %c0_i32_8 = arith.constant 0 : i32
    %11 = arith.cmpi ne, %10, %c0_i32_8 : i32
    scf.if %11 {
      %c0_9 = arith.constant 0 : index
      %c0_10 = arith.constant 0 : index
      %12 = vector.load %arg7[%c0_9, %c0_10] : memref<8x256xf32, #tpu.memory_space<vmem>>, vector<8x256xf32>
      %c0_11 = arith.constant 0 : index
      %c0_12 = arith.constant 0 : index
      %13 = vector.load %arg5[%c0_11, %c0_12] : memref<1x256xf32, #tpu.memory_space<vmem>>, vector<1x256xf32>
      %14 = vector.broadcast %13 : vector<1x256xf32> to vector<8x256xf32>
      %15 = arith.addf %12, %14 : vector<8x256xf32>
      %cst_13 = arith.constant 0.000000e+00 : f32
      %16 = vector.broadcast %cst_13 : f32 to vector<8x256xf32>
      %17 = arith.maximumf %15, %16 : vector<8x256xf32>
      %c0_14 = arith.constant 0 : index
      %c0_15 = arith.constant 0 : index
      %18 = vector.load %arg6[%c0_14, %c0_15] : memref<8x256xf32, #tpu.memory_space<vmem>>, vector<8x256xf32>
      tpu.vector_store %arg6[%c0_14, %c0_15], %17 {strides = array<i32>} : memref<8x256xf32, #tpu.memory_space<vmem>>, vector<8x256xf32>,
    } else {
    }
    return
  }
  func.func @transform_0(%arg0: i32, %arg1: i32, %arg2: i32) -> (i32, i32) {
    %c0_i32 = arith.constant 0 : i32
    return %arg0, %arg2 : i32, i32
  }
  func.func @transform_1(%arg0: i32, %arg1: i32, %arg2: i32) -> (i32, i32) {
    %c0_i32 = arith.constant 0 : i32
    return %arg2, %arg1 : i32, i32
  }
  func.func @transform_2(%arg0: i32, %arg1: i32, %arg2: i32) -> (i32, i32) {
    %c0_i32 = arith.constant 0 : i32
    %c0_i32_0 = arith.constant 0 : i32
    return %c0_i32, %arg1 : i32, i32
  }
  func.func @transform_3(%arg0: i32, %arg1: i32, %arg2: i32) -> (i32, i32) {
    %c0_i32 = arith.constant 0 : i32
    return %arg0, %arg1 : i32, i32
  }
}

module attributes {stable_mosaic.version = 11 : i64} {
  func.func @_mm_bias_res_kernel(%arg0: i32, %arg1: i32, %arg2: i32, %arg3: memref<8x384xbf16, #tpu.memory_space<vmem>>, %arg4: memref<384x256xbf16, #tpu.memory_space<vmem>>, %arg5: memref<1x256xf32, #tpu.memory_space<vmem>>, %arg6: memref<8x256xf32, #tpu.memory_space<vmem>>, %arg7: memref<8x256xf32, #tpu.memory_space<vmem>>, %arg8: memref<8x256xf32, #tpu.memory_space<vmem>>) attributes {dimension_semantics = [#tpu.dimension_semantics<parallel>, #tpu.dimension_semantics<parallel>, #tpu.dimension_semantics<arbitrary>], iteration_bounds = array<i64: 1, 1, 6>, scalar_prefetch = 0 : i64, scratch_operands = 1 : i64, tpu.core_type = #tpu.core_type<tc>, window_params = [{transform_indices = @transform_0, window_bounds = array<i64: 8, 384>}, {transform_indices = @transform_1, window_bounds = array<i64: 384, 256>}, {transform_indices = @transform_2, window_bounds = array<i64: 1, 256>}, {transform_indices = @transform_3, window_bounds = array<i64: 8, 256>}, {transform_indices = @transform_4, window_bounds = array<i64: 8, 256>}]} {
    %c0_i32 = arith.constant 0 : i32
    %0 = arith.cmpi eq, %arg2, %c0_i32 : i32
    %1 = arith.extui %0 : i1 to i32
    %c0_i32_0 = arith.constant 0 : i32
    %2 = arith.cmpi ne, %1, %c0_i32_0 : i32
    scf.if %2 {
      %cst_9 = arith.constant 0.000000e+00 : f32
      %12 = vector.broadcast %cst_9 : f32 to vector<8x256xf32>
      %c0_10 = arith.constant 0 : index
      %c0_11 = arith.constant 0 : index
      %13 = vector.load %arg8[%c0_10, %c0_11] : memref<8x256xf32, #tpu.memory_space<vmem>>, vector<8x256xf32>
      tpu.vector_store %arg8[%c0_10, %c0_11], %12 {strides = array<i32>} : memref<8x256xf32, #tpu.memory_space<vmem>>, vector<8x256xf32>,
    } else {
    }
    %c0 = arith.constant 0 : index
    %c0_1 = arith.constant 0 : index
    %3 = vector.load %arg8[%c0, %c0_1] : memref<8x256xf32, #tpu.memory_space<vmem>>, vector<8x256xf32>
    %c0_2 = arith.constant 0 : index
    %c0_3 = arith.constant 0 : index
    %4 = vector.load %arg3[%c0_2, %c0_3] : memref<8x384xbf16, #tpu.memory_space<vmem>>, vector<8x384xbf16>
    %c0_4 = arith.constant 0 : index
    %c0_5 = arith.constant 0 : index
    %5 = vector.load %arg4[%c0_4, %c0_5] : memref<384x256xbf16, #tpu.memory_space<vmem>>, vector<384x256xbf16>
    %cst = arith.constant dense<0.000000e+00> : vector<8x256xf32>
    %6 = tpu.matmul %4, %5, %cst {dimension_numbers = #tpu.dot_dimension_numbers<[1], [0], [0], [1], [0, 0, 1, 1], [], []>} : vector<8x384xbf16>, vector<384x256xbf16>, vector<8x256xf32> -> vector<8x256xf32>
    %7 = arith.addf %3, %6 : vector<8x256xf32>
    %c0_6 = arith.constant 0 : index
    %c0_7 = arith.constant 0 : index
    %8 = vector.load %arg8[%c0_6, %c0_7] : memref<8x256xf32, #tpu.memory_space<vmem>>, vector<8x256xf32>
    tpu.vector_store %arg8[%c0_6, %c0_7], %7 {strides = array<i32>} : memref<8x256xf32, #tpu.memory_space<vmem>>, vector<8x256xf32>,
    %c5_i32 = arith.constant 5 : i32
    %9 = arith.cmpi eq, %arg2, %c5_i32 : i32
    %10 = arith.extui %9 : i1 to i32
    %c0_i32_8 = arith.constant 0 : i32
    %11 = arith.cmpi ne, %10, %c0_i32_8 : i32
    scf.if %11 {
      %c0_9 = arith.constant 0 : index
      %c0_10 = arith.constant 0 : index
      %12 = vector.load %arg8[%c0_9, %c0_10] : memref<8x256xf32, #tpu.memory_space<vmem>>, vector<8x256xf32>
      %c0_11 = arith.constant 0 : index
      %c0_12 = arith.constant 0 : index
      %13 = vector.load %arg5[%c0_11, %c0_12] : memref<1x256xf32, #tpu.memory_space<vmem>>, vector<1x256xf32>
      %14 = vector.broadcast %13 : vector<1x256xf32> to vector<8x256xf32>
      %15 = arith.addf %12, %14 : vector<8x256xf32>
      %c0_13 = arith.constant 0 : index
      %c0_14 = arith.constant 0 : index
      %16 = vector.load %arg6[%c0_13, %c0_14] : memref<8x256xf32, #tpu.memory_space<vmem>>, vector<8x256xf32>
      %17 = arith.addf %15, %16 : vector<8x256xf32>
      %cst_15 = arith.constant 0.000000e+00 : f32
      %18 = vector.broadcast %cst_15 : f32 to vector<8x256xf32>
      %19 = arith.maximumf %17, %18 : vector<8x256xf32>
      %c0_16 = arith.constant 0 : index
      %c0_17 = arith.constant 0 : index
      %20 = vector.load %arg7[%c0_16, %c0_17] : memref<8x256xf32, #tpu.memory_space<vmem>>, vector<8x256xf32>
      tpu.vector_store %arg7[%c0_16, %c0_17], %19 {strides = array<i32>} : memref<8x256xf32, #tpu.memory_space<vmem>>, vector<8x256xf32>,
    } else {
    }
    return
  }
  func.func @transform_0(%arg0: i32, %arg1: i32, %arg2: i32) -> (i32, i32) {
    %c0_i32 = arith.constant 0 : i32
    return %arg0, %arg2 : i32, i32
  }
  func.func @transform_1(%arg0: i32, %arg1: i32, %arg2: i32) -> (i32, i32) {
    %c0_i32 = arith.constant 0 : i32
    return %arg2, %arg1 : i32, i32
  }
  func.func @transform_2(%arg0: i32, %arg1: i32, %arg2: i32) -> (i32, i32) {
    %c0_i32 = arith.constant 0 : i32
    %c0_i32_0 = arith.constant 0 : i32
    return %c0_i32, %arg1 : i32, i32
  }
  func.func @transform_3(%arg0: i32, %arg1: i32, %arg2: i32) -> (i32, i32) {
    %c0_i32 = arith.constant 0 : i32
    return %arg0, %arg1 : i32, i32
  }
  func.func @transform_4(%arg0: i32, %arg1: i32, %arg2: i32) -> (i32, i32) {
    %c0_i32 = arith.constant 0 : i32
    return %arg0, %arg1 : i32, i32
  }
}

module attributes {stable_mosaic.version = 11 : i64} {
  func.func @_mm_bias_kernel(%arg0: i32, %arg1: i32, %arg2: i32, %arg3: memref<2x384xbf16, #tpu.memory_space<vmem>>, %arg4: memref<384x256xbf16, #tpu.memory_space<vmem>>, %arg5: memref<1x256xf32, #tpu.memory_space<vmem>>, %arg6: memref<2x256xf32, #tpu.memory_space<vmem>>, %arg7: memref<2x256xf32, #tpu.memory_space<vmem>>) attributes {dimension_semantics = [#tpu.dimension_semantics<parallel>, #tpu.dimension_semantics<parallel>, #tpu.dimension_semantics<arbitrary>], iteration_bounds = array<i64: 1, 2, 6>, scalar_prefetch = 0 : i64, scratch_operands = 1 : i64, tpu.core_type = #tpu.core_type<tc>, window_params = [{transform_indices = @transform_0, window_bounds = array<i64: 2, 384>}, {transform_indices = @transform_1, window_bounds = array<i64: 384, 256>}, {transform_indices = @transform_2, window_bounds = array<i64: 1, 256>}, {transform_indices = @transform_3, window_bounds = array<i64: 2, 256>}]} {
    %c0_i32 = arith.constant 0 : i32
    %0 = arith.cmpi eq, %arg2, %c0_i32 : i32
    %1 = arith.extui %0 : i1 to i32
    %c0_i32_0 = arith.constant 0 : i32
    %2 = arith.cmpi ne, %1, %c0_i32_0 : i32
    scf.if %2 {
      %cst_9 = arith.constant 0.000000e+00 : f32
      %12 = vector.broadcast %cst_9 : f32 to vector<2x256xf32>
      %c0_10 = arith.constant 0 : index
      %c0_11 = arith.constant 0 : index
      %13 = vector.load %arg7[%c0_10, %c0_11] : memref<2x256xf32, #tpu.memory_space<vmem>>, vector<2x256xf32>
      tpu.vector_store %arg7[%c0_10, %c0_11], %12 {strides = array<i32>} : memref<2x256xf32, #tpu.memory_space<vmem>>, vector<2x256xf32>,
    } else {
    }
    %c0 = arith.constant 0 : index
    %c0_1 = arith.constant 0 : index
    %3 = vector.load %arg7[%c0, %c0_1] : memref<2x256xf32, #tpu.memory_space<vmem>>, vector<2x256xf32>
    %c0_2 = arith.constant 0 : index
    %c0_3 = arith.constant 0 : index
    %4 = vector.load %arg3[%c0_2, %c0_3] : memref<2x384xbf16, #tpu.memory_space<vmem>>, vector<2x384xbf16>
    %c0_4 = arith.constant 0 : index
    %c0_5 = arith.constant 0 : index
    %5 = vector.load %arg4[%c0_4, %c0_5] : memref<384x256xbf16, #tpu.memory_space<vmem>>, vector<384x256xbf16>
    %cst = arith.constant dense<0.000000e+00> : vector<2x256xf32>
    %6 = tpu.matmul %4, %5, %cst {dimension_numbers = #tpu.dot_dimension_numbers<[1], [0], [0], [1], [0, 0, 1, 1], [], []>} : vector<2x384xbf16>, vector<384x256xbf16>, vector<2x256xf32> -> vector<2x256xf32>
    %7 = arith.addf %3, %6 : vector<2x256xf32>
    %c0_6 = arith.constant 0 : index
    %c0_7 = arith.constant 0 : index
    %8 = vector.load %arg7[%c0_6, %c0_7] : memref<2x256xf32, #tpu.memory_space<vmem>>, vector<2x256xf32>
    tpu.vector_store %arg7[%c0_6, %c0_7], %7 {strides = array<i32>} : memref<2x256xf32, #tpu.memory_space<vmem>>, vector<2x256xf32>,
    %c5_i32 = arith.constant 5 : i32
    %9 = arith.cmpi eq, %arg2, %c5_i32 : i32
    %10 = arith.extui %9 : i1 to i32
    %c0_i32_8 = arith.constant 0 : i32
    %11 = arith.cmpi ne, %10, %c0_i32_8 : i32
    scf.if %11 {
      %c0_9 = arith.constant 0 : index
      %c0_10 = arith.constant 0 : index
      %12 = vector.load %arg7[%c0_9, %c0_10] : memref<2x256xf32, #tpu.memory_space<vmem>>, vector<2x256xf32>
      %c0_11 = arith.constant 0 : index
      %c0_12 = arith.constant 0 : index
      %13 = vector.load %arg5[%c0_11, %c0_12] : memref<1x256xf32, #tpu.memory_space<vmem>>, vector<1x256xf32>
      %14 = vector.broadcast %13 : vector<1x256xf32> to vector<2x256xf32>
      %15 = arith.addf %12, %14 : vector<2x256xf32>
      %cst_13 = arith.constant 0.000000e+00 : f32
      %16 = vector.broadcast %cst_13 : f32 to vector<2x256xf32>
      %17 = arith.maximumf %15, %16 : vector<2x256xf32>
      %c0_14 = arith.constant 0 : index
      %c0_15 = arith.constant 0 : index
      %18 = vector.load %arg6[%c0_14, %c0_15] : memref<2x256xf32, #tpu.memory_space<vmem>>, vector<2x256xf32>
      tpu.vector_store %arg6[%c0_14, %c0_15], %17 {strides = array<i32>} : memref<2x256xf32, #tpu.memory_space<vmem>>, vector<2x256xf32>,
    } else {
    }
    return
  }
  func.func @transform_0(%arg0: i32, %arg1: i32, %arg2: i32) -> (i32, i32) {
    %c0_i32 = arith.constant 0 : i32
    return %arg0, %arg2 : i32, i32
  }
  func.func @transform_1(%arg0: i32, %arg1: i32, %arg2: i32) -> (i32, i32) {
    %c0_i32 = arith.constant 0 : i32
    return %arg2, %arg1 : i32, i32
  }
  func.func @transform_2(%arg0: i32, %arg1: i32, %arg2: i32) -> (i32, i32) {
    %c0_i32 = arith.constant 0 : i32
    %c0_i32_0 = arith.constant 0 : i32
    return %c0_i32, %arg1 : i32, i32
  }
  func.func @transform_3(%arg0: i32, %arg1: i32, %arg2: i32) -> (i32, i32) {
    %c0_i32 = arith.constant 0 : i32
    return %arg0, %arg1 : i32, i32
  }
}

module attributes {stable_mosaic.version = 11 : i64} {
  func.func @_mm_bias_kernel(%arg0: i32, %arg1: i32, %arg2: i32, %arg3: memref<2x256xbf16, #tpu.memory_space<vmem>>, %arg4: memref<256x256xbf16, #tpu.memory_space<vmem>>, %arg5: memref<1x256xf32, #tpu.memory_space<vmem>>, %arg6: memref<2x256xf32, #tpu.memory_space<vmem>>, %arg7: memref<2x256xf32, #tpu.memory_space<vmem>>) attributes {dimension_semantics = [#tpu.dimension_semantics<parallel>, #tpu.dimension_semantics<parallel>, #tpu.dimension_semantics<arbitrary>], iteration_bounds = array<i64: 1, 2, 1>, scalar_prefetch = 0 : i64, scratch_operands = 1 : i64, tpu.core_type = #tpu.core_type<tc>, window_params = [{transform_indices = @transform_0, window_bounds = array<i64: 2, 256>}, {transform_indices = @transform_1, window_bounds = array<i64: 256, 256>}, {transform_indices = @transform_2, window_bounds = array<i64: 1, 256>}, {transform_indices = @transform_3, window_bounds = array<i64: 2, 256>}]} {
    %c0_i32 = arith.constant 0 : i32
    %0 = arith.cmpi eq, %arg2, %c0_i32 : i32
    %1 = arith.extui %0 : i1 to i32
    %c0_i32_0 = arith.constant 0 : i32
    %2 = arith.cmpi ne, %1, %c0_i32_0 : i32
    scf.if %2 {
      %cst_10 = arith.constant 0.000000e+00 : f32
      %12 = vector.broadcast %cst_10 : f32 to vector<2x256xf32>
      %c0_11 = arith.constant 0 : index
      %c0_12 = arith.constant 0 : index
      %13 = vector.load %arg7[%c0_11, %c0_12] : memref<2x256xf32, #tpu.memory_space<vmem>>, vector<2x256xf32>
      tpu.vector_store %arg7[%c0_11, %c0_12], %12 {strides = array<i32>} : memref<2x256xf32, #tpu.memory_space<vmem>>, vector<2x256xf32>,
    } else {
    }
    %c0 = arith.constant 0 : index
    %c0_1 = arith.constant 0 : index
    %3 = vector.load %arg7[%c0, %c0_1] : memref<2x256xf32, #tpu.memory_space<vmem>>, vector<2x256xf32>
    %c0_2 = arith.constant 0 : index
    %c0_3 = arith.constant 0 : index
    %4 = vector.load %arg3[%c0_2, %c0_3] : memref<2x256xbf16, #tpu.memory_space<vmem>>, vector<2x256xbf16>
    %c0_4 = arith.constant 0 : index
    %c0_5 = arith.constant 0 : index
    %5 = vector.load %arg4[%c0_4, %c0_5] : memref<256x256xbf16, #tpu.memory_space<vmem>>, vector<256x256xbf16>
    %cst = arith.constant dense<0.000000e+00> : vector<2x256xf32>
    %6 = tpu.matmul %4, %5, %cst {dimension_numbers = #tpu.dot_dimension_numbers<[1], [0], [0], [1], [0, 0, 1, 1], [], []>} : vector<2x256xbf16>, vector<256x256xbf16>, vector<2x256xf32> -> vector<2x256xf32>
    %7 = arith.addf %3, %6 : vector<2x256xf32>
    %c0_6 = arith.constant 0 : index
    %c0_7 = arith.constant 0 : index
    %8 = vector.load %arg7[%c0_6, %c0_7] : memref<2x256xf32, #tpu.memory_space<vmem>>, vector<2x256xf32>
    tpu.vector_store %arg7[%c0_6, %c0_7], %7 {strides = array<i32>} : memref<2x256xf32, #tpu.memory_space<vmem>>, vector<2x256xf32>,
    %c0_i32_8 = arith.constant 0 : i32
    %9 = arith.cmpi eq, %arg2, %c0_i32_8 : i32
    %10 = arith.extui %9 : i1 to i32
    %c0_i32_9 = arith.constant 0 : i32
    %11 = arith.cmpi ne, %10, %c0_i32_9 : i32
    scf.if %11 {
      %c0_10 = arith.constant 0 : index
      %c0_11 = arith.constant 0 : index
      %12 = vector.load %arg7[%c0_10, %c0_11] : memref<2x256xf32, #tpu.memory_space<vmem>>, vector<2x256xf32>
      %c0_12 = arith.constant 0 : index
      %c0_13 = arith.constant 0 : index
      %13 = vector.load %arg5[%c0_12, %c0_13] : memref<1x256xf32, #tpu.memory_space<vmem>>, vector<1x256xf32>
      %14 = vector.broadcast %13 : vector<1x256xf32> to vector<2x256xf32>
      %15 = arith.addf %12, %14 : vector<2x256xf32>
      %c0_14 = arith.constant 0 : index
      %c0_15 = arith.constant 0 : index
      %16 = vector.load %arg6[%c0_14, %c0_15] : memref<2x256xf32, #tpu.memory_space<vmem>>, vector<2x256xf32>
      tpu.vector_store %arg6[%c0_14, %c0_15], %15 {strides = array<i32>} : memref<2x256xf32, #tpu.memory_space<vmem>>, vector<2x256xf32>,
    } else {
    }
    return
  }
  func.func @transform_0(%arg0: i32, %arg1: i32, %arg2: i32) -> (i32, i32) {
    %c0_i32 = arith.constant 0 : i32
    return %arg0, %arg2 : i32, i32
  }
  func.func @transform_1(%arg0: i32, %arg1: i32, %arg2: i32) -> (i32, i32) {
    %c0_i32 = arith.constant 0 : i32
    return %arg2, %arg1 : i32, i32
  }
  func.func @transform_2(%arg0: i32, %arg1: i32, %arg2: i32) -> (i32, i32) {
    %c0_i32 = arith.constant 0 : i32
    %c0_i32_0 = arith.constant 0 : i32
    return %c0_i32, %arg1 : i32, i32
  }
  func.func @transform_3(%arg0: i32, %arg1: i32, %arg2: i32) -> (i32, i32) {
    %c0_i32 = arith.constant 0 : i32
    return %arg0, %arg1 : i32, i32
  }
}

module attributes {stable_mosaic.version = 11 : i64} {
  func.func @_mm_bias_res_kernel(%arg0: i32, %arg1: i32, %arg2: i32, %arg3: memref<2x512xbf16, #tpu.memory_space<vmem>>, %arg4: memref<512x256xbf16, #tpu.memory_space<vmem>>, %arg5: memref<1x256xf32, #tpu.memory_space<vmem>>, %arg6: memref<2x256xf32, #tpu.memory_space<vmem>>, %arg7: memref<2x256xf32, #tpu.memory_space<vmem>>, %arg8: memref<2x256xf32, #tpu.memory_space<vmem>>) attributes {dimension_semantics = [#tpu.dimension_semantics<parallel>, #tpu.dimension_semantics<parallel>, #tpu.dimension_semantics<arbitrary>], iteration_bounds = array<i64: 1, 2, 9>, scalar_prefetch = 0 : i64, scratch_operands = 1 : i64, tpu.core_type = #tpu.core_type<tc>, window_params = [{transform_indices = @transform_0, window_bounds = array<i64: 2, 512>}, {transform_indices = @transform_1, window_bounds = array<i64: 512, 256>}, {transform_indices = @transform_2, window_bounds = array<i64: 1, 256>}, {transform_indices = @transform_3, window_bounds = array<i64: 2, 256>}, {transform_indices = @transform_4, window_bounds = array<i64: 2, 256>}]} {
    %c0_i32 = arith.constant 0 : i32
    %0 = arith.cmpi eq, %arg2, %c0_i32 : i32
    %1 = arith.extui %0 : i1 to i32
    %c0_i32_0 = arith.constant 0 : i32
    %2 = arith.cmpi ne, %1, %c0_i32_0 : i32
    scf.if %2 {
      %cst_9 = arith.constant 0.000000e+00 : f32
      %12 = vector.broadcast %cst_9 : f32 to vector<2x256xf32>
      %c0_10 = arith.constant 0 : index
      %c0_11 = arith.constant 0 : index
      %13 = vector.load %arg8[%c0_10, %c0_11] : memref<2x256xf32, #tpu.memory_space<vmem>>, vector<2x256xf32>
      tpu.vector_store %arg8[%c0_10, %c0_11], %12 {strides = array<i32>} : memref<2x256xf32, #tpu.memory_space<vmem>>, vector<2x256xf32>,
    } else {
    }
    %c0 = arith.constant 0 : index
    %c0_1 = arith.constant 0 : index
    %3 = vector.load %arg8[%c0, %c0_1] : memref<2x256xf32, #tpu.memory_space<vmem>>, vector<2x256xf32>
    %c0_2 = arith.constant 0 : index
    %c0_3 = arith.constant 0 : index
    %4 = vector.load %arg3[%c0_2, %c0_3] : memref<2x512xbf16, #tpu.memory_space<vmem>>, vector<2x512xbf16>
    %c0_4 = arith.constant 0 : index
    %c0_5 = arith.constant 0 : index
    %5 = vector.load %arg4[%c0_4, %c0_5] : memref<512x256xbf16, #tpu.memory_space<vmem>>, vector<512x256xbf16>
    %cst = arith.constant dense<0.000000e+00> : vector<2x256xf32>
    %6 = tpu.matmul %4, %5, %cst {dimension_numbers = #tpu.dot_dimension_numbers<[1], [0], [0], [1], [0, 0, 1, 1], [], []>} : vector<2x512xbf16>, vector<512x256xbf16>, vector<2x256xf32> -> vector<2x256xf32>
    %7 = arith.addf %3, %6 : vector<2x256xf32>
    %c0_6 = arith.constant 0 : index
    %c0_7 = arith.constant 0 : index
    %8 = vector.load %arg8[%c0_6, %c0_7] : memref<2x256xf32, #tpu.memory_space<vmem>>, vector<2x256xf32>
    tpu.vector_store %arg8[%c0_6, %c0_7], %7 {strides = array<i32>} : memref<2x256xf32, #tpu.memory_space<vmem>>, vector<2x256xf32>,
    %c8_i32 = arith.constant 8 : i32
    %9 = arith.cmpi eq, %arg2, %c8_i32 : i32
    %10 = arith.extui %9 : i1 to i32
    %c0_i32_8 = arith.constant 0 : i32
    %11 = arith.cmpi ne, %10, %c0_i32_8 : i32
    scf.if %11 {
      %c0_9 = arith.constant 0 : index
      %c0_10 = arith.constant 0 : index
      %12 = vector.load %arg8[%c0_9, %c0_10] : memref<2x256xf32, #tpu.memory_space<vmem>>, vector<2x256xf32>
      %c0_11 = arith.constant 0 : index
      %c0_12 = arith.constant 0 : index
      %13 = vector.load %arg5[%c0_11, %c0_12] : memref<1x256xf32, #tpu.memory_space<vmem>>, vector<1x256xf32>
      %14 = vector.broadcast %13 : vector<1x256xf32> to vector<2x256xf32>
      %15 = arith.addf %12, %14 : vector<2x256xf32>
      %c0_13 = arith.constant 0 : index
      %c0_14 = arith.constant 0 : index
      %16 = vector.load %arg6[%c0_13, %c0_14] : memref<2x256xf32, #tpu.memory_space<vmem>>, vector<2x256xf32>
      %17 = arith.addf %15, %16 : vector<2x256xf32>
      %cst_15 = arith.constant 0.000000e+00 : f32
      %18 = vector.broadcast %cst_15 : f32 to vector<2x256xf32>
      %19 = arith.maximumf %17, %18 : vector<2x256xf32>
      %c0_16 = arith.constant 0 : index
      %c0_17 = arith.constant 0 : index
      %20 = vector.load %arg7[%c0_16, %c0_17] : memref<2x256xf32, #tpu.memory_space<vmem>>, vector<2x256xf32>
      tpu.vector_store %arg7[%c0_16, %c0_17], %19 {strides = array<i32>} : memref<2x256xf32, #tpu.memory_space<vmem>>, vector<2x256xf32>,
    } else {
    }
    return
  }
  func.func @transform_0(%arg0: i32, %arg1: i32, %arg2: i32) -> (i32, i32) {
    %c0_i32 = arith.constant 0 : i32
    return %arg0, %arg2 : i32, i32
  }
  func.func @transform_1(%arg0: i32, %arg1: i32, %arg2: i32) -> (i32, i32) {
    %c0_i32 = arith.constant 0 : i32
    return %arg2, %arg1 : i32, i32
  }
  func.func @transform_2(%arg0: i32, %arg1: i32, %arg2: i32) -> (i32, i32) {
    %c0_i32 = arith.constant 0 : i32
    %c0_i32_0 = arith.constant 0 : i32
    return %c0_i32, %arg1 : i32, i32
  }
  func.func @transform_3(%arg0: i32, %arg1: i32, %arg2: i32) -> (i32, i32) {
    %c0_i32 = arith.constant 0 : i32
    return %arg0, %arg1 : i32, i32
  }
  func.func @transform_4(%arg0: i32, %arg1: i32, %arg2: i32) -> (i32, i32) {
    %c0_i32 = arith.constant 0 : i32
    return %arg0, %arg1 : i32, i32
  }
}

module attributes {stable_mosaic.version = 11 : i64} {
  func.func @_mm_bias_kernel(%arg0: i32, %arg1: i32, %arg2: i32, %arg3: memref<2x512xbf16, #tpu.memory_space<vmem>>, %arg4: memref<512x256xbf16, #tpu.memory_space<vmem>>, %arg5: memref<1x256xf32, #tpu.memory_space<vmem>>, %arg6: memref<2x256xf32, #tpu.memory_space<vmem>>, %arg7: memref<2x256xf32, #tpu.memory_space<vmem>>) attributes {dimension_semantics = [#tpu.dimension_semantics<parallel>, #tpu.dimension_semantics<parallel>, #tpu.dimension_semantics<arbitrary>], iteration_bounds = array<i64: 1, 2, 9>, scalar_prefetch = 0 : i64, scratch_operands = 1 : i64, tpu.core_type = #tpu.core_type<tc>, window_params = [{transform_indices = @transform_0, window_bounds = array<i64: 2, 512>}, {transform_indices = @transform_1, window_bounds = array<i64: 512, 256>}, {transform_indices = @transform_2, window_bounds = array<i64: 1, 256>}, {transform_indices = @transform_3, window_bounds = array<i64: 2, 256>}]} {
    %c0_i32 = arith.constant 0 : i32
    %0 = arith.cmpi eq, %arg2, %c0_i32 : i32
    %1 = arith.extui %0 : i1 to i32
    %c0_i32_0 = arith.constant 0 : i32
    %2 = arith.cmpi ne, %1, %c0_i32_0 : i32
    scf.if %2 {
      %cst_9 = arith.constant 0.000000e+00 : f32
      %12 = vector.broadcast %cst_9 : f32 to vector<2x256xf32>
      %c0_10 = arith.constant 0 : index
      %c0_11 = arith.constant 0 : index
      %13 = vector.load %arg7[%c0_10, %c0_11] : memref<2x256xf32, #tpu.memory_space<vmem>>, vector<2x256xf32>
      tpu.vector_store %arg7[%c0_10, %c0_11], %12 {strides = array<i32>} : memref<2x256xf32, #tpu.memory_space<vmem>>, vector<2x256xf32>,
    } else {
    }
    %c0 = arith.constant 0 : index
    %c0_1 = arith.constant 0 : index
    %3 = vector.load %arg7[%c0, %c0_1] : memref<2x256xf32, #tpu.memory_space<vmem>>, vector<2x256xf32>
    %c0_2 = arith.constant 0 : index
    %c0_3 = arith.constant 0 : index
    %4 = vector.load %arg3[%c0_2, %c0_3] : memref<2x512xbf16, #tpu.memory_space<vmem>>, vector<2x512xbf16>
    %c0_4 = arith.constant 0 : index
    %c0_5 = arith.constant 0 : index
    %5 = vector.load %arg4[%c0_4, %c0_5] : memref<512x256xbf16, #tpu.memory_space<vmem>>, vector<512x256xbf16>
    %cst = arith.constant dense<0.000000e+00> : vector<2x256xf32>
    %6 = tpu.matmul %4, %5, %cst {dimension_numbers = #tpu.dot_dimension_numbers<[1], [0], [0], [1], [0, 0, 1, 1], [], []>} : vector<2x512xbf16>, vector<512x256xbf16>, vector<2x256xf32> -> vector<2x256xf32>
    %7 = arith.addf %3, %6 : vector<2x256xf32>
    %c0_6 = arith.constant 0 : index
    %c0_7 = arith.constant 0 : index
    %8 = vector.load %arg7[%c0_6, %c0_7] : memref<2x256xf32, #tpu.memory_space<vmem>>, vector<2x256xf32>
    tpu.vector_store %arg7[%c0_6, %c0_7], %7 {strides = array<i32>} : memref<2x256xf32, #tpu.memory_space<vmem>>, vector<2x256xf32>,
    %c8_i32 = arith.constant 8 : i32
    %9 = arith.cmpi eq, %arg2, %c8_i32 : i32
    %10 = arith.extui %9 : i1 to i32
    %c0_i32_8 = arith.constant 0 : i32
    %11 = arith.cmpi ne, %10, %c0_i32_8 : i32
    scf.if %11 {
      %c0_9 = arith.constant 0 : index
      %c0_10 = arith.constant 0 : index
      %12 = vector.load %arg7[%c0_9, %c0_10] : memref<2x256xf32, #tpu.memory_space<vmem>>, vector<2x256xf32>
      %c0_11 = arith.constant 0 : index
      %c0_12 = arith.constant 0 : index
      %13 = vector.load %arg5[%c0_11, %c0_12] : memref<1x256xf32, #tpu.memory_space<vmem>>, vector<1x256xf32>
      %14 = vector.broadcast %13 : vector<1x256xf32> to vector<2x256xf32>
      %15 = arith.addf %12, %14 : vector<2x256xf32>
      %cst_13 = arith.constant 0.000000e+00 : f32
      %16 = vector.broadcast %cst_13 : f32 to vector<2x256xf32>
      %17 = arith.maximumf %15, %16 : vector<2x256xf32>
      %c0_14 = arith.constant 0 : index
      %c0_15 = arith.constant 0 : index
      %18 = vector.load %arg6[%c0_14, %c0_15] : memref<2x256xf32, #tpu.memory_space<vmem>>, vector<2x256xf32>
      tpu.vector_store %arg6[%c0_14, %c0_15], %17 {strides = array<i32>} : memref<2x256xf32, #tpu.memory_space<vmem>>, vector<2x256xf32>,
    } else {
    }
    return
  }
  func.func @transform_0(%arg0: i32, %arg1: i32, %arg2: i32) -> (i32, i32) {
    %c0_i32 = arith.constant 0 : i32
    return %arg0, %arg2 : i32, i32
  }
  func.func @transform_1(%arg0: i32, %arg1: i32, %arg2: i32) -> (i32, i32) {
    %c0_i32 = arith.constant 0 : i32
    return %arg2, %arg1 : i32, i32
  }
  func.func @transform_2(%arg0: i32, %arg1: i32, %arg2: i32) -> (i32, i32) {
    %c0_i32 = arith.constant 0 : i32
    %c0_i32_0 = arith.constant 0 : i32
    return %c0_i32, %arg1 : i32, i32
  }
  func.func @transform_3(%arg0: i32, %arg1: i32, %arg2: i32) -> (i32, i32) {
    %c0_i32 = arith.constant 0 : i32
    return %arg0, %arg1 : i32, i32
  }
}

module attributes {stable_mosaic.version = 11 : i64} {
  func.func @_global_avgpool_kernel(%arg0: memref<2x1x512xf32, #tpu.memory_space<vmem>>, %arg1: memref<2x512xf32, #tpu.memory_space<vmem>>) attributes {dimension_semantics = [], scalar_prefetch = 0 : i64, scratch_operands = 0 : i64, tpu.core_type = #tpu.core_type<tc>} {
    %c0 = arith.constant 0 : index
    %c0_0 = arith.constant 0 : index
    %c0_1 = arith.constant 0 : index
    %0 = vector.load %arg0[%c0, %c0_0, %c0_1] : memref<2x1x512xf32, #tpu.memory_space<vmem>>, vector<2x1x512xf32>
    %cst = arith.constant dense<0.000000e+00> : vector<2x512xf32>
    %1 = vector.multi_reduction <add>, %0, %cst [1] : vector<2x1x512xf32> to vector<2x512xf32>
    %cst_2 = arith.constant 1.000000e+00 : f32
    %2 = vector.broadcast %cst_2 : f32 to vector<2x512xf32>
    %3 = arith.divf %1, %2 : vector<2x512xf32>
    %c0_3 = arith.constant 0 : index
    %c0_4 = arith.constant 0 : index
    %4 = vector.load %arg1[%c0_3, %c0_4] : memref<2x512xf32, #tpu.memory_space<vmem>>, vector<2x512xf32>
    tpu.vector_store %arg1[%c0_3, %c0_4], %3 {strides = array<i32>} : memref<2x512xf32, #tpu.memory_space<vmem>>, vector<2x512xf32>,
    return
  }
}

module attributes {stable_mosaic.version = 11 : i64} {
  func.func @_mm_bias_kernel(%arg0: i32, %arg1: i32, %arg2: i32, %arg3: memref<2x512xbf16, #tpu.memory_space<vmem>>, %arg4: memref<512x10xbf16, #tpu.memory_space<vmem>>, %arg5: memref<1x10xf32, #tpu.memory_space<vmem>>, %arg6: memref<2x10xf32, #tpu.memory_space<vmem>>, %arg7: memref<2x10xf32, #tpu.memory_space<vmem>>) attributes {dimension_semantics = [#tpu.dimension_semantics<parallel>, #tpu.dimension_semantics<parallel>, #tpu.dimension_semantics<arbitrary>], iteration_bounds = array<i64: 1, 1, 1>, scalar_prefetch = 0 : i64, scratch_operands = 1 : i64, tpu.core_type = #tpu.core_type<tc>, window_params = [{transform_indices = @transform_0, window_bounds = array<i64: 2, 512>}, {transform_indices = @transform_1, window_bounds = array<i64: 512, 10>}, {transform_indices = @transform_2, window_bounds = array<i64: 1, 10>}, {transform_indices = @transform_3, window_bounds = array<i64: 2, 10>}]} {
    %c0_i32 = arith.constant 0 : i32
    %0 = arith.cmpi eq, %arg2, %c0_i32 : i32
    %1 = arith.extui %0 : i1 to i32
    %c0_i32_0 = arith.constant 0 : i32
    %2 = arith.cmpi ne, %1, %c0_i32_0 : i32
    scf.if %2 {
      %cst_10 = arith.constant 0.000000e+00 : f32
      %12 = vector.broadcast %cst_10 : f32 to vector<2x10xf32>
      %c0_11 = arith.constant 0 : index
      %c0_12 = arith.constant 0 : index
      %13 = vector.load %arg7[%c0_11, %c0_12] : memref<2x10xf32, #tpu.memory_space<vmem>>, vector<2x10xf32>
      tpu.vector_store %arg7[%c0_11, %c0_12], %12 {strides = array<i32>} : memref<2x10xf32, #tpu.memory_space<vmem>>, vector<2x10xf32>,
    } else {
    }
    %c0 = arith.constant 0 : index
    %c0_1 = arith.constant 0 : index
    %3 = vector.load %arg7[%c0, %c0_1] : memref<2x10xf32, #tpu.memory_space<vmem>>, vector<2x10xf32>
    %c0_2 = arith.constant 0 : index
    %c0_3 = arith.constant 0 : index
    %4 = vector.load %arg3[%c0_2, %c0_3] : memref<2x512xbf16, #tpu.memory_space<vmem>>, vector<2x512xbf16>
    %c0_4 = arith.constant 0 : index
    %c0_5 = arith.constant 0 : index
    %5 = vector.load %arg4[%c0_4, %c0_5] : memref<512x10xbf16, #tpu.memory_space<vmem>>, vector<512x10xbf16>
    %cst = arith.constant dense<0.000000e+00> : vector<2x10xf32>
    %6 = tpu.matmul %4, %5, %cst {dimension_numbers = #tpu.dot_dimension_numbers<[1], [0], [0], [1], [0, 0, 1, 1], [], []>} : vector<2x512xbf16>, vector<512x10xbf16>, vector<2x10xf32> -> vector<2x10xf32>
    %7 = arith.addf %3, %6 : vector<2x10xf32>
    %c0_6 = arith.constant 0 : index
    %c0_7 = arith.constant 0 : index
    %8 = vector.load %arg7[%c0_6, %c0_7] : memref<2x10xf32, #tpu.memory_space<vmem>>, vector<2x10xf32>
    tpu.vector_store %arg7[%c0_6, %c0_7], %7 {strides = array<i32>} : memref<2x10xf32, #tpu.memory_space<vmem>>, vector<2x10xf32>,
    %c0_i32_8 = arith.constant 0 : i32
    %9 = arith.cmpi eq, %arg2, %c0_i32_8 : i32
    %10 = arith.extui %9 : i1 to i32
    %c0_i32_9 = arith.constant 0 : i32
    %11 = arith.cmpi ne, %10, %c0_i32_9 : i32
    scf.if %11 {
      %c0_10 = arith.constant 0 : index
      %c0_11 = arith.constant 0 : index
      %12 = vector.load %arg7[%c0_10, %c0_11] : memref<2x10xf32, #tpu.memory_space<vmem>>, vector<2x10xf32>
      %c0_12 = arith.constant 0 : index
      %c0_13 = arith.constant 0 : index
      %13 = vector.load %arg5[%c0_12, %c0_13] : memref<1x10xf32, #tpu.memory_space<vmem>>, vector<1x10xf32>
      %14 = vector.broadcast %13 : vector<1x10xf32> to vector<2x10xf32>
      %15 = arith.addf %12, %14 : vector<2x10xf32>
      %c0_14 = arith.constant 0 : index
      %c0_15 = arith.constant 0 : index
      %16 = vector.load %arg6[%c0_14, %c0_15] : memref<2x10xf32, #tpu.memory_space<vmem>>, vector<2x10xf32>
      tpu.vector_store %arg6[%c0_14, %c0_15], %15 {strides = array<i32>} : memref<2x10xf32, #tpu.memory_space<vmem>>, vector<2x10xf32>,
    } else {
    }
    return
  }
  func.func @transform_0(%arg0: i32, %arg1: i32, %arg2: i32) -> (i32, i32) {
    %c0_i32 = arith.constant 0 : i32
    return %arg0, %arg2 : i32, i32
  }
  func.func @transform_1(%arg0: i32, %arg1: i32, %arg2: i32) -> (i32, i32) {
    %c0_i32 = arith.constant 0 : i32
    return %arg2, %arg1 : i32, i32
  }
  func.func @transform_2(%arg0: i32, %arg1: i32, %arg2: i32) -> (i32, i32) {
    %c0_i32 = arith.constant 0 : i32
    %c0_i32_0 = arith.constant 0 : i32
    return %c0_i32, %arg1 : i32, i32
  }
  func.func @transform_3(%arg0: i32, %arg1: i32, %arg2: i32) -> (i32, i32) {
    %c0_i32 = arith.constant 0 : i32
    return %arg0, %arg1 : i32, i32
  }
}

</mosaic_0001>

<bundles_post_ra>
// kernel: _lambda_.23
= control target key start
LH: loop header
LB: loop body
LE: loop exit
PB: predicated region body
PF: predicated region fallthrough
CT: control target
= control target key end

     0   :  { %vm19_vm0 = vcmask 523264   ;;  %s1774_s1 = inlined_call_operand.vmem [shape: bf16[576,64], index: 1, kind: input, shape index: {}]   ;;  %s1775_s0 = inlined_call_operand.vmem [shape: bf16[128,576], index: 0, kind: input, shape index: {}]   ;;  %s1776_s2 = inlined_call_operand.vmem [shape: f32[1,64], index: 2, kind: input, shape index: {}]   ;;  %s1777_s3 = inlined_call_operand.vmem [shape: f32[128,64], index: 3, kind: output, shape index: {}]  }
   0x1   :  { %v1272_v0 = vld [vmem:[%s1774_s1 + $0x40] sm:$0xff]   ;;  %v1276_v4 = vld [vmem:[%s1774_s1 + $0x48] sm:$0xff]   ;;  %v1280_v8 = vld [vmem:[%s1774_s1 + $0x50] sm:$0xff]  }
   0x2   :  { %v1273_v1 = vld [vmem:[%s1774_s1 + $0xc0] sm:$0xff]   ;;  %1099 = vmatprep.subr.bf16.mxu0 %v1272_v0  ;;  %v1277_v5 = vld [vmem:[%s1774_s1 + $0xc8] sm:$0xff]   ;;  %v1281_v9 = vld [vmem:[%s1774_s1 + $0xd0] sm:$0xff]  }
   0x3   :  { %v1274_v2 = vld [vmem:[%s1774_s1] sm:$0xff]   ;;  %1163 = vmatprep.subr.bf16.mxu1 %v1273_v1  ;;  %v1278_v6 = vld [vmem:[%s1774_s1 + $0x8] sm:$0xff]   ;;  %v1282_v10 = vld [vmem:[%s1774_s1 + $0x10] sm:$0xff]  }
   0x4   :  { %v1275_v3 = vld [vmem:[%s1774_s1 + $0x80] sm:$0xff]   ;;  %1100 = vmatpush3.bf16.msra.mxu0 %v1274_v2  ;;  %v1279_v7 = vld [vmem:[%s1774_s1 + $0x88] sm:$0xff]   ;;  %v1283_v11 = vld [vmem:[%s1774_s1 + $0x90] sm:$0xff]  }
   0x5   :  { %1164 = vmatpush3.bf16.msra.mxu1 %v1275_v3  ;;  %1101 = vmatprep.subr.bf16.mxu0 %v1276_v4  ;;  %v1284_v12 = vld [vmem:[%s1774_s1 + $0x58] sm:$0xff]   ;;  %v1288_v16 = vld [vmem:[%s1774_s1 + $0x60] sm:$0xff]   ;;  %v1292_v20 = vld [vmem:[%s1774_s1 + $0x68] sm:$0xff]  }
   0x6   :  { %1165 = vmatprep.subr.bf16.mxu1 %v1277_v5  ;;  %v1285_v13 = vld [vmem:[%s1774_s1 + $0xd8] sm:$0xff]   ;;  %v1289_v17 = vld [vmem:[%s1774_s1 + $0xe0] sm:$0xff]   ;;  %v1293_v21 = vld [vmem:[%s1774_s1 + $0xe8] sm:$0xff]  }
   0x7   :  { %v1286_v14 = vld [vmem:[%s1774_s1 + $0x18] sm:$0xff]   ;;  %v1290_v18 = vld [vmem:[%s1774_s1 + $0x20] sm:$0xff]   ;;  %v1294_v22 = vld [vmem:[%s1774_s1 + $0x28] sm:$0xff]  }
   0x8   :  { %1102 = vmatpush3.bf16.msra.mxu0 %v1278_v6  ;;  %v1287_v15 = vld [vmem:[%s1774_s1 + $0x98] sm:$0xff]   ;;  %v1291_v19 = vld [vmem:[%s1774_s1 + $0xa0] sm:$0xff]   ;;  %v1295_v23 = vld [vmem:[%s1774_s1 + $0xa8] sm:$0xff]  }
   0x9   :  { %1166 = vmatpush3.bf16.msra.mxu1 %v1279_v7  ;;  %1103 = vmatprep.subr.bf16.mxu0 %v1280_v8  ;;  %v1296_v24 = vld [vmem:[%s1774_s1 + $0x70] sm:$0xff]   ;;  %v1300_v28 = vld [vmem:[%s1774_s1 + $0x78] sm:$0xff]   ;;  %v1309_v35 = vld [vmem:[%s1775_s0 + $0xc] ss:$20 sps:$4 sm:$0xff]  }
   0xa   :  { %1167 = vmatprep.subr.bf16.mxu1 %v1281_v9  ;;  %v1297_v25 = vld [vmem:[%s1774_s1 + $0xf0] sm:$0xff]   ;;  %v1301_v29 = vld [vmem:[%s1774_s1 + $0xf8] sm:$0xff]   ;;  %v1310_v36 = vld [vmem:[%s1774_s1 + $0x100] sm:$0xff]   ;;  %742 = vmatprep.mubr.bf16.mxu1 %v1309_v35 }
   0xb   :  { %v1298_v26 = vld [vmem:[%s1774_s1 + $0x30] sm:$0xff]   ;;  %v1302_v30 = vld [vmem:[%s1774_s1 + $0x38] sm:$0xff]   ;;  %v1311_v37 = vld [vmem:[%s1775_s0 + $0x2c] ss:$20 sps:$4 sm:$0xff]  }
   0xc   :  { %1104 = vmatpush3.bf16.msra.mxu0 %v1282_v10  ;;  %v1299_v27 = vld [vmem:[%s1774_s1 + $0xb0] sm:$0xff]   ;;  %v1303_v31 = vld [vmem:[%s1774_s1 + $0xb8] sm:$0xff]   ;;  %v1323_v42 = vld [vmem:[%s1774_s1 + $0x108] sm:$0xff]  }
   0xd   :  { %1168 = vmatpush3.bf16.msra.mxu1 %v1283_v11  ;;  %1105 = vmatprep.subr.bf16.mxu0 %v1284_v12  ;;  %v1304_v32 = vld [vmem:[%s1775_s0] ss:$20 sps:$4 sm:$0xff]   ;;  %v1306_v33 = vld [vmem:[%s1775_s0 + $0x4] ss:$20 sps:$4 sm:$0xff]   ;;  %v1307_v34 = vld [vmem:[%s1775_s0 + $0x8] ss:$20 sps:$4 sm:$0xff]  }
   0xe   :  { %1169 = vmatprep.subr.bf16.mxu1 %v1285_v13  ;;  %645 = vmatprep.mubr.bf16.mxu0 %v1306_v33  ;;  %v1313_v38 = vld [vmem:[%s1775_s0 + $0x34] ss:$20 sps:$4 sm:$0xff]   ;;  %v1316_v40 = vld [vmem:[%s1775_s0 + $0x30] ss:$20 sps:$4 sm:$0xff]   ;;  %v1322_v45 = vld [vmem:[%s1775_s0 + $0x58] ss:$20 sps:$4 sm:$0xff]  }
   0xf   :  { %v1315_v39 = vld [vmem:[%s1775_s0 + $0x28] ss:$20 sps:$4 sm:$0xff]   ;;  %v1321_v44 = vld [vmem:[%s1775_s0 + $0x50] ss:$20 sps:$4 sm:$0xff]   ;;  %v1328_v50 = vld [vmem:[%s1775_s0 + $0x78] ss:$20 sps:$4 sm:$0xff]  }
  0x10   :  { %1106 = vmatpush3.bf16.msra.mxu0 %v1286_v14  ;;  %v1317_v41 = vld [vmem:[%s1775_s0 + $0x54] ss:$20 sps:$4 sm:$0xff]   ;;  %v1319_v43 = vld [vmem:[%s1775_s0 + $0x5c] ss:$20 sps:$4 sm:$0xff]   ;;  %v1326_v48 = vld [vmem:[%s1775_s0 + $0x84] ss:$20 sps:$4 sm:$0xff]  }
  0x11   :  { %1170 = vmatpush3.bf16.msra.mxu1 %v1287_v15  ;;  %1107 = vmatprep.subr.bf16.mxu0 %v1288_v16  ;;  %v1336_v46 = vld [vmem:[%s1774_s1 + $0x110] sm:$0xff]   ;;  %v1349_v49 = vld [vmem:[%s1774_s1 + $0x118] sm:$0xff]   ;;  %v1332_v53 = vld [vmem:[%s1775_s0 + $0xac] ss:$20 sps:$4 sm:$0xff]   ;;  %v1364_v12 = vmov 0.0  }
  0x12   :  { %1171 = vmatprep.subr.bf16.mxu1 %v1289_v17  ;;  %v1324_v47 = vld [vmem:[%s1775_s0 + $0x7c] ss:$20 sps:$4 sm:$0xff]   ;;  %v1329_v51 = vld [vmem:[%s1775_s0 + $0x80] ss:$20 sps:$4 sm:$0xff]   ;;  %v1330_v52 = vld [vmem:[%s1775_s0 + $0xa4] ss:$20 sps:$4 sm:$0xff]  }
  0x13   :  { %v1334_v54 = vld [vmem:[%s1775_s0 + $0xa0] ss:$20 sps:$4 sm:$0xff]   ;;  %v1335_v55 = vld [vmem:[%s1775_s0 + $0xa8] ss:$20 sps:$4 sm:$0xff]   ;;  %v1342_v59 = vld [vmem:[%s1775_s0 + $0xd0] ss:$20 sps:$4 sm:$0xff]  }
  0x14   :  { %1108 = vmatpush3.bf16.msra.mxu0 %v1290_v18  ;;  %v1337_v56 = vld [vmem:[%s1775_s0 + $0xcc] ss:$20 sps:$4 sm:$0xff]   ;;  %v1339_v57 = vld [vmem:[%s1775_s0 + $0xd4] ss:$20 sps:$4 sm:$0xff]   ;;  %v1345_v61 = vld [vmem:[%s1775_s0 + $0xfc] ss:$20 sps:$4 sm:$0xff]  }
  0x15   :  { %1172 = vmatpush3.bf16.msra.mxu1 %v1291_v19  ;;  %1109 = vmatprep.subr.bf16.mxu0 %v1292_v20  ;;  %v1341_v58 = vld [vmem:[%s1775_s0 + $0xc8] ss:$20 sps:$4 sm:$0xff]   ;;  %v1347_v62 = vld [vmem:[%s1775_s0 + $0xf0] ss:$20 sps:$4 sm:$0xff]   ;;  %v1348_v63 = vld [vmem:[%s1775_s0 + $0xf8] ss:$20 sps:$4 sm:$0xff]  }
  0x16   :  { %1173 = vmatprep.subr.bf16.mxu1 %v1293_v21  ;;  %v1343_v60 = vld [vmem:[%s1775_s0 + $0xf4] ss:$20 sps:$4 sm:$0xff]   ;;  %v1350_v0 = vld [vmem:[%s1775_s0 + $0x11c] ss:$20 sps:$4 sm:$0xff]   ;;  %v1352_v1 = vld [vmem:[%s1775_s0 + $0x124] ss:$20 sps:$4 sm:$0xff]  }
  0x17   :  { %v1354_v2 = vld [vmem:[%s1775_s0 + $0x118] ss:$20 sps:$4 sm:$0xff]   ;;  %v1355_v3 = vld [vmem:[%s1775_s0 + $0x120] ss:$20 sps:$4 sm:$0xff]   ;;  %v1356_v4 = vld [vmem:[%s1775_s0 + $0x10] ss:$20 sps:$4 sm:$0xff]  }
  0x18   :  { %1110 = vmatpush3.bf16.msra.mxu0 %v1294_v22  ;;  %v1357_v5 = vld [vmem:[%s1775_s0 + $0xb0] ss:$20 sps:$4 sm:$0xff]   ;;  %v1358_v6 = vld [vmem:[%s1775_s0 + $0x38] ss:$20 sps:$4 sm:$0xff]   ;;  %v1360_v8 = vld [vmem:[%s1775_s0 + $0x60] ss:$20 sps:$4 sm:$0xff]  }
  0x19   :  { %1174 = vmatpush3.bf16.msra.mxu1 %v1295_v23  ;;  %1111 = vmatprep.subr.bf16.mxu0 %v1296_v24  ;;  %v1359_v7 = vld [vmem:[%s1775_s0 + $0xd8] ss:$20 sps:$4 sm:$0xff]   ;;  %v1361_v9 = vld [vmem:[%s1775_s0 + $0x100] ss:$20 sps:$4 sm:$0xff]   ;;  %v1362_v10 = vld [vmem:[%s1775_s0 + $0x88] ss:$20 sps:$4 sm:$0xff]  }
  0x1a   :  { %1175 = vmatprep.subr.bf16.mxu1 %v1297_v25  ;;  %v1363_v11 = vld [vmem:[%s1775_s0 + $0x128] ss:$20 sps:$4 sm:$0xff]   ;;  %22 = vst.msk [vmem:[#allocation2 + $0x10] sm:$0xff] %vm19_vm0, %v1364_v12  ;;  %20 = vst.msk [vmem:[#allocation2] sm:$0xff] %vm19_vm0, %v1364_v12 }
  0x1b   :  { %21 = vst.msk [vmem:[#allocation2 + $0x8] sm:$0xff] %vm19_vm0, %v1364_v12  ;;  %23 = vst.msk [vmem:[#allocation2 + $0x18] sm:$0xff] %vm19_vm0, %v1364_v12 }
  0x1c   :  { %1112 = vmatpush3.bf16.msra.mxu0 %v1298_v26  ;;  %24 = vst.msk [vmem:[#allocation2 + $0x20] sm:$0xff] %vm19_vm0, %v1364_v12  ;;  %25 = vst.msk [vmem:[#allocation2 + $0x28] sm:$0xff] %vm19_vm0, %v1364_v12 }
  0x1d   :  { %1176 = vmatpush3.bf16.msra.mxu1 %v1299_v27  ;;  %1113 = vmatprep.subr.bf16.mxu0 %v1300_v28  ;;  %26 = vst.msk [vmem:[#allocation2 + $0x30] sm:$0xff] %vm19_vm0, %v1364_v12  ;;  %27 = vst.msk [vmem:[#allocation2 + $0x38] sm:$0xff] %vm19_vm0, %v1364_v12 }
  0x1e   :  { %1177 = vmatprep.subr.bf16.mxu1 %v1301_v29  ;;  %28 = vst.msk [vmem:[#allocation2 + $0x40] sm:$0xff] %vm19_vm0, %v1364_v12  ;;  %29 = vst.msk [vmem:[#allocation2 + $0x48] sm:$0xff] %vm19_vm0, %v1364_v12 }
  0x1f   :  { %30 = vst.msk [vmem:[#allocation2 + $0x50] sm:$0xff] %vm19_vm0, %v1364_v12  ;;  %31 = vst.msk [vmem:[#allocation2 + $0x58] sm:$0xff] %vm19_vm0, %v1364_v12 }
  0x20   :  { %1114 = vmatpush3.bf16.msra.mxu0 %v1302_v30  ;;  %32 = vst.msk [vmem:[#allocation2 + $0x60] sm:$0xff] %vm19_vm0, %v1364_v12  ;;  %33 = vst.msk [vmem:[#allocation2 + $0x68] sm:$0xff] %vm19_vm0, %v1364_v12 }
  0x21   :  { %1178 = vmatpush3.bf16.msra.mxu1 %v1303_v31  ;;  %1239 = vmatprep.subr.bf16.mxu0 %v1310_v36  ;;  %34 = vst.msk [vmem:[#allocation2 + $0x70] sm:$0xff] %vm19_vm0, %v1364_v12  ;;  %35 = vst.msk [vmem:[#allocation2 + $0x78] sm:$0xff] %vm19_vm0, %v1364_v12 }
  0x22   :  { %1263 = vmatprep.subr.bf16.mxu1 %v1310_v36 }
  0x23   :  { %646 = vmatmul.mubr.bf16.vlgmr.msra.gmra.mrb[0].mxu0 %v1304_v32 }
  0x24   :  { %743 = vmatmul.mubr.bf16.vlgmr.msra.gmra.mrb[0].mxu1 %v1307_v34  ;;  %1240 = vmatpush3.bf16.msra.mxu0 %v1310_v36 }
  0x25   :  { %1267 = vmatpush3.bf16.msra.mxu1 %v1310_v36  ;;  %653 = vmatprep.mubr.bf16.mxu0 %v1311_v37 }
  0x26   :  { %750 = vmatprep.mubr.bf16.mxu1 %v1313_v38  ;;  %1241 = vmatprep.subr.bf16.mxu0 %v1323_v42 }
  0x27   :  { %1264 = vmatprep.subr.bf16.mxu1 %v1323_v42 }
  0x28   :  { %1242 = vmatpush3.bf16.msra.mxu0 %v1323_v42 }
  0x29   :  { %1268 = vmatpush3.bf16.msra.mxu1 %v1323_v42  ;;  %1243 = vmatprep.subr.bf16.mxu0 %v1336_v46 }
  0x2a   :  { %1265 = vmatprep.subr.bf16.mxu1 %v1336_v46 }
  0x2b   :  { %654 = vmatmul.mubr.bf16.gmra.mrb[4].mxu0 %v1315_v39 }
  0x2c   :  { %751 = vmatmul.mubr.bf16.gmra.mrb[4].mxu1 %v1316_v40  ;;  %661 = vmatprep.mubr.bf16.mxu0 %v1317_v41 }
  0x2d   :  { %758 = vmatprep.mubr.bf16.mxu1 %v1319_v43  ;;  %1244 = vmatpush3.bf16.msra.mxu0 %v1336_v46 }
  0x2e   :  { %1269 = vmatpush3.bf16.msra.mxu1 %v1336_v46  ;;  %1245 = vmatprep.subr.bf16.mxu0 %v1349_v49 }
  0x2f   :  { %1266 = vmatprep.subr.bf16.mxu1 %v1349_v49 }
  0x31   :  { %1246 = vmatpush3.bf16.msra.mxu0 %v1349_v49 }
  0x32   :  { %1270 = vmatpush3.bf16.msra.mxu1 %v1349_v49 }
  0x33   :  { %662 = vmatmul.mubr.bf16.gmra.mrb[8].mxu0 %v1321_v44 }
  0x34   :  { %759 = vmatmul.mubr.bf16.gmra.mrb[8].mxu1 %v1322_v45  ;;  %669 = vmatprep.mubr.bf16.mxu0 %v1324_v47 }
  0x35   :  { %766 = vmatprep.mubr.bf16.mxu1 %v1326_v48 }
  0x3b   :  { %670 = vmatmul.mubr.bf16.gmra.mrb[12].mxu0 %v1328_v50 }
  0x3c   :  { %767 = vmatmul.mubr.bf16.gmra.mrb[12].mxu1 %v1329_v51  ;;  %677 = vmatprep.mubr.bf16.mxu0 %v1330_v52 }
  0x3d   :  { %774 = vmatprep.mubr.bf16.mxu1 %v1332_v53 }
  0x43   :  { %678 = vmatmul.mubr.bf16.gmra.mrb[16].mxu0 %v1334_v54 }
  0x44   :  { %775 = vmatmul.mubr.bf16.gmra.mrb[16].mxu1 %v1335_v55  ;;  %685 = vmatprep.mubr.bf16.mxu0 %v1337_v56 }
  0x45   :  { %782 = vmatprep.mubr.bf16.mxu1 %v1339_v57 }
  0x4b   :  { %686 = vmatmul.mubr.bf16.gmra.mrb[20].mxu0 %v1341_v58 }
  0x4c   :  { %783 = vmatmul.mubr.bf16.gmra.mrb[20].mxu1 %v1342_v59  ;;  %693 = vmatprep.mubr.bf16.mxu0 %v1343_v60 }
  0x4d   :  { %790 = vmatprep.mubr.bf16.mxu1 %v1345_v61 }
  0x53   :  { %694 = vmatmul.mubr.bf16.gmra.mrb[24].mxu0 %v1347_v62 }
  0x54   :  { %791 = vmatmul.mubr.bf16.gmra.mrb[24].mxu1 %v1348_v63  ;;  %701 = vmatprep.mubr.bf16.mxu0 %v1350_v0 }
  0x55   :  { %798 = vmatprep.mubr.bf16.mxu1 %v1352_v1 }
  0x5b   :  { %702 = vmatmul.mubr.bf16.gmra.mrb[28].mxu0 %v1354_v2 }
  0x5c   :  { %799 = vmatmul.mubr.bf16.gmra.mrb[28].mxu1 %v1355_v3  ;;  %1247 = vmatprep.mubr.msk.bf16.mxu0 %vm19_vm0, %v1356_v4 }
  0x5d   :  { %1255 = vmatprep.mubr.msk.bf16.mxu1 %vm19_vm0, %v1357_v5 }
  0x63   :  { %1248 = vmatmul.mubr.msk.bf16.vlgmr.msra.gmra.mrb[32].mxu0 %vm19_vm0, %v1358_v6 }
  0x64   :  { %1256 = vmatmul.mubr.msk.bf16.vlgmr.msra.gmra.mrb[32].mxu1 %vm19_vm0, %v1359_v7  ;;  %1251 = vmatprep.mubr.msk.bf16.mxu0 %vm19_vm0, %v1360_v8 }
  0x65   :  { %1259 = vmatprep.mubr.msk.bf16.mxu1 %vm19_vm0, %v1361_v9 }
  0x6b   :  { %1252 = vmatmul.mubr.msk.bf16.gmra.mrb[36].mxu0 %vm19_vm0, %v1362_v10 }
  0x6c   :  { %1260 = vmatmul.mubr.msk.bf16.gmra.mrb[36].mxu1 %vm19_vm0, %v1363_v11 }
  0xf6   :  { %v1115_v13 = vpop.f32.mrb[0].mxu0 }
  0xf7   :  { %v1179_v14 = vpop.f32.mrb[0].mxu1  ;;  %v1116_v15 = vpop.f32.mrb[1].mxu0 }
  0xf8   :  { %v1117_v16 = vadd.f32 %v1116_v15, %v1115_v13  ;;  %v1180_v17 = vpop.f32.mrb[1].mxu1  ;;  %v1118_v18 = vpop.f32.mrb[2].mxu0 }
  0xf9   :  { %v1181_v19 = vadd.f32 %v1180_v17, %v1179_v14  ;;  %v1182_v20 = vpop.f32.mrb[2].mxu1  ;;  %v1119_v21 = vpop.f32.mrb[3].mxu0 }
  0xfa   :  { %v1120_v22 = vadd.f32 %v1119_v21, %v1118_v18  ;;  %v1183_v23 = vpop.f32.mrb[3].mxu1 }
  0xfb   :  { %v1184_v24 = vadd.f32 %v1183_v23, %v1182_v20  ;;  %v1637_v25 = vadd.f32 %v1181_v19, %v1117_v16 }
  0xfd   :  { %v1639_v26 = vadd.f32 %v1184_v24, %v1120_v22 }
  0xfe   :  { %v1121_v27 = vpop.f32.mrb[4].mxu0 }
  0xff   :  { %v1185_v28 = vpop.f32.mrb[4].mxu1  ;;  %v1122_v29 = vpop.f32.mrb[5].mxu0 }
 0x100   :  { %v1123_v30 = vadd.f32 %v1122_v29, %v1121_v27  ;;  %v1186_v31 = vpop.f32.mrb[5].mxu1  ;;  %v1124_v32 = vpop.f32.mrb[6].mxu0 }
 0x101   :  { %v1187_v33 = vadd.f32 %v1186_v31, %v1185_v28  ;;  %v1188_v34 = vpop.f32.mrb[6].mxu1  ;;  %v1125_v35 = vpop.f32.mrb[7].mxu0 }
 0x102   :  { %v1126_v36 = vadd.f32 %v1125_v35, %v1124_v32  ;;  %v1189_v37 = vpop.f32.mrb[7].mxu1 }
 0x103   :  { %v1190_v38 = vadd.f32 %v1189_v37, %v1188_v34  ;;  %v1641_v39 = vadd.f32 %v1187_v33, %v1123_v30 }
 0x105   :  { %v1643_v40 = vadd.f32 %v1190_v38, %v1126_v36 }
 0x106   :  { %v1127_v41 = vpop.f32.mrb[8].mxu0 }
 0x107   :  { %v1191_v42 = vpop.f32.mrb[8].mxu1  ;;  %v1128_v43 = vpop.f32.mrb[9].mxu0 }
 0x108   :  { %v1129_v44 = vadd.f32 %v1128_v43, %v1127_v41  ;;  %v1192_v45 = vpop.f32.mrb[9].mxu1  ;;  %v1130_v46 = vpop.f32.mrb[10].mxu0 }
 0x109   :  { %v1193_v47 = vadd.f32 %v1192_v45, %v1191_v42  ;;  %v1194_v48 = vpop.f32.mrb[10].mxu1  ;;  %v1131_v49 = vpop.f32.mrb[11].mxu0 }
 0x10a   :  { %v1132_v50 = vadd.f32 %v1131_v49, %v1130_v46  ;;  %v1195_v51 = vpop.f32.mrb[11].mxu1 }
 0x10b   :  { %v1196_v52 = vadd.f32 %v1195_v51, %v1194_v48  ;;  %v1645_v53 = vadd.f32 %v1193_v47, %v1129_v44 }
 0x10d   :  { %v1647_v54 = vadd.f32 %v1196_v52, %v1132_v50 }
 0x10e   :  { %v1133_v55 = vpop.f32.mrb[12].mxu0 }
 0x10f   :  { %v1197_v56 = vpop.f32.mrb[12].mxu1  ;;  %v1134_v57 = vpop.f32.mrb[13].mxu0 }
 0x110   :  { %v1135_v58 = vadd.f32 %v1134_v57, %v1133_v55  ;;  %v1198_v59 = vpop.f32.mrb[13].mxu1  ;;  %v1136_v60 = vpop.f32.mrb[14].mxu0 }
 0x111   :  { %v1199_v61 = vadd.f32 %v1198_v59, %v1197_v56  ;;  %v1200_v62 = vpop.f32.mrb[14].mxu1  ;;  %v1137_v63 = vpop.f32.mrb[15].mxu0 }
 0x112   :  { %v1138_v0 = vadd.f32 %v1137_v63, %v1136_v60  ;;  %v1201_v1 = vpop.f32.mrb[15].mxu1 }
 0x113   :  { %v1202_v2 = vadd.f32 %v1201_v1, %v1200_v62  ;;  %v1649_v3 = vadd.f32 %v1199_v61, %v1135_v58 }
 0x115   :  { %v1651_v4 = vadd.f32 %v1202_v2, %v1138_v0 }
 0x116   :  { %v1139_v5 = vpop.f32.mrb[16].mxu0 }
 0x117   :  { %v1203_v6 = vpop.f32.mrb[16].mxu1  ;;  %v1140_v7 = vpop.f32.mrb[17].mxu0 }
 0x118   :  { %v1141_v8 = vadd.f32 %v1140_v7, %v1139_v5  ;;  %v1204_v9 = vpop.f32.mrb[17].mxu1  ;;  %v1142_v10 = vpop.f32.mrb[18].mxu0  ;;  %v38_v5 = vld [vmem:[#allocation2 + $0x10] sm:$0xff] }
 0x119   :  { %v1205_v11 = vadd.f32 %v1204_v9, %v1203_v6  ;;  %v1206_v12 = vpop.f32.mrb[18].mxu1  ;;  %v1143_v13 = vpop.f32.mrb[19].mxu0 }
 0x11a   :  { %v1144_v14 = vadd.f32 %v1143_v13, %v1142_v10  ;;  %v1207_v15 = vpop.f32.mrb[19].mxu1  ;;  %v36_v10 = vld [vmem:[#allocation2] sm:$0xff] }
 0x11b   :  { %v1208_v16 = vadd.f32 %v1207_v15, %v1206_v12  ;;  %v777_v17 = vadd.f32 %v1205_v11, %v1141_v8  ;;  %v46_v8 = vld [vmem:[#allocation2 + $0x50] sm:$0xff] }
 0x11d   :  { %v1653_v18 = vadd.f32 %v1208_v16, %v1144_v14  ;;  %v44_v14 = vld [vmem:[#allocation2 + $0x40] sm:$0xff]  ;;  %v39_v16 = vld [vmem:[#allocation2 + $0x18] sm:$0xff] }
 0x11e   :  { %v1145_v19 = vpop.f32.mrb[20].mxu0 }
 0x11f   :  { %v1209_v20 = vpop.f32.mrb[20].mxu1  ;;  %v1146_v21 = vpop.f32.mrb[21].mxu0 }
 0x120   :  { %v1147_v22 = vadd.f32 %v1146_v21, %v1145_v19  ;;  %v1210_v23 = vpop.f32.mrb[21].mxu1  ;;  %v1148_v24 = vpop.f32.mrb[22].mxu0 }
 0x121   :  { %v1211_v27 = vadd.f32 %v1210_v23, %v1209_v20  ;;  %v1212_v28 = vpop.f32.mrb[22].mxu1  ;;  %v1149_v29 = vpop.f32.mrb[23].mxu0  ;;  %v47_v23 = vld [vmem:[#allocation2 + $0x58] sm:$0xff] }
 0x122   :  { %v1150_v30 = vadd.f32 %v1149_v29, %v1148_v24  ;;  %v1213_v31 = vpop.f32.mrb[23].mxu1 }
 0x123   :  { %v1214_v32 = vadd.f32 %v1213_v31, %v1212_v28  ;;  %v785_v33 = vadd.f32 %v1211_v27, %v1147_v22  ;;  %v37_v27 = vld [vmem:[#allocation2 + $0x8] sm:$0xff] }
 0x125   :  { %v788_v34 = vadd.f32 %v1214_v32, %v1150_v30  ;;  %v45_v32 = vld [vmem:[#allocation2 + $0x48] sm:$0xff] }
 0x126   :  { %v1151_v35 = vpop.f32.mrb[24].mxu0 }
 0x127   :  { %v1215_v36 = vpop.f32.mrb[24].mxu1  ;;  %v1152_v37 = vpop.f32.mrb[25].mxu0 }
 0x128   :  { %v1153_v38 = vadd.f32 %v1152_v37, %v1151_v35  ;;  %v1216_v41 = vpop.f32.mrb[25].mxu1  ;;  %v1154_v42 = vpop.f32.mrb[26].mxu0 }
 0x129   :  { %v1217_v43 = vadd.f32 %v1216_v41, %v1215_v36  ;;  %v1218_v44 = vpop.f32.mrb[26].mxu1  ;;  %v1155_v45 = vpop.f32.mrb[27].mxu0 }
 0x12a   :  { %v1156_v46 = vadd.f32 %v1155_v45, %v1154_v42  ;;  %v1219_v47 = vpop.f32.mrb[27].mxu1  ;;  %v40_v42 = vld [vmem:[#allocation2 + $0x20] sm:$0xff] }
 0x12b   :  { %v1220_v48 = vadd.f32 %v1219_v47, %v1218_v44  ;;  %v1655_v49 = vadd.f32 %v1217_v43, %v1153_v38  ;;  %v50_v38 = vld [vmem:[#allocation2 + $0x70] sm:$0xff]  ;;  %v1678_v44 = vld [vmem:[%s1776_s2] ss:$0 sm:$0xff] }
 0x12c   :  { %v48_v47 = vld [vmem:[#allocation2 + $0x60] sm:$0xff] }
 0x12d   :  { %v1657_v50 = vadd.f32 %v1220_v48, %v1156_v46 }
 0x12e   :  { %v1157_v51 = vpop.f32.mrb[28].mxu0 }
 0x12f   :  { %v1221_v52 = vpop.f32.mrb[28].mxu1  ;;  %v1158_v55 = vpop.f32.mrb[29].mxu0 }
 0x130   :  { %v1159_v56 = vadd.f32 %v1158_v55, %v1157_v51  ;;  %v1222_v57 = vpop.f32.mrb[29].mxu1  ;;  %v1160_v58 = vpop.f32.mrb[30].mxu0  ;;  %v43_v51 = vld [vmem:[#allocation2 + $0x38] sm:$0xff] }
 0x131   :  { %v1223_v59 = vadd.f32 %v1222_v57, %v1221_v52  ;;  %v1224_v60 = vpop.f32.mrb[30].mxu1  ;;  %v1161_v61 = vpop.f32.mrb[31].mxu0  ;;  %v51_v57 = vld [vmem:[#allocation2 + $0x78] sm:$0xff] }
 0x132   :  { %v1162_v62 = vadd.f32 %v1161_v61, %v1160_v58  ;;  %v1225_v63 = vpop.f32.mrb[31].mxu1 }
 0x133   :  { %v1226_v0 = vadd.f32 %v1225_v63, %v1224_v60  ;;  %v801_v1 = vadd.f32 %v1223_v59, %v1159_v56  ;;  %v41_v59 = vld [vmem:[#allocation2 + $0x28] sm:$0xff] }
 0x135   :  { %v1659_v2 = vadd.f32 %v1226_v0, %v1162_v62 }
 0x136   :  { %v1249_v6 = vpop.f32.mrb[32].mxu0 }
 0x137   :  { %v850_v7 = vadd.f32 %v1249_v6, %v1641_v39  ;;  %v1257_v9 = vpop.f32.mrb[32].mxu1  ;;  %v841_v11 = vpop.f32.mrb[33].mxu0 }
 0x138   :  { %v882_v12 = vadd.f32 %v1257_v9, %v785_v33  ;;  %v842_v13 = vadd.f32 %v841_v11, %v1637_v25  ;;  %v873_v15 = vpop.f32.mrb[33].mxu1  ;;  %v1250_v19 = vpop.f32.mrb[34].mxu0 }
 0x139   :  { %v906_v20 = vadd.f32 %v850_v7, %v38_v5  ;;  %v874_v21 = vadd.f32 %v873_v15, %v777_v17  ;;  %v853_v22 = vadd.f32 %v1250_v19, %v1643_v40  ;;  %v1258_v24 = vpop.f32.mrb[34].mxu1  ;;  %v844_v28 = vpop.f32.mrb[35].mxu0 }
 0x13a   :  { %v914_v39 = vadd.f32 %v882_v12, %v46_v8  ;;  %v904_v29 = vadd.f32 %v842_v13, %v36_v10  ;;  %v885_v30 = vadd.f32 %v1258_v24, %v788_v34  ;;  %v845_v31 = vadd.f32 %v844_v28, %v1639_v26  ;;  %v876_v33 = vpop.f32.mrb[35].mxu1  ;;  %v42_v26 = vld [vmem:[#allocation2 + $0x30] sm:$0xff] }
 0x13b   :  { %922 = vst.msk [vmem:[#allocation2 + $0x10] sm:$0xff] %vm19_vm0, %v906_v20  ;;  %v912_v25 = vadd.f32 %v874_v21, %v44_v14  ;;  %v907_v35 = vadd.f32 %v853_v22, %v39_v16  ;;  %v877_v36 = vadd.f32 %v876_v33, %v1653_v18 }
 0x13c   :  { %930 = vst.msk [vmem:[#allocation2 + $0x50] sm:$0xff] %vm19_vm0, %v914_v39  ;;  %920 = vst.msk [vmem:[#allocation2] sm:$0xff] %vm19_vm0, %v904_v29  ;;  %v915_v40 = vadd.f32 %v885_v30, %v47_v23  ;;  %v905_v17 = vadd.f32 %v845_v31, %v37_v27 }
 0x13d   :  { %928 = vst.msk [vmem:[#allocation2 + $0x40] sm:$0xff] %vm19_vm0, %v912_v25  ;;  %923 = vst.msk [vmem:[#allocation2 + $0x18] sm:$0xff] %vm19_vm0, %v907_v35  ;;  %v913_v34 = vadd.f32 %v877_v36, %v45_v32 }
 0x13e   :  { %931 = vst.msk [vmem:[#allocation2 + $0x58] sm:$0xff] %vm19_vm0, %v915_v40  ;;  %921 = vst.msk [vmem:[#allocation2 + $0x8] sm:$0xff] %vm19_vm0, %v905_v17  ;;  %v1253_v37 = vpop.f32.mrb[36].mxu0 }
 0x13f   :  { %929 = vst.msk [vmem:[#allocation2 + $0x48] sm:$0xff] %vm19_vm0, %v913_v34  ;;  %v866_v18 = vadd.f32 %v1253_v37, %v1649_v3  ;;  %v1261_v41 = vpop.f32.mrb[36].mxu1  ;;  %v857_v43 = vpop.f32.mrb[37].mxu0 }
 0x140   :  { %v898_v45 = vadd.f32 %v1261_v41, %v801_v1  ;;  %v858_v46 = vadd.f32 %v857_v43, %v1645_v53  ;;  %v889_v48 = vpop.f32.mrb[37].mxu1  ;;  %v1254_v52 = vpop.f32.mrb[38].mxu0  ;;  %v49_v1 = vld [vmem:[#allocation2 + $0x68] sm:$0xff] }
 0x141   :  { %v910_v55 = vadd.f32 %v866_v18, %v42_v26  ;;  %v890_v56 = vadd.f32 %v889_v48, %v1655_v49  ;;  %v869_v3 = vadd.f32 %v1254_v52, %v1651_v4  ;;  %v1262_v58 = vpop.f32.mrb[38].mxu1  ;;  %v860_v60 = vpop.f32.mrb[39].mxu0 }
 0x142   :  { %v941_v61 = vld [vmem:[#allocation2 + $0x10] sm:$0xff]  ;;  %v918_v62 = vadd.f32 %v898_v45, %v50_v38  ;;  %v908_v63 = vadd.f32 %v858_v46, %v40_v42  ;;  %v901_v0 = vadd.f32 %v1262_v58, %v1659_v2  ;;  %v861_v53 = vadd.f32 %v860_v60, %v1647_v54  ;;  %v892_v5 = vpop.f32.mrb[39].mxu1 }
 0x143   :  { %v964_v6 = vadd.f32 %v1678_v44, %v941_v61  ;;  %v949_v7 = vld [vmem:[#allocation2 + $0x50] sm:$0xff]  ;;  %v939_v8 = vld [vmem:[#allocation2] sm:$0xff]  ;;  %926 = vst.msk [vmem:[#allocation2 + $0x30] sm:$0xff] %vm19_vm0, %v910_v55  ;;  %v916_v4 = vadd.f32 %v890_v56, %v48_v47  ;;  %v911_v49 = vadd.f32 %v869_v3, %v43_v51  ;;  %v893_v9 = vadd.f32 %v892_v5, %v1657_v50 }
 0x144   :  { %v972_v10 = vadd.f32 %v1678_v44, %v949_v7  ;;  %v962_v11 = vadd.f32 %v1678_v44, %v939_v8  ;;  %v947_v12 = vld [vmem:[#allocation2 + $0x40] sm:$0xff]  ;;  %v942_v2 = vld [vmem:[#allocation2 + $0x18] sm:$0xff]  ;;  %934 = vst.msk [vmem:[#allocation2 + $0x70] sm:$0xff] %vm19_vm0, %v918_v62  ;;  %924 = vst.msk [vmem:[#allocation2 + $0x20] sm:$0xff] %vm19_vm0, %v908_v63  ;;  %v919_v54 = vadd.f32 %v901_v0, %v51_v57 }
 0x145   :  { %v909_v13 = vadd.f32 %v861_v53, %v41_v59  ;;  %v980_v14 = vmax.f32 %v964_v6, 0.0  ;;  %v970_v15 = vadd.f32 %v1678_v44, %v947_v12  ;;  %v965_v16 = vadd.f32 %v1678_v44, %v942_v2  ;;  %v950_v19 = vld [vmem:[#allocation2 + $0x58] sm:$0xff]  ;;  %v940_v20 = vld [vmem:[#allocation2 + $0x8] sm:$0xff]  ;;  %932 = vst.msk [vmem:[#allocation2 + $0x60] sm:$0xff] %vm19_vm0, %v916_v4  ;;  %927 = vst.msk [vmem:[#allocation2 + $0x38] sm:$0xff] %vm19_vm0, %v911_v49 }
 0x146   :  { %v917_v50 = vadd.f32 %v893_v9, %v49_v1  ;;  %v988_v21 = vmax.f32 %v972_v10, 0.0  ;;  %v978_v22 = vmax.f32 %v962_v11, 0.0  ;;  %v973_v23 = vadd.f32 %v1678_v44, %v950_v19  ;;  %v948_v27 = vld [vmem:[#allocation2 + $0x48] sm:$0xff]  ;;  %935 = vst.msk [vmem:[#allocation2 + $0x78] sm:$0xff] %vm19_vm0, %v919_v54 }
 0x147   :  { %v963_v24 = vadd.f32 %v1678_v44, %v940_v20  ;;  %925 = vst.msk [vmem:[#allocation2 + $0x28] sm:$0xff] %vm19_vm0, %v909_v13  ;;  %996 = vst.msk [vmem:[%s1777_s3 + $0x10] sm:$0xff] %vm19_vm0, %v980_v14  ;;  %v986_v28 = vmax.f32 %v970_v15, 0.0  ;;  %v981_v39 = vmax.f32 %v965_v16, 0.0  ;;  %v971_v29 = vadd.f32 %v1678_v44, %v948_v27 }
 0x148   :  { %933 = vst.msk [vmem:[#allocation2 + $0x68] sm:$0xff] %vm19_vm0, %v917_v50  ;;  %1004 = vst.msk [vmem:[%s1777_s3 + $0x50] sm:$0xff] %vm19_vm0, %v988_v21  ;;  %v989_v30 = vmax.f32 %v973_v23, 0.0 }
 0x149   :  { %994 = vst.msk [vmem:[%s1777_s3] sm:$0xff] %vm19_vm0, %v978_v22  ;;  %v979_v31 = vmax.f32 %v963_v24, 0.0  ;;  %1002 = vst.msk [vmem:[%s1777_s3 + $0x40] sm:$0xff] %vm19_vm0, %v986_v28  ;;  %v987_v32 = vmax.f32 %v971_v29, 0.0 }
 0x14a   :  { %997 = vst.msk [vmem:[%s1777_s3 + $0x18] sm:$0xff] %vm19_vm0, %v981_v39  ;;  %1005 = vst.msk [vmem:[%s1777_s3 + $0x58] sm:$0xff] %vm19_vm0, %v989_v30  ;;  %v945_v33 = vld [vmem:[#allocation2 + $0x30] sm:$0xff] }
 0x14b   :  { %995 = vst.msk [vmem:[%s1777_s3 + $0x8] sm:$0xff] %vm19_vm0, %v979_v31  ;;  %1003 = vst.msk [vmem:[%s1777_s3 + $0x48] sm:$0xff] %vm19_vm0, %v987_v32  ;;  %v968_v25 = vadd.f32 %v1678_v44, %v945_v33  ;;  %v953_v35 = vld [vmem:[#allocation2 + $0x70] sm:$0xff]  ;;  %v943_v36 = vld [vmem:[#allocation2 + $0x20] sm:$0xff] }
 0x14c   :  { %v976_v40 = vadd.f32 %v1678_v44, %v953_v35  ;;  %v966_v17 = vadd.f32 %v1678_v44, %v943_v36  ;;  %v951_v34 = vld [vmem:[#allocation2 + $0x60] sm:$0xff]  ;;  %v946_v26 = vld [vmem:[#allocation2 + $0x38] sm:$0xff] }
 0x14d   :  { %v984_v37 = vmax.f32 %v968_v25, 0.0  ;;  %v974_v18 = vadd.f32 %v1678_v44, %v951_v34  ;;  %v969_v38 = vadd.f32 %v1678_v44, %v946_v26  ;;  %v954_v41 = vld [vmem:[#allocation2 + $0x78] sm:$0xff] }
 0x14e   :  { %v944_v42 = vld [vmem:[#allocation2 + $0x28] sm:$0xff]  ;;  %v992_v43 = vmax.f32 %v976_v40, 0.0  ;;  %v982_v45 = vmax.f32 %v966_v17, 0.0  ;;  %v977_v46 = vadd.f32 %v1678_v44, %v954_v41 }
 0x14f   :  { %v967_v47 = vadd.f32 %v1678_v44, %v944_v42  ;;  %v952_v48 = vld [vmem:[#allocation2 + $0x68] sm:$0xff]  ;;  %1000 = vst.msk [vmem:[%s1777_s3 + $0x30] sm:$0xff] %vm19_vm0, %v984_v37  ;;  %v990_v51 = vmax.f32 %v974_v18, 0.0  ;;  %v985_v52 = vmax.f32 %v969_v38, 0.0 }
 0x150   :  { %v975_v55 = vadd.f32 %v1678_v44, %v952_v48  ;;  %1008 = vst.msk [vmem:[%s1777_s3 + $0x70] sm:$0xff] %vm19_vm0, %v992_v43  ;;  %998 = vst.msk [vmem:[%s1777_s3 + $0x20] sm:$0xff] %vm19_vm0, %v982_v45  ;;  %v993_v56 = vmax.f32 %v977_v46, 0.0 }
 0x151   :  { %v983_v3 = vmax.f32 %v967_v47, 0.0  ;;  %1006 = vst.msk [vmem:[%s1777_s3 + $0x60] sm:$0xff] %vm19_vm0, %v990_v51  ;;  %1001 = vst.msk [vmem:[%s1777_s3 + $0x38] sm:$0xff] %vm19_vm0, %v985_v52 }
 0x152   :  { %v991_v44 = vmax.f32 %v975_v55, 0.0  ;;  %1009 = vst.msk [vmem:[%s1777_s3 + $0x78] sm:$0xff] %vm19_vm0, %v993_v56 }
 0x153   :  { %999 = vst.msk [vmem:[%s1777_s3 + $0x28] sm:$0xff] %vm19_vm0, %v983_v3 }
 0x154   :  { %1007 = vst.msk [vmem:[%s1777_s3 + $0x68] sm:$0xff] %vm19_vm0, %v991_v44 }

// kernel: _lambda_.24
= control target key start
LH: loop header
LB: loop body
LE: loop exit
PB: predicated region body
PF: predicated region fallthrough
CT: control target
= control target key end

     0   :  { %vm22_vm0 = vcmask 523264   ;;  %s1862_s1 = inlined_call_operand.vmem [shape: bf16[576,64], index: 1, kind: input, shape index: {}]   ;;  %s1863_s0 = inlined_call_operand.vmem [shape: bf16[128,576], index: 0, kind: input, shape index: {}]   ;;  %s1864_s2 = inlined_call_operand.vmem [shape: f32[1,64], index: 2, kind: input, shape index: {}]   ;;  %s1865_s3 = inlined_call_operand.vmem [shape: f32[128,64], index: 3, kind: input, shape index: {}]   ;;  %s1866_s4 = inlined_call_operand.vmem [shape: f32[128,64], index: 4, kind: output, shape index: {}]  }
   0x1   :  { %v1307_v0 = vld [vmem:[%s1862_s1 + $0x40] sm:$0xff]   ;;  %v1311_v4 = vld [vmem:[%s1862_s1 + $0x48] sm:$0xff]   ;;  %v1315_v8 = vld [vmem:[%s1862_s1 + $0x50] sm:$0xff]  }
   0x2   :  { %v1308_v1 = vld [vmem:[%s1862_s1 + $0xc0] sm:$0xff]   ;;  %1134 = vmatprep.subr.bf16.mxu0 %v1307_v0  ;;  %v1312_v5 = vld [vmem:[%s1862_s1 + $0xc8] sm:$0xff]   ;;  %v1316_v9 = vld [vmem:[%s1862_s1 + $0xd0] sm:$0xff]  }
   0x3   :  { %v1309_v2 = vld [vmem:[%s1862_s1] sm:$0xff]   ;;  %1198 = vmatprep.subr.bf16.mxu1 %v1308_v1  ;;  %v1313_v6 = vld [vmem:[%s1862_s1 + $0x8] sm:$0xff]   ;;  %v1317_v10 = vld [vmem:[%s1862_s1 + $0x10] sm:$0xff]  }
   0x4   :  { %v1310_v3 = vld [vmem:[%s1862_s1 + $0x80] sm:$0xff]   ;;  %1135 = vmatpush3.bf16.msra.mxu0 %v1309_v2  ;;  %v1314_v7 = vld [vmem:[%s1862_s1 + $0x88] sm:$0xff]   ;;  %v1318_v11 = vld [vmem:[%s1862_s1 + $0x90] sm:$0xff]  }
   0x5   :  { %1199 = vmatpush3.bf16.msra.mxu1 %v1310_v3  ;;  %1136 = vmatprep.subr.bf16.mxu0 %v1311_v4  ;;  %v1319_v12 = vld [vmem:[%s1862_s1 + $0x58] sm:$0xff]   ;;  %v1323_v16 = vld [vmem:[%s1862_s1 + $0x60] sm:$0xff]   ;;  %v1327_v20 = vld [vmem:[%s1862_s1 + $0x68] sm:$0xff]  }
   0x6   :  { %1200 = vmatprep.subr.bf16.mxu1 %v1312_v5  ;;  %v1320_v13 = vld [vmem:[%s1862_s1 + $0xd8] sm:$0xff]   ;;  %v1324_v17 = vld [vmem:[%s1862_s1 + $0xe0] sm:$0xff]   ;;  %v1328_v21 = vld [vmem:[%s1862_s1 + $0xe8] sm:$0xff]  }
   0x7   :  { %v1321_v14 = vld [vmem:[%s1862_s1 + $0x18] sm:$0xff]   ;;  %v1325_v18 = vld [vmem:[%s1862_s1 + $0x20] sm:$0xff]   ;;  %v1329_v22 = vld [vmem:[%s1862_s1 + $0x28] sm:$0xff]  }
   0x8   :  { %1137 = vmatpush3.bf16.msra.mxu0 %v1313_v6  ;;  %v1322_v15 = vld [vmem:[%s1862_s1 + $0x98] sm:$0xff]   ;;  %v1326_v19 = vld [vmem:[%s1862_s1 + $0xa0] sm:$0xff]   ;;  %v1330_v23 = vld [vmem:[%s1862_s1 + $0xa8] sm:$0xff]  }
   0x9   :  { %1201 = vmatpush3.bf16.msra.mxu1 %v1314_v7  ;;  %1138 = vmatprep.subr.bf16.mxu0 %v1315_v8  ;;  %v1331_v24 = vld [vmem:[%s1862_s1 + $0x70] sm:$0xff]   ;;  %v1335_v28 = vld [vmem:[%s1862_s1 + $0x78] sm:$0xff]   ;;  %v1344_v35 = vld [vmem:[%s1863_s0 + $0xc] ss:$20 sps:$4 sm:$0xff]  }
   0xa   :  { %1202 = vmatprep.subr.bf16.mxu1 %v1316_v9  ;;  %v1332_v25 = vld [vmem:[%s1862_s1 + $0xf0] sm:$0xff]   ;;  %v1336_v29 = vld [vmem:[%s1862_s1 + $0xf8] sm:$0xff]   ;;  %v1345_v36 = vld [vmem:[%s1862_s1 + $0x100] sm:$0xff]   ;;  %745 = vmatprep.mubr.bf16.mxu1 %v1344_v35 }
   0xb   :  { %v1333_v26 = vld [vmem:[%s1862_s1 + $0x30] sm:$0xff]   ;;  %v1337_v30 = vld [vmem:[%s1862_s1 + $0x38] sm:$0xff]   ;;  %v1346_v37 = vld [vmem:[%s1863_s0 + $0x2c] ss:$20 sps:$4 sm:$0xff]  }
   0xc   :  { %1139 = vmatpush3.bf16.msra.mxu0 %v1317_v10  ;;  %v1334_v27 = vld [vmem:[%s1862_s1 + $0xb0] sm:$0xff]   ;;  %v1338_v31 = vld [vmem:[%s1862_s1 + $0xb8] sm:$0xff]   ;;  %v1358_v42 = vld [vmem:[%s1862_s1 + $0x108] sm:$0xff]  }
   0xd   :  { %1203 = vmatpush3.bf16.msra.mxu1 %v1318_v11  ;;  %1140 = vmatprep.subr.bf16.mxu0 %v1319_v12  ;;  %v1339_v32 = vld [vmem:[%s1863_s0] ss:$20 sps:$4 sm:$0xff]   ;;  %v1341_v33 = vld [vmem:[%s1863_s0 + $0x4] ss:$20 sps:$4 sm:$0xff]   ;;  %v1342_v34 = vld [vmem:[%s1863_s0 + $0x8] ss:$20 sps:$4 sm:$0xff]  }
   0xe   :  { %1204 = vmatprep.subr.bf16.mxu1 %v1320_v13  ;;  %648 = vmatprep.mubr.bf16.mxu0 %v1341_v33  ;;  %v1348_v38 = vld [vmem:[%s1863_s0 + $0x34] ss:$20 sps:$4 sm:$0xff]   ;;  %v1351_v40 = vld [vmem:[%s1863_s0 + $0x30] ss:$20 sps:$4 sm:$0xff]   ;;  %v1357_v45 = vld [vmem:[%s1863_s0 + $0x58] ss:$20 sps:$4 sm:$0xff]  }
   0xf   :  { %v1350_v39 = vld [vmem:[%s1863_s0 + $0x28] ss:$20 sps:$4 sm:$0xff]   ;;  %v1356_v44 = vld [vmem:[%s1863_s0 + $0x50] ss:$20 sps:$4 sm:$0xff]   ;;  %v1363_v50 = vld [vmem:[%s1863_s0 + $0x78] ss:$20 sps:$4 sm:$0xff]  }
  0x10   :  { %1141 = vmatpush3.bf16.msra.mxu0 %v1321_v14  ;;  %v1352_v41 = vld [vmem:[%s1863_s0 + $0x54] ss:$20 sps:$4 sm:$0xff]   ;;  %v1354_v43 = vld [vmem:[%s1863_s0 + $0x5c] ss:$20 sps:$4 sm:$0xff]   ;;  %v1361_v48 = vld [vmem:[%s1863_s0 + $0x84] ss:$20 sps:$4 sm:$0xff]  }
  0x11   :  { %1205 = vmatpush3.bf16.msra.mxu1 %v1322_v15  ;;  %1142 = vmatprep.subr.bf16.mxu0 %v1323_v16  ;;  %v1371_v46 = vld [vmem:[%s1862_s1 + $0x110] sm:$0xff]   ;;  %v1384_v49 = vld [vmem:[%s1862_s1 + $0x118] sm:$0xff]   ;;  %v1367_v53 = vld [vmem:[%s1863_s0 + $0xac] ss:$20 sps:$4 sm:$0xff]   ;;  %v1399_v12 = vmov 0.0  }
  0x12   :  { %1206 = vmatprep.subr.bf16.mxu1 %v1324_v17  ;;  %v1359_v47 = vld [vmem:[%s1863_s0 + $0x7c] ss:$20 sps:$4 sm:$0xff]   ;;  %v1364_v51 = vld [vmem:[%s1863_s0 + $0x80] ss:$20 sps:$4 sm:$0xff]   ;;  %v1365_v52 = vld [vmem:[%s1863_s0 + $0xa4] ss:$20 sps:$4 sm:$0xff]  }
  0x13   :  { %v1369_v54 = vld [vmem:[%s1863_s0 + $0xa0] ss:$20 sps:$4 sm:$0xff]   ;;  %v1370_v55 = vld [vmem:[%s1863_s0 + $0xa8] ss:$20 sps:$4 sm:$0xff]   ;;  %v1377_v59 = vld [vmem:[%s1863_s0 + $0xd0] ss:$20 sps:$4 sm:$0xff]  }
  0x14   :  { %1143 = vmatpush3.bf16.msra.mxu0 %v1325_v18  ;;  %v1372_v56 = vld [vmem:[%s1863_s0 + $0xcc] ss:$20 sps:$4 sm:$0xff]   ;;  %v1374_v57 = vld [vmem:[%s1863_s0 + $0xd4] ss:$20 sps:$4 sm:$0xff]   ;;  %v1380_v61 = vld [vmem:[%s1863_s0 + $0xfc] ss:$20 sps:$4 sm:$0xff]  }
  0x15   :  { %1207 = vmatpush3.bf16.msra.mxu1 %v1326_v19  ;;  %1144 = vmatprep.subr.bf16.mxu0 %v1327_v20  ;;  %v1376_v58 = vld [vmem:[%s1863_s0 + $0xc8] ss:$20 sps:$4 sm:$0xff]   ;;  %v1382_v62 = vld [vmem:[%s1863_s0 + $0xf0] ss:$20 sps:$4 sm:$0xff]   ;;  %v1383_v63 = vld [vmem:[%s1863_s0 + $0xf8] ss:$20 sps:$4 sm:$0xff]  }
  0x16   :  { %1208 = vmatprep.subr.bf16.mxu1 %v1328_v21  ;;  %v1378_v60 = vld [vmem:[%s1863_s0 + $0xf4] ss:$20 sps:$4 sm:$0xff]   ;;  %v1385_v0 = vld [vmem:[%s1863_s0 + $0x11c] ss:$20 sps:$4 sm:$0xff]   ;;  %v1387_v1 = vld [vmem:[%s1863_s0 + $0x124] ss:$20 sps:$4 sm:$0xff]  }
  0x17   :  { %v1389_v2 = vld [vmem:[%s1863_s0 + $0x118] ss:$20 sps:$4 sm:$0xff]   ;;  %v1390_v3 = vld [vmem:[%s1863_s0 + $0x120] ss:$20 sps:$4 sm:$0xff]   ;;  %v1391_v4 = vld [vmem:[%s1863_s0 + $0x10] ss:$20 sps:$4 sm:$0xff]  }
  0x18   :  { %1145 = vmatpush3.bf16.msra.mxu0 %v1329_v22  ;;  %v1392_v5 = vld [vmem:[%s1863_s0 + $0xb0] ss:$20 sps:$4 sm:$0xff]   ;;  %v1393_v6 = vld [vmem:[%s1863_s0 + $0x38] ss:$20 sps:$4 sm:$0xff]   ;;  %v1395_v8 = vld [vmem:[%s1863_s0 + $0x60] ss:$20 sps:$4 sm:$0xff]  }
  0x19   :  { %1209 = vmatpush3.bf16.msra.mxu1 %v1330_v23  ;;  %1146 = vmatprep.subr.bf16.mxu0 %v1331_v24  ;;  %v1394_v7 = vld [vmem:[%s1863_s0 + $0xd8] ss:$20 sps:$4 sm:$0xff]   ;;  %v1396_v9 = vld [vmem:[%s1863_s0 + $0x100] ss:$20 sps:$4 sm:$0xff]   ;;  %v1397_v10 = vld [vmem:[%s1863_s0 + $0x88] ss:$20 sps:$4 sm:$0xff]  }
  0x1a   :  { %1210 = vmatprep.subr.bf16.mxu1 %v1332_v25  ;;  %v1398_v11 = vld [vmem:[%s1863_s0 + $0x128] ss:$20 sps:$4 sm:$0xff]   ;;  %25 = vst.msk [vmem:[#allocation2 + $0x10] sm:$0xff] %vm22_vm0, %v1399_v12  ;;  %23 = vst.msk [vmem:[#allocation2] sm:$0xff] %vm22_vm0, %v1399_v12 }
  0x1b   :  { %24 = vst.msk [vmem:[#allocation2 + $0x8] sm:$0xff] %vm22_vm0, %v1399_v12  ;;  %26 = vst.msk [vmem:[#allocation2 + $0x18] sm:$0xff] %vm22_vm0, %v1399_v12 }
  0x1c   :  { %1147 = vmatpush3.bf16.msra.mxu0 %v1333_v26  ;;  %27 = vst.msk [vmem:[#allocation2 + $0x20] sm:$0xff] %vm22_vm0, %v1399_v12  ;;  %28 = vst.msk [vmem:[#allocation2 + $0x28] sm:$0xff] %vm22_vm0, %v1399_v12 }
  0x1d   :  { %1211 = vmatpush3.bf16.msra.mxu1 %v1334_v27  ;;  %1148 = vmatprep.subr.bf16.mxu0 %v1335_v28  ;;  %29 = vst.msk [vmem:[#allocation2 + $0x30] sm:$0xff] %vm22_vm0, %v1399_v12  ;;  %30 = vst.msk [vmem:[#allocation2 + $0x38] sm:$0xff] %vm22_vm0, %v1399_v12 }
  0x1e   :  { %1212 = vmatprep.subr.bf16.mxu1 %v1336_v29  ;;  %31 = vst.msk [vmem:[#allocation2 + $0x40] sm:$0xff] %vm22_vm0, %v1399_v12  ;;  %32 = vst.msk [vmem:[#allocation2 + $0x48] sm:$0xff] %vm22_vm0, %v1399_v12 }
  0x1f   :  { %33 = vst.msk [vmem:[#allocation2 + $0x50] sm:$0xff] %vm22_vm0, %v1399_v12  ;;  %34 = vst.msk [vmem:[#allocation2 + $0x58] sm:$0xff] %vm22_vm0, %v1399_v12 }
  0x20   :  { %1149 = vmatpush3.bf16.msra.mxu0 %v1337_v30  ;;  %35 = vst.msk [vmem:[#allocation2 + $0x60] sm:$0xff] %vm22_vm0, %v1399_v12  ;;  %36 = vst.msk [vmem:[#allocation2 + $0x68] sm:$0xff] %vm22_vm0, %v1399_v12 }
  0x21   :  { %1213 = vmatpush3.bf16.msra.mxu1 %v1338_v31  ;;  %1274 = vmatprep.subr.bf16.mxu0 %v1345_v36  ;;  %37 = vst.msk [vmem:[#allocation2 + $0x70] sm:$0xff] %vm22_vm0, %v1399_v12  ;;  %38 = vst.msk [vmem:[#allocation2 + $0x78] sm:$0xff] %vm22_vm0, %v1399_v12 }
  0x22   :  { %1298 = vmatprep.subr.bf16.mxu1 %v1345_v36 }
  0x23   :  { %649 = vmatmul.mubr.bf16.vlgmr.msra.gmra.mrb[0].mxu0 %v1339_v32 }
  0x24   :  { %746 = vmatmul.mubr.bf16.vlgmr.msra.gmra.mrb[0].mxu1 %v1342_v34  ;;  %1275 = vmatpush3.bf16.msra.mxu0 %v1345_v36 }
  0x25   :  { %1302 = vmatpush3.bf16.msra.mxu1 %v1345_v36  ;;  %656 = vmatprep.mubr.bf16.mxu0 %v1346_v37 }
  0x26   :  { %753 = vmatprep.mubr.bf16.mxu1 %v1348_v38  ;;  %1276 = vmatprep.subr.bf16.mxu0 %v1358_v42 }
  0x27   :  { %1299 = vmatprep.subr.bf16.mxu1 %v1358_v42 }
  0x28   :  { %1277 = vmatpush3.bf16.msra.mxu0 %v1358_v42 }
  0x29   :  { %1303 = vmatpush3.bf16.msra.mxu1 %v1358_v42  ;;  %1278 = vmatprep.subr.bf16.mxu0 %v1371_v46 }
  0x2a   :  { %1300 = vmatprep.subr.bf16.mxu1 %v1371_v46 }
  0x2b   :  { %657 = vmatmul.mubr.bf16.gmra.mrb[4].mxu0 %v1350_v39 }
  0x2c   :  { %754 = vmatmul.mubr.bf16.gmra.mrb[4].mxu1 %v1351_v40  ;;  %664 = vmatprep.mubr.bf16.mxu0 %v1352_v41 }
  0x2d   :  { %761 = vmatprep.mubr.bf16.mxu1 %v1354_v43  ;;  %1279 = vmatpush3.bf16.msra.mxu0 %v1371_v46 }
  0x2e   :  { %1304 = vmatpush3.bf16.msra.mxu1 %v1371_v46  ;;  %1280 = vmatprep.subr.bf16.mxu0 %v1384_v49 }
  0x2f   :  { %1301 = vmatprep.subr.bf16.mxu1 %v1384_v49 }
  0x31   :  { %1281 = vmatpush3.bf16.msra.mxu0 %v1384_v49 }
  0x32   :  { %1305 = vmatpush3.bf16.msra.mxu1 %v1384_v49 }
  0x33   :  { %665 = vmatmul.mubr.bf16.gmra.mrb[8].mxu0 %v1356_v44 }
  0x34   :  { %762 = vmatmul.mubr.bf16.gmra.mrb[8].mxu1 %v1357_v45  ;;  %672 = vmatprep.mubr.bf16.mxu0 %v1359_v47 }
  0x35   :  { %769 = vmatprep.mubr.bf16.mxu1 %v1361_v48 }
  0x3b   :  { %673 = vmatmul.mubr.bf16.gmra.mrb[12].mxu0 %v1363_v50 }
  0x3c   :  { %770 = vmatmul.mubr.bf16.gmra.mrb[12].mxu1 %v1364_v51  ;;  %680 = vmatprep.mubr.bf16.mxu0 %v1365_v52 }
  0x3d   :  { %777 = vmatprep.mubr.bf16.mxu1 %v1367_v53 }
  0x43   :  { %681 = vmatmul.mubr.bf16.gmra.mrb[16].mxu0 %v1369_v54 }
  0x44   :  { %778 = vmatmul.mubr.bf16.gmra.mrb[16].mxu1 %v1370_v55  ;;  %688 = vmatprep.mubr.bf16.mxu0 %v1372_v56 }
  0x45   :  { %785 = vmatprep.mubr.bf16.mxu1 %v1374_v57 }
  0x4b   :  { %689 = vmatmul.mubr.bf16.gmra.mrb[20].mxu0 %v1376_v58 }
  0x4c   :  { %786 = vmatmul.mubr.bf16.gmra.mrb[20].mxu1 %v1377_v59  ;;  %696 = vmatprep.mubr.bf16.mxu0 %v1378_v60 }
  0x4d   :  { %793 = vmatprep.mubr.bf16.mxu1 %v1380_v61 }
  0x53   :  { %697 = vmatmul.mubr.bf16.gmra.mrb[24].mxu0 %v1382_v62 }
  0x54   :  { %794 = vmatmul.mubr.bf16.gmra.mrb[24].mxu1 %v1383_v63  ;;  %704 = vmatprep.mubr.bf16.mxu0 %v1385_v0 }
  0x55   :  { %801 = vmatprep.mubr.bf16.mxu1 %v1387_v1 }
  0x5b   :  { %705 = vmatmul.mubr.bf16.gmra.mrb[28].mxu0 %v1389_v2 }
  0x5c   :  { %802 = vmatmul.mubr.bf16.gmra.mrb[28].mxu1 %v1390_v3  ;;  %1282 = vmatprep.mubr.msk.bf16.mxu0 %vm22_vm0, %v1391_v4 }
  0x5d   :  { %1290 = vmatprep.mubr.msk.bf16.mxu1 %vm22_vm0, %v1392_v5 }
  0x63   :  { %1283 = vmatmul.mubr.msk.bf16.vlgmr.msra.gmra.mrb[32].mxu0 %vm22_vm0, %v1393_v6 }
  0x64   :  { %1291 = vmatmul.mubr.msk.bf16.vlgmr.msra.gmra.mrb[32].mxu1 %vm22_vm0, %v1394_v7  ;;  %1286 = vmatprep.mubr.msk.bf16.mxu0 %vm22_vm0, %v1395_v8 }
  0x65   :  { %1294 = vmatprep.mubr.msk.bf16.mxu1 %vm22_vm0, %v1396_v9 }
  0x6b   :  { %1287 = vmatmul.mubr.msk.bf16.gmra.mrb[36].mxu0 %vm22_vm0, %v1397_v10 }
  0x6c   :  { %1295 = vmatmul.mubr.msk.bf16.gmra.mrb[36].mxu1 %vm22_vm0, %v1398_v11 }
  0xf6   :  { %v1150_v13 = vpop.f32.mrb[0].mxu0 }
  0xf7   :  { %v1214_v14 = vpop.f32.mrb[0].mxu1  ;;  %v1151_v15 = vpop.f32.mrb[1].mxu0 }
  0xf8   :  { %v1152_v16 = vadd.f32 %v1151_v15, %v1150_v13  ;;  %v1215_v17 = vpop.f32.mrb[1].mxu1  ;;  %v1153_v18 = vpop.f32.mrb[2].mxu0 }
  0xf9   :  { %v1216_v19 = vadd.f32 %v1215_v17, %v1214_v14  ;;  %v1217_v20 = vpop.f32.mrb[2].mxu1  ;;  %v1154_v21 = vpop.f32.mrb[3].mxu0 }
  0xfa   :  { %v1155_v22 = vadd.f32 %v1154_v21, %v1153_v18  ;;  %v1218_v23 = vpop.f32.mrb[3].mxu1 }
  0xfb   :  { %v1219_v24 = vadd.f32 %v1218_v23, %v1217_v20  ;;  %v1677_v25 = vadd.f32 %v1216_v19, %v1152_v16 }
  0xfd   :  { %v1679_v26 = vadd.f32 %v1219_v24, %v1155_v22 }
  0xfe   :  { %v1156_v27 = vpop.f32.mrb[4].mxu0 }
  0xff   :  { %v1220_v28 = vpop.f32.mrb[4].mxu1  ;;  %v1157_v29 = vpop.f32.mrb[5].mxu0 }
 0x100   :  { %v1158_v30 = vadd.f32 %v1157_v29, %v1156_v27  ;;  %v1221_v31 = vpop.f32.mrb[5].mxu1  ;;  %v1159_v32 = vpop.f32.mrb[6].mxu0 }
 0x101   :  { %v1222_v33 = vadd.f32 %v1221_v31, %v1220_v28  ;;  %v1223_v34 = vpop.f32.mrb[6].mxu1  ;;  %v1160_v35 = vpop.f32.mrb[7].mxu0 }
 0x102   :  { %v1161_v36 = vadd.f32 %v1160_v35, %v1159_v32  ;;  %v1224_v37 = vpop.f32.mrb[7].mxu1 }
 0x103   :  { %v1225_v38 = vadd.f32 %v1224_v37, %v1223_v34  ;;  %v1681_v39 = vadd.f32 %v1222_v33, %v1158_v30 }
 0x105   :  { %v1683_v40 = vadd.f32 %v1225_v38, %v1161_v36 }
 0x106   :  { %v1162_v41 = vpop.f32.mrb[8].mxu0 }
 0x107   :  { %v1226_v42 = vpop.f32.mrb[8].mxu1  ;;  %v1163_v43 = vpop.f32.mrb[9].mxu0 }
 0x108   :  { %v1164_v44 = vadd.f32 %v1163_v43, %v1162_v41  ;;  %v1227_v45 = vpop.f32.mrb[9].mxu1  ;;  %v1165_v46 = vpop.f32.mrb[10].mxu0 }
 0x109   :  { %v1228_v47 = vadd.f32 %v1227_v45, %v1226_v42  ;;  %v1229_v48 = vpop.f32.mrb[10].mxu1  ;;  %v1166_v49 = vpop.f32.mrb[11].mxu0 }
 0x10a   :  { %v1167_v50 = vadd.f32 %v1166_v49, %v1165_v46  ;;  %v1230_v51 = vpop.f32.mrb[11].mxu1 }
 0x10b   :  { %v1231_v52 = vadd.f32 %v1230_v51, %v1229_v48  ;;  %v1685_v53 = vadd.f32 %v1228_v47, %v1164_v44 }
 0x10d   :  { %v1687_v54 = vadd.f32 %v1231_v52, %v1167_v50 }
 0x10e   :  { %v1168_v55 = vpop.f32.mrb[12].mxu0 }
 0x10f   :  { %v1232_v56 = vpop.f32.mrb[12].mxu1  ;;  %v1169_v57 = vpop.f32.mrb[13].mxu0 }
 0x110   :  { %v1170_v58 = vadd.f32 %v1169_v57, %v1168_v55  ;;  %v1233_v59 = vpop.f32.mrb[13].mxu1  ;;  %v1171_v60 = vpop.f32.mrb[14].mxu0 }
 0x111   :  { %v1234_v61 = vadd.f32 %v1233_v59, %v1232_v56  ;;  %v1235_v62 = vpop.f32.mrb[14].mxu1  ;;  %v1172_v63 = vpop.f32.mrb[15].mxu0 }
 0x112   :  { %v1173_v0 = vadd.f32 %v1172_v63, %v1171_v60  ;;  %v1236_v1 = vpop.f32.mrb[15].mxu1 }
 0x113   :  { %v1237_v2 = vadd.f32 %v1236_v1, %v1235_v62  ;;  %v1689_v3 = vadd.f32 %v1234_v61, %v1170_v58 }
 0x115   :  { %v1691_v4 = vadd.f32 %v1237_v2, %v1173_v0 }
 0x116   :  { %v1174_v5 = vpop.f32.mrb[16].mxu0 }
 0x117   :  { %v1238_v6 = vpop.f32.mrb[16].mxu1  ;;  %v1175_v7 = vpop.f32.mrb[17].mxu0 }
 0x118   :  { %v1176_v8 = vadd.f32 %v1175_v7, %v1174_v5  ;;  %v1239_v9 = vpop.f32.mrb[17].mxu1  ;;  %v1177_v10 = vpop.f32.mrb[18].mxu0  ;;  %v41_v5 = vld [vmem:[#allocation2 + $0x10] sm:$0xff] }
 0x119   :  { %v1240_v11 = vadd.f32 %v1239_v9, %v1238_v6  ;;  %v1241_v12 = vpop.f32.mrb[18].mxu1  ;;  %v1178_v13 = vpop.f32.mrb[19].mxu0 }
 0x11a   :  { %v1179_v14 = vadd.f32 %v1178_v13, %v1177_v10  ;;  %v1242_v15 = vpop.f32.mrb[19].mxu1  ;;  %v39_v10 = vld [vmem:[#allocation2] sm:$0xff] }
 0x11b   :  { %v1243_v16 = vadd.f32 %v1242_v15, %v1241_v12  ;;  %v780_v17 = vadd.f32 %v1240_v11, %v1176_v8  ;;  %v49_v8 = vld [vmem:[#allocation2 + $0x50] sm:$0xff] }
 0x11d   :  { %v1693_v18 = vadd.f32 %v1243_v16, %v1179_v14  ;;  %v47_v14 = vld [vmem:[#allocation2 + $0x40] sm:$0xff]  ;;  %v42_v16 = vld [vmem:[#allocation2 + $0x18] sm:$0xff] }
 0x11e   :  { %v1180_v19 = vpop.f32.mrb[20].mxu0 }
 0x11f   :  { %v1244_v20 = vpop.f32.mrb[20].mxu1  ;;  %v1181_v21 = vpop.f32.mrb[21].mxu0 }
 0x120   :  { %v1182_v22 = vadd.f32 %v1181_v21, %v1180_v19  ;;  %v1245_v23 = vpop.f32.mrb[21].mxu1  ;;  %v1183_v24 = vpop.f32.mrb[22].mxu0 }
 0x121   :  { %v1246_v27 = vadd.f32 %v1245_v23, %v1244_v20  ;;  %v1247_v28 = vpop.f32.mrb[22].mxu1  ;;  %v1184_v29 = vpop.f32.mrb[23].mxu0  ;;  %v50_v23 = vld [vmem:[#allocation2 + $0x58] sm:$0xff] }
 0x122   :  { %v1185_v30 = vadd.f32 %v1184_v29, %v1183_v24  ;;  %v1248_v31 = vpop.f32.mrb[23].mxu1 }
 0x123   :  { %v1249_v32 = vadd.f32 %v1248_v31, %v1247_v28  ;;  %v788_v33 = vadd.f32 %v1246_v27, %v1182_v22  ;;  %v40_v27 = vld [vmem:[#allocation2 + $0x8] sm:$0xff] }
 0x125   :  { %v791_v34 = vadd.f32 %v1249_v32, %v1185_v30  ;;  %v48_v32 = vld [vmem:[#allocation2 + $0x48] sm:$0xff] }
 0x126   :  { %v1186_v35 = vpop.f32.mrb[24].mxu0 }
 0x127   :  { %v1250_v36 = vpop.f32.mrb[24].mxu1  ;;  %v1187_v37 = vpop.f32.mrb[25].mxu0 }
 0x128   :  { %v1188_v38 = vadd.f32 %v1187_v37, %v1186_v35  ;;  %v1251_v41 = vpop.f32.mrb[25].mxu1  ;;  %v1189_v42 = vpop.f32.mrb[26].mxu0 }
 0x129   :  { %v1252_v43 = vadd.f32 %v1251_v41, %v1250_v36  ;;  %v1253_v44 = vpop.f32.mrb[26].mxu1  ;;  %v1190_v45 = vpop.f32.mrb[27].mxu0 }
 0x12a   :  { %v1191_v46 = vadd.f32 %v1190_v45, %v1189_v42  ;;  %v1254_v47 = vpop.f32.mrb[27].mxu1  ;;  %v51_v45 = vld [vmem:[#allocation2 + $0x60] sm:$0xff] }
 0x12b   :  { %v1255_v48 = vadd.f32 %v1254_v47, %v1253_v44  ;;  %v1695_v49 = vadd.f32 %v1252_v43, %v1188_v38  ;;  %v53_v38 = vld [vmem:[#allocation2 + $0x70] sm:$0xff]  ;;  %v43_v43 = vld [vmem:[#allocation2 + $0x20] sm:$0xff] }
 0x12d   :  { %v1697_v50 = vadd.f32 %v1255_v48, %v1191_v46  ;;  %v983_v46 = vld [vmem:[%s1865_s3 + $0x10] sm:$0xff] }
 0x12e   :  { %v1192_v51 = vpop.f32.mrb[28].mxu0 }
 0x12f   :  { %v1256_v52 = vpop.f32.mrb[28].mxu1  ;;  %v1193_v55 = vpop.f32.mrb[29].mxu0 }
 0x130   :  { %v1194_v56 = vadd.f32 %v1193_v55, %v1192_v51  ;;  %v1257_v57 = vpop.f32.mrb[29].mxu1  ;;  %v1195_v58 = vpop.f32.mrb[30].mxu0 }
 0x131   :  { %v1258_v59 = vadd.f32 %v1257_v57, %v1256_v52  ;;  %v1259_v60 = vpop.f32.mrb[30].mxu1  ;;  %v1196_v61 = vpop.f32.mrb[31].mxu0  ;;  %v46_v52 = vld [vmem:[#allocation2 + $0x38] sm:$0xff]  ;;  %v991_v57 = vld [vmem:[%s1865_s3 + $0x50] sm:$0xff] }
 0x132   :  { %v1197_v62 = vadd.f32 %v1196_v61, %v1195_v58  ;;  %v1260_v63 = vpop.f32.mrb[31].mxu1  ;;  %v44_v61 = vld [vmem:[#allocation2 + $0x28] sm:$0xff] }
 0x133   :  { %v1261_v0 = vadd.f32 %v1260_v63, %v1259_v60  ;;  %v804_v1 = vadd.f32 %v1258_v59, %v1194_v56  ;;  %v54_v56 = vld [vmem:[#allocation2 + $0x78] sm:$0xff]  ;;  %v52_v63 = vld [vmem:[#allocation2 + $0x68] sm:$0xff] }
 0x135   :  { %v1699_v2 = vadd.f32 %v1261_v0, %v1197_v62 }
 0x136   :  { %v1284_v6 = vpop.f32.mrb[32].mxu0 }
 0x137   :  { %v853_v7 = vadd.f32 %v1284_v6, %v1681_v39  ;;  %v1292_v9 = vpop.f32.mrb[32].mxu1  ;;  %v844_v11 = vpop.f32.mrb[33].mxu0 }
 0x138   :  { %v885_v12 = vadd.f32 %v1292_v9, %v788_v33  ;;  %v845_v13 = vadd.f32 %v844_v11, %v1677_v25  ;;  %v876_v15 = vpop.f32.mrb[33].mxu1  ;;  %v1285_v19 = vpop.f32.mrb[34].mxu0  ;;  %v984_v11 = vld [vmem:[%s1865_s3 + $0x18] sm:$0xff] }
 0x139   :  { %v909_v20 = vadd.f32 %v853_v7, %v41_v5  ;;  %v877_v21 = vadd.f32 %v876_v15, %v780_v17  ;;  %v856_v22 = vadd.f32 %v1285_v19, %v1683_v40  ;;  %v1293_v24 = vpop.f32.mrb[34].mxu1  ;;  %v847_v28 = vpop.f32.mrb[35].mxu0  ;;  %v992_v19 = vld [vmem:[%s1865_s3 + $0x58] sm:$0xff] }
 0x13a   :  { %v917_v39 = vadd.f32 %v885_v12, %v49_v8  ;;  %v907_v29 = vadd.f32 %v845_v13, %v39_v10  ;;  %v888_v30 = vadd.f32 %v1293_v24, %v791_v34  ;;  %v848_v31 = vadd.f32 %v847_v28, %v1679_v26  ;;  %v879_v33 = vpop.f32.mrb[35].mxu1  ;;  %v45_v26 = vld [vmem:[#allocation2 + $0x30] sm:$0xff]  ;;  %v982_v28 = vld [vmem:[%s1865_s3 + $0x8] sm:$0xff] }
 0x13b   :  { %925 = vst.msk [vmem:[#allocation2 + $0x10] sm:$0xff] %vm22_vm0, %v909_v20  ;;  %v915_v25 = vadd.f32 %v877_v21, %v47_v14  ;;  %v910_v35 = vadd.f32 %v856_v22, %v42_v16  ;;  %v880_v36 = vadd.f32 %v879_v33, %v1693_v18  ;;  %v1716_v18 = vld [vmem:[%s1864_s2] ss:$0 sm:$0xff] }
 0x13c   :  { %933 = vst.msk [vmem:[#allocation2 + $0x50] sm:$0xff] %vm22_vm0, %v917_v39  ;;  %923 = vst.msk [vmem:[#allocation2] sm:$0xff] %vm22_vm0, %v907_v29  ;;  %v918_v40 = vadd.f32 %v888_v30, %v50_v23  ;;  %v908_v17 = vadd.f32 %v848_v31, %v40_v27 }
 0x13d   :  { %931 = vst.msk [vmem:[#allocation2 + $0x40] sm:$0xff] %vm22_vm0, %v915_v25  ;;  %926 = vst.msk [vmem:[#allocation2 + $0x18] sm:$0xff] %vm22_vm0, %v910_v35  ;;  %v916_v34 = vadd.f32 %v880_v36, %v48_v32  ;;  %v990_v25 = vld [vmem:[%s1865_s3 + $0x48] sm:$0xff] }
 0x13e   :  { %934 = vst.msk [vmem:[#allocation2 + $0x58] sm:$0xff] %vm22_vm0, %v918_v40  ;;  %924 = vst.msk [vmem:[#allocation2 + $0x8] sm:$0xff] %vm22_vm0, %v908_v17  ;;  %v1288_v37 = vpop.f32.mrb[36].mxu0 }
 0x13f   :  { %932 = vst.msk [vmem:[#allocation2 + $0x48] sm:$0xff] %vm22_vm0, %v916_v34  ;;  %v869_v41 = vadd.f32 %v1288_v37, %v1689_v3  ;;  %v1296_v42 = vpop.f32.mrb[36].mxu1  ;;  %v860_v44 = vpop.f32.mrb[37].mxu0 }
 0x140   :  { %v901_v47 = vadd.f32 %v1296_v42, %v804_v1  ;;  %v861_v48 = vadd.f32 %v860_v44, %v1685_v53  ;;  %v892_v51 = vpop.f32.mrb[37].mxu1  ;;  %v1289_v55 = vpop.f32.mrb[38].mxu0  ;;  %v981_v53 = vld [vmem:[%s1865_s3] sm:$0xff]  ;;  %v987_v44 = vld [vmem:[%s1865_s3 + $0x30] sm:$0xff] }
 0x141   :  { %v913_v3 = vadd.f32 %v869_v41, %v45_v26  ;;  %v893_v58 = vadd.f32 %v892_v51, %v1695_v49  ;;  %v872_v59 = vadd.f32 %v1289_v55, %v1691_v4  ;;  %v1297_v60 = vpop.f32.mrb[38].mxu1  ;;  %v863_v62 = vpop.f32.mrb[39].mxu0  ;;  %v989_v1 = vld [vmem:[%s1865_s3 + $0x40] sm:$0xff] }
 0x142   :  { %v944_v0 = vld [vmem:[#allocation2 + $0x10] sm:$0xff]  ;;  %v921_v5 = vadd.f32 %v901_v47, %v53_v38  ;;  %v911_v6 = vadd.f32 %v861_v48, %v43_v43  ;;  %v904_v7 = vadd.f32 %v1297_v60, %v1699_v2  ;;  %v864_v49 = vadd.f32 %v863_v62, %v1687_v54  ;;  %v895_v4 = vpop.f32.mrb[39].mxu1  ;;  %v985_v51 = vld [vmem:[%s1865_s3 + $0x20] sm:$0xff] }
 0x143   :  { %v967_v8 = vadd.f32 %v1716_v18, %v944_v0  ;;  %v952_v9 = vld [vmem:[#allocation2 + $0x50] sm:$0xff]  ;;  %v942_v10 = vld [vmem:[#allocation2] sm:$0xff]  ;;  %929 = vst.msk [vmem:[#allocation2 + $0x30] sm:$0xff] %vm22_vm0, %v913_v3  ;;  %v919_v12 = vadd.f32 %v893_v58, %v51_v45  ;;  %v914_v13 = vadd.f32 %v872_v59, %v46_v52  ;;  %v896_v14 = vadd.f32 %v895_v4, %v1697_v50  ;;  %v988_v58 = vld [vmem:[%s1865_s3 + $0x38] sm:$0xff] }
 0x144   :  { %v975_v15 = vadd.f32 %v1716_v18, %v952_v9  ;;  %v965_v2 = vadd.f32 %v1716_v18, %v942_v10  ;;  %v950_v54 = vld [vmem:[#allocation2 + $0x40] sm:$0xff]  ;;  %v945_v16 = vld [vmem:[#allocation2 + $0x18] sm:$0xff]  ;;  %937 = vst.msk [vmem:[#allocation2 + $0x70] sm:$0xff] %vm22_vm0, %v921_v5  ;;  %927 = vst.msk [vmem:[#allocation2 + $0x20] sm:$0xff] %vm22_vm0, %v911_v6  ;;  %v922_v20 = vadd.f32 %v904_v7, %v54_v56 }
 0x145   :  { %v912_v21 = vadd.f32 %v864_v49, %v44_v61  ;;  %v999_v22 = vadd.f32 %v983_v46, %v967_v8  ;;  %v973_v23 = vadd.f32 %v1716_v18, %v950_v54  ;;  %v968_v50 = vadd.f32 %v1716_v18, %v945_v16  ;;  %v953_v24 = vld [vmem:[#allocation2 + $0x58] sm:$0xff]  ;;  %v943_v27 = vld [vmem:[#allocation2 + $0x8] sm:$0xff]  ;;  %935 = vst.msk [vmem:[#allocation2 + $0x60] sm:$0xff] %vm22_vm0, %v919_v12  ;;  %v995_v45 = vld [vmem:[%s1865_s3 + $0x70] sm:$0xff] }
 0x146   :  { %930 = vst.msk [vmem:[#allocation2 + $0x38] sm:$0xff] %vm22_vm0, %v914_v13  ;;  %v920_v39 = vadd.f32 %v896_v14, %v52_v63  ;;  %v1007_v29 = vadd.f32 %v991_v57, %v975_v15  ;;  %v997_v30 = vadd.f32 %v981_v53, %v965_v2  ;;  %v976_v31 = vadd.f32 %v1716_v18, %v953_v24  ;;  %v951_v33 = vld [vmem:[#allocation2 + $0x48] sm:$0xff]  ;;  %v993_v52 = vld [vmem:[%s1865_s3 + $0x60] sm:$0xff]  ;;  %v996_v63 = vld [vmem:[%s1865_s3 + $0x78] sm:$0xff] }
 0x147   :  { %v966_v32 = vadd.f32 %v1716_v18, %v943_v27  ;;  %938 = vst.msk [vmem:[#allocation2 + $0x78] sm:$0xff] %vm22_vm0, %v922_v20  ;;  %928 = vst.msk [vmem:[#allocation2 + $0x28] sm:$0xff] %vm22_vm0, %v912_v21  ;;  %v1015_v35 = vmax.f32 %v999_v22, 0.0  ;;  %v1005_v36 = vadd.f32 %v989_v1, %v973_v23  ;;  %v1000_v40 = vadd.f32 %v984_v11, %v968_v50  ;;  %v986_v7 = vld [vmem:[%s1865_s3 + $0x28] sm:$0xff] }
 0x148   :  { %v974_v17 = vadd.f32 %v1716_v18, %v951_v33  ;;  %936 = vst.msk [vmem:[#allocation2 + $0x68] sm:$0xff] %vm22_vm0, %v920_v39  ;;  %v1023_v34 = vmax.f32 %v1007_v29, 0.0  ;;  %v1013_v26 = vmax.f32 %v997_v30, 0.0  ;;  %v1008_v37 = vadd.f32 %v992_v19, %v976_v31  ;;  %v994_v11 = vld [vmem:[%s1865_s3 + $0x68] sm:$0xff] }
 0x149   :  { %v998_v38 = vadd.f32 %v982_v28, %v966_v32  ;;  %1031 = vst.msk [vmem:[%s1866_s4 + $0x10] sm:$0xff] %vm22_vm0, %v1015_v35  ;;  %v1021_v41 = vmax.f32 %v1005_v36, 0.0  ;;  %v1016_v42 = vmax.f32 %v1000_v40, 0.0 }
 0x14a   :  { %v1006_v43 = vadd.f32 %v990_v25, %v974_v17  ;;  %1039 = vst.msk [vmem:[%s1866_s4 + $0x50] sm:$0xff] %vm22_vm0, %v1023_v34  ;;  %1029 = vst.msk [vmem:[%s1866_s4] sm:$0xff] %vm22_vm0, %v1013_v26  ;;  %v1024_v46 = vmax.f32 %v1008_v37, 0.0  ;;  %v948_v48 = vld [vmem:[#allocation2 + $0x30] sm:$0xff] }
 0x14b   :  { %v1014_v47 = vmax.f32 %v998_v38, 0.0  ;;  %1037 = vst.msk [vmem:[%s1866_s4 + $0x40] sm:$0xff] %vm22_vm0, %v1021_v41  ;;  %1032 = vst.msk [vmem:[%s1866_s4 + $0x18] sm:$0xff] %vm22_vm0, %v1016_v42  ;;  %v971_v56 = vadd.f32 %v1716_v18, %v948_v48  ;;  %v956_v57 = vld [vmem:[#allocation2 + $0x70] sm:$0xff]  ;;  %v946_v3 = vld [vmem:[#allocation2 + $0x20] sm:$0xff] }
 0x14c   :  { %v1022_v55 = vmax.f32 %v1006_v43, 0.0  ;;  %1040 = vst.msk [vmem:[%s1866_s4 + $0x58] sm:$0xff] %vm22_vm0, %v1024_v46  ;;  %v979_v59 = vadd.f32 %v1716_v18, %v956_v57  ;;  %v969_v60 = vadd.f32 %v1716_v18, %v946_v3  ;;  %v954_v61 = vld [vmem:[#allocation2 + $0x60] sm:$0xff] }
 0x14d   :  { %1030 = vst.msk [vmem:[%s1866_s4 + $0x8] sm:$0xff] %vm22_vm0, %v1014_v47  ;;  %v949_v62 = vld [vmem:[#allocation2 + $0x38] sm:$0xff]  ;;  %v1003_v0 = vadd.f32 %v987_v44, %v971_v56  ;;  %v977_v53 = vadd.f32 %v1716_v18, %v954_v61 }
 0x14e   :  { %1038 = vst.msk [vmem:[%s1866_s4 + $0x48] sm:$0xff] %vm22_vm0, %v1022_v55  ;;  %v972_v1 = vadd.f32 %v1716_v18, %v949_v62  ;;  %v957_v5 = vld [vmem:[#allocation2 + $0x78] sm:$0xff]  ;;  %v947_v6 = vld [vmem:[#allocation2 + $0x28] sm:$0xff]  ;;  %v1011_v49 = vadd.f32 %v995_v45, %v979_v59  ;;  %v1001_v4 = vadd.f32 %v985_v51, %v969_v60 }
 0x14f   :  { %v980_v8 = vadd.f32 %v1716_v18, %v957_v5  ;;  %v970_v9 = vadd.f32 %v1716_v18, %v947_v6  ;;  %v955_v10 = vld [vmem:[#allocation2 + $0x68] sm:$0xff]  ;;  %v1019_v12 = vmax.f32 %v1003_v0, 0.0  ;;  %v1009_v13 = vadd.f32 %v993_v52, %v977_v53 }
 0x150   :  { %v1004_v14 = vadd.f32 %v988_v58, %v972_v1  ;;  %v978_v15 = vadd.f32 %v1716_v18, %v955_v10  ;;  %v1027_v2 = vmax.f32 %v1011_v49, 0.0  ;;  %v1017_v54 = vmax.f32 %v1001_v4, 0.0 }
 0x151   :  { %v1012_v16 = vadd.f32 %v996_v63, %v980_v8  ;;  %v1002_v19 = vadd.f32 %v986_v7, %v970_v9  ;;  %1035 = vst.msk [vmem:[%s1866_s4 + $0x30] sm:$0xff] %vm22_vm0, %v1019_v12  ;;  %v1025_v20 = vmax.f32 %v1009_v13, 0.0 }
 0x152   :  { %v1020_v21 = vmax.f32 %v1004_v14, 0.0  ;;  %v1010_v22 = vadd.f32 %v994_v11, %v978_v15  ;;  %1043 = vst.msk [vmem:[%s1866_s4 + $0x70] sm:$0xff] %vm22_vm0, %v1027_v2  ;;  %1033 = vst.msk [vmem:[%s1866_s4 + $0x20] sm:$0xff] %vm22_vm0, %v1017_v54 }
 0x153   :  { %v1028_v18 = vmax.f32 %v1012_v16, 0.0  ;;  %v1018_v23 = vmax.f32 %v1002_v19, 0.0  ;;  %1041 = vst.msk [vmem:[%s1866_s4 + $0x60] sm:$0xff] %vm22_vm0, %v1025_v20 }
 0x154   :  { %1036 = vst.msk [vmem:[%s1866_s4 + $0x38] sm:$0xff] %vm22_vm0, %v1020_v21  ;;  %v1026_v50 = vmax.f32 %v1010_v22, 0.0 }
 0x155   :  { %1044 = vst.msk [vmem:[%s1866_s4 + $0x78] sm:$0xff] %vm22_vm0, %v1028_v18  ;;  %1034 = vst.msk [vmem:[%s1866_s4 + $0x28] sm:$0xff] %vm22_vm0, %v1018_v23 }
 0x156   :  { %1042 = vst.msk [vmem:[%s1866_s4 + $0x68] sm:$0xff] %vm22_vm0, %v1026_v50 }

// kernel: _lambda_.22
= control target key start
LH: loop header
LB: loop body
LE: loop exit
PB: predicated region body
PF: predicated region fallthrough
CT: control target
= control target key end

     0   :  { %s1349_s12 = smov 0   ;;  %s1351_s13 = smov 0   ;;  %s1656_s0 = inlined_call_operand.vmem [shape: bf16[512,147], index: 0, kind: input, shape index: {}]   ;;  %s1657_s1 = inlined_call_operand.vmem [shape: bf16[147,64], index: 1, kind: input, shape index: {}]   ;;  %s1658_s2 = inlined_call_operand.vmem [shape: f32[1,64], index: 2, kind: input, shape index: {}]   ;;  %s1659_s3 = inlined_call_operand.vmem [shape: f32[512,64], index: 3, kind: output, shape index: {}]  }
   0x1   :  { %s1353_s14 = smov 0  }
   0x2 LB: > { %s32_s15 = sadd.s32 1, %s1320_s13  ;;  %p1129_p0 = scmp.ge.s32.totalorder %s1324_s14, 1  ;;  %s1324_s14 = sphi %s1353_s14, %s13_s14   ;;  %s1320_s13 = sphi %s1351_s13, %s1661_s13   ;;  %s1316_s12 = sphi %s1349_s12, %s1660_s12  }
   0x3   : > { %p34_p1 = scmp.ge.s32.totalorder %s32_s15, 2  ;;  %p191_p2 = scmp.lt.s32.totalorder %s1324_s14, 3 }
   0x5   : > { %s1663_s15 = smov (%p34_p1, %s32_s15), 0  ;;  %p192_p3 = pnand %p1129_p0, %p191_p2 }
   0x6   : > { %v1244_v0 = vld [vmem:[%s1657_s1] sm:$0xff] (!%p192_p3)   ;;  %v1326_v1 = vmov (!%p192_p3), 0   ;;  %v1245_v2 = vld [vmem:[%s1657_s1 + $0x8] sm:$0xff] (!%p192_p3)   ;;  %v1246_v3 = vld [vmem:[%s1657_s1 + $0x10] sm:$0xff] (!%p192_p3)   ;;  %s1130_s22 = sshll.u32 (!%p192_p3), %s1316_s12, 5  ;;  %vm272_vm0 = vcmask (!%p192_p3), 523264  }
   0x7   : > { %195 = sbr.rel (%p192_p3) target bundleno = 333 (0x14d), region = 32  ;;  %645 = vmatprep.subr.bf16.mxu0 (!%p192_p3), %v1326_v1  ;;  %1197 = vmatprep.subr.bf16.mxu1 (!%p192_p3), %v1326_v1  ;;  %p236_p4 = scmp.lt.s32.totalorder (!%p192_p3), %s1130_s22, 63  ;;  %v1247_v4 = vld [vmem:[%s1657_s1 + $0x18] sm:$0xff] (!%p192_p3)   ;;  %v1327_v5 = vmov (!%p192_p3), 0.0   ;;  %v1248_v6 = vld [vmem:[%s1657_s1 + $0x20] sm:$0xff] (!%p192_p3)   ;;  %vm589_vm1 = vcmask (!%p192_p3), 154624  }
   0x8   : > { %646 = vmatpush1.bf16.msra.mxu0 (!%p192_p3), %v1244_v0  ;;  %1207 = vmatpush1.bf16.msra.mxu1 (!%p192_p3), %v1244_v0  ;;  %273 = vst.msk [vmem:[#allocation2] sm:$0xff] (!%p192_p3), %vm272_vm0, %v1327_v5  ;;  %274 = vst.msk [vmem:[#allocation2 + $0x8] sm:$0xff] (!%p192_p3), %vm272_vm0, %v1327_v5  ;;  %v1249_v9 = vld [vmem:[%s1657_s1 + $0x28] sm:$0xff] (!%p192_p3)   ;;  %v1250_v10 = vld [vmem:[%s1657_s1 + $0x30] sm:$0xff] (!%p192_p3)   ;;  %vm638_vm2 = vcmask (!%p192_p3), 1040384   ;;  %vm639_vm3 = vcmask (!%p192_p3), 1041408  }
   0x9   : > { %647 = vmatprep.subr.bf16.mxu0 (!%p192_p3), %v1326_v1  ;;  %1198 = vmatprep.subr.bf16.mxu1 (!%p192_p3), %v1326_v1  ;;  %275 = vst.msk [vmem:[#allocation2 + $0x10] sm:$0xff] (!%p192_p3), %vm272_vm0, %v1327_v5  ;;  %276 = vst.msk [vmem:[#allocation2 + $0x18] sm:$0xff] (!%p192_p3), %vm272_vm0, %v1327_v5  ;;  %v1251_v11 = vld [vmem:[%s1657_s1 + $0x38] sm:$0xff] (!%p192_p3)   ;;  %v1328_v12 = vmov (!%p192_p3), 65535   ;;  %v1252_v14 = vld [vmem:[%s1657_s1 + $0x40] sm:$0xff] (!%p192_p3)  }
   0xa   : > { %277 = vst.msk [vmem:[#allocation2 + $0x20] sm:$0xff] (!%p192_p3), %vm272_vm0, %v1327_v5  ;;  %278 = vst.msk [vmem:[#allocation2 + $0x28] sm:$0xff] (!%p192_p3), %vm272_vm0, %v1327_v5  ;;  %v640_v13 = vsel (!%p192_p3), %vm638_vm2, 4294967295, %v1328_v12  ;;  %v1253_v15 = vld [vmem:[%s1657_s1 + $0x48] ss:$0 sps:$4 sm:$0x33] (!%p192_p3)  }
   0xb   : > { %279 = vst.msk [vmem:[#allocation2 + $0x30] sm:$0xff] (!%p192_p3), %vm272_vm0, %v1327_v5  ;;  %280 = vst.msk [vmem:[#allocation2 + $0x38] sm:$0xff] (!%p192_p3), %vm272_vm0, %v1327_v5  ;;  %v641_v16 = vsel (!%p192_p3), %vm639_vm3, %v640_v13, 0 }
   0xc   : > { %648 = vmatpush1.bf16.msra.mxu0 (!%p192_p3), %v1245_v2  ;;  %1208 = vmatpush1.bf16.msra.mxu1 (!%p192_p3), %v1245_v2  ;;  %281 = vst.msk [vmem:[#allocation2 + $0x40] sm:$0xff] (!%p192_p3), %vm272_vm0, %v1327_v5  ;;  %282 = vst.msk [vmem:[#allocation2 + $0x48] sm:$0xff] (!%p192_p3), %vm272_vm0, %v1327_v5  ;;  %v643_v17 = vand.u32 (!%p192_p3), %v1253_v15, %v641_v16  ;;  %v1514_v2 = vld [vmem:[%s1658_s2] ss:$0 sm:$0xff] (!%p192_p3) }
   0xd   : > { %649 = vmatprep.subr.bf16.mxu0 (!%p192_p3), %v1326_v1  ;;  %1199 = vmatprep.subr.bf16.mxu1 (!%p192_p3), %v1326_v1  ;;  %283 = vst.msk [vmem:[#allocation2 + $0x50] sm:$0xff] (!%p192_p3), %vm272_vm0, %v1327_v5  ;;  %284 = vst.msk [vmem:[#allocation2 + $0x58] sm:$0xff] (!%p192_p3), %vm272_vm0, %v1327_v5 }
   0xe   : > { %s1665_s22 = smov (!%p236_p4, %s1130_s22), 63  ;;  %285 = vst.msk [vmem:[#allocation2 + $0x60] sm:$0xff] %vm272_vm0, %v1327_v5  ;;  %286 = vst.msk [vmem:[#allocation2 + $0x68] sm:$0xff] %vm272_vm0, %v1327_v5 }
   0xf   : > { %s1196_s25 = sshll.u32 %s1665_s22, 3  ;;  %287 = vst.msk [vmem:[#allocation2 + $0x70] sm:$0xff] %vm272_vm0, %v1327_v5  ;;  %288 = vst.msk [vmem:[#allocation2 + $0x78] sm:$0xff] %vm272_vm0, %v1327_v5  ;;  %v305_v48 = vld [vmem:[#allocation2] sm:$0xff]  ;;  %v306_v52 = vld [vmem:[#allocation2 + $0x8] sm:$0xff] }
  0x10   : > { %650 = vmatpush1.bf16.msra.mxu0 %v1246_v3  ;;  %1209 = vmatpush1.bf16.msra.mxu1 %v1246_v3  ;;  %289 = vst.msk [vmem:[#allocation2 + $0x80] sm:$0xff] %vm272_vm0, %v1327_v5  ;;  %290 = vst.msk [vmem:[#allocation2 + $0x88] sm:$0xff] %vm272_vm0, %v1327_v5  ;;  %s1427_s28 = scalar_lea.vmem %s1656_s0, %s1196_s25  ;;  %v307_v0 = vld [vmem:[#allocation2 + $0x10] sm:$0xff]  ;;  %s1525_s21 = scalar_lea.vmem %s1659_s3, %s1196_s25 }
  0x11   : > { %651 = vmatprep.subr.bf16.mxu0 %v1326_v1  ;;  %1200 = vmatprep.subr.bf16.mxu1 %v1326_v1  ;;  %291 = vst.msk [vmem:[#allocation2 + $0x90] sm:$0xff] %vm272_vm0, %v1327_v5  ;;  %292 = vst.msk [vmem:[#allocation2 + $0x98] sm:$0xff] %vm272_vm0, %v1327_v5  ;;  %v1256_v7 = vld [vmem:[%s1427_s28 + $0x4] ss:$8 sps:$4 sm:$0xff]   ;;  %v1254_v18 = vld [vmem:[%s1427_s28] ss:$8 sps:$4 sm:$0xff]  }
  0x12   : > { %293 = vst.msk [vmem:[#allocation2 + $0xa0] sm:$0xff] %vm272_vm0, %v1327_v5  ;;  %294 = vst.msk [vmem:[#allocation2 + $0xa8] sm:$0xff] %vm272_vm0, %v1327_v5  ;;  %v1259_v8 = vld [vmem:[%s1427_s28 + $0x84] ss:$8 sps:$4 sm:$0xff]   ;;  %1177 = vmatprep.mubr.msk.bf16.mxu0 %vm589_vm1, %v1256_v7  ;;  %v1257_v19 = vld [vmem:[%s1427_s28 + $0x80] ss:$8 sps:$4 sm:$0xff]  }
  0x13   : > { %295 = vst.msk [vmem:[#allocation2 + $0xb0] sm:$0xff] %vm272_vm0, %v1327_v5  ;;  %296 = vst.msk [vmem:[#allocation2 + $0xb8] sm:$0xff] %vm272_vm0, %v1327_v5  ;;  %1185 = vmatprep.mubr.msk.bf16.mxu1 %vm589_vm1, %v1259_v8  ;;  %v1260_v20 = vld [vmem:[%s1427_s28 + $0x14] ss:$8 sps:$4 sm:$0xff]   ;;  %v1264_v22 = vld [vmem:[%s1427_s28 + $0x10] ss:$8 sps:$4 sm:$0xff]  }
  0x14   : > { %297 = vst.msk [vmem:[#allocation2 + $0xc0] sm:$0xff] %vm272_vm0, %v1327_v5  ;;  %298 = vst.msk [vmem:[#allocation2 + $0xc8] sm:$0xff] %vm272_vm0, %v1327_v5  ;;  %652 = vmatpush1.bf16.msra.mxu0 %v1247_v4  ;;  %1210 = vmatpush1.bf16.msra.mxu1 %v1247_v4  ;;  %v1262_v21 = vld [vmem:[%s1427_s28 + $0x94] ss:$8 sps:$4 sm:$0xff]   ;;  %v1265_v23 = vld [vmem:[%s1427_s28 + $0x90] ss:$8 sps:$4 sm:$0xff]  }
  0x15   : > { %299 = vst.msk [vmem:[#allocation2 + $0xd0] sm:$0xff] %vm272_vm0, %v1327_v5  ;;  %300 = vst.msk [vmem:[#allocation2 + $0xd8] sm:$0xff] %vm272_vm0, %v1327_v5  ;;  %653 = vmatprep.subr.bf16.mxu0 %v1326_v1  ;;  %1201 = vmatprep.subr.bf16.mxu1 %v1326_v1  ;;  %v1266_v24 = vld [vmem:[%s1427_s28 + $0x24] ss:$8 sps:$4 sm:$0xff]   ;;  %v1270_v26 = vld [vmem:[%s1427_s28 + $0x20] ss:$8 sps:$4 sm:$0xff]  }
  0x16   : > { %301 = vst.msk [vmem:[#allocation2 + $0xe0] sm:$0xff] %vm272_vm0, %v1327_v5  ;;  %302 = vst.msk [vmem:[#allocation2 + $0xe8] sm:$0xff] %vm272_vm0, %v1327_v5  ;;  %v1268_v25 = vld [vmem:[%s1427_s28 + $0xa4] ss:$8 sps:$4 sm:$0xff]   ;;  %v1271_v27 = vld [vmem:[%s1427_s28 + $0xa0] ss:$8 sps:$4 sm:$0xff]  }
  0x17   : > { %303 = vst.msk [vmem:[#allocation2 + $0xf0] sm:$0xff] %vm272_vm0, %v1327_v5  ;;  %304 = vst.msk [vmem:[#allocation2 + $0xf8] sm:$0xff] %vm272_vm0, %v1327_v5  ;;  %v1272_v28 = vld [vmem:[%s1427_s28 + $0x34] ss:$8 sps:$4 sm:$0xff]   ;;  %v1276_v30 = vld [vmem:[%s1427_s28 + $0x30] ss:$8 sps:$4 sm:$0xff]  }
  0x18   : > { %654 = vmatpush1.bf16.msra.mxu0 %v1248_v6  ;;  %1211 = vmatpush1.bf16.msra.mxu1 %v1248_v6  ;;  %v1274_v29 = vld [vmem:[%s1427_s28 + $0xb4] ss:$8 sps:$4 sm:$0xff]   ;;  %v1277_v31 = vld [vmem:[%s1427_s28 + $0xb0] ss:$8 sps:$4 sm:$0xff]   ;;  %v1278_v32 = vld [vmem:[%s1427_s28 + $0x44] ss:$8 sps:$4 sm:$0xff]  }
  0x19   : > { %655 = vmatprep.subr.bf16.mxu0 %v1326_v1  ;;  %1202 = vmatprep.subr.bf16.mxu1 %v1326_v1  ;;  %v1280_v33 = vld [vmem:[%s1427_s28 + $0xc4] ss:$8 sps:$4 sm:$0xff]   ;;  %v1282_v34 = vld [vmem:[%s1427_s28 + $0x40] ss:$8 sps:$4 sm:$0xff]   ;;  %v1284_v36 = vld [vmem:[%s1427_s28 + $0x54] ss:$8 sps:$4 sm:$0xff]  }
  0x1a   : > { %v1283_v35 = vld [vmem:[%s1427_s28 + $0xc0] ss:$8 sps:$4 sm:$0xff]   ;;  %v1286_v37 = vld [vmem:[%s1427_s28 + $0xd4] ss:$8 sps:$4 sm:$0xff]   ;;  %v1288_v38 = vld [vmem:[%s1427_s28 + $0x50] ss:$8 sps:$4 sm:$0xff]  }
  0x1b   : > { %v1289_v39 = vld [vmem:[%s1427_s28 + $0xd0] ss:$8 sps:$4 sm:$0xff]   ;;  %v1290_v40 = vld [vmem:[%s1427_s28 + $0x64] ss:$8 sps:$4 sm:$0xff]   ;;  %v1294_v42 = vld [vmem:[%s1427_s28 + $0x60] ss:$8 sps:$4 sm:$0xff]  }
  0x1c   : > { %656 = vmatpush1.bf16.msra.mxu0 %v1249_v9  ;;  %1212 = vmatpush1.bf16.msra.mxu1 %v1249_v9  ;;  %v1292_v41 = vld [vmem:[%s1427_s28 + $0xe4] ss:$8 sps:$4 sm:$0xff]   ;;  %v1295_v43 = vld [vmem:[%s1427_s28 + $0xe0] ss:$8 sps:$4 sm:$0xff]   ;;  %v1296_v44 = vld [vmem:[%s1427_s28 + $0x74] ss:$8 sps:$4 sm:$0xff]  }
  0x1d   : > { %657 = vmatprep.subr.bf16.mxu0 %v1326_v1  ;;  %1203 = vmatprep.subr.bf16.mxu1 %v1326_v1  ;;  %v1298_v45 = vld [vmem:[%s1427_s28 + $0xf4] ss:$8 sps:$4 sm:$0xff]   ;;  %v1300_v46 = vld [vmem:[%s1427_s28 + $0x70] ss:$8 sps:$4 sm:$0xff]   ;;  %v321_v49 = vld [vmem:[#allocation2 + $0x80] sm:$0xff] }
  0x1e   : > { %v1301_v47 = vld [vmem:[%s1427_s28 + $0xf0] ss:$8 sps:$4 sm:$0xff]   ;;  %v322_v53 = vld [vmem:[#allocation2 + $0x88] sm:$0xff] }
  0x1f   : > { %v308_v5 = vld [vmem:[#allocation2 + $0x18] sm:$0xff] }
  0x20   : > { %658 = vmatpush1.bf16.msra.mxu0 %v1250_v10  ;;  %1213 = vmatpush1.bf16.msra.mxu1 %v1250_v10  ;;  %v324_v6 = vld [vmem:[#allocation2 + $0x98] sm:$0xff] }
  0x21   : > { %659 = vmatprep.subr.bf16.mxu0 %v1326_v1  ;;  %1204 = vmatprep.subr.bf16.mxu1 %v1326_v1 }
  0x24   : > { %660 = vmatpush1.bf16.msra.mxu0 %v1251_v11  ;;  %1214 = vmatpush1.bf16.msra.mxu1 %v1251_v11 }
  0x25   : > { %661 = vmatprep.subr.bf16.mxu0 %v1326_v1  ;;  %1205 = vmatprep.subr.bf16.mxu1 %v1326_v1 }
  0x28   : > { %662 = vmatpush1.bf16.msra.mxu0 %v1252_v14  ;;  %1215 = vmatpush1.bf16.msra.mxu1 %v1252_v14 }
  0x29   : > { %663 = vmatprep.subr.bf16.mxu0 %v1326_v1  ;;  %1206 = vmatprep.subr.bf16.mxu1 %v1326_v1  ;;  %v323_v1 = vld [vmem:[#allocation2 + $0x90] sm:$0xff] }
  0x2c   : > { %664 = vmatpush1.bf16.msra.mxu0 %v643_v17  ;;  %1216 = vmatpush1.bf16.msra.mxu1 %v643_v17 }
  0x2f   : > { %678 = vmatmul.mubr.bf16.vlgmr.msra.gmra.mrb[0].mxu0 %v1254_v18  ;;  %742 = vmatmul.mubr.bf16.vlgmr.msra.gmra.mrb[0].mxu1 %v1257_v19 }
  0x30   : > { %1178 = vmatprep.mubr.msk.bf16.mxu0 %vm589_vm1, %v1260_v20  ;;  %1186 = vmatprep.mubr.msk.bf16.mxu1 %vm589_vm1, %v1262_v21 }
  0x37   : > { %686 = vmatmul.mubr.bf16.gmra.mrb[4].mxu0 %v1264_v22  ;;  %750 = vmatmul.mubr.bf16.gmra.mrb[4].mxu1 %v1265_v23 }
  0x38   : > { %1179 = vmatprep.mubr.msk.bf16.mxu0 %vm589_vm1, %v1266_v24  ;;  %1187 = vmatprep.mubr.msk.bf16.mxu1 %vm589_vm1, %v1268_v25 }
  0x3f   : > { %694 = vmatmul.mubr.bf16.gmra.mrb[8].mxu0 %v1270_v26  ;;  %758 = vmatmul.mubr.bf16.gmra.mrb[8].mxu1 %v1271_v27  ;;  %v309_v27 = vld [vmem:[#allocation2 + $0x20] sm:$0xff] }
  0x40   : > { %1180 = vmatprep.mubr.msk.bf16.mxu0 %vm589_vm1, %v1272_v28  ;;  %1188 = vmatprep.mubr.msk.bf16.mxu1 %vm589_vm1, %v1274_v29  ;;  %v325_v28 = vld [vmem:[#allocation2 + $0xa0] sm:$0xff] }
  0x47   : > { %702 = vmatmul.mubr.bf16.gmra.mrb[12].mxu0 %v1276_v30  ;;  %766 = vmatmul.mubr.bf16.gmra.mrb[12].mxu1 %v1277_v31 }
  0x48   : > { %1181 = vmatprep.mubr.msk.bf16.mxu0 %vm589_vm1, %v1278_v32  ;;  %1189 = vmatprep.mubr.msk.bf16.mxu1 %vm589_vm1, %v1280_v33  ;;  %v310_v33 = vld [vmem:[#allocation2 + $0x28] sm:$0xff] }
  0x4f   : > { %710 = vmatmul.mubr.bf16.gmra.mrb[16].mxu0 %v1282_v34  ;;  %774 = vmatmul.mubr.bf16.gmra.mrb[16].mxu1 %v1283_v35  ;;  %v326_v34 = vld [vmem:[#allocation2 + $0xa8] sm:$0xff] }
  0x50   : > { %1182 = vmatprep.mubr.msk.bf16.mxu0 %vm589_vm1, %v1284_v36  ;;  %1190 = vmatprep.mubr.msk.bf16.mxu1 %vm589_vm1, %v1286_v37 }
  0x57   : > { %718 = vmatmul.mubr.bf16.gmra.mrb[20].mxu0 %v1288_v38  ;;  %782 = vmatmul.mubr.bf16.gmra.mrb[20].mxu1 %v1289_v39 }
  0x58   : > { %1183 = vmatprep.mubr.msk.bf16.mxu0 %vm589_vm1, %v1290_v40  ;;  %1191 = vmatprep.mubr.msk.bf16.mxu1 %vm589_vm1, %v1292_v41 }
  0x5f   : > { %726 = vmatmul.mubr.bf16.gmra.mrb[24].mxu0 %v1294_v42  ;;  %790 = vmatmul.mubr.bf16.gmra.mrb[24].mxu1 %v1295_v43 }
  0x60   : > { %1184 = vmatprep.mubr.msk.bf16.mxu0 %vm589_vm1, %v1296_v44  ;;  %1192 = vmatprep.mubr.msk.bf16.mxu1 %vm589_vm1, %v1298_v45 }
  0x67   : > { %734 = vmatmul.mubr.bf16.gmra.mrb[28].mxu0 %v1300_v46  ;;  %798 = vmatmul.mubr.bf16.gmra.mrb[28].mxu1 %v1301_v47 }
 0x102   : > { %v679_v50 = vpop.f32.mrb[0].mxu0  ;;  %v743_v51 = vpop.f32.mrb[0].mxu1 }
 0x103   : > { %v806_v54 = vadd.f32 %v679_v50, %v305_v48  ;;  %v822_v55 = vadd.f32 %v743_v51, %v321_v49  ;;  %v681_v56 = vpop.f32.mrb[1].mxu0  ;;  %v745_v57 = vpop.f32.mrb[1].mxu1 }
 0x104   : > { %v682_v58 = vpop.f32.mrb[2].mxu0  ;;  %v746_v59 = vpop.f32.mrb[2].mxu1  ;;  %v327_v56 = vld [vmem:[#allocation2 + $0xb0] sm:$0xff] }
 0x105   : > { %839 = vst.msk [vmem:[#allocation2] sm:$0xff] %vm272_vm0, %v806_v54  ;;  %855 = vst.msk [vmem:[#allocation2 + $0x80] sm:$0xff] %vm272_vm0, %v822_v55  ;;  %v807_v60 = vadd.f32 %v682_v58, %v306_v52  ;;  %v823_v61 = vadd.f32 %v746_v59, %v322_v53  ;;  %v684_v62 = vpop.f32.mrb[3].mxu0  ;;  %v748_v63 = vpop.f32.mrb[3].mxu1  ;;  %v311_v55 = vld [vmem:[#allocation2 + $0x30] sm:$0xff] }
 0x106   : > { %v328_v62 = vld [vmem:[#allocation2 + $0xb8] sm:$0xff] }
 0x107   : > { %840 = vst.msk [vmem:[#allocation2 + $0x8] sm:$0xff] %vm272_vm0, %v807_v60  ;;  %856 = vst.msk [vmem:[#allocation2 + $0x88] sm:$0xff] %vm272_vm0, %v823_v61  ;;  %v312_v61 = vld [vmem:[#allocation2 + $0x38] sm:$0xff] }
 0x10a   : > { %v687_v3 = vpop.f32.mrb[4].mxu0  ;;  %v751_v4 = vpop.f32.mrb[4].mxu1 }
 0x10b   : > { %v808_v7 = vadd.f32 %v687_v3, %v307_v0  ;;  %v824_v8 = vadd.f32 %v751_v4, %v323_v1  ;;  %v689_v9 = vpop.f32.mrb[5].mxu0  ;;  %v753_v10 = vpop.f32.mrb[5].mxu1 }
 0x10c   : > { %v874_v11 = vld [vmem:[#allocation2] sm:$0xff]  ;;  %v690_v13 = vpop.f32.mrb[6].mxu0  ;;  %v754_v14 = vpop.f32.mrb[6].mxu1 }
 0x10d   : > { %v890_v12 = vld [vmem:[#allocation2 + $0x80] sm:$0xff]  ;;  %v913_v15 = vadd.f32 %v1514_v2, %v874_v11  ;;  %841 = vst.msk [vmem:[#allocation2 + $0x10] sm:$0xff] %vm272_vm0, %v808_v7  ;;  %857 = vst.msk [vmem:[#allocation2 + $0x90] sm:$0xff] %vm272_vm0, %v824_v8  ;;  %v809_v17 = vadd.f32 %v690_v13, %v308_v5  ;;  %v825_v18 = vadd.f32 %v754_v14, %v324_v6  ;;  %v692_v19 = vpop.f32.mrb[7].mxu0  ;;  %v756_v20 = vpop.f32.mrb[7].mxu1 }
 0x10e   : > { %v929_v16 = vadd.f32 %v1514_v2, %v890_v12  ;;  %v875_v21 = vld [vmem:[#allocation2 + $0x8] sm:$0xff]  ;;  %v313_v20 = vld [vmem:[#allocation2 + $0x40] sm:$0xff] }
 0x10f   : > { %v891_v22 = vld [vmem:[#allocation2 + $0x88] sm:$0xff]  ;;  %v945_v23 = vmax.f32 %v913_v15, 0.0  ;;  %v914_v25 = vadd.f32 %v1514_v2, %v875_v21  ;;  %842 = vst.msk [vmem:[#allocation2 + $0x18] sm:$0xff] %vm272_vm0, %v809_v17  ;;  %858 = vst.msk [vmem:[#allocation2 + $0x98] sm:$0xff] %vm272_vm0, %v825_v18  ;;  %v329_v21 = vld [vmem:[#allocation2 + $0xc0] sm:$0xff] }
 0x110   : > { %v961_v24 = vmax.f32 %v929_v16, 0.0  ;;  %v930_v26 = vadd.f32 %v1514_v2, %v891_v22 }
 0x111   : > { %977 = vst.msk [vmem:[%s1525_s21] sm:$0xff] %vm272_vm0, %v945_v23  ;;  %v946_v29 = vmax.f32 %v914_v25, 0.0 }
 0x112   : > { %993 = vst.msk [vmem:[%s1525_s21 + $0x80] sm:$0xff] %vm272_vm0, %v961_v24  ;;  %v962_v30 = vmax.f32 %v930_v26, 0.0  ;;  %v695_v31 = vpop.f32.mrb[8].mxu0  ;;  %v759_v32 = vpop.f32.mrb[8].mxu1  ;;  %v314_v26 = vld [vmem:[#allocation2 + $0x48] sm:$0xff] }
 0x113   : > { %978 = vst.msk [vmem:[%s1525_s21 + $0x8] sm:$0xff] %vm272_vm0, %v946_v29  ;;  %v810_v35 = vadd.f32 %v695_v31, %v309_v27  ;;  %v826_v36 = vadd.f32 %v759_v32, %v325_v28  ;;  %v697_v37 = vpop.f32.mrb[9].mxu0  ;;  %v761_v38 = vpop.f32.mrb[9].mxu1  ;;  %v330_v27 = vld [vmem:[#allocation2 + $0xc8] sm:$0xff] }
 0x114   : > { %994 = vst.msk [vmem:[%s1525_s21 + $0x88] sm:$0xff] %vm272_vm0, %v962_v30  ;;  %v876_v39 = vld [vmem:[#allocation2 + $0x10] sm:$0xff]  ;;  %v698_v41 = vpop.f32.mrb[10].mxu0  ;;  %v762_v42 = vpop.f32.mrb[10].mxu1 }
 0x115   : > { %v892_v40 = vld [vmem:[#allocation2 + $0x90] sm:$0xff]  ;;  %v915_v43 = vadd.f32 %v1514_v2, %v876_v39  ;;  %843 = vst.msk [vmem:[#allocation2 + $0x20] sm:$0xff] %vm272_vm0, %v810_v35  ;;  %859 = vst.msk [vmem:[#allocation2 + $0xa0] sm:$0xff] %vm272_vm0, %v826_v36  ;;  %v811_v45 = vadd.f32 %v698_v41, %v310_v33  ;;  %v827_v46 = vadd.f32 %v762_v42, %v326_v34  ;;  %v700_v47 = vpop.f32.mrb[11].mxu0  ;;  %v764_v48 = vpop.f32.mrb[11].mxu1 }
 0x116   : > { %v931_v44 = vadd.f32 %v1514_v2, %v892_v40  ;;  %v877_v49 = vld [vmem:[#allocation2 + $0x18] sm:$0xff]  ;;  %v315_v48 = vld [vmem:[#allocation2 + $0x50] sm:$0xff] }
 0x117   : > { %v893_v50 = vld [vmem:[#allocation2 + $0x98] sm:$0xff]  ;;  %v947_v51 = vmax.f32 %v915_v43, 0.0  ;;  %v916_v53 = vadd.f32 %v1514_v2, %v877_v49  ;;  %844 = vst.msk [vmem:[#allocation2 + $0x28] sm:$0xff] %vm272_vm0, %v811_v45  ;;  %860 = vst.msk [vmem:[#allocation2 + $0xa8] sm:$0xff] %vm272_vm0, %v827_v46  ;;  %v331_v49 = vld [vmem:[#allocation2 + $0xd0] sm:$0xff] }
 0x118   : > { %v963_v52 = vmax.f32 %v931_v44, 0.0  ;;  %v932_v54 = vadd.f32 %v1514_v2, %v893_v50 }
 0x119   : > { %979 = vst.msk [vmem:[%s1525_s21 + $0x10] sm:$0xff] %vm272_vm0, %v947_v51  ;;  %v948_v57 = vmax.f32 %v916_v53, 0.0 }
 0x11a   : > { %995 = vst.msk [vmem:[%s1525_s21 + $0x90] sm:$0xff] %vm272_vm0, %v963_v52  ;;  %v964_v58 = vmax.f32 %v932_v54, 0.0  ;;  %v703_v59 = vpop.f32.mrb[12].mxu0  ;;  %v767_v60 = vpop.f32.mrb[12].mxu1  ;;  %v316_v54 = vld [vmem:[#allocation2 + $0x58] sm:$0xff] }
 0x11b   : > { %980 = vst.msk [vmem:[%s1525_s21 + $0x18] sm:$0xff] %vm272_vm0, %v948_v57  ;;  %v812_v63 = vadd.f32 %v703_v59, %v311_v55  ;;  %v828_v0 = vadd.f32 %v767_v60, %v327_v56  ;;  %v705_v1 = vpop.f32.mrb[13].mxu0  ;;  %v769_v3 = vpop.f32.mrb[13].mxu1  ;;  %v332_v55 = vld [vmem:[#allocation2 + $0xd8] sm:$0xff] }
 0x11c   : > { %996 = vst.msk [vmem:[%s1525_s21 + $0x98] sm:$0xff] %vm272_vm0, %v964_v58  ;;  %v878_v4 = vld [vmem:[#allocation2 + $0x20] sm:$0xff]  ;;  %v706_v6 = vpop.f32.mrb[14].mxu0  ;;  %v770_v7 = vpop.f32.mrb[14].mxu1 }
 0x11d   : > { %v894_v5 = vld [vmem:[#allocation2 + $0xa0] sm:$0xff]  ;;  %v917_v8 = vadd.f32 %v1514_v2, %v878_v4  ;;  %845 = vst.msk [vmem:[#allocation2 + $0x30] sm:$0xff] %vm272_vm0, %v812_v63  ;;  %861 = vst.msk [vmem:[#allocation2 + $0xb0] sm:$0xff] %vm272_vm0, %v828_v0  ;;  %v813_v10 = vadd.f32 %v706_v6, %v312_v61  ;;  %v829_v11 = vadd.f32 %v770_v7, %v328_v62  ;;  %v708_v12 = vpop.f32.mrb[15].mxu0  ;;  %v772_v13 = vpop.f32.mrb[15].mxu1 }
 0x11e   : > { %v933_v9 = vadd.f32 %v1514_v2, %v894_v5  ;;  %v879_v14 = vld [vmem:[#allocation2 + $0x28] sm:$0xff]  ;;  %v317_v13 = vld [vmem:[#allocation2 + $0x60] sm:$0xff] }
 0x11f   : > { %v895_v15 = vld [vmem:[#allocation2 + $0xa8] sm:$0xff]  ;;  %v949_v16 = vmax.f32 %v917_v8, 0.0  ;;  %v918_v18 = vadd.f32 %v1514_v2, %v879_v14  ;;  %846 = vst.msk [vmem:[#allocation2 + $0x38] sm:$0xff] %vm272_vm0, %v813_v10  ;;  %862 = vst.msk [vmem:[#allocation2 + $0xb8] sm:$0xff] %vm272_vm0, %v829_v11  ;;  %v333_v14 = vld [vmem:[#allocation2 + $0xe0] sm:$0xff] }
 0x120   : > { %v965_v17 = vmax.f32 %v933_v9, 0.0  ;;  %v934_v19 = vadd.f32 %v1514_v2, %v895_v15 }
 0x121   : > { %981 = vst.msk [vmem:[%s1525_s21 + $0x20] sm:$0xff] %vm272_vm0, %v949_v16  ;;  %v950_v22 = vmax.f32 %v918_v18, 0.0 }
 0x122   : > { %997 = vst.msk [vmem:[%s1525_s21 + $0xa0] sm:$0xff] %vm272_vm0, %v965_v17  ;;  %v966_v23 = vmax.f32 %v934_v19, 0.0  ;;  %v711_v24 = vpop.f32.mrb[16].mxu0  ;;  %v775_v25 = vpop.f32.mrb[16].mxu1  ;;  %v318_v19 = vld [vmem:[#allocation2 + $0x68] sm:$0xff] }
 0x123   : > { %982 = vst.msk [vmem:[%s1525_s21 + $0x28] sm:$0xff] %vm272_vm0, %v950_v22  ;;  %v814_v28 = vadd.f32 %v711_v24, %v313_v20  ;;  %v830_v29 = vadd.f32 %v775_v25, %v329_v21  ;;  %v713_v30 = vpop.f32.mrb[17].mxu0  ;;  %v777_v31 = vpop.f32.mrb[17].mxu1  ;;  %v334_v20 = vld [vmem:[#allocation2 + $0xe8] sm:$0xff] }
 0x124   : > { %998 = vst.msk [vmem:[%s1525_s21 + $0xa8] sm:$0xff] %vm272_vm0, %v966_v23  ;;  %v880_v32 = vld [vmem:[#allocation2 + $0x30] sm:$0xff]  ;;  %v714_v34 = vpop.f32.mrb[18].mxu0  ;;  %v778_v35 = vpop.f32.mrb[18].mxu1 }
 0x125   : > { %v896_v33 = vld [vmem:[#allocation2 + $0xb0] sm:$0xff]  ;;  %v919_v36 = vadd.f32 %v1514_v2, %v880_v32  ;;  %847 = vst.msk [vmem:[#allocation2 + $0x40] sm:$0xff] %vm272_vm0, %v814_v28  ;;  %863 = vst.msk [vmem:[#allocation2 + $0xc0] sm:$0xff] %vm272_vm0, %v830_v29  ;;  %v815_v38 = vadd.f32 %v714_v34, %v314_v26  ;;  %v831_v39 = vadd.f32 %v778_v35, %v330_v27  ;;  %v716_v40 = vpop.f32.mrb[19].mxu0  ;;  %v780_v41 = vpop.f32.mrb[19].mxu1 }
 0x126   : > { %v935_v37 = vadd.f32 %v1514_v2, %v896_v33  ;;  %v881_v42 = vld [vmem:[#allocation2 + $0x38] sm:$0xff]  ;;  %v319_v41 = vld [vmem:[#allocation2 + $0x70] sm:$0xff] }
 0x127   : > { %v897_v43 = vld [vmem:[#allocation2 + $0xb8] sm:$0xff]  ;;  %v951_v44 = vmax.f32 %v919_v36, 0.0  ;;  %v920_v46 = vadd.f32 %v1514_v2, %v881_v42  ;;  %848 = vst.msk [vmem:[#allocation2 + $0x48] sm:$0xff] %vm272_vm0, %v815_v38  ;;  %864 = vst.msk [vmem:[#allocation2 + $0xc8] sm:$0xff] %vm272_vm0, %v831_v39  ;;  %v335_v42 = vld [vmem:[#allocation2 + $0xf0] sm:$0xff] }
 0x128   : > { %v967_v45 = vmax.f32 %v935_v37, 0.0  ;;  %v936_v47 = vadd.f32 %v1514_v2, %v897_v43 }
 0x129   : > { %983 = vst.msk [vmem:[%s1525_s21 + $0x30] sm:$0xff] %vm272_vm0, %v951_v44  ;;  %v952_v50 = vmax.f32 %v920_v46, 0.0 }
 0x12a   : > { %999 = vst.msk [vmem:[%s1525_s21 + $0xb0] sm:$0xff] %vm272_vm0, %v967_v45  ;;  %v968_v51 = vmax.f32 %v936_v47, 0.0  ;;  %v719_v52 = vpop.f32.mrb[20].mxu0  ;;  %v783_v53 = vpop.f32.mrb[20].mxu1  ;;  %v320_v47 = vld [vmem:[#allocation2 + $0x78] sm:$0xff] }
 0x12b   : > { %984 = vst.msk [vmem:[%s1525_s21 + $0x38] sm:$0xff] %vm272_vm0, %v952_v50  ;;  %v816_v56 = vadd.f32 %v719_v52, %v315_v48  ;;  %v832_v57 = vadd.f32 %v783_v53, %v331_v49  ;;  %v721_v58 = vpop.f32.mrb[21].mxu0  ;;  %v785_v59 = vpop.f32.mrb[21].mxu1  ;;  %v336_v48 = vld [vmem:[#allocation2 + $0xf8] sm:$0xff] }
 0x12c   : > { %1000 = vst.msk [vmem:[%s1525_s21 + $0xb8] sm:$0xff] %vm272_vm0, %v968_v51  ;;  %v882_v60 = vld [vmem:[#allocation2 + $0x40] sm:$0xff]  ;;  %v722_v62 = vpop.f32.mrb[22].mxu0  ;;  %v786_v63 = vpop.f32.mrb[22].mxu1 }
 0x12d   : > { %v898_v61 = vld [vmem:[#allocation2 + $0xc0] sm:$0xff]  ;;  %v921_v0 = vadd.f32 %v1514_v2, %v882_v60  ;;  %849 = vst.msk [vmem:[#allocation2 + $0x50] sm:$0xff] %vm272_vm0, %v816_v56  ;;  %865 = vst.msk [vmem:[#allocation2 + $0xd0] sm:$0xff] %vm272_vm0, %v832_v57  ;;  %v817_v3 = vadd.f32 %v722_v62, %v316_v54  ;;  %v833_v4 = vadd.f32 %v786_v63, %v332_v55  ;;  %v724_v5 = vpop.f32.mrb[23].mxu0  ;;  %v788_v6 = vpop.f32.mrb[23].mxu1 }
 0x12e   : > { %v937_v1 = vadd.f32 %v1514_v2, %v898_v61  ;;  %v883_v7 = vld [vmem:[#allocation2 + $0x48] sm:$0xff] }
 0x12f   : > { %v899_v8 = vld [vmem:[#allocation2 + $0xc8] sm:$0xff]  ;;  %v953_v9 = vmax.f32 %v921_v0, 0.0  ;;  %v922_v11 = vadd.f32 %v1514_v2, %v883_v7  ;;  %850 = vst.msk [vmem:[#allocation2 + $0x58] sm:$0xff] %vm272_vm0, %v817_v3  ;;  %866 = vst.msk [vmem:[#allocation2 + $0xd8] sm:$0xff] %vm272_vm0, %v833_v4 }
 0x130   : > { %v969_v10 = vmax.f32 %v937_v1, 0.0  ;;  %v938_v12 = vadd.f32 %v1514_v2, %v899_v8 }
 0x131   : > { %985 = vst.msk [vmem:[%s1525_s21 + $0x40] sm:$0xff] %vm272_vm0, %v953_v9  ;;  %v954_v15 = vmax.f32 %v922_v11, 0.0 }
 0x132   : > { %1001 = vst.msk [vmem:[%s1525_s21 + $0xc0] sm:$0xff] %vm272_vm0, %v969_v10  ;;  %v970_v16 = vmax.f32 %v938_v12, 0.0  ;;  %v727_v17 = vpop.f32.mrb[24].mxu0  ;;  %v791_v18 = vpop.f32.mrb[24].mxu1 }
 0x133   : > { %986 = vst.msk [vmem:[%s1525_s21 + $0x48] sm:$0xff] %vm272_vm0, %v954_v15  ;;  %v818_v21 = vadd.f32 %v727_v17, %v317_v13  ;;  %v834_v22 = vadd.f32 %v791_v18, %v333_v14  ;;  %v729_v23 = vpop.f32.mrb[25].mxu0  ;;  %v793_v24 = vpop.f32.mrb[25].mxu1 }
 0x134   : > { %1002 = vst.msk [vmem:[%s1525_s21 + $0xc8] sm:$0xff] %vm272_vm0, %v970_v16  ;;  %v884_v25 = vld [vmem:[#allocation2 + $0x50] sm:$0xff]  ;;  %v730_v27 = vpop.f32.mrb[26].mxu0  ;;  %v794_v28 = vpop.f32.mrb[26].mxu1 }
 0x135   : > { %v900_v26 = vld [vmem:[#allocation2 + $0xd0] sm:$0xff]  ;;  %v923_v29 = vadd.f32 %v1514_v2, %v884_v25  ;;  %851 = vst.msk [vmem:[#allocation2 + $0x60] sm:$0xff] %vm272_vm0, %v818_v21  ;;  %867 = vst.msk [vmem:[#allocation2 + $0xe0] sm:$0xff] %vm272_vm0, %v834_v22  ;;  %v819_v31 = vadd.f32 %v730_v27, %v318_v19  ;;  %v835_v32 = vadd.f32 %v794_v28, %v334_v20  ;;  %v732_v33 = vpop.f32.mrb[27].mxu0  ;;  %v796_v34 = vpop.f32.mrb[27].mxu1 }
 0x136   : > { %v939_v30 = vadd.f32 %v1514_v2, %v900_v26  ;;  %v885_v35 = vld [vmem:[#allocation2 + $0x58] sm:$0xff] }
 0x137   : > { %v901_v36 = vld [vmem:[#allocation2 + $0xd8] sm:$0xff]  ;;  %v955_v37 = vmax.f32 %v923_v29, 0.0  ;;  %v924_v39 = vadd.f32 %v1514_v2, %v885_v35  ;;  %852 = vst.msk [vmem:[#allocation2 + $0x68] sm:$0xff] %vm272_vm0, %v819_v31  ;;  %868 = vst.msk [vmem:[#allocation2 + $0xe8] sm:$0xff] %vm272_vm0, %v835_v32 }
 0x138   : > { %v971_v38 = vmax.f32 %v939_v30, 0.0  ;;  %v940_v40 = vadd.f32 %v1514_v2, %v901_v36 }
 0x139   : > { %987 = vst.msk [vmem:[%s1525_s21 + $0x50] sm:$0xff] %vm272_vm0, %v955_v37  ;;  %v956_v43 = vmax.f32 %v924_v39, 0.0 }
 0x13a   : > { %1003 = vst.msk [vmem:[%s1525_s21 + $0xd0] sm:$0xff] %vm272_vm0, %v971_v38  ;;  %v972_v44 = vmax.f32 %v940_v40, 0.0  ;;  %v735_v45 = vpop.f32.mrb[28].mxu0  ;;  %v799_v46 = vpop.f32.mrb[28].mxu1 }
 0x13b   : > { %988 = vst.msk [vmem:[%s1525_s21 + $0x58] sm:$0xff] %vm272_vm0, %v956_v43  ;;  %v820_v49 = vadd.f32 %v735_v45, %v319_v41  ;;  %v836_v50 = vadd.f32 %v799_v46, %v335_v42  ;;  %v737_v51 = vpop.f32.mrb[29].mxu0  ;;  %v801_v52 = vpop.f32.mrb[29].mxu1 }
 0x13c   : > { %1004 = vst.msk [vmem:[%s1525_s21 + $0xd8] sm:$0xff] %vm272_vm0, %v972_v44  ;;  %v886_v53 = vld [vmem:[#allocation2 + $0x60] sm:$0xff]  ;;  %v738_v55 = vpop.f32.mrb[30].mxu0  ;;  %v802_v56 = vpop.f32.mrb[30].mxu1 }
 0x13d   : > { %v902_v54 = vld [vmem:[#allocation2 + $0xe0] sm:$0xff]  ;;  %v925_v57 = vadd.f32 %v1514_v2, %v886_v53  ;;  %853 = vst.msk [vmem:[#allocation2 + $0x70] sm:$0xff] %vm272_vm0, %v820_v49  ;;  %869 = vst.msk [vmem:[#allocation2 + $0xf0] sm:$0xff] %vm272_vm0, %v836_v50  ;;  %v821_v59 = vadd.f32 %v738_v55, %v320_v47  ;;  %v837_v60 = vadd.f32 %v802_v56, %v336_v48  ;;  %v740_v61 = vpop.f32.mrb[31].mxu0  ;;  %v804_v62 = vpop.f32.mrb[31].mxu1 }
 0x13e   : > { %v941_v58 = vadd.f32 %v1514_v2, %v902_v54  ;;  %v887_v63 = vld [vmem:[#allocation2 + $0x68] sm:$0xff] }
 0x13f   : > { %v903_v0 = vld [vmem:[#allocation2 + $0xe8] sm:$0xff]  ;;  %v957_v1 = vmax.f32 %v925_v57, 0.0  ;;  %v926_v4 = vadd.f32 %v1514_v2, %v887_v63  ;;  %854 = vst.msk [vmem:[#allocation2 + $0x78] sm:$0xff] %vm272_vm0, %v821_v59  ;;  %870 = vst.msk [vmem:[#allocation2 + $0xf8] sm:$0xff] %vm272_vm0, %v837_v60 }
 0x140   : > { %v973_v3 = vmax.f32 %v941_v58, 0.0  ;;  %v942_v5 = vadd.f32 %v1514_v2, %v903_v0 }
 0x141   : > { %989 = vst.msk [vmem:[%s1525_s21 + $0x60] sm:$0xff] %vm272_vm0, %v957_v1  ;;  %v958_v6 = vmax.f32 %v926_v4, 0.0 }
 0x142   : > { %1005 = vst.msk [vmem:[%s1525_s21 + $0xe0] sm:$0xff] %vm272_vm0, %v973_v3  ;;  %v974_v7 = vmax.f32 %v942_v5, 0.0 }
 0x143   : > { %990 = vst.msk [vmem:[%s1525_s21 + $0x68] sm:$0xff] %vm272_vm0, %v958_v6 }
 0x144   : > { %1006 = vst.msk [vmem:[%s1525_s21 + $0xe8] sm:$0xff] %vm272_vm0, %v974_v7  ;;  %v888_v8 = vld [vmem:[#allocation2 + $0x70] sm:$0xff] }
 0x145   : > { %v904_v9 = vld [vmem:[#allocation2 + $0xf0] sm:$0xff]  ;;  %v927_v10 = vadd.f32 %v1514_v2, %v888_v8 }
 0x146   : > { %v943_v11 = vadd.f32 %v1514_v2, %v904_v9  ;;  %v889_v12 = vld [vmem:[#allocation2 + $0x78] sm:$0xff] }
 0x147   : > { %v905_v13 = vld [vmem:[#allocation2 + $0xf8] sm:$0xff]  ;;  %v959_v14 = vmax.f32 %v927_v10, 0.0  ;;  %v928_v16 = vadd.f32 %v1514_v2, %v889_v12 }
 0x148   : > { %v975_v15 = vmax.f32 %v943_v11, 0.0  ;;  %v944_v17 = vadd.f32 %v1514_v2, %v905_v13 }
 0x149   : > { %991 = vst.msk [vmem:[%s1525_s21 + $0x70] sm:$0xff] %vm272_vm0, %v959_v14  ;;  %v960_v18 = vmax.f32 %v928_v16, 0.0 }
 0x14a   : > { %1007 = vst.msk [vmem:[%s1525_s21 + $0xf0] sm:$0xff] %vm272_vm0, %v975_v15  ;;  %v976_v19 = vmax.f32 %v944_v17, 0.0 }
 0x14b   : > { %992 = vst.msk [vmem:[%s1525_s21 + $0x78] sm:$0xff] %vm272_vm0, %v960_v18 }
 0x14c   : > { %1008 = vst.msk [vmem:[%s1525_s21 + $0xf8] sm:$0xff] %vm272_vm0, %v976_v19 }
 0x14d PF: > { %s13_s14 = sadd.s32 1, %s1324_s14   ;;  %s1660_s12 = smov %s1320_s13 }
 0x14e   : > { %p10_p5 = scmp.ge.s32.totalorder %s13_s14, 4   ;;  %s1661_s13 = smov %s1663_s15 }
 0x150   :  { %12 = sbr.rel (!%p10_p5) target bundleno = 2 (0x2), region = 76 }

// kernel: _lambda_.27
= control target key start
LH: loop header
LB: loop body
LE: loop exit
PB: predicated region body
PF: predicated region fallthrough
CT: control target
= control target key end

     0   :  { %vm377_vm0 = vcmask 523264   ;;  %s915_s1 = inlined_call_operand.vmem [shape: bf16[576,128], index: 1, kind: input, shape index: {}]   ;;  %s916_s0 = inlined_call_operand.vmem [shape: bf16[32,576], index: 0, kind: input, shape index: {}]   ;;  %s917_s2 = inlined_call_operand.vmem [shape: f32[1,128], index: 2, kind: input, shape index: {}]   ;;  %s918_s3 = inlined_call_operand.vmem [shape: f32[32,128], index: 3, kind: output, shape index: {}]  }
   0x1   :  { %v692_v0 = vld [vmem:[%s915_s1 + $0x40] sm:$0xff]   ;;  %v696_v4 = vld [vmem:[%s915_s1 + $0x48] sm:$0xff]   ;;  %v700_v8 = vld [vmem:[%s915_s1 + $0x50] sm:$0xff]  }
   0x2   :  { %v693_v1 = vld [vmem:[%s915_s1 + $0xc0] sm:$0xff]   ;;  %618 = vmatprep.subr.bf16.mxu0 %v692_v0  ;;  %v697_v5 = vld [vmem:[%s915_s1 + $0xc8] sm:$0xff]   ;;  %v701_v9 = vld [vmem:[%s915_s1 + $0xd0] sm:$0xff]  }
   0x3   :  { %v694_v2 = vld [vmem:[%s915_s1] sm:$0xff]   ;;  %646 = vmatprep.subr.bf16.mxu1 %v693_v1  ;;  %v698_v6 = vld [vmem:[%s915_s1 + $0x8] sm:$0xff]   ;;  %v702_v10 = vld [vmem:[%s915_s1 + $0x10] sm:$0xff]  }
   0x4   :  { %v695_v3 = vld [vmem:[%s915_s1 + $0x80] sm:$0xff]   ;;  %619 = vmatpush3.bf16.msra.mxu0 %v694_v2  ;;  %v699_v7 = vld [vmem:[%s915_s1 + $0x88] sm:$0xff]   ;;  %v703_v11 = vld [vmem:[%s915_s1 + $0x90] sm:$0xff]  }
   0x5   :  { %647 = vmatpush3.bf16.msra.mxu1 %v695_v3  ;;  %620 = vmatprep.subr.bf16.mxu0 %v696_v4  ;;  %v704_v12 = vld [vmem:[%s915_s1 + $0x58] sm:$0xff]   ;;  %v708_v16 = vld [vmem:[%s915_s1 + $0x60] sm:$0xff]   ;;  %v712_v20 = vld [vmem:[%s915_s1 + $0x68] sm:$0xff]  }
   0x6   :  { %648 = vmatprep.subr.bf16.mxu1 %v697_v5  ;;  %v705_v13 = vld [vmem:[%s915_s1 + $0xd8] sm:$0xff]   ;;  %v709_v17 = vld [vmem:[%s915_s1 + $0xe0] sm:$0xff]   ;;  %v713_v21 = vld [vmem:[%s915_s1 + $0xe8] sm:$0xff]  }
   0x7   :  { %v706_v14 = vld [vmem:[%s915_s1 + $0x18] sm:$0xff]   ;;  %v710_v18 = vld [vmem:[%s915_s1 + $0x20] sm:$0xff]   ;;  %v714_v22 = vld [vmem:[%s915_s1 + $0x28] sm:$0xff]  }
   0x8   :  { %621 = vmatpush3.bf16.msra.mxu0 %v698_v6  ;;  %v707_v15 = vld [vmem:[%s915_s1 + $0x98] sm:$0xff]   ;;  %v711_v19 = vld [vmem:[%s915_s1 + $0xa0] sm:$0xff]   ;;  %v715_v23 = vld [vmem:[%s915_s1 + $0xa8] sm:$0xff]  }
   0x9   :  { %649 = vmatpush3.bf16.msra.mxu1 %v699_v7  ;;  %622 = vmatprep.subr.bf16.mxu0 %v700_v8  ;;  %v716_v24 = vld [vmem:[%s915_s1 + $0x70] sm:$0xff]   ;;  %v720_v28 = vld [vmem:[%s915_s1 + $0x78] sm:$0xff]   ;;  %v729_v35 = vld [vmem:[%s916_s0 + $0xc] ss:$20 sps:$4 sm:$0xff]  }
   0xa   :  { %650 = vmatprep.subr.bf16.mxu1 %v701_v9  ;;  %v717_v25 = vld [vmem:[%s915_s1 + $0xf0] sm:$0xff]   ;;  %v721_v29 = vld [vmem:[%s915_s1 + $0xf8] sm:$0xff]   ;;  %v730_v36 = vld [vmem:[%s915_s1 + $0x100] sm:$0xff]   ;;  %465 = vmatprep.mubr.bf16.mxu1 %v729_v35 }
   0xb   :  { %v718_v26 = vld [vmem:[%s915_s1 + $0x30] sm:$0xff]   ;;  %v722_v30 = vld [vmem:[%s915_s1 + $0x38] sm:$0xff]   ;;  %v731_v37 = vld [vmem:[%s915_s1 + $0x108] sm:$0xff]  }
   0xc   :  { %623 = vmatpush3.bf16.msra.mxu0 %v702_v10  ;;  %v719_v27 = vld [vmem:[%s915_s1 + $0xb0] sm:$0xff]   ;;  %v723_v31 = vld [vmem:[%s915_s1 + $0xb8] sm:$0xff]   ;;  %v732_v38 = vld [vmem:[%s916_s0 + $0x2c] ss:$20 sps:$4 sm:$0xff]  }
   0xd   :  { %651 = vmatpush3.bf16.msra.mxu1 %v703_v11  ;;  %624 = vmatprep.subr.bf16.mxu0 %v704_v12  ;;  %v724_v32 = vld [vmem:[%s916_s0] ss:$20 sps:$4 sm:$0xff]   ;;  %v726_v33 = vld [vmem:[%s916_s0 + $0x4] ss:$20 sps:$4 sm:$0xff]   ;;  %v727_v34 = vld [vmem:[%s916_s0 + $0x8] ss:$20 sps:$4 sm:$0xff]  }
   0xe   :  { %652 = vmatprep.subr.bf16.mxu1 %v705_v13  ;;  %416 = vmatprep.mubr.bf16.mxu0 %v726_v33  ;;  %v734_v39 = vld [vmem:[%s916_s0 + $0x34] ss:$20 sps:$4 sm:$0xff]   ;;  %v737_v42 = vld [vmem:[%s916_s0 + $0x30] ss:$20 sps:$4 sm:$0xff]   ;;  %v739_v44 = vld [vmem:[%s915_s1 + $0x118] sm:$0xff]  }
   0xf   :  { %v736_v40 = vld [vmem:[%s916_s0 + $0x28] ss:$20 sps:$4 sm:$0xff]   ;;  %v738_v41 = vld [vmem:[%s915_s1 + $0x110] sm:$0xff]   ;;  %v741_v45 = vld [vmem:[%s916_s0 + $0x38] ss:$20 sps:$4 sm:$0xff]  }
  0x10   :  { %625 = vmatpush3.bf16.msra.mxu0 %v706_v14  ;;  %v740_v43 = vld [vmem:[%s916_s0 + $0x10] ss:$20 sps:$4 sm:$0xff]   ;;  %v617_v11 = vld [vmem:[%s917_s2] ss:$0 sm:$0xff] }
  0x11   :  { %653 = vmatpush3.bf16.msra.mxu1 %v707_v15  ;;  %626 = vmatprep.subr.bf16.mxu0 %v708_v16 }
  0x12   :  { %654 = vmatprep.subr.bf16.mxu1 %v709_v17 }
  0x14   :  { %627 = vmatpush3.bf16.msra.mxu0 %v710_v18 }
  0x15   :  { %655 = vmatpush3.bf16.msra.mxu1 %v711_v19  ;;  %628 = vmatprep.subr.bf16.mxu0 %v712_v20 }
  0x16   :  { %656 = vmatprep.subr.bf16.mxu1 %v713_v21 }
  0x18   :  { %629 = vmatpush3.bf16.msra.mxu0 %v714_v22 }
  0x19   :  { %657 = vmatpush3.bf16.msra.mxu1 %v715_v23  ;;  %630 = vmatprep.subr.bf16.mxu0 %v716_v24 }
  0x1a   :  { %658 = vmatprep.subr.bf16.mxu1 %v717_v25 }
  0x1c   :  { %631 = vmatpush3.bf16.msra.mxu0 %v718_v26 }
  0x1d   :  { %659 = vmatpush3.bf16.msra.mxu1 %v719_v27  ;;  %632 = vmatprep.subr.bf16.mxu0 %v720_v28 }
  0x1e   :  { %660 = vmatprep.subr.bf16.mxu1 %v721_v29 }
  0x20   :  { %633 = vmatpush3.bf16.msra.mxu0 %v722_v30 }
  0x21   :  { %661 = vmatpush3.bf16.msra.mxu1 %v723_v31  ;;  %680 = vmatprep.subr.bf16.mxu0 %v730_v36 }
  0x23   :  { %417 = vmatmul.mubr.bf16.vlgmr.msra.gmra.mrb[0].mxu0 %v724_v32 }
  0x24   :  { %466 = vmatmul.mubr.bf16.vlgmr.msra.gmra.mrb[0].mxu1 %v727_v34  ;;  %681 = vmatpush3.bf16.msra.mxu0 %v730_v36 }
  0x25   :  { %682 = vmatprep.subr.bf16.mxu0 %v731_v37  ;;  %424 = vmatprep.mubr.bf16.mxu0 %v732_v38 }
  0x26   :  { %473 = vmatprep.mubr.bf16.mxu1 %v734_v39 }
  0x28   :  { %683 = vmatpush3.bf16.msra.mxu0 %v731_v37 }
  0x29   :  { %684 = vmatprep.subr.bf16.mxu0 %v738_v41 }
  0x2b   :  { %425 = vmatmul.mubr.bf16.gmra.mrb[4].mxu0 %v736_v40 }
  0x2c   :  { %474 = vmatmul.mubr.bf16.gmra.mrb[4].mxu1 %v737_v42  ;;  %688 = vmatprep.mubr.msk.bf16.mxu0 %vm377_vm0, %v740_v43 }
  0x2d   :  { %685 = vmatpush3.bf16.msra.mxu0 %v738_v41 }
  0x2e   :  { %686 = vmatprep.subr.bf16.mxu0 %v739_v44 }
  0x31   :  { %687 = vmatpush3.bf16.msra.mxu0 %v739_v44 }
  0x34   :  { %689 = vmatmul.mubr.msk.bf16.vlgmr.msra.gmra.mrb[8].mxu0 %vm377_vm0, %v741_v45 }
  0xf6   :  { %v634_v46 = vpop.f32.mrb[0].mxu0 }
  0xf7   :  { %v662_v47 = vpop.f32.mrb[0].mxu1  ;;  %v635_v48 = vpop.f32.mrb[1].mxu0 }
  0xf8   :  { %v636_v49 = vadd.f32 %v635_v48, %v634_v46  ;;  %v663_v50 = vpop.f32.mrb[1].mxu1  ;;  %v637_v51 = vpop.f32.mrb[2].mxu0 }
  0xf9   :  { %v664_v52 = vadd.f32 %v663_v50, %v662_v47  ;;  %v665_v53 = vpop.f32.mrb[2].mxu1  ;;  %v638_v54 = vpop.f32.mrb[3].mxu0 }
  0xfa   :  { %v639_v55 = vadd.f32 %v638_v54, %v637_v51  ;;  %v666_v56 = vpop.f32.mrb[3].mxu1 }
  0xfb   :  { %v667_v57 = vadd.f32 %v666_v56, %v665_v53  ;;  %v468_v58 = vadd.f32 %v664_v52, %v636_v49 }
  0xfd   :  { %v471_v59 = vadd.f32 %v667_v57, %v639_v55 }
  0xfe   :  { %v640_v60 = vpop.f32.mrb[4].mxu0 }
  0xff   :  { %v668_v61 = vpop.f32.mrb[4].mxu1  ;;  %v641_v62 = vpop.f32.mrb[5].mxu0 }
 0x100   :  { %v642_v63 = vadd.f32 %v641_v62, %v640_v60  ;;  %v669_v0 = vpop.f32.mrb[5].mxu1  ;;  %v643_v1 = vpop.f32.mrb[6].mxu0 }
 0x101   :  { %v670_v2 = vadd.f32 %v669_v0, %v668_v61  ;;  %v671_v3 = vpop.f32.mrb[6].mxu1  ;;  %v644_v4 = vpop.f32.mrb[7].mxu0 }
 0x102   :  { %v645_v5 = vadd.f32 %v644_v4, %v643_v1  ;;  %v672_v6 = vpop.f32.mrb[7].mxu1 }
 0x103   :  { %v673_v7 = vadd.f32 %v672_v6, %v671_v3  ;;  %v476_v8 = vadd.f32 %v670_v2, %v642_v63 }
 0x105   :  { %v479_v9 = vadd.f32 %v673_v7, %v645_v5 }
 0x107   :  { %v690_v10 = vpop.f32.mrb[8].mxu0 }
 0x108   :  { %v525_v12 = vadd.f32 %v690_v10, %v476_v8  ;;  %v516_v13 = vpop.f32.mrb[9].mxu0 }
 0x109   :  { %v517_v14 = vadd.f32 %v516_v13, %v468_v58  ;;  %v691_v15 = vpop.f32.mrb[10].mxu0 }
 0x10a   :  { %v555_v16 = vadd.f32 %v617_v11, %v525_v12  ;;  %v528_v17 = vadd.f32 %v691_v15, %v479_v9  ;;  %v519_v18 = vpop.f32.mrb[11].mxu0 }
 0x10b   :  { %v553_v19 = vadd.f32 %v617_v11, %v517_v14  ;;  %v520_v20 = vadd.f32 %v519_v18, %v471_v59 }
 0x10c   :  { %v559_v21 = vmax.f32 %v555_v16, 0.0  ;;  %v556_v22 = vadd.f32 %v617_v11, %v528_v17 }
 0x10d   :  { %v557_v23 = vmax.f32 %v553_v19, 0.0  ;;  %v554_v24 = vadd.f32 %v617_v11, %v520_v20 }
 0x10e   :  { %563 = vst [vmem:[%s918_s3 + $0x10] sm:$0xff] %v559_v21  ;;  %v560_v25 = vmax.f32 %v556_v22, 0.0 }
 0x10f   :  { %561 = vst [vmem:[%s918_s3] sm:$0xff] %v557_v23  ;;  %v558_v26 = vmax.f32 %v554_v24, 0.0 }
 0x110   :  { %564 = vst [vmem:[%s918_s3 + $0x18] sm:$0xff] %v560_v25 }
 0x111   :  { %562 = vst [vmem:[%s918_s3 + $0x8] sm:$0xff] %v558_v26 }

// kernel: _lambda_.28
= control target key start
LH: loop header
LB: loop body
LE: loop exit
PB: predicated region body
PF: predicated region fallthrough
CT: control target
= control target key end

     0   :  { %vm73_vm0 = vcmask 523264   ;;  %s249_s1 = inlined_call_operand.vmem [shape: bf16[64,128], index: 1, kind: input, shape index: {}]   ;;  %s250_s0 = inlined_call_operand.vmem [shape: bf16[32,64], index: 0, kind: input, shape index: {}]   ;;  %s251_s2 = inlined_call_operand.vmem [shape: f32[1,128], index: 2, kind: input, shape index: {}]   ;;  %s252_s3 = inlined_call_operand.vmem [shape: f32[32,128], index: 3, kind: output, shape index: {}]  }
   0x1   :  { %v190_v0 = vld [vmem:[%s249_s1] sm:$0xff]   ;;  %v191_v1 = vld [vmem:[%s249_s1 + $0x8] sm:$0xff]   ;;  %v192_v2 = vld [vmem:[%s249_s1 + $0x10] sm:$0xff]  }
   0x2   :  { %178 = vmatprep.subr.bf16.mxu0 %v190_v0  ;;  %v194_v3 = vld [vmem:[%s250_s0] sm:$0xff]   ;;  %v193_v4 = vld [vmem:[%s249_s1 + $0x18] sm:$0xff]   ;;  %v195_v5 = vld [vmem:[%s250_s0 + $0x8] sm:$0xff]  }
   0x3   :  { %179 = vmatpush3.bf16.msra.mxu0 %v190_v0  ;;  %186 = vmatprep.mubr.msk.bf16.mxu0 %vm73_vm0, %v194_v3  ;;  %v171_v6 = vld [vmem:[%s251_s2] ss:$0 sm:$0xff] }
   0x4   :  { %180 = vmatprep.subr.bf16.mxu0 %v191_v1 }
   0x7   :  { %181 = vmatpush3.bf16.msra.mxu0 %v191_v1 }
   0x8   :  { %182 = vmatprep.subr.bf16.mxu0 %v192_v2 }
   0xb   :  { %183 = vmatpush3.bf16.msra.mxu0 %v192_v2 }
   0xc   :  { %184 = vmatprep.subr.bf16.mxu0 %v193_v4 }
   0xf   :  { %185 = vmatpush3.bf16.msra.mxu0 %v193_v4 }
  0x12   :  { %187 = vmatmul.mubr.msk.bf16.vlgmr.msra.gmra.mrb[0].mxu0 %vm73_vm0, %v195_v5 }
  0xe5   :  { %v188_v7 = vpop.f32.mrb[0].mxu0 }
  0xe6   :  { %v153_v8 = vadd.f32 %v188_v7, %v171_v6  ;;  %v114_v9 = vpop.f32.mrb[1].mxu0 }
  0xe7   :  { %v151_v10 = vadd.f32 %v171_v6, %v114_v9  ;;  %v189_v11 = vpop.f32.mrb[2].mxu0 }
  0xe8   :  { %157 = vst [vmem:[%s252_s3 + $0x10] sm:$0xff] %v153_v8  ;;  %v154_v12 = vadd.f32 %v189_v11, %v171_v6  ;;  %v117_v13 = vpop.f32.mrb[3].mxu0 }
  0xe9   :  { %155 = vst [vmem:[%s252_s3] sm:$0xff] %v151_v10  ;;  %v152_v14 = vadd.f32 %v171_v6, %v117_v13 }
  0xea   :  { %158 = vst [vmem:[%s252_s3 + $0x18] sm:$0xff] %v154_v12 }
  0xeb   :  { %156 = vst [vmem:[%s252_s3 + $0x8] sm:$0xff] %v152_v14 }

// kernel: _lambda_.30
= control target key start
LH: loop header
LB: loop body
LE: loop exit
PB: predicated region body
PF: predicated region fallthrough
CT: control target
= control target key end

     0   :  { %s1036_s12 = smov 0   ;;  %s1038_s13 = smov 0   ;;  %s1152_s0 = inlined_call_operand.vmem [shape: bf16[32,1152], index: 0, kind: input, shape index: {}]   ;;  %s1153_s1 = inlined_call_operand.vmem [shape: bf16[1152,128], index: 1, kind: input, shape index: {}]   ;;  %s1154_s2 = inlined_call_operand.vmem [shape: f32[1,128], index: 2, kind: input, shape index: {}]   ;;  %s1155_s3 = inlined_call_operand.vmem [shape: f32[32,128], index: 3, kind: output, shape index: {}]  }
   0x1   :  { %s1040_s14 = smov 0   ;;  %s1042_s15 = smov 0  }
   0x2   :  { %s1044_s16 = smov 0  }
   0x3 LB: > { %s25_s17 = sadd.s32 1, %s1009_s15  ;;  %p48_p1 = scmp.ne.s32.totalorder %s1001_s13, %s997_s12  ;;  %s1013_s16 = sphi %s1044_s16, %s13_s16   ;;  %s1009_s15 = sphi %s1042_s15, %s1159_s15   ;;  %s1005_s14 = sphi %s1040_s14, %s1158_s14   ;;  %s1001_s13 = sphi %s1038_s13, %s1157_s13   ;;  %s997_s12 = sphi %s1036_s12, %s1156_s12  }
   0x4   : > { %p26_p0 = scmp.ge.s32.totalorder %s25_s17, 3  ;;  %p49_p2 = scmp.eq.s32.totalorder %s1013_s16, 0 }
   0x5   : > { %s41_s19 = sadd.s32 1, %s1001_s13  ;;  %p792_p5 = scmp.ge.s32.totalorder %s1013_s16, 3 }
   0x6   : > { %s1161_s17 = smov (%p26_p0, %s25_s17), 0  ;;  %p50_p3 = por %p49_p2, %p48_p1 }
   0x7   : > { %s37_s18 = ssub.s32 %s1009_s15, %s1161_s17  ;;  %162 = sbr.rel (%p792_p5) target bundleno = 23 (0x17), region = 20 }
   0x8   : > { %p39_p4 = scmp.eq.s32.totalorder %s37_s18, 0 }
   0xa   : > { %s1071_s20 = scalar_select %p39_p4, %s1001_s13, %s41_s19  }
   0xe   : > { %165 = sbr.rel (!%p50_p3) target bundleno = 23 (0x17), region = 24  ;;  %s167_s21 = sand.u32 (%p50_p3), 1, %s1001_s13  }
   0xf   : > { %s841_s22 = smul.u32 (%p50_p3), 12, %s1009_s15 }
  0x10   : > { %s900_s23 = smul.u32 (%p50_p3), 48, %s167_s21 }
  0x11   : > { %s175_s26 = scalar_lea.vmem (%p50_p3), %s1152_s0, %s841_s22 }
  0x12   : > { %v190_v0 = vld [vmem:[%s175_s26] sm:$0xff] (%p50_p3)  ;;  %v194_v2 = vld [vmem:[%s175_s26 + $0x48] sm:$0xff] (%p50_p3)  ;;  %s169_s27 = scalar_lea.vmem (%p50_p3), [#allocation3], %s900_s23  ;;  %v798_v6 = vld [vmem:[%s175_s26 + $0x50] sm:$0xf] (%p50_p3) }
  0x13   : > { %v192_v1 = vld [vmem:[%s175_s26 + $0x24] sm:$0xff] (%p50_p3)  ;;  %191 = vst [vmem:[%s169_s27] sm:$0xff] (%p50_p3), %v190_v0  ;;  %195 = vst [vmem:[%s169_s27 + $0x18] sm:$0xff] (%p50_p3), %v194_v2  ;;  %v196_v3 = vld [vmem:[%s175_s26 + $0x6c] sm:$0xff] (%p50_p3) }
  0x14   : > { %193 = vst [vmem:[%s169_s27 + $0xc] sm:$0xff] (%p50_p3), %v192_v1  ;;  %v794_v4 = vld [vmem:[%s175_s26 + $0x8] sm:$0xf] (%p50_p3)  ;;  %v796_v5 = vld [vmem:[%s175_s26 + $0x2c] sm:$0xf] (%p50_p3)  ;;  %197 = vst [vmem:[%s169_s27 + $0x24] sm:$0xff] (%p50_p3), %v196_v3 }
  0x15   : > { %795 = vst [vmem:[%s169_s27 + $0x8] sm:$0xf] %v794_v4  ;;  %797 = vst [vmem:[%s169_s27 + $0x14] sm:$0xf] %v796_v5  ;;  %v800_v7 = vld [vmem:[%s175_s26 + $0x74] sm:$0xf] }
  0x16   : > { %799 = vst [vmem:[%s169_s27 + $0x20] sm:$0xf] %v798_v6  ;;  %801 = vst [vmem:[%s169_s27 + $0x2c] sm:$0xf] %v800_v7 }
  0x17 PF: > { %p802_p6 = scmp.ge.s32.totalorder %s1013_s16, 1  ;;  %p229_p7 = scmp.lt.s32.totalorder %s1013_s16, 4 }
  0x19   : > { %p230_p8 = pnand %p802_p6, %p229_p7 }
  0x1a   : > { %s236_s28 = sand.u32 (!%p230_p8), 1, %s997_s12   ;;  %s275_s29 = smul.u32 (!%p230_p8), 48, %s1005_s14 }
  0x1b   : > { %233 = sbr.rel (%p230_p8) target bundleno = 316 (0x13c), region = 54  ;;  %p804_p10 = scmp.ne.s32.totalorder (!%p230_p8), %s1005_s14, 0 }
  0x1c   : > { %s901_s30 = smul.u32 (!%p230_p8), 48, %s236_s28  ;;  %p276_p9 = scmp.lt.s32.totalorder (!%p230_p8), %s275_s29, 143 }
  0x1e   : > { %s1088_s8 = scalar_lea.vmem (!%p230_p8), [#allocation3], %s901_s30 }
  0x22   : > { %s1163_s29 = smov (!%p276_p9, %s275_s29), 143  ;;  %300 = sbr.rel (%p804_p10) target bundleno = 41 (0x29), region = 62 }
  0x23   : > { %s803_s4 = sshll.u32 %s1163_s29, 2  ;;  %v1015_v8 = vmov (!%p804_p10), 0.0  }
  0x24   : > { %s1086_s7 = scalar_lea.vmem %s1153_s1, %s803_s4  ;;  %301 = vst [vmem:[#allocation2] sm:$0xff] (!%p804_p10), %v1015_v8  ;;  %302 = vst [vmem:[#allocation2 + $0x8] sm:$0xff] (!%p804_p10), %v1015_v8 }
  0x25   : > { %303 = vst [vmem:[#allocation2 + $0x10] sm:$0xff] (!%p804_p10), %v1015_v8  ;;  %304 = vst [vmem:[#allocation2 + $0x18] sm:$0xff] (!%p804_p10), %v1015_v8 }
  0x29 PF: > { %v943_v9 = vld [vmem:[%s1086_s7 + $0x40] sm:$0xff]   ;;  %v946_v12 = vld [vmem:[%s1086_s7 + $0x48] sm:$0xff]   ;;  %v949_v15 = vld [vmem:[%s1086_s7 + $0x50] sm:$0xff]   ;;  %p835_p11 = scmp.ne.s32.totalorder %s1005_s14, 2 }
  0x2a   : > { %v944_v10 = vld [vmem:[%s1086_s7] sm:$0xff]   ;;  %842 = vmatprep.subr.bf16.mxu0 %v943_v9  ;;  %v947_v13 = vld [vmem:[%s1086_s7 + $0x8] sm:$0xff]   ;;  %v950_v16 = vld [vmem:[%s1086_s7 + $0x10] sm:$0xff]  }
  0x2b   : > { %v945_v11 = vld [vmem:[%s1086_s7 + $0x80] sm:$0xff]   ;;  %843 = vmatpush3.bf16.msra.mxu0 %v944_v10  ;;  %v948_v14 = vld [vmem:[%s1086_s7 + $0x88] sm:$0xff]   ;;  %v951_v17 = vld [vmem:[%s1086_s7 + $0x90] sm:$0xff]  }
  0x2c   : > { %880 = vmatprep.subr.bf16.mxu1 %v945_v11  ;;  %844 = vmatprep.subr.bf16.mxu0 %v946_v12  ;;  %v952_v18 = vld [vmem:[%s1086_s7 + $0x58] sm:$0xff]   ;;  %v955_v21 = vld [vmem:[%s1086_s7 + $0x60] sm:$0xff]   ;;  %v958_v24 = vld [vmem:[%s1086_s7 + $0x68] sm:$0xff]  }
  0x2d   : > { %881 = vmatpush3.bf16.msra.mxu1 %v945_v11  ;;  %v953_v19 = vld [vmem:[%s1086_s7 + $0x18] sm:$0xff]   ;;  %v957_v22 = vld [vmem:[%s1086_s7 + $0xa0] sm:$0xff]   ;;  %v960_v25 = vld [vmem:[%s1086_s7 + $0xa8] sm:$0xff]  }
  0x2e   : > { %882 = vmatprep.subr.bf16.mxu1 %v948_v14  ;;  %v954_v20 = vld [vmem:[%s1086_s7 + $0x98] sm:$0xff]   ;;  %v956_v23 = vld [vmem:[%s1086_s7 + $0x20] sm:$0xff]   ;;  %v959_v26 = vld [vmem:[%s1086_s7 + $0x28] sm:$0xff]  }
  0x2f   : > { %845 = vmatpush3.bf16.msra.mxu0 %v947_v13  ;;  %v961_v27 = vld [vmem:[%s1086_s7 + $0x70] sm:$0xff]   ;;  %v964_v30 = vld [vmem:[%s1086_s7 + $0x78] sm:$0xff]   ;;  %v305_v45 = vld [vmem:[#allocation2] sm:$0xff] }
  0x30   : > { %846 = vmatprep.subr.bf16.mxu0 %v949_v15  ;;  %v962_v28 = vld [vmem:[%s1086_s7 + $0x30] sm:$0xff]   ;;  %v966_v31 = vld [vmem:[%s1086_s7 + $0xb8] sm:$0xff]   ;;  %v306_v50 = vld [vmem:[#allocation2 + $0x8] sm:$0xff] }
  0x31   : > { %883 = vmatpush3.bf16.msra.mxu1 %v948_v14  ;;  %v963_v29 = vld [vmem:[%s1086_s7 + $0xb0] sm:$0xff]   ;;  %v965_v34 = vld [vmem:[%s1086_s7 + $0x38] sm:$0xff]   ;;  %v836_v4 = vld [vmem:[%s1154_s2] ss:$0 sm:$0xff] (!%p835_p11) }
  0x32   : > { %884 = vmatprep.subr.bf16.mxu1 %v951_v17  ;;  %v969_v32 = vld [vmem:[%s1088_s8 + $0x4] ss:$12 sps:$4 sm:$0xff]   ;;  %v970_v33 = vld [vmem:[%s1088_s8 + $0x8] ss:$12 sps:$4 sm:$0xff]   ;;  %v967_v35 = vld [vmem:[%s1088_s8] ss:$12 sps:$4 sm:$0xff]  }
  0x33   : > { %847 = vmatpush3.bf16.msra.mxu0 %v950_v16  ;;  %573 = vmatprep.mubr.bf16.mxu0 %v969_v32  ;;  %v972_v36 = vld [vmem:[%s1088_s8 + $0x1c] ss:$12 sps:$4 sm:$0xff]   ;;  %v971_v37 = vld [vmem:[%s1088_s8 + $0x20] ss:$12 sps:$4 sm:$0xff]   ;;  %v974_v38 = vld [vmem:[%s1088_s8 + $0x18] ss:$12 sps:$4 sm:$0xff]  }
  0x34   : > { %848 = vmatprep.subr.bf16.mxu0 %v952_v18  ;;  %896 = vmatprep.mubr.bf16.mxu1 %v970_v33  ;;  %v307_v59 = vld [vmem:[#allocation2 + $0x10] sm:$0xff]  ;;  %v308_v63 = vld [vmem:[#allocation2 + $0x18] sm:$0xff] }
  0x35   : > { %885 = vmatpush3.bf16.msra.mxu1 %v951_v17 }
  0x36   : > { %886 = vmatprep.subr.bf16.mxu1 %v954_v20 }
  0x37   : > { %849 = vmatpush3.bf16.msra.mxu0 %v953_v19 }
  0x38   : > { %850 = vmatprep.subr.bf16.mxu0 %v955_v21 }
  0x39   : > { %887 = vmatpush3.bf16.msra.mxu1 %v954_v20 }
  0x3a   : > { %888 = vmatprep.subr.bf16.mxu1 %v957_v22 }
  0x3b   : > { %851 = vmatpush3.bf16.msra.mxu0 %v956_v23 }
  0x3c   : > { %852 = vmatprep.subr.bf16.mxu0 %v958_v24 }
  0x3d   : > { %889 = vmatpush3.bf16.msra.mxu1 %v957_v22 }
  0x3e   : > { %890 = vmatprep.subr.bf16.mxu1 %v960_v25 }
  0x3f   : > { %853 = vmatpush3.bf16.msra.mxu0 %v959_v26 }
  0x40   : > { %854 = vmatprep.subr.bf16.mxu0 %v961_v27 }
  0x41   : > { %891 = vmatpush3.bf16.msra.mxu1 %v960_v25 }
  0x42   : > { %892 = vmatprep.subr.bf16.mxu1 %v963_v29 }
  0x43   : > { %855 = vmatpush3.bf16.msra.mxu0 %v962_v28 }
  0x44   : > { %856 = vmatprep.subr.bf16.mxu0 %v964_v30 }
  0x45   : > { %893 = vmatpush3.bf16.msra.mxu1 %v963_v29 }
  0x46   : > { %894 = vmatprep.subr.bf16.mxu1 %v966_v31 }
  0x47   : > { %857 = vmatpush3.bf16.msra.mxu0 %v965_v34 }
  0x49   : > { %895 = vmatpush3.bf16.msra.mxu1 %v966_v31 }
  0x4a   : > { %574 = vmatmul.mubr.bf16.vlgmr.msra.gmra.mrb[0].mxu0 %v967_v35 }
  0x4b   : > { %581 = vmatprep.mubr.bf16.mxu0 %v972_v36 }
  0x4c   : > { %897 = vmatmul.mubr.bf16.vlgmr.msra.gmra.mrb[0].mxu1 %v971_v37 }
  0x52   : > { %582 = vmatmul.mubr.bf16.gmra.mrb[4].mxu0 %v974_v38 }
 0x11d   : > { %v858_v39 = vpop.f32.mrb[0].mxu0 }
 0x11e   : > { %v859_v40 = vpop.f32.mrb[1].mxu0 }
 0x11f   : > { %v860_v41 = vadd.f32 %v859_v40, %v858_v39  ;;  %v861_v42 = vpop.f32.mrb[2].mxu0  ;;  %v898_v43 = vpop.f32.mrb[0].mxu1 }
 0x120   : > { %v862_v44 = vpop.f32.mrb[3].mxu0  ;;  %v624_v46 = vpop.f32.mrb[1].mxu1 }
 0x121   : > { %v863_v47 = vadd.f32 %v862_v44, %v861_v42  ;;  %v625_v48 = vadd.f32 %v860_v41, %v624_v46  ;;  %v899_v49 = vpop.f32.mrb[2].mxu1 }
 0x122   : > { %v627_v51 = vpop.f32.mrb[3].mxu1 }
 0x123   : > { %v639_v52 = vadd.f32 %v625_v48, %v305_v45  ;;  %v628_v53 = vadd.f32 %v863_v47, %v627_v51 }
 0x125   : > { %643 = vst [vmem:[#allocation2] sm:$0xff] %v639_v52  ;;  %v640_v54 = vadd.f32 %v628_v53, %v306_v50  ;;  %v864_v55 = vpop.f32.mrb[4].mxu0 }
 0x126   : > { %v865_v56 = vpop.f32.mrb[5].mxu0 }
 0x127   : > { %644 = vst [vmem:[#allocation2 + $0x8] sm:$0xff] %v640_v54  ;;  %v866_v57 = vadd.f32 %v865_v56, %v864_v55  ;;  %v867_v58 = vpop.f32.mrb[6].mxu0 }
 0x128   : > { %v868_v60 = vpop.f32.mrb[7].mxu0 }
 0x129   : > { %v633_v61 = vadd.f32 %v898_v43, %v866_v57  ;;  %v869_v62 = vadd.f32 %v868_v60, %v867_v58  ;;  %650 = sbr.rel (%p835_p11) target bundleno = 316 (0x13c), region = 66 }
 0x12b   : > { %v641_v0 = vadd.f32 %v633_v61, %v307_v59  ;;  %v636_v1 = vadd.f32 %v899_v49, %v869_v62 }
 0x12c   : > { %v651_v3 = vld [vmem:[#allocation2] sm:$0xff] (!%p835_p11) }
 0x12d   : > { %645 = vst [vmem:[#allocation2 + $0x10] sm:$0xff] %v641_v0  ;;  %v642_v2 = vadd.f32 %v636_v1, %v308_v63  ;;  %v662_v6 = vadd.f32 (!%p835_p11), %v836_v4, %v651_v3 }
 0x12e   : > { %v652_v5 = vld [vmem:[#allocation2 + $0x8] sm:$0xff] (!%p835_p11) }
 0x12f   : > { %646 = vst [vmem:[#allocation2 + $0x18] sm:$0xff] %v642_v2  ;;  %v663_v7 = vadd.f32 (!%p835_p11), %v836_v4, %v652_v5  ;;  %v666_v12 = vmax.f32 (!%p835_p11), %v662_v6, 0.0 }
 0x131   : > { %v667_v13 = vmax.f32 %v663_v7, 0.0  ;;  %670 = vst [vmem:[%s1155_s3] sm:$0xff] %v666_v12 }
 0x133   : > { %671 = vst [vmem:[%s1155_s3 + $0x8] sm:$0xff] %v667_v13 }
 0x134   : > { %v653_v8 = vld [vmem:[#allocation2 + $0x10] sm:$0xff] }
 0x135   : > { %v664_v10 = vadd.f32 %v836_v4, %v653_v8 }
 0x136   : > { %v654_v9 = vld [vmem:[#allocation2 + $0x18] sm:$0xff] }
 0x137   : > { %v665_v11 = vadd.f32 %v836_v4, %v654_v9  ;;  %v668_v14 = vmax.f32 %v664_v10, 0.0 }
 0x139   : > { %v669_v15 = vmax.f32 %v665_v11, 0.0  ;;  %672 = vst [vmem:[%s1155_s3 + $0x10] sm:$0xff] %v668_v14 }
 0x13b   : > { %673 = vst [vmem:[%s1155_s3 + $0x18] sm:$0xff] %v669_v15 }
 0x13c PF: > { %s13_s16 = sadd.s32 1, %s1013_s16   ;;  %s1156_s12 = smov %s1001_s13 }
 0x13d   : > { %p10_p12 = scmp.ge.s32.totalorder %s13_s16, 5   ;;  %s1157_s13 = smov %s1071_s20 }
 0x13e   : > { %s1158_s14 = smov %s1009_s15  ;;  %s1159_s15 = smov %s1161_s17 }
 0x13f   :  { %12 = sbr.rel (!%p10_p12) target bundleno = 3 (0x3), region = 113 }

// kernel: _lambda_.29
= control target key start
LH: loop header
LB: loop body
LE: loop exit
PB: predicated region body
PF: predicated region fallthrough
CT: control target
= control target key end

     0   :  { %s1128_s15 = smov 0   ;;  %s1130_s16 = smov 0   ;;  %s1256_s0 = inlined_call_operand.vmem [shape: bf16[32,1152], index: 0, kind: input, shape index: {}]   ;;  %s1257_s1 = inlined_call_operand.vmem [shape: bf16[1152,128], index: 1, kind: input, shape index: {}]   ;;  %s1258_s2 = inlined_call_operand.vmem [shape: f32[1,128], index: 2, kind: input, shape index: {}]   ;;  %s1259_s3 = inlined_call_operand.vmem [shape: f32[32,128], index: 3, kind: input, shape index: {}]   ;;  %s1260_s4 = inlined_call_operand.vmem [shape: f32[32,128], index: 4, kind: output, shape index: {}]  }
   0x1   :  { %s1132_s17 = smov 0   ;;  %s1134_s18 = smov 0  }
   0x2   :  { %s1136_s19 = smov 0  }
   0x3 LB: > { %s26_s20 = sadd.s32 1, %s1096_s18  ;;  %p49_p1 = scmp.ne.s32.totalorder %s1088_s16, %s1084_s15  ;;  %s1100_s19 = sphi %s1136_s19, %s14_s19   ;;  %s1096_s18 = sphi %s1134_s18, %s1264_s18   ;;  %s1092_s17 = sphi %s1132_s17, %s1263_s17   ;;  %s1088_s16 = sphi %s1130_s16, %s1262_s16   ;;  %s1084_s15 = sphi %s1128_s15, %s1261_s15  }
   0x4   : > { %p27_p0 = scmp.ge.s32.totalorder %s26_s20, 3  ;;  %p50_p2 = scmp.eq.s32.totalorder %s1100_s19, 0 }
   0x5   : > { %s42_s22 = sadd.s32 1, %s1088_s16  ;;  %p879_p5 = scmp.ge.s32.totalorder %s1100_s19, 3 }
   0x6   : > { %s1266_s20 = smov (%p27_p0, %s26_s20), 0  ;;  %p51_p3 = por %p50_p2, %p49_p1 }
   0x7   : > { %s38_s21 = ssub.s32 %s1096_s18, %s1266_s20  ;;  %203 = sbr.rel (%p879_p5) target bundleno = 23 (0x17), region = 24 }
   0x8   : > { %p40_p4 = scmp.eq.s32.totalorder %s38_s21, 0 }
   0xa   : > { %s1163_s23 = scalar_select %p40_p4, %s1088_s16, %s42_s22  }
   0xe   : > { %206 = sbr.rel (!%p51_p3) target bundleno = 23 (0x17), region = 28  ;;  %s208_s24 = sand.u32 (%p51_p3), 1, %s1088_s16  }
   0xf   : > { %s928_s25 = smul.u32 (%p51_p3), 12, %s1096_s18 }
  0x10   : > { %s987_s26 = smul.u32 (%p51_p3), 48, %s208_s24 }
  0x11   : > { %s216_s29 = scalar_lea.vmem (%p51_p3), %s1256_s0, %s928_s25 }
  0x12   : > { %v231_v0 = vld [vmem:[%s216_s29] sm:$0xff] (%p51_p3)  ;;  %v235_v2 = vld [vmem:[%s216_s29 + $0x48] sm:$0xff] (%p51_p3)  ;;  %s210_s30 = scalar_lea.vmem (%p51_p3), [#allocation3], %s987_s26  ;;  %v885_v6 = vld [vmem:[%s216_s29 + $0x50] sm:$0xf] (%p51_p3) }
  0x13   : > { %v233_v1 = vld [vmem:[%s216_s29 + $0x24] sm:$0xff] (%p51_p3)  ;;  %232 = vst [vmem:[%s210_s30] sm:$0xff] (%p51_p3), %v231_v0  ;;  %236 = vst [vmem:[%s210_s30 + $0x18] sm:$0xff] (%p51_p3), %v235_v2  ;;  %v237_v3 = vld [vmem:[%s216_s29 + $0x6c] sm:$0xff] (%p51_p3) }
  0x14   : > { %234 = vst [vmem:[%s210_s30 + $0xc] sm:$0xff] (%p51_p3), %v233_v1  ;;  %v881_v4 = vld [vmem:[%s216_s29 + $0x8] sm:$0xf] (%p51_p3)  ;;  %v883_v5 = vld [vmem:[%s216_s29 + $0x2c] sm:$0xf] (%p51_p3)  ;;  %238 = vst [vmem:[%s210_s30 + $0x24] sm:$0xff] (%p51_p3), %v237_v3 }
  0x15   : > { %882 = vst [vmem:[%s210_s30 + $0x8] sm:$0xf] %v881_v4  ;;  %884 = vst [vmem:[%s210_s30 + $0x14] sm:$0xf] %v883_v5  ;;  %v887_v7 = vld [vmem:[%s216_s29 + $0x74] sm:$0xf] }
  0x16   : > { %886 = vst [vmem:[%s210_s30 + $0x20] sm:$0xf] %v885_v6  ;;  %888 = vst [vmem:[%s210_s30 + $0x2c] sm:$0xf] %v887_v7 }
  0x17 PF: > { %p889_p6 = scmp.ge.s32.totalorder %s1100_s19, 1  ;;  %p270_p7 = scmp.lt.s32.totalorder %s1100_s19, 4 }
  0x19   : > { %p271_p8 = pnand %p889_p6, %p270_p7 }
  0x1a   : > { %s277_s5 = sand.u32 (!%p271_p8), 1, %s1084_s15   ;;  %s326_s6 = smul.u32 (!%p271_p8), 48, %s1092_s17 }
  0x1b   : > { %274 = sbr.rel (%p271_p8) target bundleno = 318 (0x13e), region = 58  ;;  %p891_p10 = scmp.ne.s32.totalorder (!%p271_p8), %s1092_s17, 0 }
  0x1c   : > { %s988_s7 = smul.u32 (!%p271_p8), 48, %s277_s5  ;;  %p327_p9 = scmp.lt.s32.totalorder (!%p271_p8), %s326_s6, 143 }
  0x1e   : > { %s1180_s12 = scalar_lea.vmem (!%p271_p8), [#allocation3], %s988_s7 }
  0x22   : > { %s1268_s6 = smov (!%p327_p9, %s326_s6), 143  ;;  %360 = sbr.rel (%p891_p10) target bundleno = 41 (0x29), region = 66 }
  0x23   : > { %s890_s8 = sshll.u32 %s1268_s6, 2  ;;  %v1102_v8 = vmov (!%p891_p10), 0.0  }
  0x24   : > { %s1178_s11 = scalar_lea.vmem %s1257_s1, %s890_s8  ;;  %361 = vst [vmem:[#allocation2] sm:$0xff] (!%p891_p10), %v1102_v8  ;;  %362 = vst [vmem:[#allocation2 + $0x8] sm:$0xff] (!%p891_p10), %v1102_v8 }
  0x25   : > { %363 = vst [vmem:[#allocation2 + $0x10] sm:$0xff] (!%p891_p10), %v1102_v8  ;;  %364 = vst [vmem:[#allocation2 + $0x18] sm:$0xff] (!%p891_p10), %v1102_v8 }
  0x29 PF: > { %v1030_v9 = vld [vmem:[%s1178_s11 + $0x40] sm:$0xff]   ;;  %v1033_v12 = vld [vmem:[%s1178_s11 + $0x48] sm:$0xff]   ;;  %v1036_v15 = vld [vmem:[%s1178_s11 + $0x50] sm:$0xff]   ;;  %p922_p11 = scmp.ne.s32.totalorder %s1092_s17, 2 }
  0x2a   : > { %v1031_v10 = vld [vmem:[%s1178_s11] sm:$0xff]   ;;  %929 = vmatprep.subr.bf16.mxu0 %v1030_v9  ;;  %v1034_v13 = vld [vmem:[%s1178_s11 + $0x8] sm:$0xff]   ;;  %v1037_v16 = vld [vmem:[%s1178_s11 + $0x10] sm:$0xff]  }
  0x2b   : > { %v1032_v11 = vld [vmem:[%s1178_s11 + $0x80] sm:$0xff]   ;;  %930 = vmatpush3.bf16.msra.mxu0 %v1031_v10  ;;  %v1035_v14 = vld [vmem:[%s1178_s11 + $0x88] sm:$0xff]   ;;  %v1038_v17 = vld [vmem:[%s1178_s11 + $0x90] sm:$0xff]  }
  0x2c   : > { %967 = vmatprep.subr.bf16.mxu1 %v1032_v11  ;;  %931 = vmatprep.subr.bf16.mxu0 %v1033_v12  ;;  %v1039_v18 = vld [vmem:[%s1178_s11 + $0x58] sm:$0xff]   ;;  %v1042_v21 = vld [vmem:[%s1178_s11 + $0x60] sm:$0xff]   ;;  %v1045_v24 = vld [vmem:[%s1178_s11 + $0x68] sm:$0xff]  }
  0x2d   : > { %968 = vmatpush3.bf16.msra.mxu1 %v1032_v11  ;;  %v1040_v19 = vld [vmem:[%s1178_s11 + $0x18] sm:$0xff]   ;;  %v1044_v22 = vld [vmem:[%s1178_s11 + $0xa0] sm:$0xff]   ;;  %v1047_v25 = vld [vmem:[%s1178_s11 + $0xa8] sm:$0xff]  }
  0x2e   : > { %969 = vmatprep.subr.bf16.mxu1 %v1035_v14  ;;  %v1041_v20 = vld [vmem:[%s1178_s11 + $0x98] sm:$0xff]   ;;  %v1043_v23 = vld [vmem:[%s1178_s11 + $0x20] sm:$0xff]   ;;  %v1046_v26 = vld [vmem:[%s1178_s11 + $0x28] sm:$0xff]  }
  0x2f   : > { %932 = vmatpush3.bf16.msra.mxu0 %v1034_v13  ;;  %v1048_v27 = vld [vmem:[%s1178_s11 + $0x70] sm:$0xff]   ;;  %v1051_v30 = vld [vmem:[%s1178_s11 + $0x78] sm:$0xff]   ;;  %v365_v45 = vld [vmem:[#allocation2] sm:$0xff] }
  0x30   : > { %933 = vmatprep.subr.bf16.mxu0 %v1036_v15  ;;  %v1049_v28 = vld [vmem:[%s1178_s11 + $0x30] sm:$0xff]   ;;  %v1053_v31 = vld [vmem:[%s1178_s11 + $0xb8] sm:$0xff]   ;;  %v366_v50 = vld [vmem:[#allocation2 + $0x8] sm:$0xff] }
  0x31   : > { %970 = vmatpush3.bf16.msra.mxu1 %v1035_v14  ;;  %v1050_v29 = vld [vmem:[%s1178_s11 + $0xb0] sm:$0xff]   ;;  %v1052_v34 = vld [vmem:[%s1178_s11 + $0x38] sm:$0xff]   ;;  %v923_v4 = vld [vmem:[%s1258_s2] ss:$0 sm:$0xff] (!%p922_p11) }
  0x32   : > { %971 = vmatprep.subr.bf16.mxu1 %v1038_v17  ;;  %v1056_v32 = vld [vmem:[%s1180_s12 + $0x4] ss:$12 sps:$4 sm:$0xff]   ;;  %v1057_v33 = vld [vmem:[%s1180_s12 + $0x8] ss:$12 sps:$4 sm:$0xff]   ;;  %v1054_v35 = vld [vmem:[%s1180_s12] ss:$12 sps:$4 sm:$0xff]  }
  0x33   : > { %934 = vmatpush3.bf16.msra.mxu0 %v1037_v16  ;;  %633 = vmatprep.mubr.bf16.mxu0 %v1056_v32  ;;  %v1059_v36 = vld [vmem:[%s1180_s12 + $0x1c] ss:$12 sps:$4 sm:$0xff]   ;;  %v1058_v37 = vld [vmem:[%s1180_s12 + $0x20] ss:$12 sps:$4 sm:$0xff]   ;;  %v1061_v38 = vld [vmem:[%s1180_s12 + $0x18] ss:$12 sps:$4 sm:$0xff]  }
  0x34   : > { %935 = vmatprep.subr.bf16.mxu0 %v1039_v18  ;;  %983 = vmatprep.mubr.bf16.mxu1 %v1057_v33  ;;  %v367_v59 = vld [vmem:[#allocation2 + $0x10] sm:$0xff]  ;;  %v368_v63 = vld [vmem:[#allocation2 + $0x18] sm:$0xff]  ;;  %v726_v5 = vld [vmem:[%s1259_s3] sm:$0xff] (!%p922_p11) }
  0x35   : > { %972 = vmatpush3.bf16.msra.mxu1 %v1038_v17  ;;  %v727_v8 = vld [vmem:[%s1259_s3 + $0x8] sm:$0xff] (!%p922_p11)  ;;  %v728_v12 = vld [vmem:[%s1259_s3 + $0x10] sm:$0xff] (!%p922_p11)  ;;  %v729_v14 = vld [vmem:[%s1259_s3 + $0x18] sm:$0xff] (!%p922_p11) }
  0x36   : > { %973 = vmatprep.subr.bf16.mxu1 %v1041_v20 }
  0x37   : > { %936 = vmatpush3.bf16.msra.mxu0 %v1040_v19 }
  0x38   : > { %937 = vmatprep.subr.bf16.mxu0 %v1042_v21 }
  0x39   : > { %974 = vmatpush3.bf16.msra.mxu1 %v1041_v20 }
  0x3a   : > { %975 = vmatprep.subr.bf16.mxu1 %v1044_v22 }
  0x3b   : > { %938 = vmatpush3.bf16.msra.mxu0 %v1043_v23 }
  0x3c   : > { %939 = vmatprep.subr.bf16.mxu0 %v1045_v24 }
  0x3d   : > { %976 = vmatpush3.bf16.msra.mxu1 %v1044_v22 }
  0x3e   : > { %977 = vmatprep.subr.bf16.mxu1 %v1047_v25 }
  0x3f   : > { %940 = vmatpush3.bf16.msra.mxu0 %v1046_v26 }
  0x40   : > { %941 = vmatprep.subr.bf16.mxu0 %v1048_v27 }
  0x41   : > { %978 = vmatpush3.bf16.msra.mxu1 %v1047_v25 }
  0x42   : > { %979 = vmatprep.subr.bf16.mxu1 %v1050_v29 }
  0x43   : > { %942 = vmatpush3.bf16.msra.mxu0 %v1049_v28 }
  0x44   : > { %943 = vmatprep.subr.bf16.mxu0 %v1051_v30 }
  0x45   : > { %980 = vmatpush3.bf16.msra.mxu1 %v1050_v29 }
  0x46   : > { %981 = vmatprep.subr.bf16.mxu1 %v1053_v31 }
  0x47   : > { %944 = vmatpush3.bf16.msra.mxu0 %v1052_v34 }
  0x49   : > { %982 = vmatpush3.bf16.msra.mxu1 %v1053_v31 }
  0x4a   : > { %634 = vmatmul.mubr.bf16.vlgmr.msra.gmra.mrb[0].mxu0 %v1054_v35 }
  0x4b   : > { %641 = vmatprep.mubr.bf16.mxu0 %v1059_v36 }
  0x4c   : > { %984 = vmatmul.mubr.bf16.vlgmr.msra.gmra.mrb[0].mxu1 %v1058_v37 }
  0x52   : > { %642 = vmatmul.mubr.bf16.gmra.mrb[4].mxu0 %v1061_v38 }
 0x11d   : > { %v945_v39 = vpop.f32.mrb[0].mxu0 }
 0x11e   : > { %v946_v40 = vpop.f32.mrb[1].mxu0 }
 0x11f   : > { %v947_v41 = vadd.f32 %v946_v40, %v945_v39  ;;  %v948_v42 = vpop.f32.mrb[2].mxu0  ;;  %v985_v43 = vpop.f32.mrb[0].mxu1 }
 0x120   : > { %v949_v44 = vpop.f32.mrb[3].mxu0  ;;  %v684_v46 = vpop.f32.mrb[1].mxu1 }
 0x121   : > { %v950_v47 = vadd.f32 %v949_v44, %v948_v42  ;;  %v685_v48 = vadd.f32 %v947_v41, %v684_v46  ;;  %v986_v49 = vpop.f32.mrb[2].mxu1 }
 0x122   : > { %v687_v51 = vpop.f32.mrb[3].mxu1 }
 0x123   : > { %v699_v52 = vadd.f32 %v685_v48, %v365_v45  ;;  %v688_v53 = vadd.f32 %v950_v47, %v687_v51 }
 0x125   : > { %703 = vst [vmem:[#allocation2] sm:$0xff] %v699_v52  ;;  %v700_v54 = vadd.f32 %v688_v53, %v366_v50  ;;  %v951_v55 = vpop.f32.mrb[4].mxu0 }
 0x126   : > { %v952_v56 = vpop.f32.mrb[5].mxu0 }
 0x127   : > { %704 = vst [vmem:[#allocation2 + $0x8] sm:$0xff] %v700_v54  ;;  %v953_v57 = vadd.f32 %v952_v56, %v951_v55  ;;  %v954_v58 = vpop.f32.mrb[6].mxu0 }
 0x128   : > { %v955_v60 = vpop.f32.mrb[7].mxu0 }
 0x129   : > { %v693_v61 = vadd.f32 %v985_v43, %v953_v57  ;;  %v956_v62 = vadd.f32 %v955_v60, %v954_v58  ;;  %710 = sbr.rel (%p922_p11) target bundleno = 318 (0x13e), region = 70 }
 0x12b   : > { %v701_v0 = vadd.f32 %v693_v61, %v367_v59  ;;  %v696_v1 = vadd.f32 %v986_v49, %v956_v62 }
 0x12c   : > { %v711_v3 = vld [vmem:[#allocation2] sm:$0xff] (!%p922_p11) }
 0x12d   : > { %705 = vst [vmem:[#allocation2 + $0x10] sm:$0xff] %v701_v0  ;;  %v702_v2 = vadd.f32 %v696_v1, %v368_v63  ;;  %v722_v6 = vadd.f32 (!%p922_p11), %v923_v4, %v711_v3 }
 0x12e   : > { %v712_v7 = vld [vmem:[#allocation2 + $0x8] sm:$0xff] (!%p922_p11) }
 0x12f   : > { %706 = vst [vmem:[#allocation2 + $0x18] sm:$0xff] %v702_v2  ;;  %v723_v10 = vadd.f32 (!%p922_p11), %v923_v4, %v712_v7  ;;  %v730_v15 = vadd.f32 (!%p922_p11), %v726_v5, %v722_v6 }
 0x131   : > { %v731_v17 = vadd.f32 %v727_v8, %v723_v10  ;;  %v734_v19 = vmax.f32 %v730_v15, 0.0 }
 0x133   : > { %v735_v21 = vmax.f32 %v731_v17, 0.0  ;;  %738 = vst [vmem:[%s1260_s4] sm:$0xff] %v734_v19 }
 0x134   : > { %v713_v9 = vld [vmem:[#allocation2 + $0x10] sm:$0xff] }
 0x135   : > { %v724_v11 = vadd.f32 %v923_v4, %v713_v9  ;;  %739 = vst [vmem:[%s1260_s4 + $0x8] sm:$0xff] %v735_v21 }
 0x136   : > { %v714_v13 = vld [vmem:[#allocation2 + $0x18] sm:$0xff] }
 0x137   : > { %v725_v16 = vadd.f32 %v923_v4, %v714_v13  ;;  %v732_v18 = vadd.f32 %v728_v12, %v724_v11 }
 0x139   : > { %v733_v20 = vadd.f32 %v729_v14, %v725_v16  ;;  %v736_v22 = vmax.f32 %v732_v18, 0.0 }
 0x13b   : > { %v737_v23 = vmax.f32 %v733_v20, 0.0  ;;  %740 = vst [vmem:[%s1260_s4 + $0x10] sm:$0xff] %v736_v22 }
 0x13d   : > { %741 = vst [vmem:[%s1260_s4 + $0x18] sm:$0xff] %v737_v23 }
 0x13e PF: > { %s14_s19 = sadd.s32 1, %s1100_s19   ;;  %s1261_s15 = smov %s1088_s16 }
 0x13f   : > { %p11_p12 = scmp.ge.s32.totalorder %s14_s19, 5   ;;  %s1262_s16 = smov %s1163_s23 }
 0x140   : > { %s1263_s17 = smov %s1096_s18  ;;  %s1264_s18 = smov %s1266_s20 }
 0x141   :  { %13 = sbr.rel (!%p11_p12) target bundleno = 3 (0x3), region = 120 }

// kernel: _lambda_.32
= control target key start
LH: loop header
LB: loop body
LE: loop exit
PB: predicated region body
PF: predicated region fallthrough
CT: control target
= control target key end

     0   :  { %s1027_s12 = smov 0   ;;  %s1029_s13 = smov 0   ;;  %s1129_s0 = inlined_call_operand.vmem [shape: bf16[8,1152], index: 0, kind: input, shape index: {}]   ;;  %s1130_s1 = inlined_call_operand.vmem [shape: bf16[1152,256], index: 1, kind: input, shape index: {}]   ;;  %s1131_s2 = inlined_call_operand.vmem [shape: f32[1,256], index: 2, kind: input, shape index: {}]   ;;  %s1132_s3 = inlined_call_operand.vmem [shape: f32[8,256], index: 3, kind: output, shape index: {}]  }
   0x1   :  { %s1031_s14 = smov 0  }
   0x2 LB: > { %s25_s15 = sadd.s32 1, %s999_s13  ;;  %p818_p0 = scmp.ge.s32.totalorder %s1003_s14, 1  ;;  %s1003_s14 = sphi %s1031_s14, %s13_s14   ;;  %s999_s13 = sphi %s1029_s13, %s1134_s13   ;;  %s995_s12 = sphi %s1027_s12, %s1133_s12  }
   0x3   : > { %p26_p1 = scmp.ge.s32.totalorder %s25_s15, 3  ;;  %p194_p2 = scmp.lt.s32.totalorder %s1003_s14, 4 }
   0x5   : > { %s1136_s15 = smov (%p26_p1, %s25_s15), 0  ;;  %p195_p3 = pnand %p818_p0, %p194_p2 }
   0x6   : > { %s240_s16 = smul.u32 (!%p195_p3), 3, %s995_s12  ;;  %p822_p6 = scmp.ne.s32.totalorder (!%p195_p3), %s995_s12, 0 }
   0x7   : > { %198 = sbr.rel (%p195_p3) target bundleno = 319 (0x13f), region = 32 }
   0x8   : > { %s250_s17 = smul.u32 (!%p195_p3), 48, %s995_s12  ;;  %p243_p4 = scmp.lt.s32.totalorder (!%p195_p3), %s240_s16, 8 }
   0xa   : > { %p252_p5 = scmp.lt.s32.totalorder (!%p195_p3), %s250_s17, 143 }
   0xe   : > { %s1138_s16 = smov (!%p243_p4, %s240_s16), 8  ;;  %s1140_s17 = smov (!%p252_p5, %s250_s17), 143 }
   0xf   : > { %s819_s18 = sshll.u32 %s1138_s16, 2  ;;  %s879_s22 = sshll.u32 %s1140_s17, 3  ;;  %v1005_v0 = vmov (!%p822_p6), 0.0  }
  0x10   : > { %s1052_s21 = scalar_lea.vmem %s1129_s0, %s819_s18  ;;  %s1057_s25 = scalar_lea.vmem %s1130_s1, %s879_s22  ;;  %282 = vst [vmem:[#allocation2] sm:$0xff] (!%p822_p6), %v1005_v0  ;;  %283 = vst [vmem:[#allocation2 + $0x8] sm:$0xff] (!%p822_p6), %v1005_v0 }
  0x11   : > { %281 = sbr.rel (%p822_p6) target bundleno = 24 (0x18), region = 36 }
  0x18 PF: > { %v906_v1 = vld [vmem:[%s1057_s25 + $0x4] ss:$8 sps:$4 sm:$0xff]   ;;  %v908_v2 = vld [vmem:[%s1057_s25] ss:$8 sps:$4 sm:$0xff]   ;;  %v1006_v3 = vmov 0   ;;  %p874_p7 = scmp.ne.s32.totalorder %s995_s12, 2 }
  0x19   : > { %660 = vmatprep.mubr.bf16.mxu1 %v1006_v3  ;;  %587 = vmatprep.subr.bf16.mxu0 %v906_v1  ;;  %v909_v4 = vld [vmem:[%s1057_s25 + $0x14] ss:$8 sps:$4 sm:$0xff]   ;;  %v911_v5 = vld [vmem:[%s1057_s25 + $0x10] ss:$8 sps:$4 sm:$0xff]   ;;  %v912_v6 = vld [vmem:[%s1057_s25 + $0x24] ss:$8 sps:$4 sm:$0xff]  }
  0x1a   : > { %588 = vmatpush1.bf16.msra.mxu0 %v908_v2  ;;  %v914_v7 = vld [vmem:[%s1057_s25 + $0x20] ss:$8 sps:$4 sm:$0xff]   ;;  %v915_v8 = vld [vmem:[%s1057_s25 + $0x34] ss:$8 sps:$4 sm:$0xff]   ;;  %v917_v9 = vld [vmem:[%s1057_s25 + $0x30] ss:$8 sps:$4 sm:$0xff]  }
  0x1b   : > { %589 = vmatprep.subr.bf16.mxu0 %v909_v4  ;;  %v930_v10 = vld [vmem:[%s1057_s25 + $0x104] ss:$8 sps:$4 sm:$0xff]   ;;  %v932_v11 = vld [vmem:[%s1057_s25 + $0x100] ss:$8 sps:$4 sm:$0xff]   ;;  %v936_v13 = vld [vmem:[%s1057_s25 + $0x114] ss:$8 sps:$4 sm:$0xff]   ;;  %v681_v4 = vlaneseq (!%p874_p7) }
  0x1c   : > { %v918_v12 = vld [vmem:[%s1057_s25 + $0x44] ss:$8 sps:$4 sm:$0xff]   ;;  %628 = vmatprep.subr.bf16.mxu1 %v930_v10  ;;  %v938_v14 = vld [vmem:[%s1057_s25 + $0x110] ss:$8 sps:$4 sm:$0xff]   ;;  %v920_v15 = vld [vmem:[%s1057_s25 + $0x40] ss:$8 sps:$4 sm:$0xff]  }
  0x1d   : > { %629 = vmatpush1.bf16.msra.mxu1 %v932_v11  ;;  %v921_v16 = vld [vmem:[%s1057_s25 + $0x54] ss:$8 sps:$4 sm:$0xff]   ;;  %v942_v17 = vld [vmem:[%s1057_s25 + $0x124] ss:$8 sps:$4 sm:$0xff]   ;;  %v944_v18 = vld [vmem:[%s1057_s25 + $0x120] ss:$8 sps:$4 sm:$0xff]  }
  0x1e   : > { %590 = vmatpush1.bf16.msra.mxu0 %v911_v5  ;;  %630 = vmatprep.subr.bf16.mxu1 %v936_v13  ;;  %v923_v19 = vld [vmem:[%s1057_s25 + $0x50] ss:$8 sps:$4 sm:$0xff]   ;;  %v948_v20 = vld [vmem:[%s1057_s25 + $0x134] ss:$8 sps:$4 sm:$0xff]   ;;  %v924_v21 = vld [vmem:[%s1057_s25 + $0x64] ss:$8 sps:$4 sm:$0xff]  }
  0x1f   : > { %591 = vmatprep.subr.bf16.mxu0 %v912_v6  ;;  %v950_v22 = vld [vmem:[%s1057_s25 + $0x130] ss:$8 sps:$4 sm:$0xff]   ;;  %v926_v23 = vld [vmem:[%s1057_s25 + $0x60] ss:$8 sps:$4 sm:$0xff]   ;;  %v954_v24 = vld [vmem:[%s1057_s25 + $0x144] ss:$8 sps:$4 sm:$0xff]  }
  0x20   : > { %v927_v25 = vld [vmem:[%s1057_s25 + $0x74] ss:$8 sps:$4 sm:$0xff]   ;;  %v956_v26 = vld [vmem:[%s1057_s25 + $0x140] ss:$8 sps:$4 sm:$0xff]   ;;  %v929_v27 = vld [vmem:[%s1057_s25 + $0x70] ss:$8 sps:$4 sm:$0xff]  }
  0x21   : > { %631 = vmatpush1.bf16.msra.mxu1 %v938_v14  ;;  %v960_v28 = vld [vmem:[%s1057_s25 + $0x154] ss:$8 sps:$4 sm:$0xff]   ;;  %v933_v29 = vld [vmem:[%s1057_s25 + $0x84] ss:$8 sps:$4 sm:$0xff]   ;;  %v962_v30 = vld [vmem:[%s1057_s25 + $0x150] ss:$8 sps:$4 sm:$0xff]  }
  0x22   : > { %592 = vmatpush1.bf16.msra.mxu0 %v914_v7  ;;  %632 = vmatprep.subr.bf16.mxu1 %v942_v17  ;;  %v935_v31 = vld [vmem:[%s1057_s25 + $0x80] ss:$8 sps:$4 sm:$0xff]   ;;  %v966_v32 = vld [vmem:[%s1057_s25 + $0x164] ss:$8 sps:$4 sm:$0xff]   ;;  %v939_v33 = vld [vmem:[%s1057_s25 + $0x94] ss:$8 sps:$4 sm:$0xff]  }
  0x23   : > { %593 = vmatprep.subr.bf16.mxu0 %v915_v8  ;;  %v286_v34 = vld [vmem:[%s1052_s21] sm:$0xff]  ;;  %v941_v37 = vld [vmem:[%s1057_s25 + $0x90] ss:$8 sps:$4 sm:$0xff]   ;;  %v972_v38 = vld [vmem:[%s1057_s25 + $0x174] ss:$8 sps:$4 sm:$0xff]   ;;  %v682_v5 = vshrl.u32 (!%p874_p7), %v681_v4, 7 }
  0x24   : > { %v824_v35 = vcombine.high %v286_v34, %v286_v34  ;;  %v968_v36 = vld [vmem:[%s1057_s25 + $0x160] ss:$8 sps:$4 sm:$0xff]   ;;  %v945_v39 = vld [vmem:[%s1057_s25 + $0xa4] ss:$8 sps:$4 sm:$0xff]   ;;  %v974_v40 = vld [vmem:[%s1057_s25 + $0x170] ss:$8 sps:$4 sm:$0xff]   ;;  %v823_v53 = vcombine.low %v286_v34, %v286_v34 }
  0x25   : > { %633 = vmatpush1.bf16.msra.mxu1 %v944_v18  ;;  %v947_v41 = vld [vmem:[%s1057_s25 + $0xa0] ss:$8 sps:$4 sm:$0xff]   ;;  %v951_v42 = vld [vmem:[%s1057_s25 + $0xb4] ss:$8 sps:$4 sm:$0xff]   ;;  %v953_v44 = vld [vmem:[%s1057_s25 + $0xb0] ss:$8 sps:$4 sm:$0xff]  }
  0x26   : > { %594 = vmatpush1.bf16.msra.mxu0 %v917_v9  ;;  %634 = vmatprep.subr.bf16.mxu1 %v948_v20  ;;  %v978_v43 = vld [vmem:[%s1052_s21 + $0x8] ss:$0 sps:$4 sm:$0xff]   ;;  %v957_v45 = vld [vmem:[%s1057_s25 + $0xc4] ss:$8 sps:$4 sm:$0xff]   ;;  %v963_v47 = vld [vmem:[%s1057_s25 + $0xd4] ss:$8 sps:$4 sm:$0xff]  }
  0x27   : > { %595 = vmatprep.subr.bf16.mxu0 %v918_v12  ;;  %619 = vmatprep.mubr.bf16.mxu0 %v824_v35  ;;  %v959_v46 = vld [vmem:[%s1057_s25 + $0xc0] ss:$8 sps:$4 sm:$0xff]   ;;  %v965_v48 = vld [vmem:[%s1057_s25 + $0xd0] ss:$8 sps:$4 sm:$0xff]   ;;  %v969_v49 = vld [vmem:[%s1057_s25 + $0xe4] ss:$8 sps:$4 sm:$0xff]  }
  0x28   : > { %v971_v50 = vld [vmem:[%s1057_s25 + $0xe0] ss:$8 sps:$4 sm:$0xff]   ;;  %v975_v51 = vld [vmem:[%s1057_s25 + $0xf4] ss:$8 sps:$4 sm:$0xff]   ;;  %v977_v52 = vld [vmem:[%s1057_s25 + $0xf0] ss:$8 sps:$4 sm:$0xff]  }
  0x29   : > { %635 = vmatpush1.bf16.msra.mxu1 %v950_v22  ;;  %v284_v58 = vld [vmem:[#allocation2] sm:$0xff]  ;;  %v285_v61 = vld [vmem:[#allocation2 + $0x8] sm:$0xff]  ;;  %v683_v7 = vsub.s32 (!%p874_p7), 0, %v682_v5  ;;  %v687_v8 = vsub.s32 (!%p874_p7), 1, %v682_v5 }
  0x2a   : > { %596 = vmatpush1.bf16.msra.mxu0 %v920_v15  ;;  %636 = vmatprep.subr.bf16.mxu1 %v954_v24  ;;  %v679_v6 = vld [vmem:[%s1131_s2] sm:$0x3] (!%p874_p7) }
  0x2b   : > { %597 = vmatprep.subr.bf16.mxu0 %v921_v16  ;;  %v684_v11 = vrot.slane (!%p874_p7), %v679_v6, %v683_v7  ;;  %v688_v12 = vrot.slane (!%p874_p7), %v679_v6, %v687_v8 }
  0x2d   : > { %637 = vmatpush1.bf16.msra.mxu1 %v956_v26 }
  0x2e   : > { %598 = vmatpush1.bf16.msra.mxu0 %v923_v19  ;;  %638 = vmatprep.subr.bf16.mxu1 %v960_v28 }
  0x2f   : > { %599 = vmatprep.subr.bf16.mxu0 %v924_v21 }
  0x31   : > { %639 = vmatpush1.bf16.msra.mxu1 %v962_v30 }
  0x32   : > { %600 = vmatpush1.bf16.msra.mxu0 %v926_v23  ;;  %640 = vmatprep.subr.bf16.mxu1 %v966_v32 }
  0x33   : > { %601 = vmatprep.subr.bf16.mxu0 %v927_v25 }
  0x35   : > { %641 = vmatpush1.bf16.msra.mxu1 %v968_v36 }
  0x36   : > { %602 = vmatpush1.bf16.msra.mxu0 %v929_v27  ;;  %642 = vmatprep.subr.bf16.mxu1 %v972_v38 }
  0x37   : > { %603 = vmatprep.subr.bf16.mxu0 %v933_v29 }
  0x39   : > { %643 = vmatpush1.bf16.msra.mxu1 %v974_v40 }
  0x3a   : > { %604 = vmatpush1.bf16.msra.mxu0 %v935_v31 }
  0x3b   : > { %605 = vmatprep.subr.bf16.mxu0 %v939_v33 }
  0x3c   : > { %661 = vmatmul.mubr.bf16.vlgmr.msra.gmra.mrb[0].mxu1 %v978_v43 }
  0x3e   : > { %606 = vmatpush1.bf16.msra.mxu0 %v941_v37 }
  0x3f   : > { %607 = vmatprep.subr.bf16.mxu0 %v945_v39 }
  0x42   : > { %608 = vmatpush1.bf16.msra.mxu0 %v947_v41 }
  0x43   : > { %609 = vmatprep.subr.bf16.mxu0 %v951_v42 }
  0x46   : > { %610 = vmatpush1.bf16.msra.mxu0 %v953_v44 }
  0x47   : > { %611 = vmatprep.subr.bf16.mxu0 %v957_v45 }
  0x4a   : > { %612 = vmatpush1.bf16.msra.mxu0 %v959_v46 }
  0x4b   : > { %613 = vmatprep.subr.bf16.mxu0 %v963_v47 }
  0x4e   : > { %614 = vmatpush1.bf16.msra.mxu0 %v965_v48 }
  0x4f   : > { %615 = vmatprep.subr.bf16.mxu0 %v969_v49 }
  0x52   : > { %616 = vmatpush1.bf16.msra.mxu0 %v971_v50 }
  0x53   : > { %617 = vmatprep.subr.bf16.mxu0 %v975_v51 }
  0x56   : > { %618 = vmatpush1.bf16.msra.mxu0 %v977_v52 }
  0x59   : > { %620 = vmatmul.mubr.bf16.vlgmr.msra.gmra.mrb[0].mxu0 %v823_v53 }
 0x10f   : > { %v662_v54 = vpop.f32.mrb[0].mxu1 }
 0x110   : > { %v664_v55 = vpop.f32.mrb[1].mxu1 }
 0x111   : > { %v666_v56 = vpop.f32.mrb[2].mxu1 }
 0x112   : > { %v667_v57 = vpop.f32.mrb[3].mxu1 }
 0x12c   : > { %v621_v59 = vpop.f32.mrb[0].mxu0  ;;  %676 = sbr.rel (%p874_p7) target bundleno = 319 (0x13f), region = 40 }
 0x12d   : > { %v663_v60 = vadd.f32 %v662_v54, %v621_v59  ;;  %v623_v62 = vpop.f32.mrb[1].mxu0 }
 0x12e   : > { %v665_v63 = vadd.f32 %v664_v55, %v623_v62  ;;  %v625_v0 = vpop.f32.mrb[2].mxu0 }
 0x12f   : > { %v669_v1 = vadd.f32 %v663_v60, %v284_v58  ;;  %v626_v2 = vpop.f32.mrb[3].mxu0 }
 0x130   : > { %v670_v3 = vadd.f32 %v665_v63, %v285_v61 }
 0x131   : > { %671 = vst [vmem:[#allocation2] sm:$0xff] %v669_v1 }
 0x132   : > { %672 = vst [vmem:[#allocation2 + $0x8] sm:$0xff] %v670_v3 }
 0x138   : > { %v677_v9 = vld [vmem:[#allocation2] sm:$0xff] }
 0x139   : > { %v678_v10 = vld [vmem:[#allocation2 + $0x8] sm:$0xff]  ;;  %v691_v13 = vadd.f32 %v684_v11, %v677_v9 }
 0x13a   : > { %v692_v14 = vadd.f32 %v688_v12, %v678_v10 }
 0x13b   : > { %v693_v15 = vmax.f32 %v691_v13, 0.0 }
 0x13c   : > { %v694_v16 = vmax.f32 %v692_v14, 0.0 }
 0x13d   : > { %695 = vst [vmem:[%s1132_s3] sm:$0xff] %v693_v15 }
 0x13e   : > { %696 = vst [vmem:[%s1132_s3 + $0x8] sm:$0xff] %v694_v16 }
 0x13f PF: > { %s13_s14 = sadd.s32 1, %s1003_s14   ;;  %s1133_s12 = smov %s999_s13 }
 0x140   : > { %p10_p8 = scmp.ge.s32.totalorder %s13_s14, 5   ;;  %s1134_s13 = smov %s1136_s15 }
 0x142   :  { %12 = sbr.rel (!%p10_p8) target bundleno = 2 (0x2), region = 76 }

// kernel: _lambda_.33
= control target key start
LH: loop header
LB: loop body
LE: loop exit
PB: predicated region body
PF: predicated region fallthrough
CT: control target
= control target key end

     0   :  { %v231_v1 = vmov 0   ;;  %v172_v18 = vlaneseq  ;;  %s312_s1 = inlined_call_operand.vmem [shape: bf16[128,256], index: 1, kind: input, shape index: {}]   ;;  %s313_s0 = inlined_call_operand.vmem [shape: bf16[8,128], index: 0, kind: input, shape index: {}]   ;;  %s314_s2 = inlined_call_operand.vmem [shape: f32[1,256], index: 2, kind: input, shape index: {}]   ;;  %s315_s3 = inlined_call_operand.vmem [shape: f32[8,256], index: 3, kind: output, shape index: {}]  }
   0x1   :  { %v207_v0 = vld [vmem:[%s312_s1 + $0x4] ss:$8 sps:$4 sm:$0xff]   ;;  %152 = vmatprep.mubr.bf16.mxu0 %v231_v1  ;;  %v209_v2 = vld [vmem:[%s312_s1] ss:$8 sps:$4 sm:$0xff]   ;;  %v210_v3 = vld [vmem:[%s312_s1 + $0x14] ss:$8 sps:$4 sm:$0xff]  }
   0x2   :  { %120 = vmatprep.subr.bf16.mxu0 %v207_v0  ;;  %v212_v4 = vld [vmem:[%s312_s1 + $0x10] ss:$8 sps:$4 sm:$0xff]   ;;  %v213_v5 = vld [vmem:[%s312_s1 + $0x24] ss:$8 sps:$4 sm:$0xff]   ;;  %v215_v6 = vld [vmem:[%s312_s1 + $0x20] ss:$8 sps:$4 sm:$0xff]  }
   0x3   :  { %121 = vmatpush1.bf16.msra.mxu0 %v209_v2  ;;  %v216_v7 = vld [vmem:[%s312_s1 + $0x34] ss:$8 sps:$4 sm:$0xff]   ;;  %v218_v8 = vld [vmem:[%s312_s1 + $0x30] ss:$8 sps:$4 sm:$0xff]   ;;  %v219_v9 = vld [vmem:[%s312_s1 + $0x44] ss:$8 sps:$4 sm:$0xff]  }
   0x4   :  { %122 = vmatprep.subr.bf16.mxu0 %v210_v3  ;;  %v221_v10 = vld [vmem:[%s312_s1 + $0x40] ss:$8 sps:$4 sm:$0xff]   ;;  %v222_v11 = vld [vmem:[%s312_s1 + $0x54] ss:$8 sps:$4 sm:$0xff]   ;;  %v224_v12 = vld [vmem:[%s312_s1 + $0x50] ss:$8 sps:$4 sm:$0xff]  }
   0x5   :  { %v225_v13 = vld [vmem:[%s312_s1 + $0x64] ss:$8 sps:$4 sm:$0xff]   ;;  %v227_v14 = vld [vmem:[%s312_s1 + $0x60] ss:$8 sps:$4 sm:$0xff]   ;;  %v228_v15 = vld [vmem:[%s312_s1 + $0x74] ss:$8 sps:$4 sm:$0xff]  }
   0x6   :  { %v230_v16 = vld [vmem:[%s312_s1 + $0x70] ss:$8 sps:$4 sm:$0xff]   ;;  %v23_v17 = vld [vmem:[%s313_s0] sm:$0xf]  ;;  %v173_v19 = vshrl.u32 %v172_v18, 7 }
   0x7   :  { %123 = vmatpush1.bf16.msra.mxu0 %v212_v4  ;;  %v170_v21 = vld [vmem:[%s314_s2] sm:$0x3] }
   0x8   :  { %124 = vmatprep.subr.bf16.mxu0 %v213_v5  ;;  %v174_v20 = vsub.s32 0, %v173_v19  ;;  %v178_v22 = vsub.s32 1, %v173_v19 }
   0xa   :  { %v175_v23 = vrot.slane %v170_v21, %v174_v20  ;;  %v179_v24 = vrot.slane %v170_v21, %v178_v22 }
   0xb   :  { %125 = vmatpush1.bf16.msra.mxu0 %v215_v6 }
   0xc   :  { %126 = vmatprep.subr.bf16.mxu0 %v216_v7 }
   0xf   :  { %127 = vmatpush1.bf16.msra.mxu0 %v218_v8 }
  0x10   :  { %128 = vmatprep.subr.bf16.mxu0 %v219_v9 }
  0x13   :  { %129 = vmatpush1.bf16.msra.mxu0 %v221_v10 }
  0x14   :  { %130 = vmatprep.subr.bf16.mxu0 %v222_v11 }
  0x17   :  { %131 = vmatpush1.bf16.msra.mxu0 %v224_v12 }
  0x18   :  { %132 = vmatprep.subr.bf16.mxu0 %v225_v13 }
  0x1b   :  { %133 = vmatpush1.bf16.msra.mxu0 %v227_v14 }
  0x1c   :  { %134 = vmatprep.subr.bf16.mxu0 %v228_v15 }
  0x1f   :  { %135 = vmatpush1.bf16.msra.mxu0 %v230_v16 }
  0x22   :  { %153 = vmatmul.mubr.bf16.vlgmr.msra.gmra.mrb[0].mxu0 %v23_v17 }
  0xf5   :  { %v154_v25 = vpop.f32.mrb[0].mxu0 }
  0xf6   :  { %v182_v26 = vadd.f32 %v175_v23, %v154_v25  ;;  %v156_v27 = vpop.f32.mrb[1].mxu0 }
  0xf7   :  { %v183_v28 = vadd.f32 %v179_v24, %v156_v27  ;;  %v158_v29 = vpop.f32.mrb[2].mxu0 }
  0xf8   :  { %184 = vst [vmem:[%s315_s3] sm:$0xff] %v182_v26  ;;  %v159_v30 = vpop.f32.mrb[3].mxu0 }
  0xf9   :  { %185 = vst [vmem:[%s315_s3 + $0x8] sm:$0xff] %v183_v28 }

// kernel: _lambda_.35
= control target key start
LH: loop header
LB: loop body
LE: loop exit
PB: predicated region body
PF: predicated region fallthrough
CT: control target
= control target key end

     0   :  { %s1027_s12 = smov 0   ;;  %s1029_s13 = smov 0   ;;  %s1129_s0 = inlined_call_operand.vmem [shape: bf16[8,2304], index: 0, kind: input, shape index: {}]   ;;  %s1130_s1 = inlined_call_operand.vmem [shape: bf16[2304,256], index: 1, kind: input, shape index: {}]   ;;  %s1131_s2 = inlined_call_operand.vmem [shape: f32[1,256], index: 2, kind: input, shape index: {}]   ;;  %s1132_s3 = inlined_call_operand.vmem [shape: f32[8,256], index: 3, kind: output, shape index: {}]  }
   0x1   :  { %s1031_s14 = smov 0  }
   0x2 LB: > { %s25_s15 = sadd.s32 1, %s999_s13  ;;  %p818_p0 = scmp.ge.s32.totalorder %s1003_s14, 1  ;;  %s1003_s14 = sphi %s1031_s14, %s13_s14   ;;  %s999_s13 = sphi %s1029_s13, %s1134_s13   ;;  %s995_s12 = sphi %s1027_s12, %s1133_s12  }
   0x3   : > { %p26_p1 = scmp.ge.s32.totalorder %s25_s15, 6  ;;  %p194_p2 = scmp.lt.s32.totalorder %s1003_s14, 7 }
   0x5   : > { %s1136_s15 = smov (%p26_p1, %s25_s15), 0  ;;  %p195_p3 = pnand %p818_p0, %p194_p2 }
   0x6   : > { %s240_s16 = smul.u32 (!%p195_p3), 3, %s995_s12  ;;  %p822_p6 = scmp.ne.s32.totalorder (!%p195_p3), %s995_s12, 0 }
   0x7   : > { %198 = sbr.rel (%p195_p3) target bundleno = 319 (0x13f), region = 32 }
   0x8   : > { %s250_s17 = smul.u32 (!%p195_p3), 48, %s995_s12  ;;  %p243_p4 = scmp.lt.s32.totalorder (!%p195_p3), %s240_s16, 17 }
   0xa   : > { %p252_p5 = scmp.lt.s32.totalorder (!%p195_p3), %s250_s17, 287 }
   0xe   : > { %s1138_s16 = smov (!%p243_p4, %s240_s16), 17  ;;  %s1140_s17 = smov (!%p252_p5, %s250_s17), 287 }
   0xf   : > { %s819_s18 = sshll.u32 %s1138_s16, 2  ;;  %s879_s22 = sshll.u32 %s1140_s17, 3  ;;  %v1005_v0 = vmov (!%p822_p6), 0.0  }
  0x10   : > { %s1052_s21 = scalar_lea.vmem %s1129_s0, %s819_s18  ;;  %s1057_s25 = scalar_lea.vmem %s1130_s1, %s879_s22  ;;  %282 = vst [vmem:[#allocation2] sm:$0xff] (!%p822_p6), %v1005_v0  ;;  %283 = vst [vmem:[#allocation2 + $0x8] sm:$0xff] (!%p822_p6), %v1005_v0 }
  0x11   : > { %281 = sbr.rel (%p822_p6) target bundleno = 24 (0x18), region = 36 }
  0x18 PF: > { %v906_v1 = vld [vmem:[%s1057_s25 + $0x4] ss:$8 sps:$4 sm:$0xff]   ;;  %v908_v2 = vld [vmem:[%s1057_s25] ss:$8 sps:$4 sm:$0xff]   ;;  %v1006_v3 = vmov 0   ;;  %p874_p7 = scmp.ne.s32.totalorder %s995_s12, 5 }
  0x19   : > { %660 = vmatprep.mubr.bf16.mxu1 %v1006_v3  ;;  %587 = vmatprep.subr.bf16.mxu0 %v906_v1  ;;  %v909_v4 = vld [vmem:[%s1057_s25 + $0x14] ss:$8 sps:$4 sm:$0xff]   ;;  %v911_v5 = vld [vmem:[%s1057_s25 + $0x10] ss:$8 sps:$4 sm:$0xff]   ;;  %v912_v6 = vld [vmem:[%s1057_s25 + $0x24] ss:$8 sps:$4 sm:$0xff]  }
  0x1a   : > { %588 = vmatpush1.bf16.msra.mxu0 %v908_v2  ;;  %v914_v7 = vld [vmem:[%s1057_s25 + $0x20] ss:$8 sps:$4 sm:$0xff]   ;;  %v915_v8 = vld [vmem:[%s1057_s25 + $0x34] ss:$8 sps:$4 sm:$0xff]   ;;  %v917_v9 = vld [vmem:[%s1057_s25 + $0x30] ss:$8 sps:$4 sm:$0xff]  }
  0x1b   : > { %589 = vmatprep.subr.bf16.mxu0 %v909_v4  ;;  %v930_v10 = vld [vmem:[%s1057_s25 + $0x104] ss:$8 sps:$4 sm:$0xff]   ;;  %v932_v11 = vld [vmem:[%s1057_s25 + $0x100] ss:$8 sps:$4 sm:$0xff]   ;;  %v936_v13 = vld [vmem:[%s1057_s25 + $0x114] ss:$8 sps:$4 sm:$0xff]   ;;  %v681_v4 = vlaneseq (!%p874_p7) }
  0x1c   : > { %v918_v12 = vld [vmem:[%s1057_s25 + $0x44] ss:$8 sps:$4 sm:$0xff]   ;;  %628 = vmatprep.subr.bf16.mxu1 %v930_v10  ;;  %v938_v14 = vld [vmem:[%s1057_s25 + $0x110] ss:$8 sps:$4 sm:$0xff]   ;;  %v920_v15 = vld [vmem:[%s1057_s25 + $0x40] ss:$8 sps:$4 sm:$0xff]  }
  0x1d   : > { %629 = vmatpush1.bf16.msra.mxu1 %v932_v11  ;;  %v921_v16 = vld [vmem:[%s1057_s25 + $0x54] ss:$8 sps:$4 sm:$0xff]   ;;  %v942_v17 = vld [vmem:[%s1057_s25 + $0x124] ss:$8 sps:$4 sm:$0xff]   ;;  %v944_v18 = vld [vmem:[%s1057_s25 + $0x120] ss:$8 sps:$4 sm:$0xff]  }
  0x1e   : > { %590 = vmatpush1.bf16.msra.mxu0 %v911_v5  ;;  %630 = vmatprep.subr.bf16.mxu1 %v936_v13  ;;  %v923_v19 = vld [vmem:[%s1057_s25 + $0x50] ss:$8 sps:$4 sm:$0xff]   ;;  %v948_v20 = vld [vmem:[%s1057_s25 + $0x134] ss:$8 sps:$4 sm:$0xff]   ;;  %v924_v21 = vld [vmem:[%s1057_s25 + $0x64] ss:$8 sps:$4 sm:$0xff]  }
  0x1f   : > { %591 = vmatprep.subr.bf16.mxu0 %v912_v6  ;;  %v950_v22 = vld [vmem:[%s1057_s25 + $0x130] ss:$8 sps:$4 sm:$0xff]   ;;  %v926_v23 = vld [vmem:[%s1057_s25 + $0x60] ss:$8 sps:$4 sm:$0xff]   ;;  %v954_v24 = vld [vmem:[%s1057_s25 + $0x144] ss:$8 sps:$4 sm:$0xff]  }
  0x20   : > { %v927_v25 = vld [vmem:[%s1057_s25 + $0x74] ss:$8 sps:$4 sm:$0xff]   ;;  %v956_v26 = vld [vmem:[%s1057_s25 + $0x140] ss:$8 sps:$4 sm:$0xff]   ;;  %v929_v27 = vld [vmem:[%s1057_s25 + $0x70] ss:$8 sps:$4 sm:$0xff]  }
  0x21   : > { %631 = vmatpush1.bf16.msra.mxu1 %v938_v14  ;;  %v960_v28 = vld [vmem:[%s1057_s25 + $0x154] ss:$8 sps:$4 sm:$0xff]   ;;  %v933_v29 = vld [vmem:[%s1057_s25 + $0x84] ss:$8 sps:$4 sm:$0xff]   ;;  %v962_v30 = vld [vmem:[%s1057_s25 + $0x150] ss:$8 sps:$4 sm:$0xff]  }
  0x22   : > { %592 = vmatpush1.bf16.msra.mxu0 %v914_v7  ;;  %632 = vmatprep.subr.bf16.mxu1 %v942_v17  ;;  %v935_v31 = vld [vmem:[%s1057_s25 + $0x80] ss:$8 sps:$4 sm:$0xff]   ;;  %v966_v32 = vld [vmem:[%s1057_s25 + $0x164] ss:$8 sps:$4 sm:$0xff]   ;;  %v939_v33 = vld [vmem:[%s1057_s25 + $0x94] ss:$8 sps:$4 sm:$0xff]  }
  0x23   : > { %593 = vmatprep.subr.bf16.mxu0 %v915_v8  ;;  %v286_v34 = vld [vmem:[%s1052_s21] sm:$0xff]  ;;  %v941_v37 = vld [vmem:[%s1057_s25 + $0x90] ss:$8 sps:$4 sm:$0xff]   ;;  %v972_v38 = vld [vmem:[%s1057_s25 + $0x174] ss:$8 sps:$4 sm:$0xff]   ;;  %v682_v5 = vshrl.u32 (!%p874_p7), %v681_v4, 7 }
  0x24   : > { %v824_v35 = vcombine.high %v286_v34, %v286_v34  ;;  %v968_v36 = vld [vmem:[%s1057_s25 + $0x160] ss:$8 sps:$4 sm:$0xff]   ;;  %v945_v39 = vld [vmem:[%s1057_s25 + $0xa4] ss:$8 sps:$4 sm:$0xff]   ;;  %v974_v40 = vld [vmem:[%s1057_s25 + $0x170] ss:$8 sps:$4 sm:$0xff]   ;;  %v823_v53 = vcombine.low %v286_v34, %v286_v34 }
  0x25   : > { %633 = vmatpush1.bf16.msra.mxu1 %v944_v18  ;;  %v947_v41 = vld [vmem:[%s1057_s25 + $0xa0] ss:$8 sps:$4 sm:$0xff]   ;;  %v951_v42 = vld [vmem:[%s1057_s25 + $0xb4] ss:$8 sps:$4 sm:$0xff]   ;;  %v953_v44 = vld [vmem:[%s1057_s25 + $0xb0] ss:$8 sps:$4 sm:$0xff]  }
  0x26   : > { %594 = vmatpush1.bf16.msra.mxu0 %v917_v9  ;;  %634 = vmatprep.subr.bf16.mxu1 %v948_v20  ;;  %v978_v43 = vld [vmem:[%s1052_s21 + $0x8] ss:$0 sps:$4 sm:$0xff]   ;;  %v957_v45 = vld [vmem:[%s1057_s25 + $0xc4] ss:$8 sps:$4 sm:$0xff]   ;;  %v963_v47 = vld [vmem:[%s1057_s25 + $0xd4] ss:$8 sps:$4 sm:$0xff]  }
  0x27   : > { %595 = vmatprep.subr.bf16.mxu0 %v918_v12  ;;  %619 = vmatprep.mubr.bf16.mxu0 %v824_v35  ;;  %v959_v46 = vld [vmem:[%s1057_s25 + $0xc0] ss:$8 sps:$4 sm:$0xff]   ;;  %v965_v48 = vld [vmem:[%s1057_s25 + $0xd0] ss:$8 sps:$4 sm:$0xff]   ;;  %v969_v49 = vld [vmem:[%s1057_s25 + $0xe4] ss:$8 sps:$4 sm:$0xff]  }
  0x28   : > { %v971_v50 = vld [vmem:[%s1057_s25 + $0xe0] ss:$8 sps:$4 sm:$0xff]   ;;  %v975_v51 = vld [vmem:[%s1057_s25 + $0xf4] ss:$8 sps:$4 sm:$0xff]   ;;  %v977_v52 = vld [vmem:[%s1057_s25 + $0xf0] ss:$8 sps:$4 sm:$0xff]  }
  0x29   : > { %635 = vmatpush1.bf16.msra.mxu1 %v950_v22  ;;  %v284_v58 = vld [vmem:[#allocation2] sm:$0xff]  ;;  %v285_v61 = vld [vmem:[#allocation2 + $0x8] sm:$0xff]  ;;  %v683_v7 = vsub.s32 (!%p874_p7), 0, %v682_v5  ;;  %v687_v8 = vsub.s32 (!%p874_p7), 1, %v682_v5 }
  0x2a   : > { %596 = vmatpush1.bf16.msra.mxu0 %v920_v15  ;;  %636 = vmatprep.subr.bf16.mxu1 %v954_v24  ;;  %v679_v6 = vld [vmem:[%s1131_s2] sm:$0x3] (!%p874_p7) }
  0x2b   : > { %597 = vmatprep.subr.bf16.mxu0 %v921_v16  ;;  %v684_v11 = vrot.slane (!%p874_p7), %v679_v6, %v683_v7  ;;  %v688_v12 = vrot.slane (!%p874_p7), %v679_v6, %v687_v8 }
  0x2d   : > { %637 = vmatpush1.bf16.msra.mxu1 %v956_v26 }
  0x2e   : > { %598 = vmatpush1.bf16.msra.mxu0 %v923_v19  ;;  %638 = vmatprep.subr.bf16.mxu1 %v960_v28 }
  0x2f   : > { %599 = vmatprep.subr.bf16.mxu0 %v924_v21 }
  0x31   : > { %639 = vmatpush1.bf16.msra.mxu1 %v962_v30 }
  0x32   : > { %600 = vmatpush1.bf16.msra.mxu0 %v926_v23  ;;  %640 = vmatprep.subr.bf16.mxu1 %v966_v32 }
  0x33   : > { %601 = vmatprep.subr.bf16.mxu0 %v927_v25 }
  0x35   : > { %641 = vmatpush1.bf16.msra.mxu1 %v968_v36 }
  0x36   : > { %602 = vmatpush1.bf16.msra.mxu0 %v929_v27  ;;  %642 = vmatprep.subr.bf16.mxu1 %v972_v38 }
  0x37   : > { %603 = vmatprep.subr.bf16.mxu0 %v933_v29 }
  0x39   : > { %643 = vmatpush1.bf16.msra.mxu1 %v974_v40 }
  0x3a   : > { %604 = vmatpush1.bf16.msra.mxu0 %v935_v31 }
  0x3b   : > { %605 = vmatprep.subr.bf16.mxu0 %v939_v33 }
  0x3c   : > { %661 = vmatmul.mubr.bf16.vlgmr.msra.gmra.mrb[0].mxu1 %v978_v43 }
  0x3e   : > { %606 = vmatpush1.bf16.msra.mxu0 %v941_v37 }
  0x3f   : > { %607 = vmatprep.subr.bf16.mxu0 %v945_v39 }
  0x42   : > { %608 = vmatpush1.bf16.msra.mxu0 %v947_v41 }
  0x43   : > { %609 = vmatprep.subr.bf16.mxu0 %v951_v42 }
  0x46   : > { %610 = vmatpush1.bf16.msra.mxu0 %v953_v44 }
  0x47   : > { %611 = vmatprep.subr.bf16.mxu0 %v957_v45 }
  0x4a   : > { %612 = vmatpush1.bf16.msra.mxu0 %v959_v46 }
  0x4b   : > { %613 = vmatprep.subr.bf16.mxu0 %v963_v47 }
  0x4e   : > { %614 = vmatpush1.bf16.msra.mxu0 %v965_v48 }
  0x4f   : > { %615 = vmatprep.subr.bf16.mxu0 %v969_v49 }
  0x52   : > { %616 = vmatpush1.bf16.msra.mxu0 %v971_v50 }
  0x53   : > { %617 = vmatprep.subr.bf16.mxu0 %v975_v51 }
  0x56   : > { %618 = vmatpush1.bf16.msra.mxu0 %v977_v52 }
  0x59   : > { %620 = vmatmul.mubr.bf16.vlgmr.msra.gmra.mrb[0].mxu0 %v823_v53 }
 0x10f   : > { %v662_v54 = vpop.f32.mrb[0].mxu1 }
 0x110   : > { %v664_v55 = vpop.f32.mrb[1].mxu1 }
 0x111   : > { %v666_v56 = vpop.f32.mrb[2].mxu1 }
 0x112   : > { %v667_v57 = vpop.f32.mrb[3].mxu1 }
 0x12c   : > { %v621_v59 = vpop.f32.mrb[0].mxu0  ;;  %676 = sbr.rel (%p874_p7) target bundleno = 319 (0x13f), region = 40 }
 0x12d   : > { %v663_v60 = vadd.f32 %v662_v54, %v621_v59  ;;  %v623_v62 = vpop.f32.mrb[1].mxu0 }
 0x12e   : > { %v665_v63 = vadd.f32 %v664_v55, %v623_v62  ;;  %v625_v0 = vpop.f32.mrb[2].mxu0 }
 0x12f   : > { %v669_v1 = vadd.f32 %v663_v60, %v284_v58  ;;  %v626_v2 = vpop.f32.mrb[3].mxu0 }
 0x130   : > { %v670_v3 = vadd.f32 %v665_v63, %v285_v61 }
 0x131   : > { %671 = vst [vmem:[#allocation2] sm:$0xff] %v669_v1 }
 0x132   : > { %672 = vst [vmem:[#allocation2 + $0x8] sm:$0xff] %v670_v3 }
 0x138   : > { %v677_v9 = vld [vmem:[#allocation2] sm:$0xff] }
 0x139   : > { %v678_v10 = vld [vmem:[#allocation2 + $0x8] sm:$0xff]  ;;  %v691_v13 = vadd.f32 %v684_v11, %v677_v9 }
 0x13a   : > { %v692_v14 = vadd.f32 %v688_v12, %v678_v10 }
 0x13b   : > { %v693_v15 = vmax.f32 %v691_v13, 0.0 }
 0x13c   : > { %v694_v16 = vmax.f32 %v692_v14, 0.0 }
 0x13d   : > { %695 = vst [vmem:[%s1132_s3] sm:$0xff] %v693_v15 }
 0x13e   : > { %696 = vst [vmem:[%s1132_s3 + $0x8] sm:$0xff] %v694_v16 }
 0x13f PF: > { %s13_s14 = sadd.s32 1, %s1003_s14   ;;  %s1133_s12 = smov %s999_s13 }
 0x140   : > { %p10_p8 = scmp.ge.s32.totalorder %s13_s14, 8   ;;  %s1134_s13 = smov %s1136_s15 }
 0x142   :  { %12 = sbr.rel (!%p10_p8) target bundleno = 2 (0x2), region = 76 }

// kernel: _lambda_.34
= control target key start
LH: loop header
LB: loop body
LE: loop exit
PB: predicated region body
PF: predicated region fallthrough
CT: control target
= control target key end

     0   :  { %s1121_s15 = smov 0   ;;  %s1123_s16 = smov 0   ;;  %s1229_s0 = inlined_call_operand.vmem [shape: bf16[8,2304], index: 0, kind: input, shape index: {}]   ;;  %s1230_s1 = inlined_call_operand.vmem [shape: bf16[2304,256], index: 1, kind: input, shape index: {}]   ;;  %s1231_s2 = inlined_call_operand.vmem [shape: f32[1,256], index: 2, kind: input, shape index: {}]   ;;  %s1232_s3 = inlined_call_operand.vmem [shape: f32[8,256], index: 3, kind: input, shape index: {}]   ;;  %s1233_s4 = inlined_call_operand.vmem [shape: f32[8,256], index: 4, kind: output, shape index: {}]  }
   0x1   :  { %s1125_s17 = smov 0  }
   0x2 LB: > { %s26_s18 = sadd.s32 1, %s1088_s16  ;;  %p907_p0 = scmp.ge.s32.totalorder %s1092_s17, 1  ;;  %s1092_s17 = sphi %s1125_s17, %s14_s17   ;;  %s1088_s16 = sphi %s1123_s16, %s1235_s16   ;;  %s1084_s15 = sphi %s1121_s15, %s1234_s15  }
   0x3   : > { %p27_p1 = scmp.ge.s32.totalorder %s26_s18, 6  ;;  %p236_p2 = scmp.lt.s32.totalorder %s1092_s17, 7 }
   0x5   : > { %s1237_s18 = smov (%p27_p1, %s26_s18), 0  ;;  %p237_p3 = pnand %p907_p0, %p236_p2 }
   0x6   : > { %s293_s19 = smul.u32 (!%p237_p3), 3, %s1084_s15  ;;  %p911_p6 = scmp.ne.s32.totalorder (!%p237_p3), %s1084_s15, 0 }
   0x7   : > { %240 = sbr.rel (%p237_p3) target bundleno = 321 (0x141), region = 36 }
   0x8   : > { %s303_s20 = smul.u32 (!%p237_p3), 48, %s1084_s15  ;;  %p296_p4 = scmp.lt.s32.totalorder (!%p237_p3), %s293_s19, 17 }
   0xa   : > { %p305_p5 = scmp.lt.s32.totalorder (!%p237_p3), %s303_s20, 287 }
   0xe   : > { %s1239_s19 = smov (!%p296_p4, %s293_s19), 17  ;;  %s1241_s20 = smov (!%p305_p5, %s303_s20), 287 }
   0xf   : > { %s908_s21 = sshll.u32 %s1239_s19, 2  ;;  %s968_s25 = sshll.u32 %s1241_s20, 3  ;;  %v1094_v0 = vmov (!%p911_p6), 0.0  }
  0x10   : > { %s1146_s24 = scalar_lea.vmem %s1229_s0, %s908_s21  ;;  %s1151_s28 = scalar_lea.vmem %s1230_s1, %s968_s25  ;;  %345 = vst [vmem:[#allocation2] sm:$0xff] (!%p911_p6), %v1094_v0  ;;  %346 = vst [vmem:[#allocation2 + $0x8] sm:$0xff] (!%p911_p6), %v1094_v0 }
  0x11   : > { %344 = sbr.rel (%p911_p6) target bundleno = 24 (0x18), region = 40 }
  0x18 PF: > { %v995_v1 = vld [vmem:[%s1151_s28 + $0x4] ss:$8 sps:$4 sm:$0xff]   ;;  %v997_v2 = vld [vmem:[%s1151_s28] ss:$8 sps:$4 sm:$0xff]   ;;  %v1095_v3 = vmov 0   ;;  %p963_p7 = scmp.ne.s32.totalorder %s1084_s15, 5 }
  0x19   : > { %723 = vmatprep.mubr.bf16.mxu1 %v1095_v3  ;;  %650 = vmatprep.subr.bf16.mxu0 %v995_v1  ;;  %v998_v4 = vld [vmem:[%s1151_s28 + $0x14] ss:$8 sps:$4 sm:$0xff]   ;;  %v1000_v5 = vld [vmem:[%s1151_s28 + $0x10] ss:$8 sps:$4 sm:$0xff]   ;;  %v1001_v6 = vld [vmem:[%s1151_s28 + $0x24] ss:$8 sps:$4 sm:$0xff]  }
  0x1a   : > { %651 = vmatpush1.bf16.msra.mxu0 %v997_v2  ;;  %v1003_v7 = vld [vmem:[%s1151_s28 + $0x20] ss:$8 sps:$4 sm:$0xff]   ;;  %v1004_v8 = vld [vmem:[%s1151_s28 + $0x34] ss:$8 sps:$4 sm:$0xff]   ;;  %v1006_v9 = vld [vmem:[%s1151_s28 + $0x30] ss:$8 sps:$4 sm:$0xff]  }
  0x1b   : > { %652 = vmatprep.subr.bf16.mxu0 %v998_v4  ;;  %v1019_v10 = vld [vmem:[%s1151_s28 + $0x104] ss:$8 sps:$4 sm:$0xff]   ;;  %v1021_v11 = vld [vmem:[%s1151_s28 + $0x100] ss:$8 sps:$4 sm:$0xff]   ;;  %v1025_v13 = vld [vmem:[%s1151_s28 + $0x114] ss:$8 sps:$4 sm:$0xff]   ;;  %v744_v4 = vlaneseq (!%p963_p7) }
  0x1c   : > { %v1007_v12 = vld [vmem:[%s1151_s28 + $0x44] ss:$8 sps:$4 sm:$0xff]   ;;  %691 = vmatprep.subr.bf16.mxu1 %v1019_v10  ;;  %v1027_v14 = vld [vmem:[%s1151_s28 + $0x110] ss:$8 sps:$4 sm:$0xff]   ;;  %v1009_v15 = vld [vmem:[%s1151_s28 + $0x40] ss:$8 sps:$4 sm:$0xff]  }
  0x1d   : > { %692 = vmatpush1.bf16.msra.mxu1 %v1021_v11  ;;  %v1010_v16 = vld [vmem:[%s1151_s28 + $0x54] ss:$8 sps:$4 sm:$0xff]   ;;  %v1031_v17 = vld [vmem:[%s1151_s28 + $0x124] ss:$8 sps:$4 sm:$0xff]   ;;  %v1033_v18 = vld [vmem:[%s1151_s28 + $0x120] ss:$8 sps:$4 sm:$0xff]  }
  0x1e   : > { %653 = vmatpush1.bf16.msra.mxu0 %v1000_v5  ;;  %693 = vmatprep.subr.bf16.mxu1 %v1025_v13  ;;  %v1012_v19 = vld [vmem:[%s1151_s28 + $0x50] ss:$8 sps:$4 sm:$0xff]   ;;  %v1037_v20 = vld [vmem:[%s1151_s28 + $0x134] ss:$8 sps:$4 sm:$0xff]   ;;  %v1013_v21 = vld [vmem:[%s1151_s28 + $0x64] ss:$8 sps:$4 sm:$0xff]  }
  0x1f   : > { %654 = vmatprep.subr.bf16.mxu0 %v1001_v6  ;;  %v1039_v22 = vld [vmem:[%s1151_s28 + $0x130] ss:$8 sps:$4 sm:$0xff]   ;;  %v1015_v23 = vld [vmem:[%s1151_s28 + $0x60] ss:$8 sps:$4 sm:$0xff]   ;;  %v1043_v24 = vld [vmem:[%s1151_s28 + $0x144] ss:$8 sps:$4 sm:$0xff]  }
  0x20   : > { %v1016_v25 = vld [vmem:[%s1151_s28 + $0x74] ss:$8 sps:$4 sm:$0xff]   ;;  %v1045_v26 = vld [vmem:[%s1151_s28 + $0x140] ss:$8 sps:$4 sm:$0xff]   ;;  %v1018_v27 = vld [vmem:[%s1151_s28 + $0x70] ss:$8 sps:$4 sm:$0xff]  }
  0x21   : > { %694 = vmatpush1.bf16.msra.mxu1 %v1027_v14  ;;  %v1049_v28 = vld [vmem:[%s1151_s28 + $0x154] ss:$8 sps:$4 sm:$0xff]   ;;  %v1022_v29 = vld [vmem:[%s1151_s28 + $0x84] ss:$8 sps:$4 sm:$0xff]   ;;  %v1051_v30 = vld [vmem:[%s1151_s28 + $0x150] ss:$8 sps:$4 sm:$0xff]  }
  0x22   : > { %655 = vmatpush1.bf16.msra.mxu0 %v1003_v7  ;;  %695 = vmatprep.subr.bf16.mxu1 %v1031_v17  ;;  %v1024_v31 = vld [vmem:[%s1151_s28 + $0x80] ss:$8 sps:$4 sm:$0xff]   ;;  %v1055_v32 = vld [vmem:[%s1151_s28 + $0x164] ss:$8 sps:$4 sm:$0xff]   ;;  %v1028_v33 = vld [vmem:[%s1151_s28 + $0x94] ss:$8 sps:$4 sm:$0xff]  }
  0x23   : > { %656 = vmatprep.subr.bf16.mxu0 %v1004_v8  ;;  %v349_v34 = vld [vmem:[%s1146_s24] sm:$0xff]  ;;  %v1030_v37 = vld [vmem:[%s1151_s28 + $0x90] ss:$8 sps:$4 sm:$0xff]   ;;  %v1061_v38 = vld [vmem:[%s1151_s28 + $0x174] ss:$8 sps:$4 sm:$0xff]   ;;  %v745_v5 = vshrl.u32 (!%p963_p7), %v744_v4, 7 }
  0x24   : > { %v913_v35 = vcombine.high %v349_v34, %v349_v34  ;;  %v1057_v36 = vld [vmem:[%s1151_s28 + $0x160] ss:$8 sps:$4 sm:$0xff]   ;;  %v1034_v39 = vld [vmem:[%s1151_s28 + $0xa4] ss:$8 sps:$4 sm:$0xff]   ;;  %v1063_v40 = vld [vmem:[%s1151_s28 + $0x170] ss:$8 sps:$4 sm:$0xff]   ;;  %v912_v53 = vcombine.low %v349_v34, %v349_v34 }
  0x25   : > { %696 = vmatpush1.bf16.msra.mxu1 %v1033_v18  ;;  %v1036_v41 = vld [vmem:[%s1151_s28 + $0xa0] ss:$8 sps:$4 sm:$0xff]   ;;  %v1040_v42 = vld [vmem:[%s1151_s28 + $0xb4] ss:$8 sps:$4 sm:$0xff]   ;;  %v1042_v44 = vld [vmem:[%s1151_s28 + $0xb0] ss:$8 sps:$4 sm:$0xff]  }
  0x26   : > { %657 = vmatpush1.bf16.msra.mxu0 %v1006_v9  ;;  %697 = vmatprep.subr.bf16.mxu1 %v1037_v20  ;;  %v1067_v43 = vld [vmem:[%s1146_s24 + $0x8] ss:$0 sps:$4 sm:$0xff]   ;;  %v1046_v45 = vld [vmem:[%s1151_s28 + $0xc4] ss:$8 sps:$4 sm:$0xff]   ;;  %v1052_v47 = vld [vmem:[%s1151_s28 + $0xd4] ss:$8 sps:$4 sm:$0xff]  }
  0x27   : > { %658 = vmatprep.subr.bf16.mxu0 %v1007_v12  ;;  %682 = vmatprep.mubr.bf16.mxu0 %v913_v35  ;;  %v1048_v46 = vld [vmem:[%s1151_s28 + $0xc0] ss:$8 sps:$4 sm:$0xff]   ;;  %v1054_v48 = vld [vmem:[%s1151_s28 + $0xd0] ss:$8 sps:$4 sm:$0xff]   ;;  %v1058_v49 = vld [vmem:[%s1151_s28 + $0xe4] ss:$8 sps:$4 sm:$0xff]  }
  0x28   : > { %v1060_v50 = vld [vmem:[%s1151_s28 + $0xe0] ss:$8 sps:$4 sm:$0xff]   ;;  %v1064_v51 = vld [vmem:[%s1151_s28 + $0xf4] ss:$8 sps:$4 sm:$0xff]   ;;  %v1066_v52 = vld [vmem:[%s1151_s28 + $0xf0] ss:$8 sps:$4 sm:$0xff]  }
  0x29   : > { %698 = vmatpush1.bf16.msra.mxu1 %v1039_v22  ;;  %v347_v58 = vld [vmem:[#allocation2] sm:$0xff]  ;;  %v348_v61 = vld [vmem:[#allocation2 + $0x8] sm:$0xff]  ;;  %v746_v7 = vsub.s32 (!%p963_p7), 0, %v745_v5  ;;  %v750_v8 = vsub.s32 (!%p963_p7), 1, %v745_v5 }
  0x2a   : > { %659 = vmatpush1.bf16.msra.mxu0 %v1009_v15  ;;  %699 = vmatprep.subr.bf16.mxu1 %v1043_v24  ;;  %v742_v6 = vld [vmem:[%s1231_s2] sm:$0x3] (!%p963_p7)  ;;  %v757_v14 = vld [vmem:[%s1232_s3 + $0x8] sm:$0xff] (!%p963_p7) }
  0x2b   : > { %660 = vmatprep.subr.bf16.mxu0 %v1010_v16  ;;  %v747_v11 = vrot.slane (!%p963_p7), %v742_v6, %v746_v7  ;;  %v751_v12 = vrot.slane (!%p963_p7), %v742_v6, %v750_v8  ;;  %v756_v13 = vld [vmem:[%s1232_s3] sm:$0xff] (!%p963_p7) }
  0x2d   : > { %700 = vmatpush1.bf16.msra.mxu1 %v1045_v26 }
  0x2e   : > { %661 = vmatpush1.bf16.msra.mxu0 %v1012_v19  ;;  %701 = vmatprep.subr.bf16.mxu1 %v1049_v28 }
  0x2f   : > { %662 = vmatprep.subr.bf16.mxu0 %v1013_v21 }
  0x31   : > { %702 = vmatpush1.bf16.msra.mxu1 %v1051_v30 }
  0x32   : > { %663 = vmatpush1.bf16.msra.mxu0 %v1015_v23  ;;  %703 = vmatprep.subr.bf16.mxu1 %v1055_v32 }
  0x33   : > { %664 = vmatprep.subr.bf16.mxu0 %v1016_v25 }
  0x35   : > { %704 = vmatpush1.bf16.msra.mxu1 %v1057_v36 }
  0x36   : > { %665 = vmatpush1.bf16.msra.mxu0 %v1018_v27  ;;  %705 = vmatprep.subr.bf16.mxu1 %v1061_v38 }
  0x37   : > { %666 = vmatprep.subr.bf16.mxu0 %v1022_v29 }
  0x39   : > { %706 = vmatpush1.bf16.msra.mxu1 %v1063_v40 }
  0x3a   : > { %667 = vmatpush1.bf16.msra.mxu0 %v1024_v31 }
  0x3b   : > { %668 = vmatprep.subr.bf16.mxu0 %v1028_v33 }
  0x3c   : > { %724 = vmatmul.mubr.bf16.vlgmr.msra.gmra.mrb[0].mxu1 %v1067_v43 }
  0x3e   : > { %669 = vmatpush1.bf16.msra.mxu0 %v1030_v37 }
  0x3f   : > { %670 = vmatprep.subr.bf16.mxu0 %v1034_v39 }
  0x42   : > { %671 = vmatpush1.bf16.msra.mxu0 %v1036_v41 }
  0x43   : > { %672 = vmatprep.subr.bf16.mxu0 %v1040_v42 }
  0x46   : > { %673 = vmatpush1.bf16.msra.mxu0 %v1042_v44 }
  0x47   : > { %674 = vmatprep.subr.bf16.mxu0 %v1046_v45 }
  0x4a   : > { %675 = vmatpush1.bf16.msra.mxu0 %v1048_v46 }
  0x4b   : > { %676 = vmatprep.subr.bf16.mxu0 %v1052_v47 }
  0x4e   : > { %677 = vmatpush1.bf16.msra.mxu0 %v1054_v48 }
  0x4f   : > { %678 = vmatprep.subr.bf16.mxu0 %v1058_v49 }
  0x52   : > { %679 = vmatpush1.bf16.msra.mxu0 %v1060_v50 }
  0x53   : > { %680 = vmatprep.subr.bf16.mxu0 %v1064_v51 }
  0x56   : > { %681 = vmatpush1.bf16.msra.mxu0 %v1066_v52 }
  0x59   : > { %683 = vmatmul.mubr.bf16.vlgmr.msra.gmra.mrb[0].mxu0 %v912_v53 }
 0x10f   : > { %v725_v54 = vpop.f32.mrb[0].mxu1 }
 0x110   : > { %v727_v55 = vpop.f32.mrb[1].mxu1 }
 0x111   : > { %v729_v56 = vpop.f32.mrb[2].mxu1 }
 0x112   : > { %v730_v57 = vpop.f32.mrb[3].mxu1 }
 0x12c   : > { %v684_v59 = vpop.f32.mrb[0].mxu0  ;;  %739 = sbr.rel (%p963_p7) target bundleno = 321 (0x141), region = 44 }
 0x12d   : > { %v726_v60 = vadd.f32 %v725_v54, %v684_v59  ;;  %v686_v62 = vpop.f32.mrb[1].mxu0 }
 0x12e   : > { %v728_v63 = vadd.f32 %v727_v55, %v686_v62  ;;  %v688_v0 = vpop.f32.mrb[2].mxu0 }
 0x12f   : > { %v732_v1 = vadd.f32 %v726_v60, %v347_v58  ;;  %v689_v2 = vpop.f32.mrb[3].mxu0 }
 0x130   : > { %v733_v3 = vadd.f32 %v728_v63, %v348_v61 }
 0x131   : > { %734 = vst [vmem:[#allocation2] sm:$0xff] %v732_v1 }
 0x132   : > { %735 = vst [vmem:[#allocation2 + $0x8] sm:$0xff] %v733_v3 }
 0x138   : > { %v740_v9 = vld [vmem:[#allocation2] sm:$0xff] }
 0x139   : > { %v741_v10 = vld [vmem:[#allocation2 + $0x8] sm:$0xff]  ;;  %v754_v15 = vadd.f32 %v747_v11, %v740_v9 }
 0x13a   : > { %v755_v16 = vadd.f32 %v751_v12, %v741_v10 }
 0x13b   : > { %v758_v17 = vadd.f32 %v756_v13, %v754_v15 }
 0x13c   : > { %v759_v18 = vadd.f32 %v757_v14, %v755_v16 }
 0x13d   : > { %v760_v19 = vmax.f32 %v758_v17, 0.0 }
 0x13e   : > { %v761_v20 = vmax.f32 %v759_v18, 0.0 }
 0x13f   : > { %762 = vst [vmem:[%s1233_s4] sm:$0xff] %v760_v19 }
 0x140   : > { %763 = vst [vmem:[%s1233_s4 + $0x8] sm:$0xff] %v761_v20 }
 0x141 PF: > { %s14_s17 = sadd.s32 1, %s1092_s17   ;;  %s1234_s15 = smov %s1088_s16 }
 0x142   : > { %p11_p8 = scmp.ge.s32.totalorder %s14_s17, 8   ;;  %s1235_s16 = smov %s1237_s18 }
 0x144   :  { %13 = sbr.rel (!%p11_p8) target bundleno = 2 (0x2), region = 83 }

// kernel: _lambda_.37
= control target key start
LH: loop header
LB: loop body
LE: loop exit
PB: predicated region body
PF: predicated region fallthrough
CT: control target
= control target key end

     0   :  { %s1329_s12 = smov 0   ;;  %s1331_s13 = smov 0   ;;  %s1602_s0 = inlined_call_operand.vmem [shape: bf16[2,2304], index: 0, kind: input, shape index: {}]   ;;  %s1603_s1 = inlined_call_operand.vmem [shape: bf16[2304,512], index: 1, kind: input, shape index: {}]   ;;  %s1604_s2 = inlined_call_operand.vmem [shape: f32[1,512], index: 2, kind: input, shape index: {}]   ;;  %s1605_s3 = inlined_call_operand.vmem [shape: f32[2,512], index: 3, kind: output, shape index: {}]  }
   0x1   :  { %s1333_s14 = smov 0   ;;  %s1335_s15 = smov 0  }
   0x2   :  { %s1337_s16 = smov 0   ;;  %s1339_s17 = smov 0  }
   0x3   :  { %s1341_s18 = smov 0  }
   0x4 LB: > { %s25_s19 = sadd.s32 1, %s1295_s16  ;;  %s28_s20 = sadd.s32 1, %s1299_s17  ;;  %s1303_s18 = sphi %s1341_s18, %s13_s18   ;;  %s1299_s17 = sphi %s1339_s17, %s1611_s17   ;;  %s1295_s16 = sphi %s1337_s16, %s1610_s16   ;;  %s1291_s15 = sphi %s1335_s15, %s1609_s15   ;;  %s1287_s14 = sphi %s1333_s14, %s1608_s14   ;;  %s1283_s13 = sphi %s1331_s13, %s1607_s13   ;;  %s1279_s12 = sphi %s1329_s12, %s1606_s12  }
   0x5   : > { %p26_p0 = scmp.ge.s32.totalorder %s25_s19, 6  ;;  %p76_p1 = scmp.ne.s32.totalorder %s1283_s13, %s1279_s12 }
   0x6   : > { %p77_p2 = scmp.eq.s32.totalorder %s1303_s18, 0  ;;  %s69_s24 = sadd.s32 1, %s1283_s13 }
   0x7   : > { %s1613_s19 = smov (%p26_p0, %s25_s19), 0  ;;  %s1615_s20 = smov (!%p26_p0, %s28_s20), %s1299_s17 }
   0x8   : > { %p78_p3 = por %p77_p2, %p76_p1  ;;  %p30_p4 = scmp.ge.s32.totalorder %s1615_s20, 2 }
   0x9   : > { %s64_s21 = ssub.s32 %s1295_s16, %s1613_s19  ;;  %p1051_p6 = scmp.ge.s32.totalorder %s1303_s18, 12 }
   0xa   : > { %s1617_s20 = smov (%p30_p4, %s1615_s20), 0 }
   0xb   : > { %s65_s22 = ssub.s32 %s1299_s17, %s1617_s20  ;;  %156 = sbr.rel (%p1051_p6) target bundleno = 50 (0x32), region = 16 }
   0xc   : > { %s66_s23 = sor.u32 %s65_s22, %s64_s21 }
   0xd   : > { %p67_p5 = scmp.eq.s32.totalorder %s66_s23, 0 }
   0xf   : > { %s1380_s25 = scalar_select %p67_p5, %s1283_s13, %s69_s24  }
  0x12   : > { %171 = sbr.rel (!%p78_p3) target bundleno = 50 (0x32), region = 24  ;;  %s173_s26 = sand.u32 (%p78_p3), 1, %s1283_s13  }
  0x13   : > { %s1115_s27 = smul.u32 (%p78_p3), 384, %s173_s26  ;;  %s1052_s28 = sshll.u32 (%p78_p3), %s1299_s17, 1 }
  0x14   : > { %s1112_s29 = smul.u32 (%p78_p3), 192, %s1295_s16 }
  0x15   : > { %s1394_s8 = scalar_lea.vmem (%p78_p3), [#allocation3], %s1115_s27 }
  0x16   : > { %s179_s30 = sadd.s32 (%p78_p3), %s1112_s29, %s1052_s28 }
  0x17   : > { %s1054_s4 = sshll.u32 (%p78_p3), %s179_s30, 2 }
  0x18   : > { %s1389_s7 = scalar_lea.vmem (%p78_p3), %s1603_s1, %s1054_s4 }
  0x19   : > { %v303_v0 = vld [vmem:[%s1389_s7] sm:$0xff]  ;;  %v305_v1 = vld [vmem:[%s1389_s7 + $0x10] sm:$0xff] }
  0x1a   : > { %v307_v2 = vld [vmem:[%s1389_s7 + $0x20] sm:$0xff]  ;;  %304 = vst [vmem:[%s1394_s8] sm:$0xff] %v303_v0  ;;  %306 = vst [vmem:[%s1394_s8 + $0x8] sm:$0xff] %v305_v1  ;;  %v309_v3 = vld [vmem:[%s1389_s7 + $0x30] sm:$0xff] }
  0x1b   : > { %308 = vst [vmem:[%s1394_s8 + $0x10] sm:$0xff] %v307_v2  ;;  %v311_v4 = vld [vmem:[%s1389_s7 + $0x40] sm:$0xff]  ;;  %v313_v5 = vld [vmem:[%s1389_s7 + $0x50] sm:$0xff]  ;;  %310 = vst [vmem:[%s1394_s8 + $0x18] sm:$0xff] %v309_v3 }
  0x1c   : > { %312 = vst [vmem:[%s1394_s8 + $0x20] sm:$0xff] %v311_v4  ;;  %314 = vst [vmem:[%s1394_s8 + $0x28] sm:$0xff] %v313_v5  ;;  %v315_v6 = vld [vmem:[%s1389_s7 + $0x60] sm:$0xff]  ;;  %v317_v7 = vld [vmem:[%s1389_s7 + $0x70] sm:$0xff] }
  0x1d   : > { %v319_v8 = vld [vmem:[%s1389_s7 + $0x80] sm:$0xff]  ;;  %316 = vst [vmem:[%s1394_s8 + $0x30] sm:$0xff] %v315_v6  ;;  %318 = vst [vmem:[%s1394_s8 + $0x38] sm:$0xff] %v317_v7  ;;  %v321_v9 = vld [vmem:[%s1389_s7 + $0x90] sm:$0xff] }
  0x1e   : > { %320 = vst [vmem:[%s1394_s8 + $0x40] sm:$0xff] %v319_v8  ;;  %v323_v10 = vld [vmem:[%s1389_s7 + $0xa0] sm:$0xff]  ;;  %v325_v11 = vld [vmem:[%s1389_s7 + $0xb0] sm:$0xff]  ;;  %322 = vst [vmem:[%s1394_s8 + $0x48] sm:$0xff] %v321_v9 }
  0x1f   : > { %324 = vst [vmem:[%s1394_s8 + $0x50] sm:$0xff] %v323_v10  ;;  %326 = vst [vmem:[%s1394_s8 + $0x58] sm:$0xff] %v325_v11  ;;  %v327_v12 = vld [vmem:[%s1389_s7 + $0xc0] sm:$0xff]  ;;  %v329_v13 = vld [vmem:[%s1389_s7 + $0xd0] sm:$0xff] }
  0x20   : > { %v331_v14 = vld [vmem:[%s1389_s7 + $0xe0] sm:$0xff]  ;;  %328 = vst [vmem:[%s1394_s8 + $0x60] sm:$0xff] %v327_v12  ;;  %330 = vst [vmem:[%s1394_s8 + $0x68] sm:$0xff] %v329_v13  ;;  %v333_v15 = vld [vmem:[%s1389_s7 + $0xf0] sm:$0xff] }
  0x21   : > { %332 = vst [vmem:[%s1394_s8 + $0x70] sm:$0xff] %v331_v14  ;;  %v335_v16 = vld [vmem:[%s1389_s7 + $0x100] sm:$0xff]  ;;  %v337_v17 = vld [vmem:[%s1389_s7 + $0x110] sm:$0xff]  ;;  %334 = vst [vmem:[%s1394_s8 + $0x78] sm:$0xff] %v333_v15 }
  0x22   : > { %336 = vst [vmem:[%s1394_s8 + $0x80] sm:$0xff] %v335_v16  ;;  %338 = vst [vmem:[%s1394_s8 + $0x88] sm:$0xff] %v337_v17  ;;  %v339_v18 = vld [vmem:[%s1389_s7 + $0x120] sm:$0xff]  ;;  %v341_v19 = vld [vmem:[%s1389_s7 + $0x130] sm:$0xff] }
  0x23   : > { %v343_v20 = vld [vmem:[%s1389_s7 + $0x140] sm:$0xff]  ;;  %340 = vst [vmem:[%s1394_s8 + $0x90] sm:$0xff] %v339_v18  ;;  %342 = vst [vmem:[%s1394_s8 + $0x98] sm:$0xff] %v341_v19  ;;  %v345_v21 = vld [vmem:[%s1389_s7 + $0x150] sm:$0xff] }
  0x24   : > { %344 = vst [vmem:[%s1394_s8 + $0xa0] sm:$0xff] %v343_v20  ;;  %v347_v22 = vld [vmem:[%s1389_s7 + $0x160] sm:$0xff]  ;;  %v349_v23 = vld [vmem:[%s1389_s7 + $0x170] sm:$0xff]  ;;  %346 = vst [vmem:[%s1394_s8 + $0xa8] sm:$0xff] %v345_v21 }
  0x25   : > { %348 = vst [vmem:[%s1394_s8 + $0xb0] sm:$0xff] %v347_v22  ;;  %350 = vst [vmem:[%s1394_s8 + $0xb8] sm:$0xff] %v349_v23  ;;  %v351_v24 = vld [vmem:[%s1389_s7 + $0x180] sm:$0xff]  ;;  %v353_v25 = vld [vmem:[%s1389_s7 + $0x190] sm:$0xff] }
  0x26   : > { %v355_v26 = vld [vmem:[%s1389_s7 + $0x1a0] sm:$0xff]  ;;  %352 = vst [vmem:[%s1394_s8 + $0xc0] sm:$0xff] %v351_v24  ;;  %354 = vst [vmem:[%s1394_s8 + $0xc8] sm:$0xff] %v353_v25  ;;  %v357_v27 = vld [vmem:[%s1389_s7 + $0x1b0] sm:$0xff] }
  0x27   : > { %356 = vst [vmem:[%s1394_s8 + $0xd0] sm:$0xff] %v355_v26  ;;  %v359_v28 = vld [vmem:[%s1389_s7 + $0x1c0] sm:$0xff]  ;;  %v361_v29 = vld [vmem:[%s1389_s7 + $0x1d0] sm:$0xff]  ;;  %358 = vst [vmem:[%s1394_s8 + $0xd8] sm:$0xff] %v357_v27 }
  0x28   : > { %360 = vst [vmem:[%s1394_s8 + $0xe0] sm:$0xff] %v359_v28  ;;  %362 = vst [vmem:[%s1394_s8 + $0xe8] sm:$0xff] %v361_v29  ;;  %v363_v30 = vld [vmem:[%s1389_s7 + $0x1e0] sm:$0xff]  ;;  %v365_v31 = vld [vmem:[%s1389_s7 + $0x1f0] sm:$0xff] }
  0x29   : > { %v367_v32 = vld [vmem:[%s1389_s7 + $0x200] sm:$0xff]  ;;  %364 = vst [vmem:[%s1394_s8 + $0xf0] sm:$0xff] %v363_v30  ;;  %366 = vst [vmem:[%s1394_s8 + $0xf8] sm:$0xff] %v365_v31  ;;  %v369_v33 = vld [vmem:[%s1389_s7 + $0x210] sm:$0xff] }
  0x2a   : > { %368 = vst [vmem:[%s1394_s8 + $0x100] sm:$0xff] %v367_v32  ;;  %v371_v34 = vld [vmem:[%s1389_s7 + $0x220] sm:$0xff]  ;;  %v373_v35 = vld [vmem:[%s1389_s7 + $0x230] sm:$0xff]  ;;  %370 = vst [vmem:[%s1394_s8 + $0x108] sm:$0xff] %v369_v33 }
  0x2b   : > { %372 = vst [vmem:[%s1394_s8 + $0x110] sm:$0xff] %v371_v34  ;;  %374 = vst [vmem:[%s1394_s8 + $0x118] sm:$0xff] %v373_v35  ;;  %v375_v36 = vld [vmem:[%s1389_s7 + $0x240] sm:$0xff]  ;;  %v377_v37 = vld [vmem:[%s1389_s7 + $0x250] sm:$0xff] }
  0x2c   : > { %v379_v38 = vld [vmem:[%s1389_s7 + $0x260] sm:$0xff]  ;;  %376 = vst [vmem:[%s1394_s8 + $0x120] sm:$0xff] %v375_v36  ;;  %378 = vst [vmem:[%s1394_s8 + $0x128] sm:$0xff] %v377_v37  ;;  %v381_v39 = vld [vmem:[%s1389_s7 + $0x270] sm:$0xff] }
  0x2d   : > { %380 = vst [vmem:[%s1394_s8 + $0x130] sm:$0xff] %v379_v38  ;;  %v383_v40 = vld [vmem:[%s1389_s7 + $0x280] sm:$0xff]  ;;  %v385_v41 = vld [vmem:[%s1389_s7 + $0x290] sm:$0xff]  ;;  %382 = vst [vmem:[%s1394_s8 + $0x138] sm:$0xff] %v381_v39 }
  0x2e   : > { %384 = vst [vmem:[%s1394_s8 + $0x140] sm:$0xff] %v383_v40  ;;  %386 = vst [vmem:[%s1394_s8 + $0x148] sm:$0xff] %v385_v41  ;;  %v387_v42 = vld [vmem:[%s1389_s7 + $0x2a0] sm:$0xff]  ;;  %v389_v43 = vld [vmem:[%s1389_s7 + $0x2b0] sm:$0xff] }
  0x2f   : > { %v391_v44 = vld [vmem:[%s1389_s7 + $0x2c0] sm:$0xff]  ;;  %388 = vst [vmem:[%s1394_s8 + $0x150] sm:$0xff] %v387_v42  ;;  %390 = vst [vmem:[%s1394_s8 + $0x158] sm:$0xff] %v389_v43  ;;  %v393_v45 = vld [vmem:[%s1389_s7 + $0x2d0] sm:$0xff] }
  0x30   : > { %392 = vst [vmem:[%s1394_s8 + $0x160] sm:$0xff] %v391_v44  ;;  %v395_v46 = vld [vmem:[%s1389_s7 + $0x2e0] sm:$0xff]  ;;  %v397_v47 = vld [vmem:[%s1389_s7 + $0x2f0] sm:$0xff]  ;;  %394 = vst [vmem:[%s1394_s8 + $0x168] sm:$0xff] %v393_v45 }
  0x31   : > { %396 = vst [vmem:[%s1394_s8 + $0x170] sm:$0xff] %v395_v46  ;;  %398 = vst [vmem:[%s1394_s8 + $0x178] sm:$0xff] %v397_v47 }
  0x32 PF: > { %p1055_p7 = scmp.ge.s32.totalorder %s1303_s18, 1  ;;  %p411_p8 = scmp.lt.s32.totalorder %s1303_s18, 13 }
  0x34   : > { %p412_p9 = pnand %p1055_p7, %p411_p8 }
  0x35   : > { %s418_s9 = sand.u32 (!%p412_p9), 1, %s1279_s12   ;;  %s457_s10 = smul.u32 (!%p412_p9), 3, %s1287_s14 }
  0x36   : > { %415 = sbr.rel (%p412_p9) target bundleno = 369 (0x171), region = 66  ;;  %s1056_s21 = sshll.u32 (!%p412_p9), %s1291_s15, 1 }
  0x37   : > { %s1116_s11 = smul.u32 (!%p412_p9), 384, %s418_s9  ;;  %p460_p10 = scmp.lt.s32.totalorder (!%p412_p9), %s457_s10, 17 }
  0x38   : > { %p469_p11 = scmp.lt.s32.totalorder (!%p412_p9), %s1056_s21, 3  ;;  %p1059_p12 = scmp.ne.s32.totalorder (!%p412_p9), %s1287_s14, 0 }
  0x39   : > { %s1512_s4 = scalar_lea.vmem (!%p412_p9), [#allocation3], %s1116_s11 }
  0x3d   : > { %s1619_s10 = smov (!%p460_p10, %s457_s10), 17  ;;  %s1621_s21 = smov (!%p469_p11, %s1056_s21), 3 }
  0x3e   : > { %s464_s24 = scalar_lea.vmem %s1602_s0, %s1619_s10  ;;  %s471_s12 = scalar_lea.vmem %s1604_s2, %s1621_s21  ;;  %v1305_v48 = vmov (!%p1059_p12), 0.0  }
  0x3f   : > { %s1058_s28 = sshll.u32 %s1621_s21, 1  ;;  %487 = sbr.rel (%p1059_p12) target bundleno = 70 (0x46), region = 74  ;;  %488 = vst [vmem:[#allocation2] sm:$0xf] (!%p1059_p12), %v1305_v48 }
  0x40   : > { %s1510_s30 = scalar_lea.vmem %s1605_s3, %s1058_s28 }
  0x46 PF: > { %v1177_v49 = vld [vmem:[%s1512_s4 + $0x4] ss:$8 sps:$4 sm:$0xff]   ;;  %v1179_v50 = vld [vmem:[%s1512_s4] ss:$8 sps:$4 sm:$0xff]   ;;  %v1306_v51 = vmov 0   ;;  %v551_v12 = vlaneseq  ;;  %p1109_p13 = scmp.ne.s32.totalorder %s1287_s14, 5 }
  0x47   : > { %879 = vmatprep.mubr.bf16.mxu0 %v1306_v51  ;;  %806 = vmatprep.subr.bf16.mxu1 %v1177_v49  ;;  %v1180_v52 = vld [vmem:[%s1512_s4 + $0x14] ss:$8 sps:$4 sm:$0xff]   ;;  %v1182_v53 = vld [vmem:[%s1512_s4 + $0x10] ss:$8 sps:$4 sm:$0xff]   ;;  %v1183_v54 = vld [vmem:[%s1512_s4 + $0x24] ss:$8 sps:$4 sm:$0xff]  }
  0x48   : > { %807 = vmatpush1.bf16.msra.mxu1 %v1179_v50  ;;  %v1185_v55 = vld [vmem:[%s1512_s4 + $0x20] ss:$8 sps:$4 sm:$0xff]   ;;  %v1186_v56 = vld [vmem:[%s1512_s4 + $0x34] ss:$8 sps:$4 sm:$0xff]   ;;  %v1188_v57 = vld [vmem:[%s1512_s4 + $0x30] ss:$8 sps:$4 sm:$0xff]  }
  0x49   : > { %808 = vmatprep.subr.bf16.mxu1 %v1180_v52  ;;  %v1201_v58 = vld [vmem:[%s1512_s4 + $0x104] ss:$8 sps:$4 sm:$0xff]   ;;  %v1203_v59 = vld [vmem:[%s1512_s4 + $0x100] ss:$8 sps:$4 sm:$0xff]   ;;  %v1207_v61 = vld [vmem:[%s1512_s4 + $0x114] ss:$8 sps:$4 sm:$0xff]  }
  0x4a   : > { %v1189_v60 = vld [vmem:[%s1512_s4 + $0x44] ss:$8 sps:$4 sm:$0xff]   ;;  %847 = vmatprep.subr.bf16.mxu0 %v1201_v58  ;;  %v1209_v62 = vld [vmem:[%s1512_s4 + $0x110] ss:$8 sps:$4 sm:$0xff]   ;;  %v1191_v63 = vld [vmem:[%s1512_s4 + $0x40] ss:$8 sps:$4 sm:$0xff]  }
  0x4b   : > { %848 = vmatpush1.bf16.msra.mxu0 %v1203_v59  ;;  %v1192_v0 = vld [vmem:[%s1512_s4 + $0x54] ss:$8 sps:$4 sm:$0xff]   ;;  %v1213_v1 = vld [vmem:[%s1512_s4 + $0x124] ss:$8 sps:$4 sm:$0xff]   ;;  %v1215_v2 = vld [vmem:[%s1512_s4 + $0x120] ss:$8 sps:$4 sm:$0xff]  }
  0x4c   : > { %809 = vmatpush1.bf16.msra.mxu1 %v1182_v53  ;;  %849 = vmatprep.subr.bf16.mxu0 %v1207_v61  ;;  %v1194_v3 = vld [vmem:[%s1512_s4 + $0x50] ss:$8 sps:$4 sm:$0xff]   ;;  %v1219_v4 = vld [vmem:[%s1512_s4 + $0x134] ss:$8 sps:$4 sm:$0xff]   ;;  %v1195_v5 = vld [vmem:[%s1512_s4 + $0x64] ss:$8 sps:$4 sm:$0xff]  }
  0x4d   : > { %810 = vmatprep.subr.bf16.mxu1 %v1183_v54  ;;  %v1221_v6 = vld [vmem:[%s1512_s4 + $0x130] ss:$8 sps:$4 sm:$0xff]   ;;  %v1197_v7 = vld [vmem:[%s1512_s4 + $0x60] ss:$8 sps:$4 sm:$0xff]   ;;  %v1225_v8 = vld [vmem:[%s1512_s4 + $0x144] ss:$8 sps:$4 sm:$0xff]  }
  0x4e   : > { %v1198_v9 = vld [vmem:[%s1512_s4 + $0x74] ss:$8 sps:$4 sm:$0xff]   ;;  %v1307_v10 = vmov 1966171168   ;;  %v1227_v13 = vld [vmem:[%s1512_s4 + $0x140] ss:$8 sps:$4 sm:$0xff]  }
  0x4f   : > { %850 = vmatpush1.bf16.msra.mxu0 %v1209_v62  ;;  %v549_v11 = vunpack.c.l.s4 %v1307_v10  ;;  %v1200_v14 = vld [vmem:[%s1512_s4 + $0x70] ss:$8 sps:$4 sm:$0xff]   ;;  %v1231_v15 = vld [vmem:[%s1512_s4 + $0x154] ss:$8 sps:$4 sm:$0xff]   ;;  %v1204_v16 = vld [vmem:[%s1512_s4 + $0x84] ss:$8 sps:$4 sm:$0xff]  }
  0x50   : > { %811 = vmatpush1.bf16.msra.mxu1 %v1185_v55  ;;  %851 = vmatprep.subr.bf16.mxu0 %v1213_v1  ;;  %v1543_v18 = vshrl.u32 %v551_v12, 7  ;;  %v1233_v19 = vld [vmem:[%s1512_s4 + $0x150] ss:$8 sps:$4 sm:$0xff]   ;;  %v1206_v20 = vld [vmem:[%s1512_s4 + $0x80] ss:$8 sps:$4 sm:$0xff]  }
  0x51   : > { %812 = vmatprep.subr.bf16.mxu1 %v1186_v56  ;;  %v550_v17 = vunpack.c.0.s8 %v549_v11  ;;  %v1237_v21 = vld [vmem:[%s1512_s4 + $0x164] ss:$8 sps:$4 sm:$0xff]   ;;  %v1210_v22 = vld [vmem:[%s1512_s4 + $0x94] ss:$8 sps:$4 sm:$0xff]   ;;  %v1239_v26 = vld [vmem:[%s1512_s4 + $0x160] ss:$8 sps:$4 sm:$0xff]  }
  0x52   : > { %v1060_v23 = vld.sshfl [vmem:[%s464_s24] sm:$0x13 pattern:$0x75316420]  ;;  %v1212_v27 = vld [vmem:[%s1512_s4 + $0x90] ss:$8 sps:$4 sm:$0xff]  }
  0x53   : > { %852 = vmatpush1.bf16.msra.mxu0 %v1215_v2  ;;  %v553_v24 = vsub.s32 %v550_v17, %v1543_v18  ;;  %v547_v25 = vcombine.high %v1060_v23, %v1060_v23  ;;  %v1243_v28 = vld [vmem:[%s1512_s4 + $0x174] ss:$8 sps:$4 sm:$0xff]   ;;  %v1216_v30 = vld [vmem:[%s1512_s4 + $0xa4] ss:$8 sps:$4 sm:$0xff]   ;;  %v1245_v32 = vld [vmem:[%s1512_s4 + $0x170] ss:$8 sps:$4 sm:$0xff]  }
  0x54   : > { %813 = vmatpush1.bf16.msra.mxu1 %v1188_v57  ;;  %853 = vmatprep.subr.bf16.mxu0 %v1219_v4  ;;  %v1218_v33 = vld [vmem:[%s1512_s4 + $0xa0] ss:$8 sps:$4 sm:$0xff]   ;;  %v1222_v34 = vld [vmem:[%s1512_s4 + $0xb4] ss:$8 sps:$4 sm:$0xff]   ;;  %v1224_v36 = vld [vmem:[%s1512_s4 + $0xb0] ss:$8 sps:$4 sm:$0xff]  }
  0x55   : > { %814 = vmatprep.subr.bf16.mxu1 %v1189_v60  ;;  %v561_v29 = vrot.slane %v547_v25, %v553_v24  ;;  %v554_v31 = vrot.slane %v1060_v23, %v553_v24  ;;  %v1228_v37 = vld [vmem:[%s1512_s4 + $0xc4] ss:$8 sps:$4 sm:$0xff]   ;;  %v1230_v38 = vld [vmem:[%s1512_s4 + $0xc0] ss:$8 sps:$4 sm:$0xff]   ;;  %v1234_v39 = vld [vmem:[%s1512_s4 + $0xd4] ss:$8 sps:$4 sm:$0xff]  }
  0x56   : > { %v1236_v40 = vld [vmem:[%s1512_s4 + $0xd0] ss:$8 sps:$4 sm:$0xff]   ;;  %v1240_v41 = vld [vmem:[%s1512_s4 + $0xe4] ss:$8 sps:$4 sm:$0xff]   ;;  %v1242_v42 = vld [vmem:[%s1512_s4 + $0xe0] ss:$8 sps:$4 sm:$0xff]  }
  0x57   : > { %854 = vmatpush1.bf16.msra.mxu0 %v1221_v6  ;;  %838 = vmatprep.mubr.bf16.mxu1 %v561_v29  ;;  %v562_v35 = vcombine.high %v554_v31, %v554_v31  ;;  %v1246_v43 = vld [vmem:[%s1512_s4 + $0xf4] ss:$8 sps:$4 sm:$0xff]   ;;  %v1248_v44 = vld [vmem:[%s1512_s4 + $0xf0] ss:$8 sps:$4 sm:$0xff]   ;;  %v1308_v49 = vmov 1983009808  }
  0x58   : > { %815 = vmatpush1.bf16.msra.mxu1 %v1191_v63  ;;  %855 = vmatprep.subr.bf16.mxu0 %v1225_v8  ;;  %v892_v50 = vunpack.c.l.s4 %v1308_v49  ;;  %v489_v60 = vld [vmem:[#allocation2] sm:$0xf]  ;;  %v914_v1 = vsub.s32 (!%p1109_p13), 1, %v1543_v18 }
  0x59   : > { %816 = vmatprep.subr.bf16.mxu1 %v1192_v0  ;;  %v906_v63 = vld [vmem:[%s471_s12] sm:$0x3] (!%p1109_p13)  ;;  %v910_v0 = vsub.s32 (!%p1109_p13), 0, %v1543_v18 }
  0x5a   : > { %v893_v51 = vunpack.c.0.s8 %v892_v50 }
  0x5b   : > { %856 = vmatpush1.bf16.msra.mxu0 %v1227_v13  ;;  %v911_v2 = vrot.slane (!%p1109_p13), %v906_v63, %v910_v0 }
  0x5c   : > { %817 = vmatpush1.bf16.msra.mxu1 %v1194_v3  ;;  %857 = vmatprep.subr.bf16.mxu0 %v1231_v15  ;;  %v896_v56 = vsub.s32 %v893_v51, %v1543_v18  ;;  %v915_v3 = vrot.slane (!%p1109_p13), %v906_v63, %v914_v1 }
  0x5d   : > { %818 = vmatprep.subr.bf16.mxu1 %v1195_v5 }
  0x5e   : > { %v916_v4 = vcombine.low (!%p1109_p13), %v911_v2, %v915_v3 }
  0x5f   : > { %858 = vmatpush1.bf16.msra.mxu0 %v1233_v19 }
  0x60   : > { %819 = vmatpush1.bf16.msra.mxu1 %v1197_v7  ;;  %859 = vmatprep.subr.bf16.mxu0 %v1237_v21  ;;  %v923_v6 = vrot.slane (!%p1109_p13), %v916_v4, %v896_v56 }
  0x61   : > { %820 = vmatprep.subr.bf16.mxu1 %v1198_v9 }
  0x63   : > { %860 = vmatpush1.bf16.msra.mxu0 %v1239_v26 }
  0x64   : > { %821 = vmatpush1.bf16.msra.mxu1 %v1200_v14  ;;  %861 = vmatprep.subr.bf16.mxu0 %v1243_v28 }
  0x65   : > { %822 = vmatprep.subr.bf16.mxu1 %v1204_v16 }
  0x67   : > { %862 = vmatpush1.bf16.msra.mxu0 %v1245_v32 }
  0x68   : > { %823 = vmatpush1.bf16.msra.mxu1 %v1206_v20 }
  0x69   : > { %824 = vmatprep.subr.bf16.mxu1 %v1210_v22 }
  0x6a   : > { %880 = vmatmul.mubr.bf16.vlgmr.msra.gmra.mrb[0].mxu0 %v562_v35 }
  0x6c   : > { %825 = vmatpush1.bf16.msra.mxu1 %v1212_v27 }
  0x6d   : > { %826 = vmatprep.subr.bf16.mxu1 %v1216_v30 }
  0x70   : > { %827 = vmatpush1.bf16.msra.mxu1 %v1218_v33 }
  0x71   : > { %828 = vmatprep.subr.bf16.mxu1 %v1222_v34 }
  0x74   : > { %829 = vmatpush1.bf16.msra.mxu1 %v1224_v36 }
  0x75   : > { %830 = vmatprep.subr.bf16.mxu1 %v1228_v37 }
  0x78   : > { %831 = vmatpush1.bf16.msra.mxu1 %v1230_v38 }
  0x79   : > { %832 = vmatprep.subr.bf16.mxu1 %v1234_v39 }
  0x7c   : > { %833 = vmatpush1.bf16.msra.mxu1 %v1236_v40 }
  0x7d   : > { %834 = vmatprep.subr.bf16.mxu1 %v1240_v41 }
  0x80   : > { %835 = vmatpush1.bf16.msra.mxu1 %v1242_v42 }
  0x81   : > { %836 = vmatprep.subr.bf16.mxu1 %v1246_v43 }
  0x84   : > { %837 = vmatpush1.bf16.msra.mxu1 %v1248_v44 }
  0x87   : > { %839 = vmatmul.mubr.bf16.vlgmr.msra.gmra.mrb[0].mxu1 %v554_v31 }
 0x13d   : > { %v881_v45 = vpop.f32.mrb[0].mxu0 }
 0x13e   : > { %v883_v46 = vpop.f32.mrb[1].mxu0 }
 0x13f   : > { %v885_v47 = vpop.f32.mrb[2].mxu0 }
 0x140   : > { %v886_v48 = vpop.f32.mrb[3].mxu0 }
 0x15a   : > { %v840_v52 = vpop.f32.mrb[0].mxu1 }
 0x15b   : > { %v882_v53 = vadd.f32 %v881_v45, %v840_v52  ;;  %v842_v54 = vpop.f32.mrb[1].mxu1 }
 0x15c   : > { %v884_v55 = vadd.f32 %v883_v46, %v842_v54  ;;  %v844_v57 = vpop.f32.mrb[2].mxu1 }
 0x15d   : > { %v845_v58 = vpop.f32.mrb[3].mxu1 }
 0x15e   : > { %v890_v59 = vcombine.low %v882_v53, %v884_v55  ;;  %904 = sbr.rel (%p1109_p13) target bundleno = 369 (0x171), region = 78 }
 0x160   : > { %v897_v61 = vrot.slane %v890_v59, %v896_v56 }
 0x162   : > { %v899_v62 = vadd.f32 %v897_v61, %v489_v60 }
 0x164   : > { %900 = vst [vmem:[#allocation2] sm:$0xf] %v899_v62 }
 0x16b   : > { %v905_v5 = vld [vmem:[#allocation2] sm:$0xf] }
 0x16c   : > { %v925_v7 = vadd.f32 %v923_v6, %v905_v5 }
 0x16e   : > { %v926_v8 = vmax.f32 %v925_v7, 0.0 }
 0x170   : > { %927 = vst [vmem:[%s1510_s30] sm:$0xf] %v926_v8 }
 0x171 PF: > { %s13_s18 = sadd.s32 1, %s1303_s18   ;;  %s1606_s12 = smov %s1283_s13 }
 0x172   : > { %p10_p0 = scmp.ge.s32.totalorder %s13_s18, 14   ;;  %s1607_s13 = smov %s1380_s25 }
 0x173   : > { %s1608_s14 = smov %s1295_s16  ;;  %s1609_s15 = smov %s1299_s17 }
 0x174   : > { %s1610_s16 = smov %s1613_s19  ;;  %s1611_s17 = smov %s1617_s20 }
 0x175   :  { %12 = sbr.rel (!%p10_p0) target bundleno = 4 (0x4), region = 119 }

// kernel: _lambda_.38
= control target key start
LH: loop header
LB: loop body
LE: loop exit
PB: predicated region body
PF: predicated region fallthrough
CT: control target
= control target key end

     0   :  { %s1045_s12 = smov 0   ;;  %s1047_s13 = smov 0   ;;  %s1229_s0 = inlined_call_operand.vmem [shape: bf16[2,256], index: 0, kind: input, shape index: {}]   ;;  %s1230_s1 = inlined_call_operand.vmem [shape: bf16[256,512], index: 1, kind: input, shape index: {}]   ;;  %s1231_s2 = inlined_call_operand.vmem [shape: f32[1,512], index: 2, kind: input, shape index: {}]   ;;  %s1232_s3 = inlined_call_operand.vmem [shape: f32[2,512], index: 3, kind: output, shape index: {}]  }
   0x1   :  { %s1049_s14 = smov 0   ;;  %s1051_s15 = smov 0  }
   0x2   :  { %s1053_s16 = smov 0  }
   0x3 LB: > { %s28_s17 = sadd.s32 1, %s1016_s15  ;;  %p76_p1 = scmp.ne.s32.totalorder %s1008_s13, %s1004_s12  ;;  %s1020_s16 = sphi %s1053_s16, %s13_s16   ;;  %s1016_s15 = sphi %s1051_s15, %s1236_s15   ;;  %s1012_s14 = sphi %s1049_s14, %s1235_s14   ;;  %s1008_s13 = sphi %s1047_s13, %s1234_s13   ;;  %s1004_s12 = sphi %s1045_s12, %s1233_s12  }
   0x4   : > { %p30_p0 = scmp.ge.s32.totalorder %s28_s17, 2  ;;  %p77_p2 = scmp.eq.s32.totalorder %s1020_s16, 0 }
   0x5   : > { %s69_s19 = sadd.s32 1, %s1008_s13  ;;  %p846_p5 = scmp.ge.s32.totalorder %s1020_s16, 2 }
   0x6   : > { %s1238_s17 = smov (%p30_p0, %s28_s17), 0  ;;  %p78_p3 = por %p77_p2, %p76_p1 }
   0x7   : > { %s65_s18 = ssub.s32 %s1016_s15, %s1238_s17  ;;  %168 = sbr.rel (%p846_p5) target bundleno = 34 (0x22), region = 20 }
   0x8   : > { %p67_p4 = scmp.eq.s32.totalorder %s65_s18, 0 }
   0xa   : > { %s1080_s20 = scalar_select %p67_p4, %s1008_s13, %s69_s19  }
   0xe   : > { %171 = sbr.rel (!%p78_p3) target bundleno = 34 (0x22), region = 24  ;;  %s173_s21 = sand.u32 (%p78_p3), 1, %s1008_s13  }
   0xf   : > { %s890_s22 = sshll.u32 (%p78_p3), %s1016_s15, 3  ;;  %s847_s23 = sshll.u32 (%p78_p3), %s173_s21, 8 }
  0x10   : > { %s1088_s26 = scalar_lea.vmem (%p78_p3), %s1230_s1, %s890_s22  ;;  %s1093_s27 = scalar_lea.vmem (%p78_p3), [#allocation3], %s847_s23 }
  0x11   : > { %v271_v0 = vld [vmem:[%s1088_s26] sm:$0xff] (%p78_p3)  ;;  %v273_v1 = vld [vmem:[%s1088_s26 + $0x10] sm:$0xff] (%p78_p3) }
  0x12   : > { %v275_v2 = vld [vmem:[%s1088_s26 + $0x20] sm:$0xff] (%p78_p3)  ;;  %272 = vst [vmem:[%s1093_s27] sm:$0xff] (%p78_p3), %v271_v0  ;;  %274 = vst [vmem:[%s1093_s27 + $0x8] sm:$0xff] (%p78_p3), %v273_v1  ;;  %v277_v3 = vld [vmem:[%s1088_s26 + $0x30] sm:$0xff] (%p78_p3) }
  0x13   : > { %276 = vst [vmem:[%s1093_s27 + $0x10] sm:$0xff] (%p78_p3), %v275_v2  ;;  %v279_v4 = vld [vmem:[%s1088_s26 + $0x40] sm:$0xff] (%p78_p3)  ;;  %v281_v5 = vld [vmem:[%s1088_s26 + $0x50] sm:$0xff] (%p78_p3)  ;;  %278 = vst [vmem:[%s1093_s27 + $0x18] sm:$0xff] (%p78_p3), %v277_v3 }
  0x14   : > { %280 = vst [vmem:[%s1093_s27 + $0x20] sm:$0xff] (%p78_p3), %v279_v4  ;;  %282 = vst [vmem:[%s1093_s27 + $0x28] sm:$0xff] (%p78_p3), %v281_v5  ;;  %v283_v6 = vld [vmem:[%s1088_s26 + $0x60] sm:$0xff] (%p78_p3)  ;;  %v285_v7 = vld [vmem:[%s1088_s26 + $0x70] sm:$0xff] (%p78_p3) }
  0x15   : > { %v287_v8 = vld [vmem:[%s1088_s26 + $0x80] sm:$0xff]  ;;  %284 = vst [vmem:[%s1093_s27 + $0x30] sm:$0xff] %v283_v6  ;;  %286 = vst [vmem:[%s1093_s27 + $0x38] sm:$0xff] %v285_v7  ;;  %v289_v9 = vld [vmem:[%s1088_s26 + $0x90] sm:$0xff] }
  0x16   : > { %288 = vst [vmem:[%s1093_s27 + $0x40] sm:$0xff] %v287_v8  ;;  %v291_v10 = vld [vmem:[%s1088_s26 + $0xa0] sm:$0xff]  ;;  %v293_v11 = vld [vmem:[%s1088_s26 + $0xb0] sm:$0xff]  ;;  %290 = vst [vmem:[%s1093_s27 + $0x48] sm:$0xff] %v289_v9 }
  0x17   : > { %292 = vst [vmem:[%s1093_s27 + $0x50] sm:$0xff] %v291_v10  ;;  %294 = vst [vmem:[%s1093_s27 + $0x58] sm:$0xff] %v293_v11  ;;  %v295_v12 = vld [vmem:[%s1088_s26 + $0xc0] sm:$0xff]  ;;  %v297_v13 = vld [vmem:[%s1088_s26 + $0xd0] sm:$0xff] }
  0x18   : > { %v299_v14 = vld [vmem:[%s1088_s26 + $0xe0] sm:$0xff]  ;;  %296 = vst [vmem:[%s1093_s27 + $0x60] sm:$0xff] %v295_v12  ;;  %298 = vst [vmem:[%s1093_s27 + $0x68] sm:$0xff] %v297_v13  ;;  %v301_v15 = vld [vmem:[%s1088_s26 + $0xf0] sm:$0xff] }
  0x19   : > { %300 = vst [vmem:[%s1093_s27 + $0x70] sm:$0xff] %v299_v14  ;;  %v303_v16 = vld [vmem:[%s1088_s26 + $0x100] sm:$0xff]  ;;  %v305_v17 = vld [vmem:[%s1088_s26 + $0x110] sm:$0xff]  ;;  %302 = vst [vmem:[%s1093_s27 + $0x78] sm:$0xff] %v301_v15 }
  0x1a   : > { %304 = vst [vmem:[%s1093_s27 + $0x80] sm:$0xff] %v303_v16  ;;  %306 = vst [vmem:[%s1093_s27 + $0x88] sm:$0xff] %v305_v17  ;;  %v307_v18 = vld [vmem:[%s1088_s26 + $0x120] sm:$0xff]  ;;  %v309_v19 = vld [vmem:[%s1088_s26 + $0x130] sm:$0xff] }
  0x1b   : > { %v311_v20 = vld [vmem:[%s1088_s26 + $0x140] sm:$0xff]  ;;  %308 = vst [vmem:[%s1093_s27 + $0x90] sm:$0xff] %v307_v18  ;;  %310 = vst [vmem:[%s1093_s27 + $0x98] sm:$0xff] %v309_v19  ;;  %v313_v21 = vld [vmem:[%s1088_s26 + $0x150] sm:$0xff] }
  0x1c   : > { %312 = vst [vmem:[%s1093_s27 + $0xa0] sm:$0xff] %v311_v20  ;;  %v315_v22 = vld [vmem:[%s1088_s26 + $0x160] sm:$0xff]  ;;  %v317_v23 = vld [vmem:[%s1088_s26 + $0x170] sm:$0xff]  ;;  %314 = vst [vmem:[%s1093_s27 + $0xa8] sm:$0xff] %v313_v21 }
  0x1d   : > { %316 = vst [vmem:[%s1093_s27 + $0xb0] sm:$0xff] %v315_v22  ;;  %318 = vst [vmem:[%s1093_s27 + $0xb8] sm:$0xff] %v317_v23  ;;  %v319_v24 = vld [vmem:[%s1088_s26 + $0x180] sm:$0xff]  ;;  %v321_v25 = vld [vmem:[%s1088_s26 + $0x190] sm:$0xff] }
  0x1e   : > { %v323_v26 = vld [vmem:[%s1088_s26 + $0x1a0] sm:$0xff]  ;;  %320 = vst [vmem:[%s1093_s27 + $0xc0] sm:$0xff] %v319_v24  ;;  %322 = vst [vmem:[%s1093_s27 + $0xc8] sm:$0xff] %v321_v25  ;;  %v325_v27 = vld [vmem:[%s1088_s26 + $0x1b0] sm:$0xff] }
  0x1f   : > { %324 = vst [vmem:[%s1093_s27 + $0xd0] sm:$0xff] %v323_v26  ;;  %v327_v28 = vld [vmem:[%s1088_s26 + $0x1c0] sm:$0xff]  ;;  %v329_v29 = vld [vmem:[%s1088_s26 + $0x1d0] sm:$0xff]  ;;  %326 = vst [vmem:[%s1093_s27 + $0xd8] sm:$0xff] %v325_v27 }
  0x20   : > { %328 = vst [vmem:[%s1093_s27 + $0xe0] sm:$0xff] %v327_v28  ;;  %330 = vst [vmem:[%s1093_s27 + $0xe8] sm:$0xff] %v329_v29  ;;  %v331_v30 = vld [vmem:[%s1088_s26 + $0x1e0] sm:$0xff]  ;;  %v333_v31 = vld [vmem:[%s1088_s26 + $0x1f0] sm:$0xff] }
  0x21   : > { %332 = vst [vmem:[%s1093_s27 + $0xf0] sm:$0xff] %v331_v30  ;;  %334 = vst [vmem:[%s1093_s27 + $0xf8] sm:$0xff] %v333_v31 }
  0x22 PF: > { %p850_p6 = scmp.ge.s32.totalorder %s1020_s16, 1  ;;  %p347_p7 = scmp.lt.s32.totalorder %s1020_s16, 3 }
  0x24   : > { %p348_p8 = pnand %p850_p6, %p347_p7 }
  0x25   : > { %s354_s28 = sand.u32 (!%p348_p8), 1, %s1004_s12   ;;  %v1162_v32 = vld.sshfl [vmem:[%s1229_s0] sm:$0x11 pattern:$0x75316420] (!%p348_p8)  ;;  %v470_v33 = vlaneseq (!%p348_p8)  ;;  %v1023_v10 = vmov (!%p348_p8), 0.0  }
  0x26   : > { %351 = sbr.rel (%p348_p8) target bundleno = 335 (0x14f), region = 66  ;;  %s851_s4 = sshll.u32 (!%p348_p8), %s354_s28, 8  ;;  %v1022_v34 = vmov (!%p348_p8), 1966171168   ;;  %v466_v39 = vcombine.high (!%p348_p8), %v1162_v32, %v1162_v32  ;;  %423 = vst [vmem:[#allocation2] sm:$0xf] (!%p348_p8), %v1023_v10 }
  0x27   : > { %v468_v35 = vunpack.c.l.s4 (!%p348_p8), %v1022_v34  ;;  %v1164_v36 = vshrl.u32 (!%p348_p8), %v470_v33, 7  ;;  %s1166_s5 = scalar_lea.vmem (!%p348_p8), [#allocation3], %s851_s4  ;;  %s852_s6 = sshll.u32 (!%p348_p8), %s1012_s14, 1  ;;  %v1024_v11 = vmov (!%p348_p8), 1983009808  }
  0x28   : > { %v934_v37 = vld [vmem:[%s1166_s5 + $0x4] ss:$8 sps:$4 sm:$0xff] (!%p348_p8)   ;;  %v936_v38 = vld [vmem:[%s1166_s5] ss:$8 sps:$4 sm:$0xff] (!%p348_p8)   ;;  %v937_v41 = vld [vmem:[%s1166_s5 + $0x14] ss:$8 sps:$4 sm:$0xff] (!%p348_p8)   ;;  %v688_v12 = vunpack.c.l.s4 (!%p348_p8), %v1024_v11 }
  0x29   : > { %v469_v40 = vunpack.c.0.s8 (!%p348_p8), %v468_v35  ;;  %643 = vmatprep.subr.bf16.mxu0 (!%p348_p8), %v934_v37  ;;  %v939_v42 = vld [vmem:[%s1166_s5 + $0x10] ss:$8 sps:$4 sm:$0xff] (!%p348_p8)   ;;  %v940_v44 = vld [vmem:[%s1166_s5 + $0x24] ss:$8 sps:$4 sm:$0xff] (!%p348_p8)   ;;  %v942_v46 = vld [vmem:[%s1166_s5 + $0x20] ss:$8 sps:$4 sm:$0xff] (!%p348_p8)  }
  0x2a   : > { %644 = vmatpush1.bf16.msra.mxu0 (!%p348_p8), %v936_v38  ;;  %v943_v47 = vld [vmem:[%s1166_s5 + $0x34] ss:$8 sps:$4 sm:$0xff] (!%p348_p8)   ;;  %v945_v48 = vld [vmem:[%s1166_s5 + $0x30] ss:$8 sps:$4 sm:$0xff] (!%p348_p8)   ;;  %v946_v49 = vld [vmem:[%s1166_s5 + $0x44] ss:$8 sps:$4 sm:$0xff] (!%p348_p8)   ;;  %v689_v13 = vunpack.c.0.s8 (!%p348_p8), %v688_v12 }
  0x2b   : > { %v472_v43 = vsub.s32 (!%p348_p8), %v469_v40, %v1164_v36  ;;  %645 = vmatprep.subr.bf16.mxu0 (!%p348_p8), %v937_v41  ;;  %v948_v50 = vld [vmem:[%s1166_s5 + $0x40] ss:$8 sps:$4 sm:$0xff] (!%p348_p8)   ;;  %v949_v51 = vld [vmem:[%s1166_s5 + $0x54] ss:$8 sps:$4 sm:$0xff] (!%p348_p8)   ;;  %v951_v52 = vld [vmem:[%s1166_s5 + $0x50] ss:$8 sps:$4 sm:$0xff] (!%p348_p8)  }
  0x2c   : > { %v952_v53 = vld [vmem:[%s1166_s5 + $0x64] ss:$8 sps:$4 sm:$0xff] (!%p348_p8)   ;;  %v954_v54 = vld [vmem:[%s1166_s5 + $0x60] ss:$8 sps:$4 sm:$0xff] (!%p348_p8)   ;;  %v955_v55 = vld [vmem:[%s1166_s5 + $0x74] ss:$8 sps:$4 sm:$0xff] (!%p348_p8)   ;;  %v692_v15 = vsub.s32 (!%p348_p8), %v689_v13, %v1164_v36 }
  0x2d   : > { %v480_v45 = vrot.slane %v466_v39, %v472_v43  ;;  %v957_v56 = vld [vmem:[%s1166_s5 + $0x70] ss:$8 sps:$4 sm:$0xff]   ;;  %v958_v57 = vld [vmem:[%s1166_s5 + $0x84] ss:$8 sps:$4 sm:$0xff]   ;;  %v960_v58 = vld [vmem:[%s1166_s5 + $0x80] ss:$8 sps:$4 sm:$0xff]   ;;  %v473_v9 = vrot.slane %v1162_v32, %v472_v43 }
  0x2e   : > { %646 = vmatpush1.bf16.msra.mxu0 %v939_v42  ;;  %v961_v59 = vld [vmem:[%s1166_s5 + $0x94] ss:$8 sps:$4 sm:$0xff]   ;;  %v963_v60 = vld [vmem:[%s1166_s5 + $0x90] ss:$8 sps:$4 sm:$0xff]   ;;  %v964_v61 = vld [vmem:[%s1166_s5 + $0xa4] ss:$8 sps:$4 sm:$0xff]  }
  0x2f   : > { %675 = vmatprep.mubr.bf16.mxu0 %v480_v45  ;;  %647 = vmatprep.subr.bf16.mxu0 %v940_v44  ;;  %v966_v62 = vld [vmem:[%s1166_s5 + $0xa0] ss:$8 sps:$4 sm:$0xff]   ;;  %v967_v63 = vld [vmem:[%s1166_s5 + $0xb4] ss:$8 sps:$4 sm:$0xff]   ;;  %v969_v0 = vld [vmem:[%s1166_s5 + $0xb0] ss:$8 sps:$4 sm:$0xff]  }
  0x30   : > { %v970_v1 = vld [vmem:[%s1166_s5 + $0xc4] ss:$8 sps:$4 sm:$0xff]   ;;  %v972_v2 = vld [vmem:[%s1166_s5 + $0xc0] ss:$8 sps:$4 sm:$0xff]   ;;  %v973_v3 = vld [vmem:[%s1166_s5 + $0xd4] ss:$8 sps:$4 sm:$0xff]  }
  0x31   : > { %v975_v4 = vld [vmem:[%s1166_s5 + $0xd0] ss:$8 sps:$4 sm:$0xff]   ;;  %v976_v5 = vld [vmem:[%s1166_s5 + $0xe4] ss:$8 sps:$4 sm:$0xff]   ;;  %v978_v6 = vld [vmem:[%s1166_s5 + $0xe0] ss:$8 sps:$4 sm:$0xff]  }
  0x32   : > { %648 = vmatpush1.bf16.msra.mxu0 %v942_v46  ;;  %v979_v7 = vld [vmem:[%s1166_s5 + $0xf4] ss:$8 sps:$4 sm:$0xff]   ;;  %v981_v8 = vld [vmem:[%s1166_s5 + $0xf0] ss:$8 sps:$4 sm:$0xff]   ;;  %p405_p9 = scmp.lt.s32.totalorder %s852_s6, 3  ;;  %v705_v16 = vsub.s32 0, %v1164_v36 }
  0x33   : > { %649 = vmatprep.subr.bf16.mxu0 %v943_v47  ;;  %v709_v17 = vsub.s32 1, %v1164_v36  ;;  %v424_v22 = vld [vmem:[#allocation2] sm:$0xf] }
  0x34   : > { %s1240_s6 = smov (!%p405_p9, %s852_s6), 3 }
  0x35   : > { %s407_s9 = scalar_lea.vmem %s1231_s2, %s1240_s6  ;;  %s854_s10 = sshll.u32 %s1240_s6, 1 }
  0x36   : > { %650 = vmatpush1.bf16.msra.mxu0 %v945_v48  ;;  %v701_v19 = vld [vmem:[%s407_s9] sm:$0x3]  ;;  %s417_s14 = scalar_lea.vmem %s1232_s3, %s854_s10 }
  0x37   : > { %651 = vmatprep.subr.bf16.mxu0 %v946_v49  ;;  %v706_v25 = vrot.slane %v701_v19, %v705_v16  ;;  %v710_v26 = vrot.slane %v701_v19, %v709_v17 }
  0x39   : > { %v711_v28 = vcombine.low %v706_v25, %v710_v26 }
  0x3a   : > { %652 = vmatpush1.bf16.msra.mxu0 %v948_v50 }
  0x3b   : > { %653 = vmatprep.subr.bf16.mxu0 %v949_v51  ;;  %v718_v29 = vrot.slane %v711_v28, %v692_v15 }
  0x3e   : > { %654 = vmatpush1.bf16.msra.mxu0 %v951_v52 }
  0x3f   : > { %655 = vmatprep.subr.bf16.mxu0 %v952_v53 }
  0x42   : > { %656 = vmatpush1.bf16.msra.mxu0 %v954_v54 }
  0x43   : > { %657 = vmatprep.subr.bf16.mxu0 %v955_v55 }
  0x46   : > { %658 = vmatpush1.bf16.msra.mxu0 %v957_v56 }
  0x47   : > { %659 = vmatprep.subr.bf16.mxu0 %v958_v57 }
  0x4a   : > { %660 = vmatpush1.bf16.msra.mxu0 %v960_v58 }
  0x4b   : > { %661 = vmatprep.subr.bf16.mxu0 %v961_v59 }
  0x4e   : > { %662 = vmatpush1.bf16.msra.mxu0 %v963_v60 }
  0x4f   : > { %663 = vmatprep.subr.bf16.mxu0 %v964_v61 }
  0x52   : > { %664 = vmatpush1.bf16.msra.mxu0 %v966_v62 }
  0x53   : > { %665 = vmatprep.subr.bf16.mxu0 %v967_v63 }
  0x56   : > { %666 = vmatpush1.bf16.msra.mxu0 %v969_v0 }
  0x57   : > { %667 = vmatprep.subr.bf16.mxu0 %v970_v1 }
  0x5a   : > { %668 = vmatpush1.bf16.msra.mxu0 %v972_v2 }
  0x5b   : > { %669 = vmatprep.subr.bf16.mxu0 %v973_v3 }
  0x5e   : > { %670 = vmatpush1.bf16.msra.mxu0 %v975_v4 }
  0x5f   : > { %671 = vmatprep.subr.bf16.mxu0 %v976_v5 }
  0x62   : > { %672 = vmatpush1.bf16.msra.mxu0 %v978_v6 }
  0x63   : > { %673 = vmatprep.subr.bf16.mxu0 %v979_v7 }
  0x66   : > { %674 = vmatpush1.bf16.msra.mxu0 %v981_v8 }
  0x69   : > { %676 = vmatmul.mubr.bf16.vlgmr.msra.gmra.mrb[0].mxu0 %v473_v9 }
 0x13c   : > { %v677_v14 = vpop.f32.mrb[0].mxu0 }
 0x13d   : > { %v679_v18 = vpop.f32.mrb[1].mxu0 }
 0x13e   : > { %v686_v20 = vcombine.low %v677_v14, %v679_v18  ;;  %v681_v21 = vpop.f32.mrb[2].mxu0 }
 0x13f   : > { %v682_v23 = vpop.f32.mrb[3].mxu0 }
 0x140   : > { %v693_v24 = vrot.slane %v686_v20, %v692_v15 }
 0x142   : > { %v695_v27 = vadd.f32 %v693_v24, %v424_v22 }
 0x144   : > { %696 = vst [vmem:[#allocation2] sm:$0xf] %v695_v27 }
 0x14b   : > { %v700_v30 = vld [vmem:[#allocation2] sm:$0xf] }
 0x14c   : > { %v720_v31 = vadd.f32 %v718_v29, %v700_v30 }
 0x14e   : > { %721 = vst [vmem:[%s417_s14] sm:$0xf] %v720_v31 }
 0x14f PF: > { %s13_s16 = sadd.s32 1, %s1020_s16   ;;  %s1233_s12 = smov %s1008_s13 }
 0x150   : > { %p10_p10 = scmp.ge.s32.totalorder %s13_s16, 4   ;;  %s1234_s13 = smov %s1080_s20 }
 0x151   : > { %s1235_s14 = smov %s1016_s15  ;;  %s1236_s15 = smov %s1238_s17 }
 0x152   :  { %12 = sbr.rel (!%p10_p10) target bundleno = 3 (0x3), region = 119 }

// kernel: _lambda_.39
= control target key start
LH: loop header
LB: loop body
LE: loop exit
PB: predicated region body
PF: predicated region fallthrough
CT: control target
= control target key end

     0   :  { %s1620_s15 = smov 0   ;;  %s1622_s16 = smov 0   ;;  %s1947_s0 = inlined_call_operand.vmem [shape: bf16[2,4608], index: 0, kind: input, shape index: {}]   ;;  %s1948_s1 = inlined_call_operand.vmem [shape: bf16[4608,512], index: 1, kind: input, shape index: {}]   ;;  %s1949_s2 = inlined_call_operand.vmem [shape: f32[1,512], index: 2, kind: input, shape index: {}]   ;;  %s1950_s3 = inlined_call_operand.vmem [shape: f32[2,512], index: 3, kind: input, shape index: {}]   ;;  %s1951_s4 = inlined_call_operand.vmem [shape: f32[2,512], index: 4, kind: output, shape index: {}]  }
   0x1   :  { %s1624_s17 = smov 0   ;;  %s1626_s18 = smov 0  }
   0x2   :  { %s1628_s19 = smov 0   ;;  %s1630_s20 = smov 0  }
   0x3   :  { %s1632_s21 = smov 0  }
   0x4 LB: > { %s26_s22 = sadd.s32 1, %s1582_s19  ;;  %s29_s23 = sadd.s32 1, %s1586_s20  ;;  %s1590_s21 = sphi %s1632_s21, %s14_s21   ;;  %s1586_s20 = sphi %s1630_s20, %s1957_s20   ;;  %s1582_s19 = sphi %s1628_s19, %s1956_s19   ;;  %s1578_s18 = sphi %s1626_s18, %s1955_s18   ;;  %s1574_s17 = sphi %s1624_s17, %s1954_s17   ;;  %s1570_s16 = sphi %s1622_s16, %s1953_s16   ;;  %s1566_s15 = sphi %s1620_s15, %s1952_s15  }
   0x5   : > { %p27_p0 = scmp.ge.s32.totalorder %s26_s22, 9  ;;  %p77_p1 = scmp.ne.s32.totalorder %s1570_s16, %s1566_s15 }
   0x6   : > { %p78_p2 = scmp.eq.s32.totalorder %s1590_s21, 0  ;;  %s70_s27 = sadd.s32 1, %s1570_s16 }
   0x7   : > { %s1959_s22 = smov (%p27_p0, %s26_s22), 0  ;;  %s1961_s23 = smov (!%p27_p0, %s29_s23), %s1586_s20 }
   0x8   : > { %p79_p3 = por %p78_p2, %p77_p1  ;;  %p31_p4 = scmp.ge.s32.totalorder %s1961_s23, 2 }
   0x9   : > { %s65_s24 = ssub.s32 %s1582_s19, %s1959_s22  ;;  %p1295_p6 = scmp.ge.s32.totalorder %s1590_s21, 18 }
   0xa   : > { %s1963_s23 = smov (%p31_p4, %s1961_s23), 0 }
   0xb   : > { %s66_s25 = ssub.s32 %s1586_s20, %s1963_s23  ;;  %185 = sbr.rel (%p1295_p6) target bundleno = 57 (0x39), region = 16 }
   0xc   : > { %s67_s26 = sor.u32 %s66_s25, %s65_s24 }
   0xd   : > { %p68_p5 = scmp.eq.s32.totalorder %s67_s26, 0 }
   0xf   : > { %s1671_s28 = scalar_select %p68_p5, %s1570_s16, %s70_s27  }
  0x12   : > { %200 = sbr.rel (!%p79_p3) target bundleno = 57 (0x39), region = 24  ;;  %s202_s29 = sand.u32 (%p79_p3), 1, %s1570_s16  }
  0x13   : > { %s1298_s30 = sshll.u32 (%p79_p3), %s1586_s20, 1  ;;  %s1296_s5 = sshll.u32 (%p79_p3), %s202_s29, 9 }
  0x14   : > { %s1378_s6 = sshll.u32 (%p79_p3), %s1582_s19, 8  ;;  %s1685_s12 = scalar_lea.vmem (%p79_p3), [#allocation3], %s1296_s5 }
  0x15   : > { %s208_s7 = sadd.s32 (%p79_p3), %s1378_s6, %s1298_s30 }
  0x16   : > { %s1300_s8 = sshll.u32 (%p79_p3), %s208_s7, 2 }
  0x17   : > { %s1680_s11 = scalar_lea.vmem (%p79_p3), %s1948_s1, %s1300_s8 }
  0x18   : > { %v364_v0 = vld [vmem:[%s1680_s11] sm:$0xff] (%p79_p3)  ;;  %v366_v1 = vld [vmem:[%s1680_s11 + $0x10] sm:$0xff] (%p79_p3) }
  0x19   : > { %v368_v2 = vld [vmem:[%s1680_s11 + $0x20] sm:$0xff]  ;;  %365 = vst [vmem:[%s1685_s12] sm:$0xff] %v364_v0  ;;  %367 = vst [vmem:[%s1685_s12 + $0x8] sm:$0xff] %v366_v1  ;;  %v370_v3 = vld [vmem:[%s1680_s11 + $0x30] sm:$0xff] }
  0x1a   : > { %369 = vst [vmem:[%s1685_s12 + $0x10] sm:$0xff] %v368_v2  ;;  %v372_v4 = vld [vmem:[%s1680_s11 + $0x40] sm:$0xff]  ;;  %v374_v5 = vld [vmem:[%s1680_s11 + $0x50] sm:$0xff]  ;;  %371 = vst [vmem:[%s1685_s12 + $0x18] sm:$0xff] %v370_v3 }
  0x1b   : > { %373 = vst [vmem:[%s1685_s12 + $0x20] sm:$0xff] %v372_v4  ;;  %375 = vst [vmem:[%s1685_s12 + $0x28] sm:$0xff] %v374_v5  ;;  %v376_v6 = vld [vmem:[%s1680_s11 + $0x60] sm:$0xff]  ;;  %v378_v7 = vld [vmem:[%s1680_s11 + $0x70] sm:$0xff] }
  0x1c   : > { %v380_v8 = vld [vmem:[%s1680_s11 + $0x80] sm:$0xff]  ;;  %377 = vst [vmem:[%s1685_s12 + $0x30] sm:$0xff] %v376_v6  ;;  %379 = vst [vmem:[%s1685_s12 + $0x38] sm:$0xff] %v378_v7  ;;  %v382_v9 = vld [vmem:[%s1680_s11 + $0x90] sm:$0xff] }
  0x1d   : > { %381 = vst [vmem:[%s1685_s12 + $0x40] sm:$0xff] %v380_v8  ;;  %v384_v10 = vld [vmem:[%s1680_s11 + $0xa0] sm:$0xff]  ;;  %v386_v11 = vld [vmem:[%s1680_s11 + $0xb0] sm:$0xff]  ;;  %383 = vst [vmem:[%s1685_s12 + $0x48] sm:$0xff] %v382_v9 }
  0x1e   : > { %385 = vst [vmem:[%s1685_s12 + $0x50] sm:$0xff] %v384_v10  ;;  %387 = vst [vmem:[%s1685_s12 + $0x58] sm:$0xff] %v386_v11  ;;  %v388_v12 = vld [vmem:[%s1680_s11 + $0xc0] sm:$0xff]  ;;  %v390_v13 = vld [vmem:[%s1680_s11 + $0xd0] sm:$0xff] }
  0x1f   : > { %v392_v14 = vld [vmem:[%s1680_s11 + $0xe0] sm:$0xff]  ;;  %389 = vst [vmem:[%s1685_s12 + $0x60] sm:$0xff] %v388_v12  ;;  %391 = vst [vmem:[%s1685_s12 + $0x68] sm:$0xff] %v390_v13  ;;  %v394_v15 = vld [vmem:[%s1680_s11 + $0xf0] sm:$0xff] }
  0x20   : > { %393 = vst [vmem:[%s1685_s12 + $0x70] sm:$0xff] %v392_v14  ;;  %v396_v16 = vld [vmem:[%s1680_s11 + $0x100] sm:$0xff]  ;;  %v398_v17 = vld [vmem:[%s1680_s11 + $0x110] sm:$0xff]  ;;  %395 = vst [vmem:[%s1685_s12 + $0x78] sm:$0xff] %v394_v15 }
  0x21   : > { %397 = vst [vmem:[%s1685_s12 + $0x80] sm:$0xff] %v396_v16  ;;  %399 = vst [vmem:[%s1685_s12 + $0x88] sm:$0xff] %v398_v17  ;;  %v400_v18 = vld [vmem:[%s1680_s11 + $0x120] sm:$0xff]  ;;  %v402_v19 = vld [vmem:[%s1680_s11 + $0x130] sm:$0xff] }
  0x22   : > { %v404_v20 = vld [vmem:[%s1680_s11 + $0x140] sm:$0xff]  ;;  %401 = vst [vmem:[%s1685_s12 + $0x90] sm:$0xff] %v400_v18  ;;  %403 = vst [vmem:[%s1685_s12 + $0x98] sm:$0xff] %v402_v19  ;;  %v406_v21 = vld [vmem:[%s1680_s11 + $0x150] sm:$0xff] }
  0x23   : > { %405 = vst [vmem:[%s1685_s12 + $0xa0] sm:$0xff] %v404_v20  ;;  %v408_v22 = vld [vmem:[%s1680_s11 + $0x160] sm:$0xff]  ;;  %v410_v23 = vld [vmem:[%s1680_s11 + $0x170] sm:$0xff]  ;;  %407 = vst [vmem:[%s1685_s12 + $0xa8] sm:$0xff] %v406_v21 }
  0x24   : > { %409 = vst [vmem:[%s1685_s12 + $0xb0] sm:$0xff] %v408_v22  ;;  %411 = vst [vmem:[%s1685_s12 + $0xb8] sm:$0xff] %v410_v23  ;;  %v412_v24 = vld [vmem:[%s1680_s11 + $0x180] sm:$0xff]  ;;  %v414_v25 = vld [vmem:[%s1680_s11 + $0x190] sm:$0xff] }
  0x25   : > { %v416_v26 = vld [vmem:[%s1680_s11 + $0x1a0] sm:$0xff]  ;;  %413 = vst [vmem:[%s1685_s12 + $0xc0] sm:$0xff] %v412_v24  ;;  %415 = vst [vmem:[%s1685_s12 + $0xc8] sm:$0xff] %v414_v25  ;;  %v418_v27 = vld [vmem:[%s1680_s11 + $0x1b0] sm:$0xff] }
  0x26   : > { %417 = vst [vmem:[%s1685_s12 + $0xd0] sm:$0xff] %v416_v26  ;;  %v420_v28 = vld [vmem:[%s1680_s11 + $0x1c0] sm:$0xff]  ;;  %v422_v29 = vld [vmem:[%s1680_s11 + $0x1d0] sm:$0xff]  ;;  %419 = vst [vmem:[%s1685_s12 + $0xd8] sm:$0xff] %v418_v27 }
  0x27   : > { %421 = vst [vmem:[%s1685_s12 + $0xe0] sm:$0xff] %v420_v28  ;;  %423 = vst [vmem:[%s1685_s12 + $0xe8] sm:$0xff] %v422_v29  ;;  %v424_v30 = vld [vmem:[%s1680_s11 + $0x1e0] sm:$0xff]  ;;  %v426_v31 = vld [vmem:[%s1680_s11 + $0x1f0] sm:$0xff] }
  0x28   : > { %v428_v32 = vld [vmem:[%s1680_s11 + $0x200] sm:$0xff]  ;;  %425 = vst [vmem:[%s1685_s12 + $0xf0] sm:$0xff] %v424_v30  ;;  %427 = vst [vmem:[%s1685_s12 + $0xf8] sm:$0xff] %v426_v31  ;;  %v430_v33 = vld [vmem:[%s1680_s11 + $0x210] sm:$0xff] }
  0x29   : > { %429 = vst [vmem:[%s1685_s12 + $0x100] sm:$0xff] %v428_v32  ;;  %v432_v34 = vld [vmem:[%s1680_s11 + $0x220] sm:$0xff]  ;;  %v434_v35 = vld [vmem:[%s1680_s11 + $0x230] sm:$0xff]  ;;  %431 = vst [vmem:[%s1685_s12 + $0x108] sm:$0xff] %v430_v33 }
  0x2a   : > { %433 = vst [vmem:[%s1685_s12 + $0x110] sm:$0xff] %v432_v34  ;;  %435 = vst [vmem:[%s1685_s12 + $0x118] sm:$0xff] %v434_v35  ;;  %v436_v36 = vld [vmem:[%s1680_s11 + $0x240] sm:$0xff]  ;;  %v438_v37 = vld [vmem:[%s1680_s11 + $0x250] sm:$0xff] }
  0x2b   : > { %v440_v38 = vld [vmem:[%s1680_s11 + $0x260] sm:$0xff]  ;;  %437 = vst [vmem:[%s1685_s12 + $0x120] sm:$0xff] %v436_v36  ;;  %439 = vst [vmem:[%s1685_s12 + $0x128] sm:$0xff] %v438_v37  ;;  %v442_v39 = vld [vmem:[%s1680_s11 + $0x270] sm:$0xff] }
  0x2c   : > { %441 = vst [vmem:[%s1685_s12 + $0x130] sm:$0xff] %v440_v38  ;;  %v444_v40 = vld [vmem:[%s1680_s11 + $0x280] sm:$0xff]  ;;  %v446_v41 = vld [vmem:[%s1680_s11 + $0x290] sm:$0xff]  ;;  %443 = vst [vmem:[%s1685_s12 + $0x138] sm:$0xff] %v442_v39 }
  0x2d   : > { %445 = vst [vmem:[%s1685_s12 + $0x140] sm:$0xff] %v444_v40  ;;  %447 = vst [vmem:[%s1685_s12 + $0x148] sm:$0xff] %v446_v41  ;;  %v448_v42 = vld [vmem:[%s1680_s11 + $0x2a0] sm:$0xff]  ;;  %v450_v43 = vld [vmem:[%s1680_s11 + $0x2b0] sm:$0xff] }
  0x2e   : > { %v452_v44 = vld [vmem:[%s1680_s11 + $0x2c0] sm:$0xff]  ;;  %449 = vst [vmem:[%s1685_s12 + $0x150] sm:$0xff] %v448_v42  ;;  %451 = vst [vmem:[%s1685_s12 + $0x158] sm:$0xff] %v450_v43  ;;  %v454_v45 = vld [vmem:[%s1680_s11 + $0x2d0] sm:$0xff] }
  0x2f   : > { %453 = vst [vmem:[%s1685_s12 + $0x160] sm:$0xff] %v452_v44  ;;  %v456_v46 = vld [vmem:[%s1680_s11 + $0x2e0] sm:$0xff]  ;;  %v458_v47 = vld [vmem:[%s1680_s11 + $0x2f0] sm:$0xff]  ;;  %455 = vst [vmem:[%s1685_s12 + $0x168] sm:$0xff] %v454_v45 }
  0x30   : > { %457 = vst [vmem:[%s1685_s12 + $0x170] sm:$0xff] %v456_v46  ;;  %459 = vst [vmem:[%s1685_s12 + $0x178] sm:$0xff] %v458_v47  ;;  %v460_v48 = vld [vmem:[%s1680_s11 + $0x300] sm:$0xff]  ;;  %v462_v49 = vld [vmem:[%s1680_s11 + $0x310] sm:$0xff] }
  0x31   : > { %v464_v50 = vld [vmem:[%s1680_s11 + $0x320] sm:$0xff]  ;;  %461 = vst [vmem:[%s1685_s12 + $0x180] sm:$0xff] %v460_v48  ;;  %463 = vst [vmem:[%s1685_s12 + $0x188] sm:$0xff] %v462_v49  ;;  %v466_v51 = vld [vmem:[%s1680_s11 + $0x330] sm:$0xff] }
  0x32   : > { %465 = vst [vmem:[%s1685_s12 + $0x190] sm:$0xff] %v464_v50  ;;  %v468_v52 = vld [vmem:[%s1680_s11 + $0x340] sm:$0xff]  ;;  %v470_v53 = vld [vmem:[%s1680_s11 + $0x350] sm:$0xff]  ;;  %467 = vst [vmem:[%s1685_s12 + $0x198] sm:$0xff] %v466_v51 }
  0x33   : > { %469 = vst [vmem:[%s1685_s12 + $0x1a0] sm:$0xff] %v468_v52  ;;  %471 = vst [vmem:[%s1685_s12 + $0x1a8] sm:$0xff] %v470_v53  ;;  %v472_v54 = vld [vmem:[%s1680_s11 + $0x360] sm:$0xff]  ;;  %v474_v55 = vld [vmem:[%s1680_s11 + $0x370] sm:$0xff] }
  0x34   : > { %v476_v56 = vld [vmem:[%s1680_s11 + $0x380] sm:$0xff]  ;;  %473 = vst [vmem:[%s1685_s12 + $0x1b0] sm:$0xff] %v472_v54  ;;  %475 = vst [vmem:[%s1685_s12 + $0x1b8] sm:$0xff] %v474_v55  ;;  %v478_v57 = vld [vmem:[%s1680_s11 + $0x390] sm:$0xff] }
  0x35   : > { %477 = vst [vmem:[%s1685_s12 + $0x1c0] sm:$0xff] %v476_v56  ;;  %v480_v58 = vld [vmem:[%s1680_s11 + $0x3a0] sm:$0xff]  ;;  %v482_v59 = vld [vmem:[%s1680_s11 + $0x3b0] sm:$0xff]  ;;  %479 = vst [vmem:[%s1685_s12 + $0x1c8] sm:$0xff] %v478_v57 }
  0x36   : > { %481 = vst [vmem:[%s1685_s12 + $0x1d0] sm:$0xff] %v480_v58  ;;  %483 = vst [vmem:[%s1685_s12 + $0x1d8] sm:$0xff] %v482_v59  ;;  %v484_v60 = vld [vmem:[%s1680_s11 + $0x3c0] sm:$0xff]  ;;  %v486_v61 = vld [vmem:[%s1680_s11 + $0x3d0] sm:$0xff] }
  0x37   : > { %v488_v62 = vld [vmem:[%s1680_s11 + $0x3e0] sm:$0xff]  ;;  %485 = vst [vmem:[%s1685_s12 + $0x1e0] sm:$0xff] %v484_v60  ;;  %487 = vst [vmem:[%s1685_s12 + $0x1e8] sm:$0xff] %v486_v61  ;;  %v490_v63 = vld [vmem:[%s1680_s11 + $0x3f0] sm:$0xff] }
  0x38   : > { %489 = vst [vmem:[%s1685_s12 + $0x1f0] sm:$0xff] %v488_v62  ;;  %491 = vst [vmem:[%s1685_s12 + $0x1f8] sm:$0xff] %v490_v63 }
  0x39 PF: > { %p1301_p7 = scmp.ge.s32.totalorder %s1590_s21, 1  ;;  %p517_p8 = scmp.lt.s32.totalorder %s1590_s21, 19 }
  0x3b   : > { %p518_p9 = pnand %p1301_p7, %p517_p8 }
  0x3c   : > { %s524_s13 = sand.u32 (!%p518_p9), 1, %s1566_s15   ;;  %s1303_s14 = sshll.u32 (!%p518_p9), %s1574_s17, 2 }
  0x3d   : > { %521 = sbr.rel (%p518_p9) target bundleno = 379 (0x17b), region = 70  ;;  %s1302_s24 = sshll.u32 (!%p518_p9), %s524_s13, 9 }
  0x3e   : > { %p577_p10 = scmp.lt.s32.totalorder (!%p518_p9), %s1303_s14, 35  ;;  %s1304_s25 = sshll.u32 (!%p518_p9), %s1578_s18, 1 }
  0x3f   : > { %p586_p11 = scmp.lt.s32.totalorder (!%p518_p9), %s1304_s25, 3  ;;  %s1840_s12 = scalar_lea.vmem (!%p518_p9), [#allocation3], %s1302_s24 }
  0x40   : > { %p1309_p12 = scmp.ne.s32.totalorder (!%p518_p9), %s1574_s17, 0 }
  0x44   : > { %s1965_s14 = smov (!%p577_p10, %s1303_s14), 35  ;;  %s1967_s25 = smov (!%p586_p11, %s1304_s25), 3 }
  0x45   : > { %s581_s29 = scalar_lea.vmem %s1947_s0, %s1965_s14  ;;  %s588_s15 = scalar_lea.vmem %s1949_s2, %s1967_s25  ;;  %v1592_v0 = vmov (!%p1309_p12), 0.0  }
  0x46   : > { %s1306_s6 = sshll.u32 %s1967_s25, 1  ;;  %613 = sbr.rel (%p1309_p12) target bundleno = 77 (0x4d), region = 78  ;;  %614 = vst [vmem:[#allocation2] sm:$0xf] (!%p1309_p12), %v1592_v0 }
  0x47   : > { %s1833_s18 = scalar_lea.vmem %s1950_s3, %s1306_s6  ;;  %s1838_s11 = scalar_lea.vmem %s1951_s4, %s1306_s6 }
  0x4d PF: > { %v1440_v1 = vld [vmem:[%s1840_s12 + $0x4] ss:$8 sps:$4 sm:$0xff]   ;;  %v1444_v3 = vld [vmem:[%s1840_s12] ss:$8 sps:$4 sm:$0xff]   ;;  %v1446_v5 = vld [vmem:[%s1840_s12 + $0x14] ss:$8 sps:$4 sm:$0xff]   ;;  %v693_v41 = vlaneseq }
  0x4e   : > { %v1442_v2 = vld [vmem:[%s1840_s12 + $0x104] ss:$8 sps:$4 sm:$0xff]   ;;  %1030 = vmatprep.subr.bf16.mxu1 %v1440_v1  ;;  %v1445_v4 = vld [vmem:[%s1840_s12 + $0x100] ss:$8 sps:$4 sm:$0xff]   ;;  %v1448_v6 = vld [vmem:[%s1840_s12 + $0x114] ss:$8 sps:$4 sm:$0xff]  }
  0x4f   : > { %1071 = vmatprep.subr.bf16.mxu0 %v1442_v2  ;;  %1031 = vmatpush1.bf16.msra.mxu1 %v1444_v3  ;;  %v1450_v7 = vld [vmem:[%s1840_s12 + $0x10] ss:$8 sps:$4 sm:$0xff]   ;;  %v1452_v9 = vld [vmem:[%s1840_s12 + $0x24] ss:$8 sps:$4 sm:$0xff]   ;;  %v1456_v11 = vld [vmem:[%s1840_s12 + $0x20] ss:$8 sps:$4 sm:$0xff]  }
  0x50   : > { %1072 = vmatpush1.bf16.msra.mxu0 %v1445_v4  ;;  %1032 = vmatprep.subr.bf16.mxu1 %v1446_v5  ;;  %v1451_v8 = vld [vmem:[%s1840_s12 + $0x110] ss:$8 sps:$4 sm:$0xff]   ;;  %v1454_v10 = vld [vmem:[%s1840_s12 + $0x124] ss:$8 sps:$4 sm:$0xff]   ;;  %v1457_v12 = vld [vmem:[%s1840_s12 + $0x120] ss:$8 sps:$4 sm:$0xff]  }
  0x51   : > { %1073 = vmatprep.subr.bf16.mxu0 %v1448_v6  ;;  %v1458_v13 = vld [vmem:[%s1840_s12 + $0x34] ss:$8 sps:$4 sm:$0xff]   ;;  %v1462_v15 = vld [vmem:[%s1840_s12 + $0x30] ss:$8 sps:$4 sm:$0xff]   ;;  %v1464_v17 = vld [vmem:[%s1840_s12 + $0x44] ss:$8 sps:$4 sm:$0xff]  }
  0x52   : > { %v1460_v14 = vld [vmem:[%s1840_s12 + $0x134] ss:$8 sps:$4 sm:$0xff]   ;;  %v1463_v16 = vld [vmem:[%s1840_s12 + $0x130] ss:$8 sps:$4 sm:$0xff]   ;;  %v1466_v18 = vld [vmem:[%s1840_s12 + $0x144] ss:$8 sps:$4 sm:$0xff]  }
  0x53   : > { %1033 = vmatpush1.bf16.msra.mxu1 %v1450_v7  ;;  %v1468_v19 = vld [vmem:[%s1840_s12 + $0x40] ss:$8 sps:$4 sm:$0xff]   ;;  %v1470_v21 = vld [vmem:[%s1840_s12 + $0x54] ss:$8 sps:$4 sm:$0xff]   ;;  %v1474_v23 = vld [vmem:[%s1840_s12 + $0x50] ss:$8 sps:$4 sm:$0xff]  }
  0x54   : > { %1074 = vmatpush1.bf16.msra.mxu0 %v1451_v8  ;;  %1034 = vmatprep.subr.bf16.mxu1 %v1452_v9  ;;  %v1469_v20 = vld [vmem:[%s1840_s12 + $0x140] ss:$8 sps:$4 sm:$0xff]   ;;  %v1472_v22 = vld [vmem:[%s1840_s12 + $0x154] ss:$8 sps:$4 sm:$0xff]   ;;  %v1475_v24 = vld [vmem:[%s1840_s12 + $0x150] ss:$8 sps:$4 sm:$0xff]  }
  0x55   : > { %1075 = vmatprep.subr.bf16.mxu0 %v1454_v10  ;;  %v1476_v25 = vld [vmem:[%s1840_s12 + $0x64] ss:$8 sps:$4 sm:$0xff]   ;;  %v1480_v27 = vld [vmem:[%s1840_s12 + $0x60] ss:$8 sps:$4 sm:$0xff]   ;;  %v1482_v29 = vld [vmem:[%s1840_s12 + $0x74] ss:$8 sps:$4 sm:$0xff]  }
  0x56   : > { %v1478_v26 = vld [vmem:[%s1840_s12 + $0x164] ss:$8 sps:$4 sm:$0xff]   ;;  %v1481_v28 = vld [vmem:[%s1840_s12 + $0x160] ss:$8 sps:$4 sm:$0xff]   ;;  %v1484_v30 = vld [vmem:[%s1840_s12 + $0x174] ss:$8 sps:$4 sm:$0xff]  }
  0x57   : > { %1035 = vmatpush1.bf16.msra.mxu1 %v1456_v11  ;;  %v1486_v31 = vld [vmem:[%s1840_s12 + $0x70] ss:$8 sps:$4 sm:$0xff]   ;;  %v1488_v33 = vld [vmem:[%s1840_s12 + $0x84] ss:$8 sps:$4 sm:$0xff]   ;;  %v1492_v35 = vld [vmem:[%s1840_s12 + $0x80] ss:$8 sps:$4 sm:$0xff]  }
  0x58   : > { %1076 = vmatpush1.bf16.msra.mxu0 %v1457_v12  ;;  %1036 = vmatprep.subr.bf16.mxu1 %v1458_v13  ;;  %v1487_v32 = vld [vmem:[%s1840_s12 + $0x170] ss:$8 sps:$4 sm:$0xff]   ;;  %v1490_v34 = vld [vmem:[%s1840_s12 + $0x184] ss:$8 sps:$4 sm:$0xff]   ;;  %v1493_v36 = vld [vmem:[%s1840_s12 + $0x180] ss:$8 sps:$4 sm:$0xff]  }
  0x59   : > { %1077 = vmatprep.subr.bf16.mxu0 %v1460_v14  ;;  %v1494_v37 = vld [vmem:[%s1840_s12 + $0x94] ss:$8 sps:$4 sm:$0xff]   ;;  %v1593_v39 = vmov 1966171168   ;;  %v1498_v42 = vld [vmem:[%s1840_s12 + $0x90] ss:$8 sps:$4 sm:$0xff]  }
  0x5a   : > { %v1496_v38 = vld [vmem:[%s1840_s12 + $0x194] ss:$8 sps:$4 sm:$0xff]   ;;  %v691_v40 = vunpack.c.l.s4 %v1593_v39  ;;  %v1499_v43 = vld [vmem:[%s1840_s12 + $0x190] ss:$8 sps:$4 sm:$0xff]   ;;  %v1500_v44 = vld [vmem:[%s1840_s12 + $0xa4] ss:$8 sps:$4 sm:$0xff]  }
  0x5b   : > { %1037 = vmatpush1.bf16.msra.mxu1 %v1462_v15  ;;  %v1502_v45 = vld [vmem:[%s1840_s12 + $0x1a4] ss:$8 sps:$4 sm:$0xff]   ;;  %v1885_v47 = vshrl.u32 %v693_v41, 7  ;;  %v1504_v48 = vld [vmem:[%s1840_s12 + $0xa0] ss:$8 sps:$4 sm:$0xff]   ;;  %p1375_p13 = scmp.ne.s32.totalorder %s1574_s17, 8 }
  0x5c   : > { %1078 = vmatpush1.bf16.msra.mxu0 %v1463_v16  ;;  %1038 = vmatprep.subr.bf16.mxu1 %v1464_v17  ;;  %v692_v46 = vunpack.c.0.s8 %v691_v40  ;;  %v1505_v49 = vld [vmem:[%s1840_s12 + $0x1a0] ss:$8 sps:$4 sm:$0xff]   ;;  %v1506_v50 = vld [vmem:[%s1840_s12 + $0xb4] ss:$8 sps:$4 sm:$0xff]   ;;  %v1510_v54 = vld [vmem:[%s1840_s12 + $0xb0] ss:$8 sps:$4 sm:$0xff]  }
  0x5d   : > { %1079 = vmatprep.subr.bf16.mxu0 %v1466_v18  ;;  %v1508_v51 = vld [vmem:[%s1840_s12 + $0x1b4] ss:$8 sps:$4 sm:$0xff]   ;;  %v1511_v55 = vld [vmem:[%s1840_s12 + $0x1b0] ss:$8 sps:$4 sm:$0xff]   ;;  %v1512_v57 = vld [vmem:[%s1840_s12 + $0xc4] ss:$8 sps:$4 sm:$0xff]  }
  0x5e   : > { %v695_v52 = vsub.s32 %v692_v46, %v1885_v47  ;;  %v1310_v53 = vld.sshfl [vmem:[%s581_s29] sm:$0x33 pattern:$0x75316420]  ;;  %v1514_v58 = vld [vmem:[%s1840_s12 + $0x1c4] ss:$8 sps:$4 sm:$0xff]  }
  0x5f   : > { %1039 = vmatpush1.bf16.msra.mxu1 %v1468_v19  ;;  %v689_v56 = vcombine.high %v1310_v53, %v1310_v53  ;;  %v1516_v60 = vld [vmem:[%s1840_s12 + $0xc0] ss:$8 sps:$4 sm:$0xff]   ;;  %v1518_v63 = vld [vmem:[%s1840_s12 + $0xd4] ss:$8 sps:$4 sm:$0xff]   ;;  %v1522_v1 = vld [vmem:[%s1840_s12 + $0xd0] ss:$8 sps:$4 sm:$0xff]  }
  0x60   : > { %1080 = vmatpush1.bf16.msra.mxu0 %v1469_v20  ;;  %1040 = vmatprep.subr.bf16.mxu1 %v1470_v21  ;;  %v1517_v61 = vld [vmem:[%s1840_s12 + $0x1c0] ss:$8 sps:$4 sm:$0xff]   ;;  %v1520_v0 = vld [vmem:[%s1840_s12 + $0x1d4] ss:$8 sps:$4 sm:$0xff]   ;;  %v1523_v2 = vld [vmem:[%s1840_s12 + $0x1d0] ss:$8 sps:$4 sm:$0xff]   ;;  %v696_v9 = vrot.slane %v1310_v53, %v695_v52 }
  0x61   : > { %1081 = vmatprep.subr.bf16.mxu0 %v1472_v22  ;;  %v703_v59 = vrot.slane %v689_v56, %v695_v52  ;;  %v1524_v3 = vld [vmem:[%s1840_s12 + $0xe4] ss:$8 sps:$4 sm:$0xff]   ;;  %v1528_v5 = vld [vmem:[%s1840_s12 + $0xe0] ss:$8 sps:$4 sm:$0xff]   ;;  %v1530_v7 = vld [vmem:[%s1840_s12 + $0xf4] ss:$8 sps:$4 sm:$0xff]  }
  0x62   : > { %v1526_v4 = vld [vmem:[%s1840_s12 + $0x1e4] ss:$8 sps:$4 sm:$0xff]   ;;  %v1529_v6 = vld [vmem:[%s1840_s12 + $0x1e0] ss:$8 sps:$4 sm:$0xff]   ;;  %v1532_v8 = vld [vmem:[%s1840_s12 + $0x1f4] ss:$8 sps:$4 sm:$0xff]   ;;  %v704_v12 = vcombine.high %v696_v9, %v696_v9 }
  0x63   : > { %1041 = vmatpush1.bf16.msra.mxu1 %v1474_v23  ;;  %v705_v62 = vcombine.high %v703_v59, %v703_v59  ;;  %1062 = vmatprep.mubr.bf16.mxu1 %v703_v59  ;;  %v1534_v10 = vld [vmem:[%s1840_s12 + $0xf0] ss:$8 sps:$4 sm:$0xff]   ;;  %v1594_v13 = vmov 1983009808   ;;  %v1150_v39 = vld [vmem:[%s1833_s18] sm:$0xf] (!%p1375_p13) }
  0x64   : > { %1082 = vmatpush1.bf16.msra.mxu0 %v1475_v24  ;;  %1042 = vmatprep.subr.bf16.mxu1 %v1476_v25  ;;  %v1535_v11 = vld [vmem:[%s1840_s12 + $0x1f0] ss:$8 sps:$4 sm:$0xff]   ;;  %v1116_v14 = vunpack.c.l.s4 %v1594_v13 }
  0x65   : > { %1083 = vmatprep.subr.bf16.mxu0 %v1478_v26  ;;  %1103 = vmatprep.mubr.bf16.mxu0 %v705_v62 }
  0x66   : > { %v1117_v15 = vunpack.c.0.s8 %v1116_v14 }
  0x67   : > { %1043 = vmatpush1.bf16.msra.mxu1 %v1480_v27 }
  0x68   : > { %1084 = vmatpush1.bf16.msra.mxu0 %v1481_v28  ;;  %1044 = vmatprep.subr.bf16.mxu1 %v1482_v29  ;;  %v1120_v22 = vsub.s32 %v1117_v15, %v1885_v47  ;;  %v615_v28 = vld [vmem:[#allocation2] sm:$0xf] }
  0x69   : > { %1085 = vmatprep.subr.bf16.mxu0 %v1484_v30 }
  0x6b   : > { %1045 = vmatpush1.bf16.msra.mxu1 %v1486_v31  ;;  %v1130_v31 = vld [vmem:[%s588_s15] sm:$0x3] (!%p1375_p13) }
  0x6c   : > { %1086 = vmatpush1.bf16.msra.mxu0 %v1487_v32  ;;  %1046 = vmatprep.subr.bf16.mxu1 %v1488_v33  ;;  %v1134_v32 = vsub.s32 (!%p1375_p13), 0, %v1885_v47  ;;  %v1138_v33 = vsub.s32 (!%p1375_p13), 1, %v1885_v47 }
  0x6d   : > { %1087 = vmatprep.subr.bf16.mxu0 %v1490_v34 }
  0x6e   : > { %v1135_v34 = vrot.slane (!%p1375_p13), %v1130_v31, %v1134_v32 }
  0x6f   : > { %1047 = vmatpush1.bf16.msra.mxu1 %v1492_v35  ;;  %v1139_v35 = vrot.slane (!%p1375_p13), %v1130_v31, %v1138_v33 }
  0x70   : > { %1088 = vmatpush1.bf16.msra.mxu0 %v1493_v36  ;;  %1048 = vmatprep.subr.bf16.mxu1 %v1494_v37 }
  0x71   : > { %1089 = vmatprep.subr.bf16.mxu0 %v1496_v38  ;;  %v1140_v36 = vcombine.low (!%p1375_p13), %v1135_v34, %v1139_v35 }
  0x73   : > { %1049 = vmatpush1.bf16.msra.mxu1 %v1498_v42  ;;  %v1147_v38 = vrot.slane (!%p1375_p13), %v1140_v36, %v1120_v22 }
  0x74   : > { %1090 = vmatpush1.bf16.msra.mxu0 %v1499_v43  ;;  %1050 = vmatprep.subr.bf16.mxu1 %v1500_v44 }
  0x75   : > { %1091 = vmatprep.subr.bf16.mxu0 %v1502_v45 }
  0x77   : > { %1051 = vmatpush1.bf16.msra.mxu1 %v1504_v48 }
  0x78   : > { %1092 = vmatpush1.bf16.msra.mxu0 %v1505_v49  ;;  %1052 = vmatprep.subr.bf16.mxu1 %v1506_v50 }
  0x79   : > { %1093 = vmatprep.subr.bf16.mxu0 %v1508_v51 }
  0x7b   : > { %1053 = vmatpush1.bf16.msra.mxu1 %v1510_v54 }
  0x7c   : > { %1094 = vmatpush1.bf16.msra.mxu0 %v1511_v55  ;;  %1054 = vmatprep.subr.bf16.mxu1 %v1512_v57 }
  0x7d   : > { %1095 = vmatprep.subr.bf16.mxu0 %v1514_v58 }
  0x7f   : > { %1055 = vmatpush1.bf16.msra.mxu1 %v1516_v60 }
  0x80   : > { %1096 = vmatpush1.bf16.msra.mxu0 %v1517_v61  ;;  %1056 = vmatprep.subr.bf16.mxu1 %v1518_v63 }
  0x81   : > { %1097 = vmatprep.subr.bf16.mxu0 %v1520_v0 }
  0x83   : > { %1057 = vmatpush1.bf16.msra.mxu1 %v1522_v1 }
  0x84   : > { %1098 = vmatpush1.bf16.msra.mxu0 %v1523_v2  ;;  %1058 = vmatprep.subr.bf16.mxu1 %v1524_v3 }
  0x85   : > { %1099 = vmatprep.subr.bf16.mxu0 %v1526_v4 }
  0x87   : > { %1059 = vmatpush1.bf16.msra.mxu1 %v1528_v5 }
  0x88   : > { %1100 = vmatpush1.bf16.msra.mxu0 %v1529_v6  ;;  %1060 = vmatprep.subr.bf16.mxu1 %v1530_v7 }
  0x89   : > { %1101 = vmatprep.subr.bf16.mxu0 %v1532_v8 }
  0x8b   : > { %1061 = vmatpush1.bf16.msra.mxu1 %v1534_v10 }
  0x8c   : > { %1102 = vmatpush1.bf16.msra.mxu0 %v1535_v11 }
  0x8e   : > { %1063 = vmatmul.mubr.bf16.vlgmr.msra.gmra.mrb[0].mxu1 %v696_v9 }
  0x8f   : > { %1104 = vmatmul.mubr.bf16.vlgmr.msra.gmra.mrb[0].mxu0 %v704_v12 }
 0x161   : > { %v1064_v16 = vpop.f32.mrb[0].mxu1 }
 0x162   : > { %v1105_v17 = vpop.f32.mrb[0].mxu0  ;;  %v1066_v19 = vpop.f32.mrb[1].mxu1 }
 0x163   : > { %v1106_v18 = vadd.f32 %v1105_v17, %v1064_v16  ;;  %v1107_v20 = vpop.f32.mrb[1].mxu0  ;;  %v1068_v23 = vpop.f32.mrb[2].mxu1 }
 0x164   : > { %v1108_v21 = vadd.f32 %v1107_v20, %v1066_v19  ;;  %v1109_v24 = vpop.f32.mrb[2].mxu0  ;;  %v1069_v25 = vpop.f32.mrb[3].mxu1 }
 0x165   : > { %v1110_v26 = vpop.f32.mrb[3].mxu0 }
 0x166   : > { %v1114_v27 = vcombine.low %v1106_v18, %v1108_v21  ;;  %1128 = sbr.rel (%p1375_p13) target bundleno = 379 (0x17b), region = 82 }
 0x168   : > { %v1121_v29 = vrot.slane %v1114_v27, %v1120_v22 }
 0x16a   : > { %v1123_v30 = vadd.f32 %v1121_v29, %v615_v28 }
 0x16c   : > { %1124 = vst [vmem:[#allocation2] sm:$0xf] %v1123_v30 }
 0x173   : > { %v1129_v37 = vld [vmem:[#allocation2] sm:$0xf] }
 0x174   : > { %v1149_v40 = vadd.f32 %v1147_v38, %v1129_v37 }
 0x176   : > { %v1151_v41 = vadd.f32 %v1150_v39, %v1149_v40 }
 0x178   : > { %v1152_v42 = vmax.f32 %v1151_v41, 0.0 }
 0x17a   : > { %1153 = vst [vmem:[%s1838_s11] sm:$0xf] %v1152_v42 }
 0x17b PF: > { %s14_s21 = sadd.s32 1, %s1590_s21   ;;  %s1952_s15 = smov %s1570_s16 }
 0x17c   : > { %p11_p0 = scmp.ge.s32.totalorder %s14_s21, 20   ;;  %s1953_s16 = smov %s1671_s28 }
 0x17d   : > { %s1954_s17 = smov %s1582_s19  ;;  %s1955_s18 = smov %s1586_s20 }
 0x17e   : > { %s1956_s19 = smov %s1959_s22  ;;  %s1957_s20 = smov %s1963_s23 }
 0x17f   :  { %13 = sbr.rel (!%p11_p0) target bundleno = 4 (0x4), region = 126 }

// kernel: _lambda_.40
= control target key start
LH: loop header
LB: loop body
LE: loop exit
PB: predicated region body
PF: predicated region fallthrough
CT: control target
= control target key end

     0   :  { %s1530_s12 = smov 0   ;;  %s1532_s13 = smov 0   ;;  %s1851_s0 = inlined_call_operand.vmem [shape: bf16[2,4608], index: 0, kind: input, shape index: {}]   ;;  %s1852_s1 = inlined_call_operand.vmem [shape: bf16[4608,512], index: 1, kind: input, shape index: {}]   ;;  %s1853_s2 = inlined_call_operand.vmem [shape: f32[1,512], index: 2, kind: input, shape index: {}]   ;;  %s1854_s3 = inlined_call_operand.vmem [shape: f32[2,512], index: 3, kind: output, shape index: {}]  }
   0x1   :  { %s1534_s14 = smov 0   ;;  %s1536_s15 = smov 0  }
   0x2   :  { %s1538_s16 = smov 0   ;;  %s1540_s17 = smov 0  }
   0x3   :  { %s1542_s18 = smov 0  }
   0x4 LB: > { %s25_s19 = sadd.s32 1, %s1497_s16  ;;  %s28_s20 = sadd.s32 1, %s1501_s17  ;;  %s1505_s18 = sphi %s1542_s18, %s13_s18   ;;  %s1501_s17 = sphi %s1540_s17, %s1860_s17   ;;  %s1497_s16 = sphi %s1538_s16, %s1859_s16   ;;  %s1493_s15 = sphi %s1536_s15, %s1858_s15   ;;  %s1489_s14 = sphi %s1534_s14, %s1857_s14   ;;  %s1485_s13 = sphi %s1532_s13, %s1856_s13   ;;  %s1481_s12 = sphi %s1530_s12, %s1855_s12  }
   0x5   : > { %p26_p0 = scmp.ge.s32.totalorder %s25_s19, 9  ;;  %p76_p1 = scmp.ne.s32.totalorder %s1485_s13, %s1481_s12 }
   0x6   : > { %p77_p2 = scmp.eq.s32.totalorder %s1505_s18, 0  ;;  %s69_s24 = sadd.s32 1, %s1485_s13 }
   0x7   : > { %s1862_s19 = smov (%p26_p0, %s25_s19), 0  ;;  %s1864_s20 = smov (!%p26_p0, %s28_s20), %s1501_s17 }
   0x8   : > { %p78_p3 = por %p77_p2, %p76_p1  ;;  %p30_p4 = scmp.ge.s32.totalorder %s1864_s20, 2 }
   0x9   : > { %s64_s21 = ssub.s32 %s1497_s16, %s1862_s19  ;;  %p1212_p6 = scmp.ge.s32.totalorder %s1505_s18, 18 }
   0xa   : > { %s1866_s20 = smov (%p30_p4, %s1864_s20), 0 }
   0xb   : > { %s65_s22 = ssub.s32 %s1501_s17, %s1866_s20  ;;  %156 = sbr.rel (%p1212_p6) target bundleno = 57 (0x39), region = 16 }
   0xc   : > { %s66_s23 = sor.u32 %s65_s22, %s64_s21 }
   0xd   : > { %p67_p5 = scmp.eq.s32.totalorder %s66_s23, 0 }
   0xf   : > { %s1581_s25 = scalar_select %p67_p5, %s1485_s13, %s69_s24  }
  0x12   : > { %171 = sbr.rel (!%p78_p3) target bundleno = 57 (0x39), region = 24  ;;  %s173_s26 = sand.u32 (%p78_p3), 1, %s1485_s13  }
  0x13   : > { %s1215_s27 = sshll.u32 (%p78_p3), %s1501_s17, 1  ;;  %s1213_s28 = sshll.u32 (%p78_p3), %s173_s26, 9 }
  0x14   : > { %s1293_s29 = sshll.u32 (%p78_p3), %s1497_s16, 8  ;;  %s1595_s8 = scalar_lea.vmem (%p78_p3), [#allocation3], %s1213_s28 }
  0x15   : > { %s179_s30 = sadd.s32 (%p78_p3), %s1293_s29, %s1215_s27 }
  0x16   : > { %s1217_s4 = sshll.u32 (%p78_p3), %s179_s30, 2 }
  0x17   : > { %s1590_s7 = scalar_lea.vmem (%p78_p3), %s1852_s1, %s1217_s4 }
  0x18   : > { %v335_v0 = vld [vmem:[%s1590_s7] sm:$0xff] (%p78_p3)  ;;  %v337_v1 = vld [vmem:[%s1590_s7 + $0x10] sm:$0xff] (%p78_p3) }
  0x19   : > { %v339_v2 = vld [vmem:[%s1590_s7 + $0x20] sm:$0xff]  ;;  %336 = vst [vmem:[%s1595_s8] sm:$0xff] %v335_v0  ;;  %338 = vst [vmem:[%s1595_s8 + $0x8] sm:$0xff] %v337_v1  ;;  %v341_v3 = vld [vmem:[%s1590_s7 + $0x30] sm:$0xff] }
  0x1a   : > { %340 = vst [vmem:[%s1595_s8 + $0x10] sm:$0xff] %v339_v2  ;;  %v343_v4 = vld [vmem:[%s1590_s7 + $0x40] sm:$0xff]  ;;  %v345_v5 = vld [vmem:[%s1590_s7 + $0x50] sm:$0xff]  ;;  %342 = vst [vmem:[%s1595_s8 + $0x18] sm:$0xff] %v341_v3 }
  0x1b   : > { %344 = vst [vmem:[%s1595_s8 + $0x20] sm:$0xff] %v343_v4  ;;  %346 = vst [vmem:[%s1595_s8 + $0x28] sm:$0xff] %v345_v5  ;;  %v347_v6 = vld [vmem:[%s1590_s7 + $0x60] sm:$0xff]  ;;  %v349_v7 = vld [vmem:[%s1590_s7 + $0x70] sm:$0xff] }
  0x1c   : > { %v351_v8 = vld [vmem:[%s1590_s7 + $0x80] sm:$0xff]  ;;  %348 = vst [vmem:[%s1595_s8 + $0x30] sm:$0xff] %v347_v6  ;;  %350 = vst [vmem:[%s1595_s8 + $0x38] sm:$0xff] %v349_v7  ;;  %v353_v9 = vld [vmem:[%s1590_s7 + $0x90] sm:$0xff] }
  0x1d   : > { %352 = vst [vmem:[%s1595_s8 + $0x40] sm:$0xff] %v351_v8  ;;  %v355_v10 = vld [vmem:[%s1590_s7 + $0xa0] sm:$0xff]  ;;  %v357_v11 = vld [vmem:[%s1590_s7 + $0xb0] sm:$0xff]  ;;  %354 = vst [vmem:[%s1595_s8 + $0x48] sm:$0xff] %v353_v9 }
  0x1e   : > { %356 = vst [vmem:[%s1595_s8 + $0x50] sm:$0xff] %v355_v10  ;;  %358 = vst [vmem:[%s1595_s8 + $0x58] sm:$0xff] %v357_v11  ;;  %v359_v12 = vld [vmem:[%s1590_s7 + $0xc0] sm:$0xff]  ;;  %v361_v13 = vld [vmem:[%s1590_s7 + $0xd0] sm:$0xff] }
  0x1f   : > { %v363_v14 = vld [vmem:[%s1590_s7 + $0xe0] sm:$0xff]  ;;  %360 = vst [vmem:[%s1595_s8 + $0x60] sm:$0xff] %v359_v12  ;;  %362 = vst [vmem:[%s1595_s8 + $0x68] sm:$0xff] %v361_v13  ;;  %v365_v15 = vld [vmem:[%s1590_s7 + $0xf0] sm:$0xff] }
  0x20   : > { %364 = vst [vmem:[%s1595_s8 + $0x70] sm:$0xff] %v363_v14  ;;  %v367_v16 = vld [vmem:[%s1590_s7 + $0x100] sm:$0xff]  ;;  %v369_v17 = vld [vmem:[%s1590_s7 + $0x110] sm:$0xff]  ;;  %366 = vst [vmem:[%s1595_s8 + $0x78] sm:$0xff] %v365_v15 }
  0x21   : > { %368 = vst [vmem:[%s1595_s8 + $0x80] sm:$0xff] %v367_v16  ;;  %370 = vst [vmem:[%s1595_s8 + $0x88] sm:$0xff] %v369_v17  ;;  %v371_v18 = vld [vmem:[%s1590_s7 + $0x120] sm:$0xff]  ;;  %v373_v19 = vld [vmem:[%s1590_s7 + $0x130] sm:$0xff] }
  0x22   : > { %v375_v20 = vld [vmem:[%s1590_s7 + $0x140] sm:$0xff]  ;;  %372 = vst [vmem:[%s1595_s8 + $0x90] sm:$0xff] %v371_v18  ;;  %374 = vst [vmem:[%s1595_s8 + $0x98] sm:$0xff] %v373_v19  ;;  %v377_v21 = vld [vmem:[%s1590_s7 + $0x150] sm:$0xff] }
  0x23   : > { %376 = vst [vmem:[%s1595_s8 + $0xa0] sm:$0xff] %v375_v20  ;;  %v379_v22 = vld [vmem:[%s1590_s7 + $0x160] sm:$0xff]  ;;  %v381_v23 = vld [vmem:[%s1590_s7 + $0x170] sm:$0xff]  ;;  %378 = vst [vmem:[%s1595_s8 + $0xa8] sm:$0xff] %v377_v21 }
  0x24   : > { %380 = vst [vmem:[%s1595_s8 + $0xb0] sm:$0xff] %v379_v22  ;;  %382 = vst [vmem:[%s1595_s8 + $0xb8] sm:$0xff] %v381_v23  ;;  %v383_v24 = vld [vmem:[%s1590_s7 + $0x180] sm:$0xff]  ;;  %v385_v25 = vld [vmem:[%s1590_s7 + $0x190] sm:$0xff] }
  0x25   : > { %v387_v26 = vld [vmem:[%s1590_s7 + $0x1a0] sm:$0xff]  ;;  %384 = vst [vmem:[%s1595_s8 + $0xc0] sm:$0xff] %v383_v24  ;;  %386 = vst [vmem:[%s1595_s8 + $0xc8] sm:$0xff] %v385_v25  ;;  %v389_v27 = vld [vmem:[%s1590_s7 + $0x1b0] sm:$0xff] }
  0x26   : > { %388 = vst [vmem:[%s1595_s8 + $0xd0] sm:$0xff] %v387_v26  ;;  %v391_v28 = vld [vmem:[%s1590_s7 + $0x1c0] sm:$0xff]  ;;  %v393_v29 = vld [vmem:[%s1590_s7 + $0x1d0] sm:$0xff]  ;;  %390 = vst [vmem:[%s1595_s8 + $0xd8] sm:$0xff] %v389_v27 }
  0x27   : > { %392 = vst [vmem:[%s1595_s8 + $0xe0] sm:$0xff] %v391_v28  ;;  %394 = vst [vmem:[%s1595_s8 + $0xe8] sm:$0xff] %v393_v29  ;;  %v395_v30 = vld [vmem:[%s1590_s7 + $0x1e0] sm:$0xff]  ;;  %v397_v31 = vld [vmem:[%s1590_s7 + $0x1f0] sm:$0xff] }
  0x28   : > { %v399_v32 = vld [vmem:[%s1590_s7 + $0x200] sm:$0xff]  ;;  %396 = vst [vmem:[%s1595_s8 + $0xf0] sm:$0xff] %v395_v30  ;;  %398 = vst [vmem:[%s1595_s8 + $0xf8] sm:$0xff] %v397_v31  ;;  %v401_v33 = vld [vmem:[%s1590_s7 + $0x210] sm:$0xff] }
  0x29   : > { %400 = vst [vmem:[%s1595_s8 + $0x100] sm:$0xff] %v399_v32  ;;  %v403_v34 = vld [vmem:[%s1590_s7 + $0x220] sm:$0xff]  ;;  %v405_v35 = vld [vmem:[%s1590_s7 + $0x230] sm:$0xff]  ;;  %402 = vst [vmem:[%s1595_s8 + $0x108] sm:$0xff] %v401_v33 }
  0x2a   : > { %404 = vst [vmem:[%s1595_s8 + $0x110] sm:$0xff] %v403_v34  ;;  %406 = vst [vmem:[%s1595_s8 + $0x118] sm:$0xff] %v405_v35  ;;  %v407_v36 = vld [vmem:[%s1590_s7 + $0x240] sm:$0xff]  ;;  %v409_v37 = vld [vmem:[%s1590_s7 + $0x250] sm:$0xff] }
  0x2b   : > { %v411_v38 = vld [vmem:[%s1590_s7 + $0x260] sm:$0xff]  ;;  %408 = vst [vmem:[%s1595_s8 + $0x120] sm:$0xff] %v407_v36  ;;  %410 = vst [vmem:[%s1595_s8 + $0x128] sm:$0xff] %v409_v37  ;;  %v413_v39 = vld [vmem:[%s1590_s7 + $0x270] sm:$0xff] }
  0x2c   : > { %412 = vst [vmem:[%s1595_s8 + $0x130] sm:$0xff] %v411_v38  ;;  %v415_v40 = vld [vmem:[%s1590_s7 + $0x280] sm:$0xff]  ;;  %v417_v41 = vld [vmem:[%s1590_s7 + $0x290] sm:$0xff]  ;;  %414 = vst [vmem:[%s1595_s8 + $0x138] sm:$0xff] %v413_v39 }
  0x2d   : > { %416 = vst [vmem:[%s1595_s8 + $0x140] sm:$0xff] %v415_v40  ;;  %418 = vst [vmem:[%s1595_s8 + $0x148] sm:$0xff] %v417_v41  ;;  %v419_v42 = vld [vmem:[%s1590_s7 + $0x2a0] sm:$0xff]  ;;  %v421_v43 = vld [vmem:[%s1590_s7 + $0x2b0] sm:$0xff] }
  0x2e   : > { %v423_v44 = vld [vmem:[%s1590_s7 + $0x2c0] sm:$0xff]  ;;  %420 = vst [vmem:[%s1595_s8 + $0x150] sm:$0xff] %v419_v42  ;;  %422 = vst [vmem:[%s1595_s8 + $0x158] sm:$0xff] %v421_v43  ;;  %v425_v45 = vld [vmem:[%s1590_s7 + $0x2d0] sm:$0xff] }
  0x2f   : > { %424 = vst [vmem:[%s1595_s8 + $0x160] sm:$0xff] %v423_v44  ;;  %v427_v46 = vld [vmem:[%s1590_s7 + $0x2e0] sm:$0xff]  ;;  %v429_v47 = vld [vmem:[%s1590_s7 + $0x2f0] sm:$0xff]  ;;  %426 = vst [vmem:[%s1595_s8 + $0x168] sm:$0xff] %v425_v45 }
  0x30   : > { %428 = vst [vmem:[%s1595_s8 + $0x170] sm:$0xff] %v427_v46  ;;  %430 = vst [vmem:[%s1595_s8 + $0x178] sm:$0xff] %v429_v47  ;;  %v431_v48 = vld [vmem:[%s1590_s7 + $0x300] sm:$0xff]  ;;  %v433_v49 = vld [vmem:[%s1590_s7 + $0x310] sm:$0xff] }
  0x31   : > { %v435_v50 = vld [vmem:[%s1590_s7 + $0x320] sm:$0xff]  ;;  %432 = vst [vmem:[%s1595_s8 + $0x180] sm:$0xff] %v431_v48  ;;  %434 = vst [vmem:[%s1595_s8 + $0x188] sm:$0xff] %v433_v49  ;;  %v437_v51 = vld [vmem:[%s1590_s7 + $0x330] sm:$0xff] }
  0x32   : > { %436 = vst [vmem:[%s1595_s8 + $0x190] sm:$0xff] %v435_v50  ;;  %v439_v52 = vld [vmem:[%s1590_s7 + $0x340] sm:$0xff]  ;;  %v441_v53 = vld [vmem:[%s1590_s7 + $0x350] sm:$0xff]  ;;  %438 = vst [vmem:[%s1595_s8 + $0x198] sm:$0xff] %v437_v51 }
  0x33   : > { %440 = vst [vmem:[%s1595_s8 + $0x1a0] sm:$0xff] %v439_v52  ;;  %442 = vst [vmem:[%s1595_s8 + $0x1a8] sm:$0xff] %v441_v53  ;;  %v443_v54 = vld [vmem:[%s1590_s7 + $0x360] sm:$0xff]  ;;  %v445_v55 = vld [vmem:[%s1590_s7 + $0x370] sm:$0xff] }
  0x34   : > { %v447_v56 = vld [vmem:[%s1590_s7 + $0x380] sm:$0xff]  ;;  %444 = vst [vmem:[%s1595_s8 + $0x1b0] sm:$0xff] %v443_v54  ;;  %446 = vst [vmem:[%s1595_s8 + $0x1b8] sm:$0xff] %v445_v55  ;;  %v449_v57 = vld [vmem:[%s1590_s7 + $0x390] sm:$0xff] }
  0x35   : > { %448 = vst [vmem:[%s1595_s8 + $0x1c0] sm:$0xff] %v447_v56  ;;  %v451_v58 = vld [vmem:[%s1590_s7 + $0x3a0] sm:$0xff]  ;;  %v453_v59 = vld [vmem:[%s1590_s7 + $0x3b0] sm:$0xff]  ;;  %450 = vst [vmem:[%s1595_s8 + $0x1c8] sm:$0xff] %v449_v57 }
  0x36   : > { %452 = vst [vmem:[%s1595_s8 + $0x1d0] sm:$0xff] %v451_v58  ;;  %454 = vst [vmem:[%s1595_s8 + $0x1d8] sm:$0xff] %v453_v59  ;;  %v455_v60 = vld [vmem:[%s1590_s7 + $0x3c0] sm:$0xff]  ;;  %v457_v61 = vld [vmem:[%s1590_s7 + $0x3d0] sm:$0xff] }
  0x37   : > { %v459_v62 = vld [vmem:[%s1590_s7 + $0x3e0] sm:$0xff]  ;;  %456 = vst [vmem:[%s1595_s8 + $0x1e0] sm:$0xff] %v455_v60  ;;  %458 = vst [vmem:[%s1595_s8 + $0x1e8] sm:$0xff] %v457_v61  ;;  %v461_v63 = vld [vmem:[%s1590_s7 + $0x3f0] sm:$0xff] }
  0x38   : > { %460 = vst [vmem:[%s1595_s8 + $0x1f0] sm:$0xff] %v459_v62  ;;  %462 = vst [vmem:[%s1595_s8 + $0x1f8] sm:$0xff] %v461_v63 }
  0x39 PF: > { %p1218_p7 = scmp.ge.s32.totalorder %s1505_s18, 1  ;;  %p475_p8 = scmp.lt.s32.totalorder %s1505_s18, 19 }
  0x3b   : > { %p476_p9 = pnand %p1218_p7, %p475_p8 }
  0x3c   : > { %s482_s9 = sand.u32 (!%p476_p9), 1, %s1481_s12   ;;  %s1220_s10 = sshll.u32 (!%p476_p9), %s1489_s14, 2 }
  0x3d   : > { %479 = sbr.rel (%p476_p9) target bundleno = 377 (0x179), region = 66  ;;  %s1219_s11 = sshll.u32 (!%p476_p9), %s482_s9, 9 }
  0x3e   : > { %p524_p10 = scmp.lt.s32.totalorder (!%p476_p9), %s1220_s10, 35  ;;  %s1221_s21 = sshll.u32 (!%p476_p9), %s1493_s15, 1 }
  0x3f   : > { %p533_p11 = scmp.lt.s32.totalorder (!%p476_p9), %s1221_s21, 3  ;;  %s1745_s4 = scalar_lea.vmem (!%p476_p9), [#allocation3], %s1219_s11 }
  0x40   : > { %p1224_p12 = scmp.ne.s32.totalorder (!%p476_p9), %s1489_s14, 0 }
  0x44   : > { %s1868_s10 = smov (!%p524_p10, %s1220_s10), 35  ;;  %s1870_s21 = smov (!%p533_p11, %s1221_s21), 3 }
  0x45   : > { %s528_s24 = scalar_lea.vmem %s1851_s0, %s1868_s10  ;;  %s535_s12 = scalar_lea.vmem %s1853_s2, %s1870_s21  ;;  %v1507_v0 = vmov (!%p1224_p12), 0.0  }
  0x46   : > { %s1223_s28 = sshll.u32 %s1870_s21, 1  ;;  %550 = sbr.rel (%p1224_p12) target bundleno = 77 (0x4d), region = 74  ;;  %551 = vst [vmem:[#allocation2] sm:$0xf] (!%p1224_p12), %v1507_v0 }
  0x47   : > { %s1743_s15 = scalar_lea.vmem %s1854_s3, %s1223_s28 }
  0x4d PF: > { %v1355_v1 = vld [vmem:[%s1745_s4 + $0x4] ss:$8 sps:$4 sm:$0xff]   ;;  %v1359_v3 = vld [vmem:[%s1745_s4] ss:$8 sps:$4 sm:$0xff]   ;;  %v1361_v5 = vld [vmem:[%s1745_s4 + $0x14] ss:$8 sps:$4 sm:$0xff]   ;;  %v630_v41 = vlaneseq }
  0x4e   : > { %v1357_v2 = vld [vmem:[%s1745_s4 + $0x104] ss:$8 sps:$4 sm:$0xff]   ;;  %967 = vmatprep.subr.bf16.mxu1 %v1355_v1  ;;  %v1360_v4 = vld [vmem:[%s1745_s4 + $0x100] ss:$8 sps:$4 sm:$0xff]   ;;  %v1363_v6 = vld [vmem:[%s1745_s4 + $0x114] ss:$8 sps:$4 sm:$0xff]  }
  0x4f   : > { %1008 = vmatprep.subr.bf16.mxu0 %v1357_v2  ;;  %968 = vmatpush1.bf16.msra.mxu1 %v1359_v3  ;;  %v1365_v7 = vld [vmem:[%s1745_s4 + $0x10] ss:$8 sps:$4 sm:$0xff]   ;;  %v1367_v9 = vld [vmem:[%s1745_s4 + $0x24] ss:$8 sps:$4 sm:$0xff]   ;;  %v1371_v11 = vld [vmem:[%s1745_s4 + $0x20] ss:$8 sps:$4 sm:$0xff]  }
  0x50   : > { %1009 = vmatpush1.bf16.msra.mxu0 %v1360_v4  ;;  %969 = vmatprep.subr.bf16.mxu1 %v1361_v5  ;;  %v1366_v8 = vld [vmem:[%s1745_s4 + $0x110] ss:$8 sps:$4 sm:$0xff]   ;;  %v1369_v10 = vld [vmem:[%s1745_s4 + $0x124] ss:$8 sps:$4 sm:$0xff]   ;;  %v1372_v12 = vld [vmem:[%s1745_s4 + $0x120] ss:$8 sps:$4 sm:$0xff]  }
  0x51   : > { %1010 = vmatprep.subr.bf16.mxu0 %v1363_v6  ;;  %v1373_v13 = vld [vmem:[%s1745_s4 + $0x34] ss:$8 sps:$4 sm:$0xff]   ;;  %v1377_v15 = vld [vmem:[%s1745_s4 + $0x30] ss:$8 sps:$4 sm:$0xff]   ;;  %v1379_v17 = vld [vmem:[%s1745_s4 + $0x44] ss:$8 sps:$4 sm:$0xff]  }
  0x52   : > { %v1375_v14 = vld [vmem:[%s1745_s4 + $0x134] ss:$8 sps:$4 sm:$0xff]   ;;  %v1378_v16 = vld [vmem:[%s1745_s4 + $0x130] ss:$8 sps:$4 sm:$0xff]   ;;  %v1381_v18 = vld [vmem:[%s1745_s4 + $0x144] ss:$8 sps:$4 sm:$0xff]  }
  0x53   : > { %970 = vmatpush1.bf16.msra.mxu1 %v1365_v7  ;;  %v1383_v19 = vld [vmem:[%s1745_s4 + $0x40] ss:$8 sps:$4 sm:$0xff]   ;;  %v1385_v21 = vld [vmem:[%s1745_s4 + $0x54] ss:$8 sps:$4 sm:$0xff]   ;;  %v1389_v23 = vld [vmem:[%s1745_s4 + $0x50] ss:$8 sps:$4 sm:$0xff]  }
  0x54   : > { %1011 = vmatpush1.bf16.msra.mxu0 %v1366_v8  ;;  %971 = vmatprep.subr.bf16.mxu1 %v1367_v9  ;;  %v1384_v20 = vld [vmem:[%s1745_s4 + $0x140] ss:$8 sps:$4 sm:$0xff]   ;;  %v1387_v22 = vld [vmem:[%s1745_s4 + $0x154] ss:$8 sps:$4 sm:$0xff]   ;;  %v1390_v24 = vld [vmem:[%s1745_s4 + $0x150] ss:$8 sps:$4 sm:$0xff]  }
  0x55   : > { %1012 = vmatprep.subr.bf16.mxu0 %v1369_v10  ;;  %v1391_v25 = vld [vmem:[%s1745_s4 + $0x64] ss:$8 sps:$4 sm:$0xff]   ;;  %v1395_v27 = vld [vmem:[%s1745_s4 + $0x60] ss:$8 sps:$4 sm:$0xff]   ;;  %v1397_v29 = vld [vmem:[%s1745_s4 + $0x74] ss:$8 sps:$4 sm:$0xff]  }
  0x56   : > { %v1393_v26 = vld [vmem:[%s1745_s4 + $0x164] ss:$8 sps:$4 sm:$0xff]   ;;  %v1396_v28 = vld [vmem:[%s1745_s4 + $0x160] ss:$8 sps:$4 sm:$0xff]   ;;  %v1399_v30 = vld [vmem:[%s1745_s4 + $0x174] ss:$8 sps:$4 sm:$0xff]  }
  0x57   : > { %972 = vmatpush1.bf16.msra.mxu1 %v1371_v11  ;;  %v1401_v31 = vld [vmem:[%s1745_s4 + $0x70] ss:$8 sps:$4 sm:$0xff]   ;;  %v1403_v33 = vld [vmem:[%s1745_s4 + $0x84] ss:$8 sps:$4 sm:$0xff]   ;;  %v1407_v35 = vld [vmem:[%s1745_s4 + $0x80] ss:$8 sps:$4 sm:$0xff]  }
  0x58   : > { %1013 = vmatpush1.bf16.msra.mxu0 %v1372_v12  ;;  %973 = vmatprep.subr.bf16.mxu1 %v1373_v13  ;;  %v1402_v32 = vld [vmem:[%s1745_s4 + $0x170] ss:$8 sps:$4 sm:$0xff]   ;;  %v1405_v34 = vld [vmem:[%s1745_s4 + $0x184] ss:$8 sps:$4 sm:$0xff]   ;;  %v1408_v36 = vld [vmem:[%s1745_s4 + $0x180] ss:$8 sps:$4 sm:$0xff]  }
  0x59   : > { %1014 = vmatprep.subr.bf16.mxu0 %v1375_v14  ;;  %v1409_v37 = vld [vmem:[%s1745_s4 + $0x94] ss:$8 sps:$4 sm:$0xff]   ;;  %v1508_v39 = vmov 1966171168   ;;  %v1413_v42 = vld [vmem:[%s1745_s4 + $0x90] ss:$8 sps:$4 sm:$0xff]  }
  0x5a   : > { %v1411_v38 = vld [vmem:[%s1745_s4 + $0x194] ss:$8 sps:$4 sm:$0xff]   ;;  %v628_v40 = vunpack.c.l.s4 %v1508_v39  ;;  %v1414_v43 = vld [vmem:[%s1745_s4 + $0x190] ss:$8 sps:$4 sm:$0xff]   ;;  %v1415_v44 = vld [vmem:[%s1745_s4 + $0xa4] ss:$8 sps:$4 sm:$0xff]  }
  0x5b   : > { %974 = vmatpush1.bf16.msra.mxu1 %v1377_v15  ;;  %v1417_v45 = vld [vmem:[%s1745_s4 + $0x1a4] ss:$8 sps:$4 sm:$0xff]   ;;  %v1790_v47 = vshrl.u32 %v630_v41, 7  ;;  %v1419_v48 = vld [vmem:[%s1745_s4 + $0xa0] ss:$8 sps:$4 sm:$0xff]   ;;  %p1290_p13 = scmp.ne.s32.totalorder %s1489_s14, 8 }
  0x5c   : > { %1015 = vmatpush1.bf16.msra.mxu0 %v1378_v16  ;;  %975 = vmatprep.subr.bf16.mxu1 %v1379_v17  ;;  %v629_v46 = vunpack.c.0.s8 %v628_v40  ;;  %v1420_v49 = vld [vmem:[%s1745_s4 + $0x1a0] ss:$8 sps:$4 sm:$0xff]   ;;  %v1421_v50 = vld [vmem:[%s1745_s4 + $0xb4] ss:$8 sps:$4 sm:$0xff]   ;;  %v1425_v54 = vld [vmem:[%s1745_s4 + $0xb0] ss:$8 sps:$4 sm:$0xff]  }
  0x5d   : > { %1016 = vmatprep.subr.bf16.mxu0 %v1381_v18  ;;  %v1423_v51 = vld [vmem:[%s1745_s4 + $0x1b4] ss:$8 sps:$4 sm:$0xff]   ;;  %v1426_v55 = vld [vmem:[%s1745_s4 + $0x1b0] ss:$8 sps:$4 sm:$0xff]   ;;  %v1427_v57 = vld [vmem:[%s1745_s4 + $0xc4] ss:$8 sps:$4 sm:$0xff]  }
  0x5e   : > { %v632_v52 = vsub.s32 %v629_v46, %v1790_v47  ;;  %v1225_v53 = vld.sshfl [vmem:[%s528_s24] sm:$0x33 pattern:$0x75316420]  ;;  %v1429_v58 = vld [vmem:[%s1745_s4 + $0x1c4] ss:$8 sps:$4 sm:$0xff]  }
  0x5f   : > { %976 = vmatpush1.bf16.msra.mxu1 %v1383_v19  ;;  %v626_v56 = vcombine.high %v1225_v53, %v1225_v53  ;;  %v1431_v60 = vld [vmem:[%s1745_s4 + $0xc0] ss:$8 sps:$4 sm:$0xff]   ;;  %v1433_v63 = vld [vmem:[%s1745_s4 + $0xd4] ss:$8 sps:$4 sm:$0xff]   ;;  %v1437_v1 = vld [vmem:[%s1745_s4 + $0xd0] ss:$8 sps:$4 sm:$0xff]  }
  0x60   : > { %1017 = vmatpush1.bf16.msra.mxu0 %v1384_v20  ;;  %977 = vmatprep.subr.bf16.mxu1 %v1385_v21  ;;  %v1432_v61 = vld [vmem:[%s1745_s4 + $0x1c0] ss:$8 sps:$4 sm:$0xff]   ;;  %v1435_v0 = vld [vmem:[%s1745_s4 + $0x1d4] ss:$8 sps:$4 sm:$0xff]   ;;  %v1438_v2 = vld [vmem:[%s1745_s4 + $0x1d0] ss:$8 sps:$4 sm:$0xff]   ;;  %v633_v9 = vrot.slane %v1225_v53, %v632_v52 }
  0x61   : > { %1018 = vmatprep.subr.bf16.mxu0 %v1387_v22  ;;  %v640_v59 = vrot.slane %v626_v56, %v632_v52  ;;  %v1439_v3 = vld [vmem:[%s1745_s4 + $0xe4] ss:$8 sps:$4 sm:$0xff]   ;;  %v1443_v5 = vld [vmem:[%s1745_s4 + $0xe0] ss:$8 sps:$4 sm:$0xff]   ;;  %v1445_v7 = vld [vmem:[%s1745_s4 + $0xf4] ss:$8 sps:$4 sm:$0xff]  }
  0x62   : > { %v1441_v4 = vld [vmem:[%s1745_s4 + $0x1e4] ss:$8 sps:$4 sm:$0xff]   ;;  %v1444_v6 = vld [vmem:[%s1745_s4 + $0x1e0] ss:$8 sps:$4 sm:$0xff]   ;;  %v1447_v8 = vld [vmem:[%s1745_s4 + $0x1f4] ss:$8 sps:$4 sm:$0xff]   ;;  %v641_v12 = vcombine.high %v633_v9, %v633_v9 }
  0x63   : > { %978 = vmatpush1.bf16.msra.mxu1 %v1389_v23  ;;  %v642_v62 = vcombine.high %v640_v59, %v640_v59  ;;  %999 = vmatprep.mubr.bf16.mxu1 %v640_v59  ;;  %v1449_v10 = vld [vmem:[%s1745_s4 + $0xf0] ss:$8 sps:$4 sm:$0xff]   ;;  %v1509_v13 = vmov 1983009808  }
  0x64   : > { %1019 = vmatpush1.bf16.msra.mxu0 %v1390_v24  ;;  %979 = vmatprep.subr.bf16.mxu1 %v1391_v25  ;;  %v1450_v11 = vld [vmem:[%s1745_s4 + $0x1f0] ss:$8 sps:$4 sm:$0xff]   ;;  %v1053_v14 = vunpack.c.l.s4 %v1509_v13 }
  0x65   : > { %1020 = vmatprep.subr.bf16.mxu0 %v1393_v26  ;;  %1040 = vmatprep.mubr.bf16.mxu0 %v642_v62 }
  0x66   : > { %v1054_v15 = vunpack.c.0.s8 %v1053_v14 }
  0x67   : > { %980 = vmatpush1.bf16.msra.mxu1 %v1395_v27 }
  0x68   : > { %1021 = vmatpush1.bf16.msra.mxu0 %v1396_v28  ;;  %981 = vmatprep.subr.bf16.mxu1 %v1397_v29  ;;  %v1057_v22 = vsub.s32 %v1054_v15, %v1790_v47  ;;  %v552_v28 = vld [vmem:[#allocation2] sm:$0xf] }
  0x69   : > { %1022 = vmatprep.subr.bf16.mxu0 %v1399_v30 }
  0x6b   : > { %982 = vmatpush1.bf16.msra.mxu1 %v1401_v31  ;;  %v1067_v31 = vld [vmem:[%s535_s12] sm:$0x3] (!%p1290_p13) }
  0x6c   : > { %1023 = vmatpush1.bf16.msra.mxu0 %v1402_v32  ;;  %983 = vmatprep.subr.bf16.mxu1 %v1403_v33  ;;  %v1071_v32 = vsub.s32 (!%p1290_p13), 0, %v1790_v47  ;;  %v1075_v33 = vsub.s32 (!%p1290_p13), 1, %v1790_v47 }
  0x6d   : > { %1024 = vmatprep.subr.bf16.mxu0 %v1405_v34 }
  0x6e   : > { %v1072_v34 = vrot.slane (!%p1290_p13), %v1067_v31, %v1071_v32 }
  0x6f   : > { %984 = vmatpush1.bf16.msra.mxu1 %v1407_v35  ;;  %v1076_v35 = vrot.slane (!%p1290_p13), %v1067_v31, %v1075_v33 }
  0x70   : > { %1025 = vmatpush1.bf16.msra.mxu0 %v1408_v36  ;;  %985 = vmatprep.subr.bf16.mxu1 %v1409_v37 }
  0x71   : > { %1026 = vmatprep.subr.bf16.mxu0 %v1411_v38  ;;  %v1077_v36 = vcombine.low (!%p1290_p13), %v1072_v34, %v1076_v35 }
  0x73   : > { %986 = vmatpush1.bf16.msra.mxu1 %v1413_v42  ;;  %v1084_v38 = vrot.slane (!%p1290_p13), %v1077_v36, %v1057_v22 }
  0x74   : > { %1027 = vmatpush1.bf16.msra.mxu0 %v1414_v43  ;;  %987 = vmatprep.subr.bf16.mxu1 %v1415_v44 }
  0x75   : > { %1028 = vmatprep.subr.bf16.mxu0 %v1417_v45 }
  0x77   : > { %988 = vmatpush1.bf16.msra.mxu1 %v1419_v48 }
  0x78   : > { %1029 = vmatpush1.bf16.msra.mxu0 %v1420_v49  ;;  %989 = vmatprep.subr.bf16.mxu1 %v1421_v50 }
  0x79   : > { %1030 = vmatprep.subr.bf16.mxu0 %v1423_v51 }
  0x7b   : > { %990 = vmatpush1.bf16.msra.mxu1 %v1425_v54 }
  0x7c   : > { %1031 = vmatpush1.bf16.msra.mxu0 %v1426_v55  ;;  %991 = vmatprep.subr.bf16.mxu1 %v1427_v57 }
  0x7d   : > { %1032 = vmatprep.subr.bf16.mxu0 %v1429_v58 }
  0x7f   : > { %992 = vmatpush1.bf16.msra.mxu1 %v1431_v60 }
  0x80   : > { %1033 = vmatpush1.bf16.msra.mxu0 %v1432_v61  ;;  %993 = vmatprep.subr.bf16.mxu1 %v1433_v63 }
  0x81   : > { %1034 = vmatprep.subr.bf16.mxu0 %v1435_v0 }
  0x83   : > { %994 = vmatpush1.bf16.msra.mxu1 %v1437_v1 }
  0x84   : > { %1035 = vmatpush1.bf16.msra.mxu0 %v1438_v2  ;;  %995 = vmatprep.subr.bf16.mxu1 %v1439_v3 }
  0x85   : > { %1036 = vmatprep.subr.bf16.mxu0 %v1441_v4 }
  0x87   : > { %996 = vmatpush1.bf16.msra.mxu1 %v1443_v5 }
  0x88   : > { %1037 = vmatpush1.bf16.msra.mxu0 %v1444_v6  ;;  %997 = vmatprep.subr.bf16.mxu1 %v1445_v7 }
  0x89   : > { %1038 = vmatprep.subr.bf16.mxu0 %v1447_v8 }
  0x8b   : > { %998 = vmatpush1.bf16.msra.mxu1 %v1449_v10 }
  0x8c   : > { %1039 = vmatpush1.bf16.msra.mxu0 %v1450_v11 }
  0x8e   : > { %1000 = vmatmul.mubr.bf16.vlgmr.msra.gmra.mrb[0].mxu1 %v633_v9 }
  0x8f   : > { %1041 = vmatmul.mubr.bf16.vlgmr.msra.gmra.mrb[0].mxu0 %v641_v12 }
 0x161   : > { %v1001_v16 = vpop.f32.mrb[0].mxu1 }
 0x162   : > { %v1042_v17 = vpop.f32.mrb[0].mxu0  ;;  %v1003_v19 = vpop.f32.mrb[1].mxu1 }
 0x163   : > { %v1043_v18 = vadd.f32 %v1042_v17, %v1001_v16  ;;  %v1044_v20 = vpop.f32.mrb[1].mxu0  ;;  %v1005_v23 = vpop.f32.mrb[2].mxu1 }
 0x164   : > { %v1045_v21 = vadd.f32 %v1044_v20, %v1003_v19  ;;  %v1046_v24 = vpop.f32.mrb[2].mxu0  ;;  %v1006_v25 = vpop.f32.mrb[3].mxu1 }
 0x165   : > { %v1047_v26 = vpop.f32.mrb[3].mxu0 }
 0x166   : > { %v1051_v27 = vcombine.low %v1043_v18, %v1045_v21  ;;  %1065 = sbr.rel (%p1290_p13) target bundleno = 377 (0x179), region = 78 }
 0x168   : > { %v1058_v29 = vrot.slane %v1051_v27, %v1057_v22 }
 0x16a   : > { %v1060_v30 = vadd.f32 %v1058_v29, %v552_v28 }
 0x16c   : > { %1061 = vst [vmem:[#allocation2] sm:$0xf] %v1060_v30 }
 0x173   : > { %v1066_v37 = vld [vmem:[#allocation2] sm:$0xf] }
 0x174   : > { %v1086_v39 = vadd.f32 %v1084_v38, %v1066_v37 }
 0x176   : > { %v1087_v40 = vmax.f32 %v1086_v39, 0.0 }
 0x178   : > { %1088 = vst [vmem:[%s1743_s15] sm:$0xf] %v1087_v40 }
 0x179 PF: > { %s13_s18 = sadd.s32 1, %s1505_s18   ;;  %s1855_s12 = smov %s1485_s13 }
 0x17a   : > { %p10_p0 = scmp.ge.s32.totalorder %s13_s18, 20   ;;  %s1856_s13 = smov %s1581_s25 }
 0x17b   : > { %s1857_s14 = smov %s1497_s16  ;;  %s1858_s15 = smov %s1501_s17 }
 0x17c   : > { %s1859_s16 = smov %s1862_s19  ;;  %s1860_s17 = smov %s1866_s20 }
 0x17d   :  { %12 = sbr.rel (!%p10_p0) target bundleno = 4 (0x4), region = 119 }

// kernel: _lambda_.42
= control target key start
LH: loop header
LB: loop body
LE: loop exit
PB: predicated region body
PF: predicated region fallthrough
CT: control target
= control target key end

     0   :  { %s46_s0 = inlined_call_operand.vmem [shape: f32[2,1,512], index: 0, kind: input, shape index: {}]   ;;  %s47_s1 = inlined_call_operand.vmem [shape: f32[2,512], index: 1, kind: output, shape index: {}]  }
   0x1   :  { %v29_v0 = vld [vmem:[%s46_s0] sm:$0xff]  }
   0x2   :  { %28 = vst.sshfl [vmem:[%s47_s1] sm:$0xff pattern:$0x75316420] %v29_v0 }

// kernel: _lambda_.43
= control target key start
LH: loop header
LB: loop body
LE: loop exit
PB: predicated region body
PF: predicated region fallthrough
CT: control target
= control target key end

     0   :  { %v100_v30 = vlaneseq  ;;  %v556_v34 = vmov 1966171168   ;;  %s696_s0 = inlined_call_operand.vmem [shape: bf16[2,512], index: 0, kind: input, shape index: {}]   ;;  %s697_s1 = inlined_call_operand.vmem [shape: bf16[512,10], index: 1, kind: input, shape index: {}]   ;;  %s698_s2 = inlined_call_operand.vmem [shape: f32[1,10], index: 2, kind: input, shape index: {}]   ;;  %s699_s3 = inlined_call_operand.hbm [shape: f32[2,10], index: 3, kind: output, shape index: {}]  }
   0x1   :  { %v500_v0 = vld [vmem:[%s697_s1 + $0x40] sm:$0xff]   ;;  %v504_v4 = vld [vmem:[%s697_s1 + $0x48] sm:$0xff]   ;;  %v508_v8 = vld [vmem:[%s697_s1 + $0x50] sm:$0xff]   ;;  %v98_v35 = vunpack.c.l.s4 %v556_v34 }
   0x2   :  { %v501_v1 = vld [vmem:[%s697_s1 + $0xc0] sm:$0xff]   ;;  %453 = vmatprep.subr.bf16.mxu0 %v500_v0  ;;  %v505_v5 = vld [vmem:[%s697_s1 + $0xc8] sm:$0xff]   ;;  %v509_v9 = vld [vmem:[%s697_s1 + $0xd0] sm:$0xff]   ;;  %v101_v36 = vshrl.u32 %v100_v30, 7 }
   0x3   :  { %v502_v2 = vld [vmem:[%s697_s1] sm:$0xff]   ;;  %475 = vmatprep.subr.bf16.mxu1 %v501_v1  ;;  %v506_v6 = vld [vmem:[%s697_s1 + $0x8] sm:$0xff]   ;;  %v510_v10 = vld [vmem:[%s697_s1 + $0x10] sm:$0xff]  }
   0x4   :  { %v503_v3 = vld [vmem:[%s697_s1 + $0x80] sm:$0xff]   ;;  %454 = vmatpush3.bf16.msra.mxu0 %v502_v2  ;;  %v507_v7 = vld [vmem:[%s697_s1 + $0x88] sm:$0xff]   ;;  %v511_v11 = vld [vmem:[%s697_s1 + $0x90] sm:$0xff]  }
   0x5   :  { %476 = vmatpush3.bf16.msra.mxu1 %v503_v3  ;;  %455 = vmatprep.subr.bf16.mxu0 %v504_v4  ;;  %v512_v12 = vld [vmem:[%s697_s1 + $0x58] sm:$0xff]   ;;  %v516_v16 = vld [vmem:[%s697_s1 + $0x60] sm:$0xff]   ;;  %v520_v20 = vld [vmem:[%s697_s1 + $0x68] sm:$0xff]  }
   0x6   :  { %477 = vmatprep.subr.bf16.mxu1 %v505_v5  ;;  %v513_v13 = vld [vmem:[%s697_s1 + $0xd8] sm:$0xff]   ;;  %v517_v17 = vld [vmem:[%s697_s1 + $0xe0] sm:$0xff]   ;;  %v521_v21 = vld [vmem:[%s697_s1 + $0xe8] sm:$0xff]  }
   0x7   :  { %v514_v14 = vld [vmem:[%s697_s1 + $0x18] sm:$0xff]   ;;  %v518_v18 = vld [vmem:[%s697_s1 + $0x20] sm:$0xff]   ;;  %v522_v22 = vld [vmem:[%s697_s1 + $0x28] sm:$0xff]  }
   0x8   :  { %456 = vmatpush3.bf16.msra.mxu0 %v506_v6  ;;  %v515_v15 = vld [vmem:[%s697_s1 + $0x98] sm:$0xff]   ;;  %v519_v19 = vld [vmem:[%s697_s1 + $0xa0] sm:$0xff]   ;;  %v523_v23 = vld [vmem:[%s697_s1 + $0xa8] sm:$0xff]  }
   0x9   :  { %478 = vmatpush3.bf16.msra.mxu1 %v507_v7  ;;  %457 = vmatprep.subr.bf16.mxu0 %v508_v8  ;;  %v524_v24 = vld [vmem:[%s697_s1 + $0x70] sm:$0xff]   ;;  %v528_v28 = vld [vmem:[%s697_s1 + $0x78] sm:$0xff]   ;;  %v419_v33 = vld.sshfl [vmem:[%s696_s0] sm:$0x33 pattern:$0x75316420] }
   0xa   :  { %479 = vmatprep.subr.bf16.mxu1 %v509_v9  ;;  %v525_v25 = vld [vmem:[%s697_s1 + $0xf0] sm:$0xff]   ;;  %v529_v29 = vld [vmem:[%s697_s1 + $0xf8] sm:$0xff]  }
   0xb   :  { %v526_v26 = vld [vmem:[%s697_s1 + $0x30] sm:$0xff]   ;;  %v530_v31 = vld [vmem:[%s697_s1 + $0x38] sm:$0xff]  }
   0xc   :  { %458 = vmatpush3.bf16.msra.mxu0 %v510_v10  ;;  %v527_v27 = vld [vmem:[%s697_s1 + $0xb0] sm:$0xff]   ;;  %v531_v32 = vld [vmem:[%s697_s1 + $0xb8] sm:$0xff]  }
   0xd   :  { %480 = vmatpush3.bf16.msra.mxu1 %v511_v11  ;;  %459 = vmatprep.subr.bf16.mxu0 %v512_v12 }
   0xe   :  { %481 = vmatprep.subr.bf16.mxu1 %v513_v13 }
  0x10   :  { %460 = vmatpush3.bf16.msra.mxu0 %v514_v14 }
  0x11   :  { %482 = vmatpush3.bf16.msra.mxu1 %v515_v15  ;;  %461 = vmatprep.subr.bf16.mxu0 %v516_v16 }
  0x12   :  { %483 = vmatprep.subr.bf16.mxu1 %v517_v17 }
  0x14   :  { %462 = vmatpush3.bf16.msra.mxu0 %v518_v18 }
  0x15   :  { %484 = vmatpush3.bf16.msra.mxu1 %v519_v19  ;;  %463 = vmatprep.subr.bf16.mxu0 %v520_v20 }
  0x16   :  { %485 = vmatprep.subr.bf16.mxu1 %v521_v21 }
  0x18   :  { %464 = vmatpush3.bf16.msra.mxu0 %v522_v22 }
  0x19   :  { %486 = vmatpush3.bf16.msra.mxu1 %v523_v23  ;;  %465 = vmatprep.subr.bf16.mxu0 %v524_v24 }
  0x1a   :  { %487 = vmatprep.subr.bf16.mxu1 %v525_v25 }
  0x1c   :  { %466 = vmatpush3.bf16.msra.mxu0 %v526_v26 }
  0x1d   :  { %488 = vmatpush3.bf16.msra.mxu1 %v527_v27  ;;  %467 = vmatprep.subr.bf16.mxu0 %v528_v28 }
  0x1e   :  { %489 = vmatprep.subr.bf16.mxu1 %v529_v29 }
  0x20   :  { %468 = vmatpush3.bf16.msra.mxu0 %v530_v31 }
  0x21   :  { %490 = vmatpush3.bf16.msra.mxu1 %v531_v32 }
  0x22   :  { %8 = vsyncpa [#allocation4], 0  ;;  %v96_v37 = vcombine.high %v419_v33, %v419_v33  ;;  %v99_v38 = vunpack.c.0.s8 %v98_v35  ;;  %vm20_vm0 = vcmask 74752   ;;  %v557_v44 = vmov 0.0   ;;  %v452_v58 = vld [vmem:[%s698_s2] ss:$0 sm:$0xff] }
  0x23   :  { %21 = vst.msk [vmem:[#allocation2] sm:$0x3] %vm20_vm0, %v557_v44  ;;  %s558_s24 = smov [#allocation3]  }
  0x24   :  { %v102_v39 = vsub.s32 %v99_v38, %v101_v36  ;;  %s411_s25 = sshll.u32 %s558_s24, 4  ;;  %s412_s25 = int_to_ptr.vmem [resolvable:$true] %s411_s25 }
  0x25   :  { %s532_s26 = scalar_lea.vmem %s412_s25, 32  ;;  %p537_p1 = scmp.lt.s32.totalorder %s412_s25, %s412_s25 }
  0x26   :  { %v110_v40 = vrot.slane %v96_v37, %v102_v39  ;;  %v103_v41 = vrot.slane %v419_v33, %v102_v39  ;;  %p533_p0 = scmp.ne.s32.totalorder %s412_s25, %s532_s26  ;;  %p538_p2 = scmp.lt.s32.totalorder %s532_s26, %s532_s26 }
  0x28   :  { %341 = vmatprep.mubr.bf16.mxu0 %v110_v40  ;;  %v112_v42 = vcombine.high %v110_v40, %v110_v40  ;;  %v111_v43 = vcombine.high %v103_v41, %v103_v41  ;;  %p539_p3 = por %p538_p2, %p537_p1 }
  0x29   :  { %342 = vmatmul.mubr.bf16.vlgmr.msra.gmra.mrb[0].mxu0 %v103_v41 }
  0x2a   :  { %381 = vmatprep.mubr.bf16.mxu1 %v112_v42  ;;  %v22_v55 = vld [vmem:[#allocation2] sm:$0x3]  ;;  %p540_p4 = pnand %p539_p3, %p533_p0 }
  0x2b   :  { %382 = vmatmul.mubr.bf16.vlgmr.msra.gmra.mrb[0].mxu1 %v111_v43 }
  0xfc   :  { %v469_v45 = vpop.f32.mrb[0].mxu0 }
  0xfd   :  { %v470_v46 = vpop.f32.mrb[1].mxu0 }
  0xfe   :  { %v491_v47 = vpop.f32.mrb[0].mxu1  ;;  %v471_v48 = vadd.f32 %v470_v46, %v469_v45  ;;  %v472_v49 = vpop.f32.mrb[2].mxu0 }
  0xff   :  { %v492_v50 = vpop.f32.mrb[1].mxu1  ;;  %v473_v51 = vpop.f32.mrb[3].mxu0 }
 0x100   :  { %v493_v52 = vadd.f32 %v492_v50, %v491_v47  ;;  %v494_v53 = vpop.f32.mrb[2].mxu1 }
 0x101   :  { %v495_v54 = vpop.f32.mrb[3].mxu1 }
 0x102   :  { %v384_v56 = vadd.f32 %v493_v52, %v471_v48 }
 0x104   :  { %v389_v57 = vadd.f32 %v384_v56, %v22_v55 }
 0x106   :  { %391 = vst.msk [vmem:[#allocation2] sm:$0x3] %vm20_vm0, %v389_v57 }
 0x10d   :  { %v395_v59 = vld [vmem:[#allocation2] sm:$0x3] }
 0x10e   :  { %v403_v60 = vadd.f32 %v452_v58, %v395_v59 }
 0x110   :  { %404 = vst.msk [vmem:[#allocation3] sm:$0x3] %vm20_vm0, %v403_v60 }
 0x111   :  { %543 = shalt.err (!%p540_p4)
}
 0x112   :  { %s544_s29 = scalar_lea.hbm %s699_s3, 32 }
 0x113   :  { %p545_p5 = scmp.ne.s32.totalorder %s699_s3, %s544_s29  ;;  %p548_p6 = scmp.lt.u32.totalorder %s544_s29, %s699_s3 }
 0x115   :  { %p550_p7 = pnand %p548_p6, %p545_p5 }
 0x117   :  { %553 = shalt.err (!%p550_p7)
}
 0x118   :  { %414 = dma.vmem_to_hbm [thread:$0]  %s412_s25, 32, %s699_s3, [#allocation4]  }
 0x119   :  { %554 = dma.done.wait [#allocation4], 32  }
 0x11a   :  { %555 = vsyncadd [#allocation4], 4294967264 }
 0x11b   :  { %418 = vsyncpa [#allocation4], 1 }

</bundles_post_ra>
